<compile_context>
chip_gen: v5e
topology: v5e:2x2
jax: 0.10.0
libtpu: 0.0.40
codegen_flags: <defaults>
</compile_context>

<pallas_src>
import functools

import jax
import jax.numpy as jnp
from jax.experimental import pallas as pl
from jax.experimental.pallas import tpu as pltpu


INPUT_DIM = 123
PADDED_INPUT_DIM = 128   # fc1 contraction padded to a lane multiple
HIDDEN1 = 1024
HIDDEN2 = 2048
LANE = 128

# Largest padded out_dim for which the whole network fits comfortably in VMEM as a
# single grid point on every generation (worst case ~17 MiB double-buffered).
FUSED_OUT_DIM_MAX = 1024
# fc3 w3 column-tile cap: 2048 x 1024 bf16 = 4 MiB per buffer (~8.5 MiB total with
# double buffering) and guarantees >= 2 parallel tiles on the two-pass path.
FC3_TILE_N_MAX = 1024

VMEM_LIMIT = 32 * 1024 * 1024


def _round_up(n, m):
    return ((n + m - 1) // m) * m


def _pick_tile(dim, cap, quantum=LANE):
    """Largest multiple of `quantum` that divides `dim` and is <= cap (dim % 128 == 0)."""
    t = (min(cap, dim) // quantum) * quantum
    while t > quantum and dim % t != 0:
        t -= quantum
    return max(t, quantum)


# --------------------------------------------------------------------------------------
# Kernels
# --------------------------------------------------------------------------------------

def _fused_kernel(x_ref, w1_ref, b1_ref, w2_ref, b2_ref, w3_ref, b3_ref, o_ref):
    """Whole network in one grid point (small out_dim). bf16 inputs, f32 MXU accum."""
    h1 = jnp.dot(x_ref[...], w1_ref[...], preferred_element_type=jnp.float32)
    h1 = jnp.maximum(h1 + b1_ref[...], 0.0).astype(jnp.bfloat16)
    h2 = jnp.dot(h1, w2_ref[...], preferred_element_type=jnp.float32)
    h2 = jnp.maximum(h2 + b2_ref[...], 0.0).astype(jnp.bfloat16)
    o_ref[...] = (jnp.dot(h2, w3_ref[...], preferred_element_type=jnp.float32)
                  + b3_ref[...])


def _fc12_kernel(x_ref, w1_ref, b1_ref, w2_ref, b2_ref, h2_ref):
    """Single-step prologue: h2 = relu(fc2(relu(fc1(x)))), whole w2 resident."""
    h1 = jnp.dot(x_ref[...], w1_ref[...], preferred_element_type=jnp.float32)
    h1 = jnp.maximum(h1 + b1_ref[...], 0.0).astype(jnp.bfloat16)
    h2 = jnp.dot(h1, w2_ref[...], preferred_element_type=jnp.float32)
    h2_ref[...] = jnp.maximum(h2 + b2_ref[...], 0.0).astype(h2_ref.dtype)


def _fc3_kernel(h2_ref, w3_ref, b3_ref, o_ref):
    """One lane-dense w3 column tile per grid step; no reduction axis, no accumulator."""
    o_ref[...] = (jnp.dot(h2_ref[...], w3_ref[...], preferred_element_type=jnp.float32)
                  + b3_ref[...])


# --------------------------------------------------------------------------------------
# Forward wrapper
# --------------------------------------------------------------------------------------

@functools.partial(jax.jit, static_argnames=("output_height", "output_width"))
def improved_generator_forward(x, params, output_height, output_width):
    """x: (B, INPUT_DIM) f32 -> (B, output_height, output_width) f32."""
    w1, b1, w2, b2, w3, b3 = params
    B = x.shape[0]
    out_dim = output_height * output_width
    out_dim_p = w3.shape[1]          # padded to a multiple of 128 in init_params
    k_in = w1.shape[0]               # PADDED_INPUT_DIM

    # Pad the fc1 contraction dim (123 -> 128) and stream activations as bf16.
    x_p = jnp.pad(x, ((0, 0), (0, k_in - x.shape[1]))).astype(w1.dtype)

    if out_dim_p <= FUSED_OUT_DIM_MAX:
        # Small outputs (default 16x16): one grid point, everything resident in VMEM.
        flops = 2 * B * (k_in * HIDDEN1 + HIDDEN1 * HIDDEN2 + HIDDEN2 * out_dim_p)
        weight_bytes = (w1.size + w2.size + w3.size) * 2
        act_bytes = x_p.size * 2 + (b1.size + b2.size + b3.size) * 4 + B * out_dim_p * 4
        out2d = pl.pallas_call(
            _fused_kernel,
            out_shape=jax.ShapeDtypeStruct((B, out_dim_p), jnp.float32),
            grid_spec=pltpu.PrefetchScalarGridSpec(
                num_scalar_prefetch=0,
                grid=(1,),
                in_specs=[
                    pl.BlockSpec((B, k_in), lambda i: (0, 0)),            # x (padded)
                    pl.BlockSpec((k_in, HIDDEN1), lambda i: (0, 0)),      # w1
                    pl.BlockSpec((1, HIDDEN1), lambda i: (0, 0)),         # b1
                    pl.BlockSpec((HIDDEN1, HIDDEN2), lambda i: (0, 0)),   # w2
                    pl.BlockSpec((1, HIDDEN2), lambda i: (0, 0)),         # b2
                    pl.BlockSpec((HIDDEN2, out_dim_p), lambda i: (0, 0)), # w3
                    pl.BlockSpec((1, out_dim_p), lambda i: (0, 0)),       # b3
                ],
                out_specs=pl.BlockSpec((B, out_dim_p), lambda i: (0, 0)),
            ),
            compiler_params=pltpu.CompilerParams(
                dimension_semantics=("arbitrary",),
                vmem_limit_bytes=VMEM_LIMIT),
            cost_estimate=pl.CostEstimate(
                flops=flops, transcendentals=0,
                bytes_accessed=weight_bytes + act_bytes),
        )(x_p, w1, b1, w2, b2, w3, b3)
    else:
        # Large outputs: (1) single-step prologue computes h2 exactly once;
        # (2) fc3 streams w3 column tiles on a 1-D parallel grid (>= 2 tiles).
        h2 = pl.pallas_call(
            _fc12_kernel,
            out_shape=jax.ShapeDtypeStruct((B, HIDDEN2), jnp.bfloat16),
            grid_spec=pltpu.PrefetchScalarGridSpec(
                num_scalar_prefetch=0,
                grid=(1,),
                in_specs=[
                    pl.BlockSpec((B, k_in), lambda i: (0, 0)),
                    pl.BlockSpec((k_in, HIDDEN1), lambda i: (0, 0)),
                    pl.BlockSpec((1, HIDDEN1), lambda i: (0, 0)),
                    pl.BlockSpec((HIDDEN1, HIDDEN2), lambda i: (0, 0)),
                    pl.BlockSpec((1, HIDDEN2), lambda i: (0, 0)),
                ],
                out_specs=pl.BlockSpec((B, HIDDEN2), lambda i: (0, 0)),
            ),
            compiler_params=pltpu.CompilerParams(
                dimension_semantics=("arbitrary",),
                vmem_limit_bytes=VMEM_LIMIT),
            cost_estimate=pl.CostEstimate(
                flops=2 * B * (k_in * HIDDEN1 + HIDDEN1 * HIDDEN2),
                transcendentals=0,
                bytes_accessed=(w1.size + w2.size) * 2 + x_p.size * 2
                               + (b1.size + b2.size) * 4 + B * HIDDEN2 * 2),
        )(x_p, w1, b1, w2, b2)

        tn = _pick_tile(out_dim_p, FC3_TILE_N_MAX)
        nj = out_dim_p // tn
        out2d = pl.pallas_call(
            _fc3_kernel,
            out_shape=jax.ShapeDtypeStruct((B, out_dim_p), jnp.float32),
            grid_spec=pltpu.PrefetchScalarGridSpec(
                num_scalar_prefetch=0,
                grid=(nj,),
                in_specs=[
                    pl.BlockSpec((B, HIDDEN2), lambda j: (0, 0)),    # h2 (resident)
                    pl.BlockSpec((HIDDEN2, tn), lambda j: (0, j)),   # w3 column tile
                    pl.BlockSpec((1, tn), lambda j: (0, j)),         # b3 tile
                ],
                out_specs=pl.BlockSpec((B, tn), lambda j: (0, j)),
            ),
            compiler_params=pltpu.CompilerParams(
                dimension_semantics=("parallel",),
                vmem_limit_bytes=VMEM_LIMIT),
            cost_estimate=pl.CostEstimate(
                flops=2 * B * HIDDEN2 * out_dim_p,
                transcendentals=0,
                bytes_accessed=w3.size * 2 + b3.size * 4
                               + B * HIDDEN2 * 2 + B * out_dim_p * 4),
        )(h2, w3, b3)

    # torch `.view(-1, H, W)` equivalent (drop the zero-padded output columns first).
    return out2d[:, :out_dim].reshape(B, output_height, output_width)


def init_params(key, output_height, output_width):
    """torch.nn.Linear-style init (uniform(+-1/sqrt(fan_in))).

    Weights are stored transposed vs torch ((in, out)) and cast to bfloat16 for
    bandwidth-bound streaming.  w1 is zero-padded 123 -> 128 rows; w3/b3 columns are
    zero-padded so out_dim is a multiple of 128 (lane-dense tiles and stores).  Biases
    stay f32 as (1, out) rows for clean 2-D broadcasting.
    """
    out_dim = output_height * output_width
    out_dim_p = _round_up(out_dim, LANE)
    dims = [(INPUT_DIM, HIDDEN1), (HIDDEN1, HIDDEN2), (HIDDEN2, out_dim)]
    keys = jax.random.split(key, 2 * len(dims))
    params = []
    for i, (fan_in, fan_out) in enumerate(dims):
        bound = float(fan_in) ** -0.5
        w = jax.random.uniform(keys[2 * i], (fan_in, fan_out),
                               minval=-bound, maxval=bound, dtype=jnp.float32)
        b = jax.random.uniform(keys[2 * i + 1], (1, fan_out),
                               minval=-bound, maxval=bound, dtype=jnp.float32)
        if i == 0:
            w = jnp.pad(w, ((0, PADDED_INPUT_DIM - fan_in), (0, 0)))
        if i == 2:
            w = jnp.pad(w, ((0, 0), (0, out_dim_p - fan_out)))
            b = jnp.pad(b, ((0, 0), (0, out_dim_p - fan_out)))
        params.extend([w.astype(jnp.bfloat16), b])
    return tuple(params)


if __name__ == "__main__":
    batch = 8
    key = jax.random.PRNGKey(0)

    # Exercise both code paths: fused single-step (16x16, 28x28 incl. non-128-multiple
    # out_dim) and the prologue + parallel-fc3 path (64x64).
    for (H, W) in [(16, 16), (28, 28), (64, 64)]:
        k_params, k_x = jax.random.split(jax.random.fold_in(key, H * W))
        params = init_params(k_params, H, W)
        x = jax.random.normal(k_x, (batch, INPUT_DIM), dtype=jnp.float32)

        y = improved_generator_forward(x, params, H, W)
        y = jax.block_until_ready(y)

        # Pure-JAX reference with the same dtype pipeline (bf16 weights/activations,
        # f32 MXU accumulation) for a tight correctness check.
        w1, b1, w2, b2, w3, b3 = params
        x_p = jnp.pad(x, ((0, 0), (0, PADDED_INPUT_DIM - INPUT_DIM))).astype(jnp.bfloat16)
        h1 = jnp.maximum(jnp.dot(x_p, w1, preferred_element_type=jnp.float32) + b1, 0.0)
        h2 = jnp.maximum(jnp.dot(h1.astype(jnp.bfloat16), w2,
                                 preferred_element_type=jnp.float32) + b2, 0.0)
        ref = jnp.dot(h2.astype(jnp.bfloat16), w3,
                      preferred_element_type=jnp.float32) + b3
        ref = ref[:, :H * W].reshape(batch, H, W)

        assert y.shape == (batch, H, W)
        err = float(jnp.max(jnp.abs(y - ref)))
        assert jnp.allclose(y, ref, atol=2e-2, rtol=2e-2), (H, W, err)

    print("KERNEL_OK")
</pallas_src>

<mosaic_0001>
module attributes {stable_mosaic.version = 11 : i64} {
  func.func @_fused_kernel(%arg0: i32, %arg1: memref<8x128xbf16, #tpu.memory_space<vmem>>, %arg2: memref<128x1024xbf16, #tpu.memory_space<vmem>>, %arg3: memref<1x1024xf32, #tpu.memory_space<vmem>>, %arg4: memref<1024x2048xbf16, #tpu.memory_space<vmem>>, %arg5: memref<1x2048xf32, #tpu.memory_space<vmem>>, %arg6: memref<2048x256xbf16, #tpu.memory_space<vmem>>, %arg7: memref<1x256xf32, #tpu.memory_space<vmem>>, %arg8: memref<8x256xf32, #tpu.memory_space<vmem>>) attributes {dimension_semantics = [#tpu.dimension_semantics<arbitrary>], iteration_bounds = array<i64: 1>, scalar_prefetch = 0 : i64, scratch_operands = 0 : i64, tpu.core_type = #tpu.core_type<tc>, window_params = [{pipeline_mode = #tpu.pipeline_mode<synchronous>, transform_indices = @transform_0, window_bounds = array<i64: 8, 128>}, {pipeline_mode = #tpu.pipeline_mode<synchronous>, transform_indices = @transform_1, window_bounds = array<i64: 128, 1024>}, {pipeline_mode = #tpu.pipeline_mode<synchronous>, transform_indices = @transform_2, window_bounds = array<i64: 1, 1024>}, {pipeline_mode = #tpu.pipeline_mode<synchronous>, transform_indices = @transform_3, window_bounds = array<i64: 1024, 2048>}, {pipeline_mode = #tpu.pipeline_mode<synchronous>, transform_indices = @transform_4, window_bounds = array<i64: 1, 2048>}, {pipeline_mode = #tpu.pipeline_mode<synchronous>, transform_indices = @transform_5, window_bounds = array<i64: 2048, 256>}, {pipeline_mode = #tpu.pipeline_mode<synchronous>, transform_indices = @transform_6, window_bounds = array<i64: 1, 256>}, {pipeline_mode = #tpu.pipeline_mode<synchronous>, transform_indices = @transform_7, window_bounds = array<i64: 8, 256>}]} {
    %c0 = arith.constant 0 : index
    %c0_0 = arith.constant 0 : index
    %0 = vector.load %arg1[%c0, %c0_0] : memref<8x128xbf16, #tpu.memory_space<vmem>>, vector<8x128xbf16>
    %c0_1 = arith.constant 0 : index
    %c0_2 = arith.constant 0 : index
    %1 = vector.load %arg2[%c0_1, %c0_2] : memref<128x1024xbf16, #tpu.memory_space<vmem>>, vector<128x1024xbf16>
    %cst = arith.constant dense<0.000000e+00> : vector<8x1024xf32>
    %2 = tpu.matmul %0, %1, %cst {dimension_numbers = #tpu.dot_dimension_numbers<[1], [0], [0], [1], [0, 0, 1, 1], [], []>} : vector<8x128xbf16>, vector<128x1024xbf16>, vector<8x1024xf32> -> vector<8x1024xf32>
    %c0_3 = arith.constant 0 : index
    %c0_4 = arith.constant 0 : index
    %3 = vector.load %arg3[%c0_3, %c0_4] : memref<1x1024xf32, #tpu.memory_space<vmem>>, vector<1x1024xf32>
    %4 = vector.broadcast %3 : vector<1x1024xf32> to vector<8x1024xf32>
    %5 = arith.addf %2, %4 : vector<8x1024xf32>
    %cst_5 = arith.constant 0.000000e+00 : f32
    %6 = vector.broadcast %cst_5 : f32 to vector<8x1024xf32>
    %7 = arith.maximumf %5, %6 : vector<8x1024xf32>
    %8 = arith.truncf %7 : vector<8x1024xf32> to vector<8x1024xbf16>
    %c0_6 = arith.constant 0 : index
    %c0_7 = arith.constant 0 : index
    %9 = vector.load %arg4[%c0_6, %c0_7] : memref<1024x2048xbf16, #tpu.memory_space<vmem>>, vector<1024x2048xbf16>
    %cst_8 = arith.constant dense<0.000000e+00> : vector<8x2048xf32>
    %10 = tpu.matmul %8, %9, %cst_8 {dimension_numbers = #tpu.dot_dimension_numbers<[1], [0], [0], [1], [0, 0, 1, 1], [], []>} : vector<8x1024xbf16>, vector<1024x2048xbf16>, vector<8x2048xf32> -> vector<8x2048xf32>
    %c0_9 = arith.constant 0 : index
    %c0_10 = arith.constant 0 : index
    %11 = vector.load %arg5[%c0_9, %c0_10] : memref<1x2048xf32, #tpu.memory_space<vmem>>, vector<1x2048xf32>
    %12 = vector.broadcast %11 : vector<1x2048xf32> to vector<8x2048xf32>
    %13 = arith.addf %10, %12 : vector<8x2048xf32>
    %cst_11 = arith.constant 0.000000e+00 : f32
    %14 = vector.broadcast %cst_11 : f32 to vector<8x2048xf32>
    %15 = arith.maximumf %13, %14 : vector<8x2048xf32>
    %16 = arith.truncf %15 : vector<8x2048xf32> to vector<8x2048xbf16>
    %c0_12 = arith.constant 0 : index
    %c0_13 = arith.constant 0 : index
    %17 = vector.load %arg6[%c0_12, %c0_13] : memref<2048x256xbf16, #tpu.memory_space<vmem>>, vector<2048x256xbf16>
    %cst_14 = arith.constant dense<0.000000e+00> : vector<8x256xf32>
    %18 = tpu.matmul %16, %17, %cst_14 {dimension_numbers = #tpu.dot_dimension_numbers<[1], [0], [0], [1], [0, 0, 1, 1], [], []>} : vector<8x2048xbf16>, vector<2048x256xbf16>, vector<8x256xf32> -> vector<8x256xf32>
    %c0_15 = arith.constant 0 : index
    %c0_16 = arith.constant 0 : index
    %19 = vector.load %arg7[%c0_15, %c0_16] : memref<1x256xf32, #tpu.memory_space<vmem>>, vector<1x256xf32>
    %20 = vector.broadcast %19 : vector<1x256xf32> to vector<8x256xf32>
    %21 = arith.addf %18, %20 : vector<8x256xf32>
    %c0_17 = arith.constant 0 : index
    %c0_18 = arith.constant 0 : index
    %22 = vector.load %arg8[%c0_17, %c0_18] : memref<8x256xf32, #tpu.memory_space<vmem>>, vector<8x256xf32>
    tpu.vector_store %arg8[%c0_17, %c0_18], %21 {strides = array<i32>} : memref<8x256xf32, #tpu.memory_space<vmem>>, vector<8x256xf32>,
    return
  }
  func.func @transform_0(%arg0: i32) -> (i32, i32) {
    %c0_i32 = arith.constant 0 : i32
    %c0_i32_0 = arith.constant 0 : i32
    %c0_i32_1 = arith.constant 0 : i32
    return %c0_i32, %c0_i32_0 : i32, i32
  }
  func.func @transform_1(%arg0: i32) -> (i32, i32) {
    %c0_i32 = arith.constant 0 : i32
    %c0_i32_0 = arith.constant 0 : i32
    %c0_i32_1 = arith.constant 0 : i32
    return %c0_i32, %c0_i32_0 : i32, i32
  }
  func.func @transform_2(%arg0: i32) -> (i32, i32) {
    %c0_i32 = arith.constant 0 : i32
    %c0_i32_0 = arith.constant 0 : i32
    %c0_i32_1 = arith.constant 0 : i32
    return %c0_i32, %c0_i32_0 : i32, i32
  }
  func.func @transform_3(%arg0: i32) -> (i32, i32) {
    %c0_i32 = arith.constant 0 : i32
    %c0_i32_0 = arith.constant 0 : i32
    %c0_i32_1 = arith.constant 0 : i32
    return %c0_i32, %c0_i32_0 : i32, i32
  }
  func.func @transform_4(%arg0: i32) -> (i32, i32) {
    %c0_i32 = arith.constant 0 : i32
    %c0_i32_0 = arith.constant 0 : i32
    %c0_i32_1 = arith.constant 0 : i32
    return %c0_i32, %c0_i32_0 : i32, i32
  }
  func.func @transform_5(%arg0: i32) -> (i32, i32) {
    %c0_i32 = arith.constant 0 : i32
    %c0_i32_0 = arith.constant 0 : i32
    %c0_i32_1 = arith.constant 0 : i32
    return %c0_i32, %c0_i32_0 : i32, i32
  }
  func.func @transform_6(%arg0: i32) -> (i32, i32) {
    %c0_i32 = arith.constant 0 : i32
    %c0_i32_0 = arith.constant 0 : i32
    %c0_i32_1 = arith.constant 0 : i32
    return %c0_i32, %c0_i32_0 : i32, i32
  }
  func.func @transform_7(%arg0: i32) -> (i32, i32) {
    %c0_i32 = arith.constant 0 : i32
    %c0_i32_0 = arith.constant 0 : i32
    %c0_i32_1 = arith.constant 0 : i32
    return %c0_i32, %c0_i32_0 : i32, i32
  }
}

</mosaic_0001>

<bundles_post_ra>
// kernel: improved_generator_forward.1
= control target key start
LH: loop header
LB: loop body
LE: loop exit
PB: predicated region body
PF: predicated region fallthrough
CT: control target
= control target key end

     0   :  { %12 = vsyncpa [#allocation3], 0  ;;  %s17840_s0 = inlined_call_operand.vmem [shape: bf16[8,128], index: 0, kind: input, shape index: {}]   ;;  %s17841_s1 = inlined_call_operand.hbm [shape: bf16[128,1024], index: 1, kind: input, shape index: {}]   ;;  %s17842_s2 = inlined_call_operand.hbm [shape: f32[1,1024], index: 2, kind: input, shape index: {}]   ;;  %s17843_s3 = inlined_call_operand.hbm [shape: bf16[1024,2048], index: 3, kind: input, shape index: {}]   ;;  %s17844_s4 = inlined_call_operand.hbm [shape: f32[1,2048], index: 4, kind: input, shape index: {}]   ;;  %s17845_s5 = inlined_call_operand.hbm [shape: bf16[2048,256], index: 5, kind: input, shape index: {}]   ;;  %s17846_s6 = inlined_call_operand.hbm [shape: f32[1,256], index: 6, kind: input, shape index: {}]   ;;  %s17847_s7 = inlined_call_operand.vmem [shape: f32[8,256], index: 7, kind: output, shape index: {}]  }
   0x1   :  { %13 = vsyncpa [#allocation5], 0 }
   0x2   :  { %14 = vsyncpa [#allocation8], 0  ;;  %s36_s26 = sshll.u32 %s17842_s2, 4  ;;  %s37_s26 = int_to_ptr.hbm [resolvable:$true] %s36_s26 }
   0x3   :  { %15 = vsyncpa [#allocation11], 0  ;;  %s17371_s27 = smov [#allocation4]   ;;  %s60_s8 = sshll.u32 %s17844_s4, 4  ;;  %s61_s8 = int_to_ptr.hbm [resolvable:$true] %s60_s8 }
   0x4   :  { %s38_s28 = sshll.u32 %s17371_s27, 4  ;;  %s17372_s9 = smov [#allocation7]   ;;  %s39_s28 = int_to_ptr.vmem [resolvable:$true] %s38_s28 }
   0x5   :  { %41 = dma.hbm_to_vmem [thread:$0]  %s37_s26, 128, %s39_s28, [#allocation5]  }
   0x6   :  { %s62_s10 = sshll.u32 %s17372_s9, 4  ;;  %s22_s13 = sshll.u32 %s17841_s1, 4  ;;  %s63_s10 = int_to_ptr.vmem [resolvable:$true] %s62_s10  ;;  %s23_s13 = int_to_ptr.hbm [resolvable:$true] %s22_s13 }
   0x7   :  { %65 = dma.hbm_to_vmem [thread:$0]  %s61_s8, 256, %s63_s10, [#allocation8]  }
   0x8   :  { %s17373_s2 = smov [#allocation2]   ;;  %s46_s17 = sshll.u32 %s17843_s3, 4  ;;  %s47_s17 = int_to_ptr.hbm [resolvable:$true] %s46_s17 }
   0x9   :  { %s24_s14 = sshll.u32 %s17373_s2, 4  ;;  %s17374_s18 = smov 512   ;;  %s25_s14 = int_to_ptr.vmem [resolvable:$true] %s24_s14 }
   0xa   :  { %s17375_s4 = smov 32   ;;  %s17376_s19 = smov [#allocation6]  }
   0xb   :  { %30 = dma.hbm_to_vmem [thread:$0]  %s23_s13, 8192, %s25_s14, [#allocation3], %s17374_s18, %s17374_s18, %s17375_s4  }
   0xc   :  { %s48_s20 = sshll.u32 %s17376_s19, 4  ;;  %s17377_s21 = smov 1024   ;;  %s49_s20 = int_to_ptr.vmem [resolvable:$true] %s48_s20 }
   0xd   :  { %s17378_s22 = smov 64   ;;  %s70_s24 = sshll.u32 %s17845_s5, 4  ;;  %s71_s24 = int_to_ptr.hbm [resolvable:$true] %s70_s24 }
   0xe   :  { %54 = dma.hbm_to_vmem [thread:$0]  %s47_s17, 131072, %s49_s20, [#allocation5], %s17377_s21, %s17377_s21, %s17378_s22  }
   0xf   :  { %s17379_s25 = smov [#allocation9]   ;;  %s84_s28 = sshll.u32 %s17846_s6, 4  ;;  %s85_s28 = int_to_ptr.hbm [resolvable:$true] %s84_s28 }
  0x10   :  { %s72_s26 = sshll.u32 %s17379_s25, 4  ;;  %s17380_s29 = smov 128   ;;  %s73_s26 = int_to_ptr.vmem [resolvable:$true] %s72_s26 }
  0x11   :  { %s17381_s30 = smov 8   ;;  %s17382_s8 = smov [#allocation10]  }
  0x12   :  { %78 = dma.hbm_to_vmem [thread:$0]  %s71_s24, 32768, %s73_s26, [#allocation8], %s17380_s29, %s17380_s29, %s17381_s30  }
  0x13   :  { %s86_s9 = sshll.u32 %s17382_s8, 4  ;;  %s87_s9 = int_to_ptr.vmem [resolvable:$true] %s86_s9 }
  0x14   :  { %89 = dma.hbm_to_vmem [thread:$0]  %s85_s28, 32, %s87_s9, [#allocation11]  }
  0x15   :  { %17363 = dma.done.wait [#allocation3], 8192  }
  0x16   :  { %17364 = vsyncadd [#allocation3], 4294959104 }
  0x17   :  { %17365 = dma.done.wait [#allocation5], 131200  }
  0x18   :  { %17366 = vsyncadd [#allocation5], 4294836096 }
  0x19   :  { %17367 = dma.done.wait [#allocation8], 33024  }
  0x1a   :  { %17368 = vsyncadd [#allocation8], 4294934272 }
  0x1b   :  { %17369 = dma.done.wait [#allocation11], 32  }
  0x1c   :  { %17370 = vsyncadd [#allocation11], 4294967264  ;;  %v10707_v0 = vld [vmem:[#allocation2 + $0x1c0] sm:$0xf]  ;;  %v15913_v2 = vld [vmem:[#allocation2 + $0x1c4] sm:$0xf] }
  0x1d   :  { %v15917_v1 = vld [vmem:[#allocation2 + $0x1dc] sm:$0xf0]  ;;  %v10709_v4 = vld [vmem:[#allocation2 + $0x1e0] sm:$0xf0]  ;;  %v10715_v5 = vld [vmem:[#allocation2 + $0x1c8] sm:$0xf] }
  0x1e   :  { %v10708_v3 = vor.u32 %v15917_v1, %v10707_v0  ;;  %v15918_v6 = vld [vmem:[#allocation2 + $0x1e4] sm:$0xf0]  ;;  %v10712_v7 = vor.u32 %v15913_v2, %v10709_v4  ;;  %v15914_v9 = vld [vmem:[#allocation2 + $0x1cc] sm:$0xf]  ;;  %v10675_v11 = vld [vmem:[#allocation2 + $0x180] sm:$0xf] }
  0x1f   :  { %v10716_v8 = vor.u32 %v15918_v6, %v10715_v5  ;;  %v10717_v10 = vld [vmem:[#allocation2 + $0x1e8] sm:$0xf0]  ;;  %v15909_v13 = vld [vmem:[#allocation2 + $0x19c] sm:$0xf0]  ;;  %v15905_v14 = vld [vmem:[#allocation2 + $0x184] sm:$0xf] }
  0x20   :  { %517 = vmatpush.bf16.msra.mxu0 %v10708_v3  ;;  %v10720_v12 = vor.u32 %v15914_v9, %v10717_v10  ;;  %v10677_v15 = vld [vmem:[#allocation2 + $0x1a0] sm:$0xf0]  ;;  %530 = vmatpush.bf16.msra.mxu1 %v10712_v7  ;;  %v10676_v16 = vor.u32 %v15909_v13, %v10675_v11  ;;  %v10683_v18 = vld [vmem:[#allocation2 + $0x188] sm:$0xf]  ;;  %v15906_v20 = vld [vmem:[#allocation2 + $0x18c] sm:$0xf] }
  0x21   :  { %543 = vmatpush.bf16.msra.mxu2 %v10716_v8  ;;  %v10680_v17 = vor.u32 %v15905_v14, %v10677_v15  ;;  %v15910_v19 = vld [vmem:[#allocation2 + $0x1a4] sm:$0xf0]  ;;  %v10685_v22 = vld [vmem:[#allocation2 + $0x1a8] sm:$0xf0]  ;;  %v10643_v23 = vld [vmem:[#allocation2 + $0x140] sm:$0xf] }
  0x22   :  { %556 = vmatpush.bf16.msra.mxu3 %v10720_v12  ;;  %v10684_v21 = vor.u32 %v15910_v19, %v10683_v18  ;;  %v15901_v24 = vld [vmem:[#allocation2 + $0x15c] sm:$0xf0]  ;;  %v10688_v25 = vor.u32 %v15906_v20, %v10685_v22  ;;  %v15897_v26 = vld [vmem:[#allocation2 + $0x144] sm:$0xf]  ;;  %v10651_v28 = vld [vmem:[#allocation2 + $0x148] sm:$0xf] }
  0x23   :  { %v10645_v27 = vld [vmem:[#allocation2 + $0x160] sm:$0xf0]  ;;  %v10644_v29 = vor.u32 %v15901_v24, %v10643_v23  ;;  %v15902_v30 = vld [vmem:[#allocation2 + $0x164] sm:$0xf0]  ;;  %v15898_v31 = vld [vmem:[#allocation2 + $0x14c] sm:$0xf] }
  0x24   :  { %518 = vmatpush.bf16.msra.mxu0 %v10676_v16  ;;  %v10653_v32 = vld [vmem:[#allocation2 + $0x168] sm:$0xf0]  ;;  %531 = vmatpush.bf16.msra.mxu1 %v10680_v17  ;;  %v10648_v33 = vor.u32 %v15897_v26, %v10645_v27  ;;  %v10652_v34 = vor.u32 %v15902_v30, %v10651_v28  ;;  %v10611_v35 = vld [vmem:[#allocation2 + $0x100] sm:$0xf]  ;;  %v15889_v37 = vld [vmem:[#allocation2 + $0x104] sm:$0xf] }
  0x25   :  { %544 = vmatpush.bf16.msra.mxu2 %v10684_v21  ;;  %v15893_v36 = vld [vmem:[#allocation2 + $0x11c] sm:$0xf0]  ;;  %v10656_v38 = vor.u32 %v15898_v31, %v10653_v32  ;;  %v10613_v39 = vld [vmem:[#allocation2 + $0x120] sm:$0xf0]  ;;  %v10619_v40 = vld [vmem:[#allocation2 + $0x108] sm:$0xf] }
  0x26   :  { %557 = vmatpush.bf16.msra.mxu3 %v10688_v25  ;;  %v15894_v41 = vld [vmem:[#allocation2 + $0x124] sm:$0xf0]  ;;  %v15890_v42 = vld [vmem:[#allocation2 + $0x10c] sm:$0xf]  ;;  %v10612_v44 = vor.u32 %v15893_v36, %v10611_v35  ;;  %v10616_v45 = vor.u32 %v15889_v37, %v10613_v39  ;;  %v10579_v47 = vld [vmem:[#allocation2 + $0xc0] sm:$0xf] }
  0x27   :  { %v10621_v43 = vld [vmem:[#allocation2 + $0x128] sm:$0xf0]  ;;  %v10620_v46 = vor.u32 %v15894_v41, %v10619_v40  ;;  %v15885_v48 = vld [vmem:[#allocation2 + $0xdc] sm:$0xf0]  ;;  %v15881_v49 = vld [vmem:[#allocation2 + $0xc4] sm:$0xf] }
  0x28   :  { %519 = vmatpush.bf16.msra.mxu0 %v10644_v29  ;;  %532 = vmatpush.bf16.msra.mxu1 %v10648_v33  ;;  %v10624_v50 = vor.u32 %v15890_v42, %v10621_v43  ;;  %v10581_v51 = vld [vmem:[#allocation2 + $0xe0] sm:$0xf0]  ;;  %v10587_v52 = vld [vmem:[#allocation2 + $0xc8] sm:$0xf]  ;;  %v15882_v54 = vld [vmem:[#allocation2 + $0xcc] sm:$0xf]  ;;  %v10580_v56 = vor.u32 %v15885_v48, %v10579_v47 }
  0x29   :  { %545 = vmatpush.bf16.msra.mxu2 %v10652_v34  ;;  %v15886_v53 = vld [vmem:[#allocation2 + $0xe4] sm:$0xf0]  ;;  %v10589_v55 = vld [vmem:[#allocation2 + $0xe8] sm:$0xf0]  ;;  %v10584_v57 = vor.u32 %v15881_v49, %v10581_v51  ;;  %v10547_v59 = vld [vmem:[#allocation2 + $0x80] sm:$0xf] }
  0x2a   :  { %558 = vmatpush.bf16.msra.mxu3 %v10656_v38  ;;  %v10588_v58 = vor.u32 %v15886_v53, %v10587_v52  ;;  %v15877_v60 = vld [vmem:[#allocation2 + $0x9c] sm:$0xf0]  ;;  %v15873_v61 = vld [vmem:[#allocation2 + $0x84] sm:$0xf]  ;;  %v10592_v62 = vor.u32 %v15882_v54, %v10589_v55  ;;  %v10555_v0 = vld [vmem:[#allocation2 + $0x88] sm:$0xf] }
  0x2b   :  { %v10549_v63 = vld [vmem:[#allocation2 + $0xa0] sm:$0xf0]  ;;  %v15878_v1 = vld [vmem:[#allocation2 + $0xa4] sm:$0xf0]  ;;  %v15874_v2 = vld [vmem:[#allocation2 + $0x8c] sm:$0xf]  ;;  %v10548_v4 = vor.u32 %v15877_v60, %v10547_v59 }
  0x2c   :  { %520 = vmatpush.bf16.msra.mxu0 %v10612_v44  ;;  %533 = vmatpush.bf16.msra.mxu1 %v10616_v45  ;;  %v10557_v3 = vld [vmem:[#allocation2 + $0xa8] sm:$0xf0]  ;;  %v10552_v5 = vor.u32 %v15873_v61, %v10549_v63  ;;  %v10556_v6 = vor.u32 %v15878_v1, %v10555_v0  ;;  %v10515_v7 = vld [vmem:[#allocation2 + $0x40] sm:$0xf]  ;;  %v15865_v9 = vld [vmem:[#allocation2 + $0x44] sm:$0xf] }
  0x2d   :  { %546 = vmatpush.bf16.msra.mxu2 %v10620_v46  ;;  %v15869_v8 = vld [vmem:[#allocation2 + $0x5c] sm:$0xf0]  ;;  %v10560_v10 = vor.u32 %v15874_v2, %v10557_v3  ;;  %v10517_v11 = vld [vmem:[#allocation2 + $0x60] sm:$0xf0]  ;;  %v10523_v12 = vld [vmem:[#allocation2 + $0x48] sm:$0xf] }
  0x2e   :  { %559 = vmatpush.bf16.msra.mxu3 %v10624_v50  ;;  %v15870_v13 = vld [vmem:[#allocation2 + $0x64] sm:$0xf0]  ;;  %v15866_v14 = vld [vmem:[#allocation2 + $0x4c] sm:$0xf]  ;;  %v10516_v16 = vor.u32 %v15869_v8, %v10515_v7  ;;  %v10483_v17 = vld [vmem:[#allocation2] sm:$0xf]  ;;  %v10520_v19 = vor.u32 %v15865_v9, %v10517_v11 }
  0x2f   :  { %v10525_v15 = vld [vmem:[#allocation2 + $0x68] sm:$0xf0]  ;;  %v15861_v18 = vld [vmem:[#allocation2 + $0x1c] sm:$0xf0]  ;;  %v10524_v20 = vor.u32 %v15870_v13, %v10523_v12  ;;  %v15857_v21 = vld [vmem:[#allocation2 + $0x4] sm:$0xf] }
  0x30   :  { %521 = vmatpush.bf16.msra.mxu0 %v10580_v56  ;;  %534 = vmatpush.bf16.msra.mxu1 %v10584_v57  ;;  %v10485_v22 = vld [vmem:[#allocation2 + $0x20] sm:$0xf0]  ;;  %v10491_v23 = vld [vmem:[#allocation2 + $0x8] sm:$0xf]  ;;  %v10528_v24 = vor.u32 %v15866_v14, %v10525_v15  ;;  %v15858_v26 = vld [vmem:[#allocation2 + $0xc] sm:$0xf]  ;;  %v10484_v31 = vor.u32 %v15861_v18, %v10483_v17 }
  0x31   :  { %547 = vmatpush.bf16.msra.mxu2 %v10588_v58  ;;  %v15862_v25 = vld [vmem:[#allocation2 + $0x24] sm:$0xf0]  ;;  %v10493_v27 = vld [vmem:[#allocation2 + $0x28] sm:$0xf0]  ;;  %v10723_v28 = vld [vmem:[#allocation2 + $0x1d0] sm:$0xf]  ;;  %v10488_v35 = vor.u32 %v15857_v21, %v10485_v22 }
  0x32   :  { %560 = vmatpush.bf16.msra.mxu3 %v10592_v62  ;;  %v15919_v29 = vld [vmem:[#allocation2 + $0x1ec] sm:$0xf0]  ;;  %v15915_v30 = vld [vmem:[#allocation2 + $0x1d4] sm:$0xf]  ;;  %v10731_v33 = vld [vmem:[#allocation2 + $0x1d8] sm:$0xf]  ;;  %v10492_v36 = vor.u32 %v15862_v25, %v10491_v23  ;;  %v10496_v39 = vor.u32 %v15858_v26, %v10493_v27 }
  0x33   :  { %v10725_v32 = vld [vmem:[#allocation2 + $0x1f0] sm:$0xf0]  ;;  %v15920_v34 = vld [vmem:[#allocation2 + $0x1f4] sm:$0xf0]  ;;  %v15916_v37 = vld [vmem:[#allocation2 + $0x1dc] sm:$0xf]  ;;  %v10724_v40 = vor.u32 %v15919_v29, %v10723_v28 }
  0x34   :  { %522 = vmatpush.bf16.msra.mxu0 %v10548_v4  ;;  %535 = vmatpush.bf16.msra.mxu1 %v10552_v5  ;;  %v10733_v38 = vld [vmem:[#allocation2 + $0x1f8] sm:$0xf0]  ;;  %v10728_v41 = vor.u32 %v15915_v30, %v10725_v32  ;;  %v10732_v42 = vor.u32 %v15920_v34, %v10731_v33  ;;  %v10691_v43 = vld [vmem:[#allocation2 + $0x190] sm:$0xf]  ;;  %v15907_v45 = vld [vmem:[#allocation2 + $0x194] sm:$0xf] }
  0x35   :  { %548 = vmatpush.bf16.msra.mxu2 %v10556_v6  ;;  %v15911_v44 = vld [vmem:[#allocation2 + $0x1ac] sm:$0xf0]  ;;  %v10736_v46 = vor.u32 %v15916_v37, %v10733_v38  ;;  %v10693_v47 = vld [vmem:[#allocation2 + $0x1b0] sm:$0xf0]  ;;  %v10699_v48 = vld [vmem:[#allocation2 + $0x198] sm:$0xf] }
  0x36   :  { %561 = vmatpush.bf16.msra.mxu3 %v10560_v10  ;;  %v15912_v49 = vld [vmem:[#allocation2 + $0x1b4] sm:$0xf0]  ;;  %v17444_v50 = vld [vmem:[%s17840_s0] sm:$0xf]  ;;  %v15908_v51 = vld [vmem:[#allocation2 + $0x19c] sm:$0xf]  ;;  %v10692_v53 = vor.u32 %v15911_v44, %v10691_v43  ;;  %v10696_v54 = vor.u32 %v15907_v45, %v10693_v47 }
  0x37   :  { %v10701_v52 = vld [vmem:[#allocation2 + $0x1b8] sm:$0xf0]  ;;  %v10700_v55 = vor.u32 %v15912_v49, %v10699_v48  ;;  %v10659_v56 = vld [vmem:[#allocation2 + $0x150] sm:$0xf]  ;;  %v15899_v58 = vld [vmem:[#allocation2 + $0x154] sm:$0xf] }
  0x38   :  { %523 = vmatpush.bf16.msra.mxu0 %v10516_v16  ;;  %536 = vmatpush.bf16.msra.mxu1 %v10520_v19  ;;  %v15903_v57 = vld [vmem:[#allocation2 + $0x16c] sm:$0xf0]  ;;  %v10704_v59 = vor.u32 %v15908_v51, %v10701_v52  ;;  %v10661_v60 = vld [vmem:[#allocation2 + $0x170] sm:$0xf0]  ;;  %v10667_v61 = vld [vmem:[#allocation2 + $0x158] sm:$0xf] }
  0x39   :  { %549 = vmatpush.bf16.msra.mxu2 %v10524_v20  ;;  %v15904_v62 = vld [vmem:[#allocation2 + $0x174] sm:$0xf0]  ;;  %v15900_v63 = vld [vmem:[#allocation2 + $0x15c] sm:$0xf]  ;;  %v10660_v1 = vor.u32 %v15903_v57, %v10659_v56  ;;  %v10664_v2 = vor.u32 %v15899_v58, %v10661_v60  ;;  %v10627_v4 = vld [vmem:[#allocation2 + $0x110] sm:$0xf] }
  0x3a   :  { %562 = vmatpush.bf16.msra.mxu3 %v10528_v24  ;;  %v10669_v0 = vld [vmem:[#allocation2 + $0x178] sm:$0xf0]  ;;  %v10668_v3 = vor.u32 %v15904_v62, %v10667_v61  ;;  %v15895_v5 = vld [vmem:[#allocation2 + $0x12c] sm:$0xf0]  ;;  %v15891_v6 = vld [vmem:[#allocation2 + $0x114] sm:$0xf] }
  0x3b   :  { %v10672_v7 = vor.u32 %v15900_v63, %v10669_v0  ;;  %v10629_v8 = vld [vmem:[#allocation2 + $0x130] sm:$0xf0]  ;;  %v10635_v9 = vld [vmem:[#allocation2 + $0x118] sm:$0xf]  ;;  %v15892_v11 = vld [vmem:[#allocation2 + $0x11c] sm:$0xf]  ;;  %v10628_v13 = vor.u32 %v15895_v5, %v10627_v4 }
  0x3c   :  { %524 = vmatpush.bf16.msra.mxu0 %v10484_v31  ;;  %537 = vmatpush.bf16.msra.mxu1 %v10488_v35  ;;  %v15896_v10 = vld [vmem:[#allocation2 + $0x134] sm:$0xf0]  ;;  %v10637_v12 = vld [vmem:[#allocation2 + $0x138] sm:$0xf0]  ;;  %v10632_v14 = vor.u32 %v15891_v6, %v10629_v8  ;;  %v10595_v16 = vld [vmem:[#allocation2 + $0xd0] sm:$0xf] }
  0x3d   :  { %550 = vmatpush.bf16.msra.mxu2 %v10492_v36  ;;  %v10636_v15 = vor.u32 %v15896_v10, %v10635_v9  ;;  %v15887_v17 = vld [vmem:[#allocation2 + $0xec] sm:$0xf0]  ;;  %v15883_v18 = vld [vmem:[#allocation2 + $0xd4] sm:$0xf]  ;;  %v10640_v19 = vor.u32 %v15892_v11, %v10637_v12  ;;  %v10603_v21 = vld [vmem:[#allocation2 + $0xd8] sm:$0xf] }
  0x3e   :  { %563 = vmatpush.bf16.msra.mxu3 %v10496_v39  ;;  %v10597_v20 = vld [vmem:[#allocation2 + $0xf0] sm:$0xf0]  ;;  %v15888_v22 = vld [vmem:[#allocation2 + $0xf4] sm:$0xf0]  ;;  %v15884_v23 = vld [vmem:[#allocation2 + $0xdc] sm:$0xf]  ;;  %v10596_v25 = vor.u32 %v15887_v17, %v10595_v16 }
  0x3f   :  { %525 = vmatmul.bf16.vlgmr.msra.gmra.mxu0 %v17444_v50  ;;  %538 = vmatmul.bf16.vlgmr.msra.gmra.mxu1 %v17444_v50  ;;  %v10605_v24 = vld [vmem:[#allocation2 + $0xf8] sm:$0xf0]  ;;  %v10600_v26 = vor.u32 %v15883_v18, %v10597_v20  ;;  %v10604_v27 = vor.u32 %v15888_v22, %v10603_v21  ;;  %v10563_v28 = vld [vmem:[#allocation2 + $0x90] sm:$0xf]  ;;  %v15875_v30 = vld [vmem:[#allocation2 + $0x94] sm:$0xf] }
  0x40   :  { %569 = vmatpush.bf16.msrb.mxu0 %v10724_v40  ;;  %582 = vmatpush.bf16.msrb.mxu1 %v10728_v41  ;;  %v15879_v29 = vld [vmem:[#allocation2 + $0xac] sm:$0xf0]  ;;  %v10608_v31 = vor.u32 %v15884_v23, %v10605_v24  ;;  %v10565_v32 = vld [vmem:[#allocation2 + $0xb0] sm:$0xf0]  ;;  %v10571_v33 = vld [vmem:[#allocation2 + $0x98] sm:$0xf] }
  0x41   :  { %595 = vmatpush.bf16.msrb.mxu2 %v10732_v42  ;;  %564 = vmatmul.bf16.vlgmr.msra.gmra.mxu3 %v17444_v50  ;;  %v15880_v34 = vld [vmem:[#allocation2 + $0xb4] sm:$0xf0]  ;;  %v15876_v35 = vld [vmem:[#allocation2 + $0x9c] sm:$0xf]  ;;  %v10564_v37 = vor.u32 %v15879_v29, %v10563_v28  ;;  %v10568_v38 = vor.u32 %v15875_v30, %v10565_v32  ;;  %v10531_v40 = vld [vmem:[#allocation2 + $0x50] sm:$0xf] }
  0x42   :  { %608 = vmatpush.bf16.msrb.mxu3 %v10736_v46  ;;  %551 = vmatmul.bf16.vlgmr.msra.gmra.mxu2 %v17444_v50  ;;  %v10573_v36 = vld [vmem:[#allocation2 + $0xb8] sm:$0xf0]  ;;  %v10572_v39 = vor.u32 %v15880_v34, %v10571_v33  ;;  %v15871_v41 = vld [vmem:[#allocation2 + $0x6c] sm:$0xf0]  ;;  %v15867_v42 = vld [vmem:[#allocation2 + $0x54] sm:$0xf] }
  0x43   :  { %v10576_v43 = vor.u32 %v15876_v35, %v10573_v36  ;;  %v10533_v44 = vld [vmem:[#allocation2 + $0x70] sm:$0xf0]  ;;  %v10539_v45 = vld [vmem:[#allocation2 + $0x58] sm:$0xf]  ;;  %v15868_v47 = vld [vmem:[#allocation2 + $0x5c] sm:$0xf]  ;;  %v10532_v49 = vor.u32 %v15871_v41, %v10531_v40 }
  0x44   :  { %570 = vmatpush.bf16.msrb.mxu0 %v10692_v53  ;;  %583 = vmatpush.bf16.msrb.mxu1 %v10696_v54  ;;  %v15872_v46 = vld [vmem:[#allocation2 + $0x74] sm:$0xf0]  ;;  %v10541_v48 = vld [vmem:[#allocation2 + $0x78] sm:$0xf0]  ;;  %v10499_v51 = vld [vmem:[#allocation2 + $0x10] sm:$0xf]  ;;  %v10536_v52 = vor.u32 %v15867_v42, %v10533_v44 }
  0x45   :  { %596 = vmatpush.bf16.msrb.mxu2 %v10700_v55  ;;  %v10540_v53 = vor.u32 %v15872_v46, %v10539_v45  ;;  %v15863_v54 = vld [vmem:[#allocation2 + $0x2c] sm:$0xf0]  ;;  %v15859_v55 = vld [vmem:[#allocation2 + $0x14] sm:$0xf]  ;;  %v10544_v57 = vor.u32 %v15868_v47, %v10541_v48  ;;  %v10507_v58 = vld [vmem:[#allocation2 + $0x18] sm:$0xf] }
  0x46   :  { %609 = vmatpush.bf16.msrb.mxu3 %v10704_v59  ;;  %v10501_v56 = vld [vmem:[#allocation2 + $0x30] sm:$0xf0]  ;;  %v15864_v59 = vld [vmem:[#allocation2 + $0x34] sm:$0xf0]  ;;  %v15860_v60 = vld [vmem:[#allocation2 + $0x1c] sm:$0xf]  ;;  %v10500_v0 = vor.u32 %v15863_v54, %v10499_v51 }
  0x47   :  { %v10509_v61 = vld [vmem:[#allocation2 + $0x38] sm:$0xf0]  ;;  %v11187_v62 = vld [vmem:[#allocation6 + $0x380] sm:$0xf]  ;;  %v10508_v4 = vor.u32 %v15864_v59, %v10507_v58 }
  0x48   :  { %571 = vmatpush.bf16.msrb.mxu0 %v10660_v1  ;;  %584 = vmatpush.bf16.msrb.mxu1 %v10664_v2  ;;  %v16041_v63 = vld [vmem:[#allocation6 + $0x3bc] sm:$0xf0]  ;;  %v10512_v5 = vor.u32 %v15860_v60, %v10509_v61 }
  0x49   :  { %597 = vmatpush.bf16.msrb.mxu2 %v10668_v3  ;;  %v11699_v1 = vld [vmem:[#allocation6 + $0x780] sm:$0xf]  ;;  %v10504_v3 = vor.u32 %v15859_v55, %v10501_v56  ;;  %v11188_v6 = vor.u32 %v16041_v63, %v11187_v62 }
  0x4a   :  { %610 = vmatpush.bf16.msrb.mxu3 %v10672_v7  ;;  %v16169_v2 = vld [vmem:[#allocation6 + $0x7bc] sm:$0xf0] }
  0x4b   :  { %v11123_v7 = vld [vmem:[#allocation6 + $0x300] sm:$0xf]  ;;  %v11700_v10 = vor.u32 %v16169_v2, %v11699_v1 }
  0x4c   :  { %572 = vmatpush.bf16.msrb.mxu0 %v10628_v13  ;;  %585 = vmatpush.bf16.msrb.mxu1 %v10632_v14  ;;  %v12211_v8 = vld [vmem:[#allocation6 + $0xb80] sm:$0xf] }
  0x4d   :  { %598 = vmatpush.bf16.msrb.mxu2 %v10636_v15  ;;  %v16297_v9 = vld [vmem:[#allocation6 + $0xbbc] sm:$0xf0] }
  0x4e   :  { %611 = vmatpush.bf16.msrb.mxu3 %v10640_v19  ;;  %v16025_v11 = vld [vmem:[#allocation6 + $0x33c] sm:$0xf0]  ;;  %v12212_v16 = vor.u32 %v16297_v9, %v12211_v8 }
  0x4f   :  { %v12723_v12 = vld [vmem:[#allocation6 + $0xf80] sm:$0xf]  ;;  %v11124_v17 = vor.u32 %v16025_v11, %v11123_v7 }
  0x50   :  { %573 = vmatpush.bf16.msrb.mxu0 %v10596_v25  ;;  %586 = vmatpush.bf16.msrb.mxu1 %v10600_v26  ;;  %v16425_v13 = vld [vmem:[#allocation6 + $0xfbc] sm:$0xf0] }
  0x51   :  { %599 = vmatpush.bf16.msrb.mxu2 %v10604_v27  ;;  %v11635_v14 = vld [vmem:[#allocation6 + $0x700] sm:$0xf]  ;;  %v12724_v18 = vor.u32 %v16425_v13, %v12723_v12 }
  0x52   :  { %612 = vmatpush.bf16.msrb.mxu3 %v10608_v31  ;;  %v16153_v15 = vld [vmem:[#allocation6 + $0x73c] sm:$0xf0] }
  0x53   :  { %v11059_v19 = vld [vmem:[#allocation6 + $0x280] sm:$0xf]  ;;  %v11636_v22 = vor.u32 %v16153_v15, %v11635_v14 }
  0x54   :  { %574 = vmatpush.bf16.msrb.mxu0 %v10564_v37  ;;  %587 = vmatpush.bf16.msrb.mxu1 %v10568_v38  ;;  %v12147_v20 = vld [vmem:[#allocation6 + $0xb00] sm:$0xf] }
  0x55   :  { %600 = vmatpush.bf16.msrb.mxu2 %v10572_v39  ;;  %v16281_v21 = vld [vmem:[#allocation6 + $0xb3c] sm:$0xf0] }
  0x56   :  { %613 = vmatpush.bf16.msrb.mxu3 %v10576_v43  ;;  %v16009_v23 = vld [vmem:[#allocation6 + $0x2bc] sm:$0xf0]  ;;  %v12148_v28 = vor.u32 %v16281_v21, %v12147_v20 }
  0x57   :  { %v12659_v24 = vld [vmem:[#allocation6 + $0xf00] sm:$0xf]  ;;  %v11060_v29 = vor.u32 %v16009_v23, %v11059_v19 }
  0x58   :  { %575 = vmatpush.bf16.msrb.mxu0 %v10532_v49  ;;  %588 = vmatpush.bf16.msrb.mxu1 %v10536_v52  ;;  %v16409_v25 = vld [vmem:[#allocation6 + $0xf3c] sm:$0xf0] }
  0x59   :  { %601 = vmatpush.bf16.msrb.mxu2 %v10540_v53  ;;  %v11571_v26 = vld [vmem:[#allocation6 + $0x680] sm:$0xf]  ;;  %v12660_v30 = vor.u32 %v16409_v25, %v12659_v24 }
  0x5a   :  { %614 = vmatpush.bf16.msrb.mxu3 %v10544_v57  ;;  %v16137_v27 = vld [vmem:[#allocation6 + $0x6bc] sm:$0xf0] }
  0x5b   :  { %v10995_v31 = vld [vmem:[#allocation6 + $0x200] sm:$0xf]  ;;  %v11572_v34 = vor.u32 %v16137_v27, %v11571_v26 }
  0x5c   :  { %576 = vmatpush.bf16.msrb.mxu0 %v10500_v0  ;;  %589 = vmatpush.bf16.msrb.mxu1 %v10504_v3  ;;  %v12083_v32 = vld [vmem:[#allocation6 + $0xa80] sm:$0xf] }
  0x5d   :  { %602 = vmatpush.bf16.msrb.mxu2 %v10508_v4  ;;  %v16265_v33 = vld [vmem:[#allocation6 + $0xabc] sm:$0xf0] }
  0x5e   :  { %615 = vmatpush.bf16.msrb.mxu3 %v10512_v5  ;;  %v15993_v35 = vld [vmem:[#allocation6 + $0x23c] sm:$0xf0]  ;;  %v12084_v40 = vor.u32 %v16265_v33, %v12083_v32 }
  0x5f   :  { %577 = vmatmul.bf16.vlgmr.msrb.gmra.mxu0 %v17444_v50  ;;  %590 = vmatmul.bf16.vlgmr.msrb.gmra.mxu1 %v17444_v50  ;;  %v12595_v36 = vld [vmem:[#allocation6 + $0xe80] sm:$0xf] }
  0x60   :  { %6817 = vmatpush.bf16.msra.mxu0 %v11188_v6  ;;  %6830 = vmatpush.bf16.msra.mxu1 %v11700_v10  ;;  %v16393_v37 = vld [vmem:[#allocation6 + $0xebc] sm:$0xf0] }
  0x61   :  { %603 = vmatmul.bf16.vlgmr.msrb.gmra.mxu2 %v17444_v50  ;;  %616 = vmatmul.bf16.vlgmr.msrb.gmra.mxu3 %v17444_v50  ;;  %v11507_v38 = vld [vmem:[#allocation6 + $0x600] sm:$0xf]  ;;  %v10996_v50 = vor.u32 %v15993_v35, %v10995_v31  ;;  %v12596_v41 = vor.u32 %v16393_v37, %v12595_v36 }
  0x62   :  { %6843 = vmatpush.bf16.msra.mxu2 %v12212_v16  ;;  %6856 = vmatpush.bf16.msra.mxu3 %v12724_v18  ;;  %v16121_v39 = vld [vmem:[#allocation6 + $0x63c] sm:$0xf0] }
  0x63   :  { %v10931_v42 = vld [vmem:[#allocation6 + $0x180] sm:$0xf]  ;;  %v11508_v45 = vor.u32 %v16121_v39, %v11507_v38 }
  0x64   :  { %6818 = vmatpush.bf16.msra.mxu0 %v11124_v17  ;;  %6831 = vmatpush.bf16.msra.mxu1 %v11636_v22  ;;  %v12019_v43 = vld [vmem:[#allocation6 + $0xa00] sm:$0xf] }
  0x65   :  { %v16249_v44 = vld [vmem:[#allocation6 + $0xa3c] sm:$0xf0] }
  0x66   :  { %6844 = vmatpush.bf16.msra.mxu2 %v12148_v28  ;;  %6857 = vmatpush.bf16.msra.mxu3 %v12660_v30  ;;  %v15977_v46 = vld [vmem:[#allocation6 + $0x1bc] sm:$0xf0]  ;;  %v12020_v52 = vor.u32 %v16249_v44, %v12019_v43 }
  0x67   :  { %v12531_v47 = vld [vmem:[#allocation6 + $0xe00] sm:$0xf]  ;;  %v10932_v53 = vor.u32 %v15977_v46, %v10931_v42 }
  0x68   :  { %6819 = vmatpush.bf16.msra.mxu0 %v11060_v29  ;;  %6832 = vmatpush.bf16.msra.mxu1 %v11572_v34  ;;  %v16377_v48 = vld [vmem:[#allocation6 + $0xe3c] sm:$0xf0] }
  0x69   :  { %v11443_v49 = vld [vmem:[#allocation6 + $0x580] sm:$0xf]  ;;  %v12532_v54 = vor.u32 %v16377_v48, %v12531_v47 }
  0x6a   :  { %v16105_v51 = vld [vmem:[#allocation6 + $0x5bc] sm:$0xf0]  ;;  %6845 = vmatpush.bf16.msra.mxu2 %v12084_v40  ;;  %6858 = vmatpush.bf16.msra.mxu3 %v12596_v41 }
  0x6b   :  { %v10867_v55 = vld [vmem:[#allocation6 + $0x100] sm:$0xf]  ;;  %v11444_v58 = vor.u32 %v16105_v51, %v11443_v49 }
  0x6c   :  { %6820 = vmatpush.bf16.msra.mxu0 %v10996_v50  ;;  %v11955_v56 = vld [vmem:[#allocation6 + $0x980] sm:$0xf]  ;;  %6833 = vmatpush.bf16.msra.mxu1 %v11508_v45 }
  0x6d   :  { %v16233_v57 = vld [vmem:[#allocation6 + $0x9bc] sm:$0xf0] }
  0x6e   :  { %v15961_v59 = vld [vmem:[#allocation6 + $0x13c] sm:$0xf0]  ;;  %6846 = vmatpush.bf16.msra.mxu2 %v12020_v52  ;;  %v11956_v0 = vor.u32 %v16233_v57, %v11955_v56  ;;  %6859 = vmatpush.bf16.msra.mxu3 %v12532_v54 }
  0x6f   :  { %v12467_v60 = vld [vmem:[#allocation6 + $0xd80] sm:$0xf]  ;;  %v10868_v1 = vor.u32 %v15961_v59, %v10867_v55 }
  0x70   :  { %v16361_v61 = vld [vmem:[#allocation6 + $0xdbc] sm:$0xf0]  ;;  %6821 = vmatpush.bf16.msra.mxu0 %v10932_v53  ;;  %6834 = vmatpush.bf16.msra.mxu1 %v11444_v58 }
  0x71   :  { %v11379_v62 = vld [vmem:[#allocation6 + $0x500] sm:$0xf]  ;;  %v12468_v2 = vor.u32 %v16361_v61, %v12467_v60 }
  0x72   :  { %v16089_v63 = vld [vmem:[#allocation6 + $0x53c] sm:$0xf0]  ;;  %6847 = vmatpush.bf16.msra.mxu2 %v11956_v0 }
  0x73   :  { %v10803_v3 = vld [vmem:[#allocation6 + $0x80] sm:$0xf]  ;;  %v11380_v6 = vor.u32 %v16089_v63, %v11379_v62  ;;  %6860 = vmatpush.bf16.msra.mxu3 %v12468_v2 }
  0x74   :  { %v11891_v4 = vld [vmem:[#allocation6 + $0x900] sm:$0xf]  ;;  %6822 = vmatpush.bf16.msra.mxu0 %v10868_v1 }
  0x75   :  { %v16217_v5 = vld [vmem:[#allocation6 + $0x93c] sm:$0xf0]  ;;  %6835 = vmatpush.bf16.msra.mxu1 %v11380_v6 }
  0x76   :  { %v15945_v7 = vld [vmem:[#allocation6 + $0xbc] sm:$0xf0]  ;;  %v11892_v12 = vor.u32 %v16217_v5, %v11891_v4 }
  0x77   :  { %v12403_v8 = vld [vmem:[#allocation6 + $0xd00] sm:$0xf]  ;;  %v10804_v14 = vor.u32 %v15945_v7, %v10803_v3 }
  0x78   :  { %v16345_v9 = vld [vmem:[#allocation6 + $0xd3c] sm:$0xf0]  ;;  %6848 = vmatpush.bf16.msra.mxu2 %v11892_v12 }
  0x79   :  { %v11315_v10 = vld [vmem:[#allocation6 + $0x480] sm:$0xf]  ;;  %v12404_v15 = vor.u32 %v16345_v9, %v12403_v8  ;;  %6823 = vmatpush.bf16.msra.mxu0 %v10804_v14 }
  0x7a   :  { %v16073_v11 = vld [vmem:[#allocation6 + $0x4bc] sm:$0xf0] }
  0x7b   :  { %v10739_v13 = vld [vmem:[#allocation6] sm:$0xf]  ;;  %v11316_v19 = vor.u32 %v16073_v11, %v11315_v10  ;;  %6861 = vmatpush.bf16.msra.mxu3 %v12404_v15 }
  0x7c   :  { %v15929_v16 = vld [vmem:[#allocation6 + $0x3c] sm:$0xf0] }
  0x7d   :  { %v11827_v17 = vld [vmem:[#allocation6 + $0x880] sm:$0xf]  ;;  %v10740_v29 = vor.u32 %v15929_v16, %v10739_v13  ;;  %6836 = vmatpush.bf16.msra.mxu1 %v11316_v19 }
  0x7e   :  { %v16201_v18 = vld [vmem:[#allocation6 + $0x8bc] sm:$0xf0] }
  0x7f   :  { %v11251_v20 = vld [vmem:[#allocation6 + $0x400] sm:$0xf]  ;;  %v11828_v28 = vor.u32 %v16201_v18, %v11827_v17  ;;  %6824 = vmatpush.bf16.msra.mxu0 %v10740_v29 }
  0x80   :  { %v12339_v21 = vld [vmem:[#allocation6 + $0xc80] sm:$0xf] }
  0x81   :  { %v16329_v22 = vld [vmem:[#allocation6 + $0xcbc] sm:$0xf0]  ;;  %6849 = vmatpush.bf16.msra.mxu2 %v11828_v28 }
  0x82   :  { %v16057_v23 = vld [vmem:[#allocation6 + $0x43c] sm:$0xf0]  ;;  %v12340_v30 = vor.u32 %v16329_v22, %v12339_v21 }
  0x83   :  { %v13235_v24 = vld [vmem:[#allocation6 + $0x1380] sm:$0xf]  ;;  %v11252_v35 = vor.u32 %v16057_v23, %v11251_v20 }
  0x84   :  { %v16553_v25 = vld [vmem:[#allocation6 + $0x13bc] sm:$0xf0]  ;;  %6862 = vmatpush.bf16.msra.mxu3 %v12340_v30 }
  0x85   :  { %v13747_v26 = vld [vmem:[#allocation6 + $0x1780] sm:$0xf]  ;;  %v13236_v36 = vor.u32 %v16553_v25, %v13235_v24  ;;  %6837 = vmatpush.bf16.msra.mxu1 %v11252_v35 }
  0x86   :  { %v16681_v27 = vld [vmem:[#allocation6 + $0x17bc] sm:$0xf0] }
  0x87   :  { %v13171_v31 = vld [vmem:[#allocation6 + $0x1300] sm:$0xf]  ;;  %v13748_v40 = vor.u32 %v16681_v27, %v13747_v26  ;;  %6869 = vmatpush.bf16.msrb.mxu0 %v13236_v36 }
  0x88   :  { %v11763_v32 = vld [vmem:[#allocation6 + $0x800] sm:$0xf] }
  0x89   :  { %v16185_v33 = vld [vmem:[#allocation6 + $0x83c] sm:$0xf0]  ;;  %6882 = vmatpush.bf16.msrb.mxu1 %v13748_v40 }
  0x8a   :  { %v12275_v34 = vld [vmem:[#allocation6 + $0xc00] sm:$0xf]  ;;  %v11764_v45 = vor.u32 %v16185_v33, %v11763_v32 }
  0x8b   :  { %v16313_v37 = vld [vmem:[#allocation6 + $0xc3c] sm:$0xf0] }
  0x8c   :  { %v14259_v38 = vld [vmem:[#allocation6 + $0x1b80] sm:$0xf]  ;;  %v12276_v46 = vor.u32 %v16313_v37, %v12275_v34  ;;  %6850 = vmatpush.bf16.msra.mxu2 %v11764_v45 }
  0x8d   :  { %v16809_v39 = vld [vmem:[#allocation6 + $0x1bbc] sm:$0xf0] }
  0x8e   :  { %v16537_v50 = vld [vmem:[#allocation6 + $0x133c] sm:$0xf0]  ;;  %v14260_v47 = vor.u32 %v16809_v39, %v14259_v38  ;;  %6863 = vmatpush.bf16.msra.mxu3 %v12276_v46 }
  0x8f   :  { %v14771_v41 = vld [vmem:[#allocation6 + $0x1f80] sm:$0xf]  ;;  %v13172_v48 = vor.u32 %v16537_v50, %v13171_v31 }
  0x90   :  { %v16937_v42 = vld [vmem:[#allocation6 + $0x1fbc] sm:$0xf0]  ;;  %6895 = vmatpush.bf16.msrb.mxu2 %v14260_v47 }
  0x91   :  { %v13683_v43 = vld [vmem:[#allocation6 + $0x1700] sm:$0xf]  ;;  %v14772_v49 = vor.u32 %v16937_v42, %v14771_v41  ;;  %6870 = vmatpush.bf16.msrb.mxu0 %v13172_v48 }
  0x92   :  { %v16665_v44 = vld [vmem:[#allocation6 + $0x173c] sm:$0xf0] }
  0x93   :  { %v13107_v51 = vld [vmem:[#allocation6 + $0x1280] sm:$0xf]  ;;  %v13684_v54 = vor.u32 %v16665_v44, %v13683_v43  ;;  %6908 = vmatpush.bf16.msrb.mxu3 %v14772_v49 }
  0x94   :  { %v14195_v52 = vld [vmem:[#allocation6 + $0x1b00] sm:$0xf] }
  0x95   :  { %v16793_v53 = vld [vmem:[#allocation6 + $0x1b3c] sm:$0xf0]  ;;  %6883 = vmatpush.bf16.msrb.mxu1 %v13684_v54 }
  0x96   :  { %v16521_v55 = vld [vmem:[#allocation6 + $0x12bc] sm:$0xf0]  ;;  %v14196_v60 = vor.u32 %v16793_v53, %v14195_v52 }
  0x97   :  { %v14707_v56 = vld [vmem:[#allocation6 + $0x1f00] sm:$0xf]  ;;  %v13108_v61 = vor.u32 %v16521_v55, %v13107_v51 }
  0x98   :  { %v16921_v57 = vld [vmem:[#allocation6 + $0x1f3c] sm:$0xf0]  ;;  %6896 = vmatpush.bf16.msrb.mxu2 %v14196_v60 }
  0x99   :  { %v13619_v58 = vld [vmem:[#allocation6 + $0x1680] sm:$0xf]  ;;  %v14708_v62 = vor.u32 %v16921_v57, %v14707_v56  ;;  %6871 = vmatpush.bf16.msrb.mxu0 %v13108_v61 }
  0x9a   :  { %v16649_v59 = vld [vmem:[#allocation6 + $0x16bc] sm:$0xf0] }
  0x9b   :  { %v13043_v63 = vld [vmem:[#allocation6 + $0x1200] sm:$0xf]  ;;  %v13620_v2 = vor.u32 %v16649_v59, %v13619_v58  ;;  %6909 = vmatpush.bf16.msrb.mxu3 %v14708_v62 }
  0x9c   :  { %v14131_v0 = vld [vmem:[#allocation6 + $0x1a80] sm:$0xf] }
  0x9d   :  { %v16777_v1 = vld [vmem:[#allocation6 + $0x1abc] sm:$0xf0]  ;;  %6884 = vmatpush.bf16.msrb.mxu1 %v13620_v2  ;;  %v17454_v2 = vld [vmem:[#allocation4] sm:$0xff] }
  0x9e   :  { %v16505_v3 = vld [vmem:[#allocation6 + $0x123c] sm:$0xf0]  ;;  %v14132_v8 = vor.u32 %v16777_v1, %v14131_v0 }
  0x9f   :  { %v14643_v4 = vld [vmem:[#allocation6 + $0x1e80] sm:$0xf]  ;;  %v13044_v9 = vor.u32 %v16505_v3, %v13043_v63  ;;  %v181_v3 = vperm.slane %v17454_v2, 0 }
  0xa0   :  { %v16905_v5 = vld [vmem:[#allocation6 + $0x1ebc] sm:$0xf0]  ;;  %6897 = vmatpush.bf16.msrb.mxu2 %v14132_v8  ;;  %v16033_v8 = vld [vmem:[#allocation6 + $0x384] sm:$0xf] }
  0xa1   :  { %v13555_v6 = vld [vmem:[#allocation6 + $0x1600] sm:$0xf]  ;;  %v14644_v10 = vor.u32 %v16905_v5, %v14643_v4  ;;  %6872 = vmatpush.bf16.msrb.mxu0 %v13044_v9  ;;  %v182_v4 = vperm.slane %v17454_v2, 1  ;;  %v11189_v9 = vld [vmem:[#allocation6 + $0x3c0] sm:$0xf0] }
  0xa2   :  { %v16633_v7 = vld [vmem:[#allocation6 + $0x163c] sm:$0xf0] }
  0xa3   :  { %v12979_v11 = vld [vmem:[#allocation6 + $0x1180] sm:$0xf]  ;;  %v13556_v14 = vor.u32 %v16633_v7, %v13555_v6  ;;  %6910 = vmatpush.bf16.msrb.mxu3 %v14644_v10 }
  0xa4   :  { %v14067_v12 = vld [vmem:[#allocation6 + $0x1a00] sm:$0xf] }
  0xa5   :  { %v16761_v13 = vld [vmem:[#allocation6 + $0x1a3c] sm:$0xf0]  ;;  %6885 = vmatpush.bf16.msrb.mxu1 %v13556_v14 }
  0xa6   :  { %v16489_v15 = vld [vmem:[#allocation6 + $0x11bc] sm:$0xf0]  ;;  %v14068_v20 = vor.u32 %v16761_v13, %v14067_v12  ;;  %v11701_v12 = vld [vmem:[#allocation6 + $0x7c0] sm:$0xf0] }
  0xa7   :  { %v14579_v16 = vld [vmem:[#allocation6 + $0x1e00] sm:$0xf]  ;;  %v12980_v21 = vor.u32 %v16489_v15, %v12979_v11  ;;  %v16161_v11 = vld [vmem:[#allocation6 + $0x784] sm:$0xf]  ;;  %v183_v15 = vperm.slane %v17454_v2, 2 }
  0xa8   :  { %v16889_v17 = vld [vmem:[#allocation6 + $0x1e3c] sm:$0xf0]  ;;  %6898 = vmatpush.bf16.msrb.mxu2 %v14068_v20  ;;  %v16017_v20 = vld [vmem:[#allocation6 + $0x304] sm:$0xf] }
  0xa9   :  { %v13491_v18 = vld [vmem:[#allocation6 + $0x1580] sm:$0xf]  ;;  %v14580_v22 = vor.u32 %v16889_v17, %v14579_v16  ;;  %6873 = vmatpush.bf16.msrb.mxu0 %v12980_v21  ;;  %v11192_v16 = vor.u32 %v16033_v8, %v11189_v9  ;;  %v11125_v21 = vld [vmem:[#allocation6 + $0x340] sm:$0xf0] }
  0xaa   :  { %v16617_v19 = vld [vmem:[#allocation6 + $0x15bc] sm:$0xf0] }
  0xab   :  { %v13492_v23 = vor.u32 %v16617_v19, %v13491_v18  ;;  %v12915_v24 = vld [vmem:[#allocation6 + $0x1100] sm:$0xf]  ;;  %6911 = vmatpush.bf16.msrb.mxu3 %v14580_v22  ;;  %v184_v18 = vperm.slane %v17454_v2, 3  ;;  %v11704_v19 = vor.u32 %v16161_v11, %v11701_v12  ;;  %v16241_v11 = vld [vmem:[#allocation6 + $0xa04] sm:$0xf] }
  0xac   :  { %v16473_v25 = vld [vmem:[#allocation6 + $0x113c] sm:$0xf0]  ;;  %v12021_v12 = vld [vmem:[#allocation6 + $0xa40] sm:$0xf0] }
  0xad   :  { %v13427_v26 = vld [vmem:[#allocation6 + $0x1500] sm:$0xf]  ;;  %v12916_v28 = vor.u32 %v16473_v25, %v12915_v24  ;;  %6886 = vmatpush.bf16.msrb.mxu1 %v13492_v23  ;;  %v16145_v23 = vld [vmem:[#allocation6 + $0x704] sm:$0xf] }
  0xae   :  { %v16601_v27 = vld [vmem:[#allocation6 + $0x153c] sm:$0xf0]  ;;  %v11637_v24 = vld [vmem:[#allocation6 + $0x740] sm:$0xf0] }
  0xaf   :  { %v13428_v29 = vor.u32 %v16601_v27, %v13427_v26  ;;  %6874 = vmatpush.bf16.msrb.mxu0 %v12916_v28  ;;  %v14003_v30 = vld [vmem:[#allocation6 + $0x1980] sm:$0xf] }
  0xb0   :  { %v16745_v31 = vld [vmem:[#allocation6 + $0x19bc] sm:$0xf0] }
  0xb1   :  { %6887 = vmatpush.bf16.msrb.mxu1 %v13428_v29  ;;  %v14515_v32 = vld [vmem:[#allocation6 + $0x1d80] sm:$0xf]  ;;  %v14004_v33 = vor.u32 %v16745_v31, %v14003_v30  ;;  %v11128_v29 = vor.u32 %v16017_v20, %v11125_v21  ;;  %v16289_v30 = vld [vmem:[#allocation6 + $0xb84] sm:$0xf]  ;;  %v12024_v21 = vor.u32 %v16241_v11, %v12021_v12 }
  0xb2   :  { %v16873_v34 = vld [vmem:[#allocation6 + $0x1dbc] sm:$0xf0]  ;;  %v12213_v31 = vld [vmem:[#allocation6 + $0xbc0] sm:$0xf0] }
  0xb3   :  { %v14516_v35 = vor.u32 %v16873_v34, %v14515_v32  ;;  %v12851_v36 = vld [vmem:[#allocation6 + $0x1080] sm:$0xf]  ;;  %6899 = vmatpush.bf16.msrb.mxu2 %v14004_v33  ;;  %v16417_v32 = vld [vmem:[#allocation6 + $0xf84] sm:$0xf]  ;;  %v11640_v34 = vor.u32 %v16145_v23, %v11637_v24 }
  0xb4   :  { %v16457_v37 = vld [vmem:[#allocation6 + $0x10bc] sm:$0xf0]  ;;  %v11381_v20 = vld [vmem:[#allocation6 + $0x540] sm:$0xf0] }
  0xb5   :  { %v12852_v38 = vor.u32 %v16457_v37, %v12851_v36  ;;  %v13363_v39 = vld [vmem:[#allocation6 + $0x1480] sm:$0xf]  ;;  %6912 = vmatpush.bf16.msrb.mxu3 %v14516_v35  ;;  %v12725_v36 = vld [vmem:[#allocation6 + $0xfc0] sm:$0xf0] }
  0xb6   :  { %v16585_v40 = vld [vmem:[#allocation6 + $0x14bc] sm:$0xf0]  ;;  %v16001_v37 = vld [vmem:[#allocation6 + $0x284] sm:$0xf] }
  0xb7   :  { %v13364_v50 = vor.u32 %v16585_v40, %v13363_v39  ;;  %v13939_v41 = vld [vmem:[#allocation6 + $0x1900] sm:$0xf]  ;;  %6875 = vmatpush.bf16.msrb.mxu0 %v12852_v38  ;;  %v11061_v38 = vld [vmem:[#allocation6 + $0x2c0] sm:$0xf0] }
  0xb8   :  { %v16729_v42 = vld [vmem:[#allocation6 + $0x193c] sm:$0xf0]  ;;  %v16129_v40 = vld [vmem:[#allocation6 + $0x684] sm:$0xf] }
  0xb9   :  { %v14451_v43 = vld [vmem:[#allocation6 + $0x1d00] sm:$0xf]  ;;  %v13940_v44 = vor.u32 %v16729_v42, %v13939_v41  ;;  %6888 = vmatpush.bf16.msrb.mxu1 %v13364_v50  ;;  %v11573_v50 = vld [vmem:[#allocation6 + $0x6c0] sm:$0xf0]  ;;  %v12216_v42 = vor.u32 %v16289_v30, %v12213_v31 }
  0xba   :  { %v16857_v45 = vld [vmem:[#allocation6 + $0x1d3c] sm:$0xf0]  ;;  %v15937_v30 = vld [vmem:[#allocation6 + $0x84] sm:$0xf] }
  0xbb   :  { %v14452_v46 = vor.u32 %v16857_v45, %v14451_v43  ;;  %v12787_v47 = vld [vmem:[#allocation6 + $0x1000] sm:$0xf]  ;;  %6900 = vmatpush.bf16.msrb.mxu2 %v13940_v44  ;;  %v12728_v44 = vor.u32 %v16417_v32, %v12725_v36  ;;  %v11064_v45 = vor.u32 %v16001_v37, %v11061_v38  ;;  %v10805_v31 = vld [vmem:[#allocation6 + $0xc0] sm:$0xf0]  ;;  %v185_v32 = vperm.slane %v17454_v2, 4 }
  0xbc   :  { %v16441_v48 = vld [vmem:[#allocation6 + $0x103c] sm:$0xf0]  ;;  %v526_v5 = vpop.f32.mrf.mxu0  ;;  %v539_v7 = vpop.f32.mrf.mxu1  ;;  %v10808_v38 = vor.u32 %v15937_v30, %v10805_v31  ;;  %v16529_v12 = vld [vmem:[#allocation6 + $0x1304] sm:$0xf] }
  0xbd   :  { %v13299_v49 = vld [vmem:[#allocation6 + $0x1400] sm:$0xf]  ;;  %v12788_v51 = vor.u32 %v16441_v48, %v12787_v47  ;;  %6913 = vmatpush.bf16.msrb.mxu3 %v14452_v46  ;;  %v527_v6 = vadd.f32 %v526_v5, %v181_v3  ;;  %v540_v10 = vadd.f32 %v539_v7, %v182_v4  ;;  %v16273_v46 = vld [vmem:[#allocation6 + $0xb04] sm:$0xf] }
  0xbe   :  { %v16569_v52 = vld [vmem:[#allocation6 + $0x143c] sm:$0xf0]  ;;  %v12149_v47 = vld [vmem:[#allocation6 + $0xb40] sm:$0xf0] }
  0xbf   :  { %v13300_v53 = vor.u32 %v16569_v52, %v13299_v49  ;;  %6876 = vmatpush.bf16.msrb.mxu0 %v12788_v51  ;;  %v13875_v54 = vld [vmem:[#allocation6 + $0x1880] sm:$0xf]  ;;  %v621_v13 = vmax.f32 %v527_v6, 0.0  ;;  %v622_v14 = vmax.f32 %v540_v10, 0.0  ;;  %v16401_v48 = vld [vmem:[#allocation6 + $0xf04] sm:$0xf]  ;;  %v11576_v51 = vor.u32 %v16129_v40, %v11573_v50 }
  0xc0   :  { %v16713_v55 = vld [vmem:[#allocation6 + $0x18bc] sm:$0xf0]  ;;  %v12661_v52 = vld [vmem:[#allocation6 + $0xf40] sm:$0xf0] }
  0xc1   :  { %6889 = vmatpush.bf16.msrb.mxu1 %v13300_v53  ;;  %v13876_v56 = vor.u32 %v16713_v55, %v13875_v54  ;;  %v14387_v57 = vld [vmem:[#allocation6 + $0x1c80] sm:$0xf]  ;;  %v17459_v17 = vpack.c.bf16 %v621_v13, %v621_v13  ;;  %v17462_v22 = vpack.c.bf16 %v622_v14, %v622_v14  ;;  %v15985_v53 = vld [vmem:[#allocation6 + $0x204] sm:$0xf] }
  0xc2   :  { %v16841_v58 = vld [vmem:[#allocation6 + $0x1cbc] sm:$0xf0]  ;;  %v10997_v54 = vld [vmem:[#allocation6 + $0x240] sm:$0xf0] }
  0xc3   :  { %v14388_v59 = vor.u32 %v16841_v58, %v14387_v57  ;;  %6901 = vmatpush.bf16.msrb.mxu2 %v13876_v56  ;;  %v13811_v60 = vld [vmem:[#allocation6 + $0x1800] sm:$0xf]  ;;  %6825 = vmatmul.bf16.vlgmr.msra.gmra.mxu0 %v17459_v17  ;;  %v16113_v55 = vld [vmem:[#allocation6 + $0x604] sm:$0xf]  ;;  %v12152_v58 = vor.u32 %v16273_v46, %v12149_v47 }
  0xc4   :  { %v16697_v61 = vld [vmem:[#allocation6 + $0x183c] sm:$0xf0]  ;;  %v565_v27 = vpop.f32.mrf.mxu3  ;;  %6838 = vmatmul.bf16.vlgmr.msra.gmra.mxu1 %v17462_v22  ;;  %6921 = vmatpush.bf16.msra.mxu0 %v11192_v16  ;;  %v528_v28 = vpop.f32.mrf.mxu0  ;;  %v11509_v56 = vld [vmem:[#allocation6 + $0x640] sm:$0xf0] }
  0xc5   :  { %6914 = vmatpush.bf16.msrb.mxu3 %v14388_v59  ;;  %v13812_v62 = vor.u32 %v16697_v61, %v13811_v60  ;;  %v14323_v63 = vld [vmem:[#allocation6 + $0x1c00] sm:$0xf]  ;;  %v552_v25 = vpop.f32.mrf.mxu2  ;;  %v566_v33 = vadd.f32 %v565_v27, %v184_v18  ;;  %6934 = vmatpush.bf16.msra.mxu1 %v11704_v19  ;;  %v541_v35 = vpop.f32.mrf.mxu1  ;;  %v12664_v60 = vor.u32 %v16401_v48, %v12661_v52  ;;  %v12597_v3 = vld [vmem:[#allocation6 + $0xec0] sm:$0xf0] }
  0xc6   :  { %v16825_v0 = vld [vmem:[#allocation6 + $0x1c3c] sm:$0xf0]  ;;  %v553_v26 = vadd.f32 %v552_v25, %v183_v15  ;;  %v11000_v61 = vor.u32 %v15985_v53, %v10997_v54  ;;  %v15969_v4 = vld [vmem:[#allocation6 + $0x184] sm:$0xf]  ;;  %v186_v35 = vperm.slane %v17454_v2, 5 }
  0xc7   :  { %v14324_v1 = vor.u32 %v16825_v0, %v14323_v63  ;;  %6902 = vmatpush.bf16.msrb.mxu2 %v13812_v62  ;;  %v624_v41 = vmax.f32 %v566_v33, 0.0  ;;  %v16257_v62 = vld [vmem:[#allocation6 + $0xa84] sm:$0xf] }
  0xc8   :  { %v623_v39 = vmax.f32 %v553_v26, 0.0  ;;  %6922 = vmatpush.bf16.msra.mxu0 %v11128_v29  ;;  %v12085_v63 = vld [vmem:[#allocation6 + $0xac0] sm:$0xf0] }
  0xc9   :  { %6915 = vmatpush.bf16.msrb.mxu3 %v14324_v1  ;;  %v17468_v49 = vpack.c.bf16 %v624_v41, %v624_v41  ;;  %6935 = vmatpush.bf16.msra.mxu1 %v11640_v34  ;;  %v16385_v0 = vld [vmem:[#allocation6 + $0xe84] sm:$0xf]  ;;  %v11512_v1 = vor.u32 %v16113_v55, %v11509_v56  ;;  %v12088_v8 = vor.u32 %v16257_v62, %v12085_v63 }
  0xca   :  { %v17466_v43 = vpack.c.bf16 %v623_v39, %v623_v39  ;;  %v10933_v5 = vld [vmem:[#allocation6 + $0x1c0] sm:$0xf0]  ;;  %v12600_v9 = vor.u32 %v16385_v0, %v12597_v3 }
  0xcb   :  { %6864 = vmatmul.bf16.vlgmr.msra.gmra.mxu3 %v17468_v49  ;;  %v16097_v6 = vld [vmem:[#allocation6 + $0x584] sm:$0xf]  ;;  %v10936_v10 = vor.u32 %v15969_v4, %v10933_v5 }
  0xcc   :  { %6851 = vmatmul.bf16.vlgmr.msra.gmra.mxu2 %v17466_v43  ;;  %v567_v59 = vpop.f32.mrf.mxu3  ;;  %6923 = vmatpush.bf16.msra.mxu0 %v11064_v45  ;;  %v11445_v7 = vld [vmem:[#allocation6 + $0x5c0] sm:$0xf0] }
  0xcd   :  { %6947 = vmatpush.bf16.msra.mxu2 %v12216_v42  ;;  %v554_v57 = vpop.f32.mrf.mxu2  ;;  %6960 = vmatpush.bf16.msra.mxu3 %v12728_v44  ;;  %v16369_v13 = vld [vmem:[#allocation6 + $0xe04] sm:$0xf]  ;;  %v11448_v14 = vor.u32 %v16097_v6, %v11445_v7  ;;  %v188_v7 = vperm.slane %v17454_v2, 7 }
  0xce   :  { %6936 = vmatpush.bf16.msra.mxu1 %v11576_v51  ;;  %v12533_v15 = vld [vmem:[#allocation6 + $0xe40] sm:$0xf0] }
  0xcf   :  { %v15953_v16 = vld [vmem:[#allocation6 + $0x104] sm:$0xf]  ;;  %v12536_v23 = vor.u32 %v16369_v13, %v12533_v15 }
  0xd0   :  { %6924 = vmatpush.bf16.msra.mxu0 %v11000_v61  ;;  %v10869_v18 = vld [vmem:[#allocation6 + $0x140] sm:$0xf0] }
  0xd1   :  { %6948 = vmatpush.bf16.msra.mxu2 %v12152_v58  ;;  %6961 = vmatpush.bf16.msra.mxu3 %v12664_v60  ;;  %v16081_v19 = vld [vmem:[#allocation6 + $0x504] sm:$0xf]  ;;  %v10872_v24 = vor.u32 %v15953_v16, %v10869_v18 }
  0xd2   :  { %6937 = vmatpush.bf16.msra.mxu1 %v11512_v1  ;;  %v16225_v25 = vld [vmem:[#allocation6 + $0x984] sm:$0xf]  ;;  %v11384_v28 = vor.u32 %v16081_v19, %v11381_v20  ;;  %v187_v1 = vperm.slane %v17454_v2, 6 }
  0xd3   :  { %v11957_v26 = vld [vmem:[#allocation6 + $0x9c0] sm:$0xf0] }
  0xd4   :  { %6925 = vmatpush.bf16.msra.mxu0 %v10936_v10  ;;  %v16353_v27 = vld [vmem:[#allocation6 + $0xd84] sm:$0xf]  ;;  %v11960_v36 = vor.u32 %v16225_v25, %v11957_v26 }
  0xd5   :  { %6949 = vmatpush.bf16.msra.mxu2 %v12088_v8  ;;  %6962 = vmatpush.bf16.msra.mxu3 %v12600_v9  ;;  %v12469_v29 = vld [vmem:[#allocation6 + $0xdc0] sm:$0xf0] }
  0xd6   :  { %6938 = vmatpush.bf16.msra.mxu1 %v11448_v14  ;;  %v16065_v33 = vld [vmem:[#allocation6 + $0x484] sm:$0xf]  ;;  %v12472_v37 = vor.u32 %v16353_v27, %v12469_v29 }
  0xd7   :  { %v11317_v34 = vld [vmem:[#allocation6 + $0x4c0] sm:$0xf0] }
  0xd8   :  { %6926 = vmatpush.bf16.msra.mxu0 %v10872_v24  ;;  %v16209_v39 = vld [vmem:[#allocation6 + $0x904] sm:$0xf]  ;;  %v11320_v42 = vor.u32 %v16065_v33, %v11317_v34 }
  0xd9   :  { %6950 = vmatpush.bf16.msra.mxu2 %v12024_v21  ;;  %6963 = vmatpush.bf16.msra.mxu3 %v12536_v23  ;;  %v11893_v40 = vld [vmem:[#allocation6 + $0x940] sm:$0xf0] }
  0xda   :  { %v16337_v50 = vld [vmem:[#allocation6 + $0xd04] sm:$0xf]  ;;  %6939 = vmatpush.bf16.msra.mxu1 %v11384_v28  ;;  %v11896_v55 = vor.u32 %v16209_v39, %v11893_v40 }
  0xdb   :  { %v12405_v44 = vld [vmem:[#allocation6 + $0xd40] sm:$0xf0] }
  0xdc   :  { %v578_v41 = vpop.f32.mrf.mxu0  ;;  %v15921_v45 = vld [vmem:[#allocation6 + $0x4] sm:$0xf]  ;;  %v591_v48 = vpop.f32.mrf.mxu1  ;;  %6927 = vmatpush.bf16.msra.mxu0 %v10808_v38  ;;  %v12408_v60 = vor.u32 %v16337_v50, %v12405_v44 }
  0xdd   :  { %v10741_v46 = vld [vmem:[#allocation6 + $0x40] sm:$0xf0]  ;;  %v579_v47 = vadd.f32 %v578_v41, %v185_v32  ;;  %v592_v54 = vadd.f32 %v591_v48, %v186_v35  ;;  %6951 = vmatpush.bf16.msra.mxu2 %v11960_v36  ;;  %6964 = vmatpush.bf16.msra.mxu3 %v12472_v37 }
  0xde   :  { %v16049_v51 = vld [vmem:[#allocation6 + $0x404] sm:$0xf]  ;;  %v10744_v61 = vor.u32 %v15921_v45, %v10741_v46  ;;  %6940 = vmatpush.bf16.msra.mxu1 %v11320_v42 }
  0xdf   :  { %v11253_v52 = vld [vmem:[#allocation6 + $0x440] sm:$0xf0]  ;;  %v625_v59 = vmax.f32 %v579_v47, 0.0  ;;  %v626_v0 = vmax.f32 %v592_v54, 0.0 }
  0xe0   :  { %v16545_v53 = vld [vmem:[#allocation6 + $0x1384] sm:$0xf]  ;;  %v11256_v3 = vor.u32 %v16049_v51, %v11253_v52  ;;  %6928 = vmatpush.bf16.msra.mxu0 %v10744_v61 }
  0xe1   :  { %v13237_v56 = vld [vmem:[#allocation6 + $0x13c0] sm:$0xf0]  ;;  %v17475_v6 = vpack.c.bf16 %v625_v59, %v625_v59  ;;  %v17478_v9 = vpack.c.bf16 %v626_v0, %v626_v0  ;;  %6952 = vmatpush.bf16.msra.mxu2 %v11896_v55  ;;  %6965 = vmatpush.bf16.msra.mxu3 %v12408_v60 }
  0xe2   :  { %v16673_v57 = vld [vmem:[#allocation6 + $0x1784] sm:$0xf]  ;;  %v13240_v8 = vor.u32 %v16545_v53, %v13237_v56  ;;  %6941 = vmatpush.bf16.msra.mxu1 %v11256_v3 }
  0xe3   :  { %v13749_v58 = vld [vmem:[#allocation6 + $0x17c0] sm:$0xf0]  ;;  %6877 = vmatmul.bf16.vlgmr.msrb.gmra.mxu0 %v17475_v6  ;;  %6890 = vmatmul.bf16.vlgmr.msrb.gmra.mxu1 %v17478_v9 }
  0xe4   :  { %v16193_v62 = vld [vmem:[#allocation6 + $0x884] sm:$0xf]  ;;  %v13752_v10 = vor.u32 %v16673_v57, %v13749_v58  ;;  %v604_v15 = vpop.f32.mrf.mxu2  ;;  %v617_v23 = vpop.f32.mrf.mxu3  ;;  %6973 = vmatpush.bf16.msrb.mxu0 %v13240_v8 }
  0xe5   :  { %v11829_v63 = vld [vmem:[#allocation6 + $0x8c0] sm:$0xf0]  ;;  %v605_v21 = vadd.f32 %v604_v15, %v187_v1  ;;  %v580_v2 = vpop.f32.mrf.mxu0  ;;  %v618_v27 = vadd.f32 %v617_v23, %v188_v7  ;;  %v593_v29 = vpop.f32.mrf.mxu1 }
  0xe6   :  { %v16321_v4 = vld [vmem:[#allocation6 + $0xc84] sm:$0xf]  ;;  %v11832_v11 = vor.u32 %v16193_v62, %v11829_v63  ;;  %6986 = vmatpush.bf16.msrb.mxu1 %v13752_v10 }
  0xe7   :  { %v12341_v5 = vld [vmem:[#allocation6 + $0xcc0] sm:$0xf0]  ;;  %v627_v33 = vmax.f32 %v605_v21, 0.0  ;;  %v628_v38 = vmax.f32 %v618_v27, 0.0 }
  0xe8   :  { %v13173_v13 = vld [vmem:[#allocation6 + $0x1340] sm:$0xf0]  ;;  %v12344_v16 = vor.u32 %v16321_v4, %v12341_v5  ;;  %6953 = vmatpush.bf16.msra.mxu2 %v11832_v11 }
  0xe9   :  { %v16657_v14 = vld [vmem:[#allocation6 + $0x1704] sm:$0xf]  ;;  %v13176_v28 = vor.u32 %v16529_v12, %v13173_v13  ;;  %v17482_v41 = vpack.c.bf16 %v627_v33, %v627_v33  ;;  %v17484_v44 = vpack.c.bf16 %v628_v38, %v628_v38 }
  0xea   :  { %v13685_v18 = vld [vmem:[#allocation6 + $0x1740] sm:$0xf0]  ;;  %6966 = vmatpush.bf16.msra.mxu3 %v12344_v16 }
  0xeb   :  { %v16177_v19 = vld [vmem:[#allocation6 + $0x804] sm:$0xf]  ;;  %v13688_v34 = vor.u32 %v16657_v14, %v13685_v18  ;;  %6974 = vmatpush.bf16.msrb.mxu0 %v13176_v28  ;;  %6903 = vmatmul.bf16.vlgmr.msrb.gmra.mxu2 %v17482_v41 }
  0xec   :  { %v11765_v20 = vld [vmem:[#allocation6 + $0x840] sm:$0xf0]  ;;  %v606_v56 = vpop.f32.mrf.mxu2  ;;  %6916 = vmatmul.bf16.vlgmr.msrb.gmra.mxu3 %v17484_v44  ;;  %v619_v59 = vpop.f32.mrf.mxu3 }
  0xed   :  { %v16305_v24 = vld [vmem:[#allocation6 + $0xc04] sm:$0xf]  ;;  %v11768_v35 = vor.u32 %v16177_v19, %v11765_v20  ;;  %6987 = vmatpush.bf16.msrb.mxu1 %v13688_v34  ;;  %v16170_v56 = vld [vmem:[#allocation6 + $0x7c4] sm:$0xf0] }
  0xee   :  { %v12277_v25 = vld [vmem:[#allocation6 + $0xc40] sm:$0xf0] }
  0xef   :  { %v16801_v26 = vld [vmem:[#allocation6 + $0x1b84] sm:$0xf]  ;;  %v12280_v39 = vor.u32 %v16305_v24, %v12277_v25  ;;  %6954 = vmatpush.bf16.msra.mxu2 %v11768_v35 }
  0xf0   :  { %v14261_v30 = vld [vmem:[#allocation6 + $0x1bc0] sm:$0xf0] }
  0xf1   :  { %v16929_v31 = vld [vmem:[#allocation6 + $0x1f84] sm:$0xf]  ;;  %v14264_v42 = vor.u32 %v16801_v26, %v14261_v30  ;;  %6967 = vmatpush.bf16.msra.mxu3 %v12280_v39 }
  0xf2   :  { %v14773_v32 = vld [vmem:[#allocation6 + $0x1fc0] sm:$0xf0] }
  0xf3   :  { %v16513_v36 = vld [vmem:[#allocation6 + $0x1284] sm:$0xf]  ;;  %v14776_v45 = vor.u32 %v16929_v31, %v14773_v32  ;;  %6999 = vmatpush.bf16.msrb.mxu2 %v14264_v42  ;;  %6929 = vmatmul.bf16.vlgmr.msra.gmra.mxu0 %v17459_v17 }
  0xf4   :  { %v13109_v37 = vld [vmem:[#allocation6 + $0x12c0] sm:$0xf0]  ;;  %6942 = vmatmul.bf16.vlgmr.msra.gmra.mxu1 %v17462_v22 }
  0xf5   :  { %v16641_v40 = vld [vmem:[#allocation6 + $0x1684] sm:$0xf]  ;;  %v13112_v46 = vor.u32 %v16513_v36, %v13109_v37  ;;  %7012 = vmatpush.bf16.msrb.mxu3 %v14776_v45 }
  0xf6   :  { %v13621_v50 = vld [vmem:[#allocation6 + $0x16c0] sm:$0xf0] }
  0xf7   :  { %v16785_v47 = vld [vmem:[#allocation6 + $0x1b04] sm:$0xf]  ;;  %v13624_v52 = vor.u32 %v16641_v40, %v13621_v50  ;;  %6975 = vmatpush.bf16.msrb.mxu0 %v13112_v46 }
  0xf8   :  { %v14197_v48 = vld [vmem:[#allocation6 + $0x1b40] sm:$0xf0] }
  0xf9   :  { %v16913_v51 = vld [vmem:[#allocation6 + $0x1f04] sm:$0xf]  ;;  %v14200_v60 = vor.u32 %v16785_v47, %v14197_v48  ;;  %6988 = vmatpush.bf16.msrb.mxu1 %v13624_v52  ;;  %v11195_v52 = vld [vmem:[#allocation6 + $0x388] sm:$0xf] }
  0xfa   :  { %v14709_v53 = vld [vmem:[#allocation6 + $0x1f40] sm:$0xf0] }
  0xfb   :  { %v16497_v54 = vld [vmem:[#allocation6 + $0x1204] sm:$0xf]  ;;  %v14712_v61 = vor.u32 %v16913_v51, %v14709_v53  ;;  %7000 = vmatpush.bf16.msrb.mxu2 %v14200_v60 }
  0xfc   :  { %v13045_v55 = vld [vmem:[#allocation6 + $0x1240] sm:$0xf0]  ;;  %6955 = vmatmul.bf16.vlgmr.msra.gmra.mxu2 %v17466_v43  ;;  %6968 = vmatmul.bf16.vlgmr.msra.gmra.mxu3 %v17468_v49 }
  0xfd   :  { %v16625_v57 = vld [vmem:[#allocation6 + $0x1604] sm:$0xf]  ;;  %v13048_v62 = vor.u32 %v16497_v54, %v13045_v55  ;;  %7013 = vmatpush.bf16.msrb.mxu3 %v14712_v61  ;;  %v16042_v54 = vld [vmem:[#allocation6 + $0x3c4] sm:$0xf0] }
  0xfe   :  { %v13557_v58 = vld [vmem:[#allocation6 + $0x1640] sm:$0xf0]  ;;  %v11707_v55 = vld [vmem:[#allocation6 + $0x788] sm:$0xf] }
  0xff   :  { %v16769_v63 = vld [vmem:[#allocation6 + $0x1a84] sm:$0xf]  ;;  %v13560_v1 = vor.u32 %v16625_v57, %v13557_v58  ;;  %6976 = vmatpush.bf16.msrb.mxu0 %v13048_v62 }
 0x100   :  { %v14133_v0 = vld [vmem:[#allocation6 + $0x1ac0] sm:$0xf0] }
 0x101   :  { %v16897_v3 = vld [vmem:[#allocation6 + $0x1e84] sm:$0xf]  ;;  %v14136_v11 = vor.u32 %v16769_v63, %v14133_v0  ;;  %6989 = vmatpush.bf16.msrb.mxu1 %v13560_v1  ;;  %v11196_v0 = vor.u32 %v16042_v54, %v11195_v52  ;;  %v11708_v1 = vor.u32 %v16170_v56, %v11707_v55  ;;  %v10939_v52 = vld [vmem:[#allocation6 + $0x188] sm:$0xf] }
 0x102   :  { %v14645_v4 = vld [vmem:[#allocation6 + $0x1ec0] sm:$0xf0]  ;;  %v11451_v54 = vld [vmem:[#allocation6 + $0x588] sm:$0xf] }
 0x103   :  { %v16481_v5 = vld [vmem:[#allocation6 + $0x1184] sm:$0xf]  ;;  %v14648_v12 = vor.u32 %v16897_v3, %v14645_v4  ;;  %7001 = vmatpush.bf16.msrb.mxu2 %v14136_v11  ;;  %v11131_v3 = vld [vmem:[#allocation6 + $0x308] sm:$0xf] }
 0x104   :  { %v12981_v7 = vld [vmem:[#allocation6 + $0x11c0] sm:$0xf0]  ;;  %v16106_v55 = vld [vmem:[#allocation6 + $0x5c4] sm:$0xf0] }
 0x105   :  { %v16609_v8 = vld [vmem:[#allocation6 + $0x1584] sm:$0xf]  ;;  %v12984_v15 = vor.u32 %v16481_v5, %v12981_v7  ;;  %7014 = vmatpush.bf16.msrb.mxu3 %v14648_v12  ;;  %v16026_v5 = vld [vmem:[#allocation6 + $0x344] sm:$0xf0] }
 0x106   :  { %v13493_v10 = vld [vmem:[#allocation6 + $0x15c0] sm:$0xf0]  ;;  %v11643_v7 = vld [vmem:[#allocation6 + $0x708] sm:$0xf] }
 0x107   :  { %v16753_v13 = vld [vmem:[#allocation6 + $0x1a04] sm:$0xf]  ;;  %v13496_v16 = vor.u32 %v16609_v8, %v13493_v10  ;;  %6977 = vmatpush.bf16.msrb.mxu0 %v12984_v15  ;;  %v16154_v8 = vld [vmem:[#allocation6 + $0x744] sm:$0xf0] }
 0x108   :  { %v14069_v14 = vld [vmem:[#allocation6 + $0x1a40] sm:$0xf0]  ;;  %v12219_v15 = vld [vmem:[#allocation6 + $0xb88] sm:$0xf] }
 0x109   :  { %v16881_v18 = vld [vmem:[#allocation6 + $0x1e04] sm:$0xf]  ;;  %v14072_v24 = vor.u32 %v16753_v13, %v14069_v14  ;;  %6990 = vmatpush.bf16.msrb.mxu1 %v13496_v16  ;;  %v16298_v16 = vld [vmem:[#allocation6 + $0xbc4] sm:$0xf0] }
 0x10a   :  { %v14581_v19 = vld [vmem:[#allocation6 + $0x1e40] sm:$0xf0] }
 0x10b   :  { %v16465_v20 = vld [vmem:[#allocation6 + $0x1104] sm:$0xf]  ;;  %v14584_v25 = vor.u32 %v16881_v18, %v14581_v19  ;;  %7002 = vmatpush.bf16.msrb.mxu2 %v14072_v24  ;;  %v11132_v18 = vor.u32 %v16026_v5, %v11131_v3  ;;  %v11644_v19 = vor.u32 %v16154_v8, %v11643_v7  ;;  %v16010_v24 = vld [vmem:[#allocation6 + $0x2c4] sm:$0xf0] }
 0x10c   :  { %v12917_v21 = vld [vmem:[#allocation6 + $0x1140] sm:$0xf0]  ;;  %v11387_v3 = vld [vmem:[#allocation6 + $0x508] sm:$0xf] }
 0x10d   :  { %v16593_v23 = vld [vmem:[#allocation6 + $0x1504] sm:$0xf]  ;;  %v12920_v28 = vor.u32 %v16465_v20, %v12917_v21  ;;  %7015 = vmatpush.bf16.msrb.mxu3 %v14584_v25  ;;  %v12731_v20 = vld [vmem:[#allocation6 + $0xf88] sm:$0xf] }
 0x10e   :  { %v13429_v2 = vld [vmem:[#allocation6 + $0x1540] sm:$0xf0]  ;;  %v16426_v21 = vld [vmem:[#allocation6 + $0xfc4] sm:$0xf0] }
 0x10f   :  { %v16737_v26 = vld [vmem:[#allocation6 + $0x1984] sm:$0xf]  ;;  %v13432_v29 = vor.u32 %v16593_v23, %v13429_v2  ;;  %6978 = vmatpush.bf16.msrb.mxu0 %v12920_v28  ;;  %v11067_v23 = vld [vmem:[#allocation6 + $0x288] sm:$0xf]  ;;  %v12220_v28 = vor.u32 %v16298_v16, %v12219_v15 }
 0x110   :  { %v14005_v27 = vld [vmem:[#allocation6 + $0x19c0] sm:$0xf0]  ;;  %v11579_v25 = vld [vmem:[#allocation6 + $0x688] sm:$0xf] }
 0x111   :  { %v16865_v30 = vld [vmem:[#allocation6 + $0x1d84] sm:$0xf]  ;;  %v14008_v36 = vor.u32 %v16737_v26, %v14005_v27  ;;  %6991 = vmatpush.bf16.msrb.mxu1 %v13432_v29  ;;  %v16138_v26 = vld [vmem:[#allocation6 + $0x6c4] sm:$0xf0]  ;;  %v12732_v29 = vor.u32 %v16426_v21, %v12731_v20 }
 0x112   :  { %v14517_v31 = vld [vmem:[#allocation6 + $0x1dc0] sm:$0xf0]  ;;  %v11963_v8 = vld [vmem:[#allocation6 + $0x988] sm:$0xf] }
 0x113   :  { %v16449_v32 = vld [vmem:[#allocation6 + $0x1084] sm:$0xf]  ;;  %v14520_v37 = vor.u32 %v16865_v30, %v14517_v31  ;;  %7003 = vmatpush.bf16.msrb.mxu2 %v14008_v36  ;;  %v12155_v30 = vld [vmem:[#allocation6 + $0xb08] sm:$0xf] }
 0x114   :  { %v12853_v33 = vld [vmem:[#allocation6 + $0x10c0] sm:$0xf0]  ;;  %v16282_v31 = vld [vmem:[#allocation6 + $0xb44] sm:$0xf0] }
 0x115   :  { %v16577_v34 = vld [vmem:[#allocation6 + $0x1484] sm:$0xf]  ;;  %v12856_v50 = vor.u32 %v16449_v32, %v12853_v33  ;;  %7016 = vmatpush.bf16.msrb.mxu3 %v14520_v37  ;;  %v11068_v32 = vor.u32 %v16010_v24, %v11067_v23  ;;  %v11580_v33 = vor.u32 %v16138_v26, %v11579_v25  ;;  %v11003_v36 = vld [vmem:[#allocation6 + $0x208] sm:$0xf] }
 0x116   :  { %v13365_v35 = vld [vmem:[#allocation6 + $0x14c0] sm:$0xf0]  ;;  %v15994_v37 = vld [vmem:[#allocation6 + $0x244] sm:$0xf0] }
 0x117   :  { %v16721_v38 = vld [vmem:[#allocation6 + $0x1904] sm:$0xf]  ;;  %v13368_v42 = vor.u32 %v16577_v34, %v13365_v35  ;;  %6979 = vmatpush.bf16.msrb.mxu0 %v12856_v50  ;;  %v12667_v34 = vld [vmem:[#allocation6 + $0xf08] sm:$0xf] }
 0x118   :  { %v13941_v39 = vld [vmem:[#allocation6 + $0x1940] sm:$0xf0]  ;;  %v16410_v35 = vld [vmem:[#allocation6 + $0xf44] sm:$0xf0] }
 0x119   :  { %v16849_v40 = vld [vmem:[#allocation6 + $0x1d04] sm:$0xf]  ;;  %v13944_v53 = vor.u32 %v16721_v38, %v13941_v39  ;;  %6992 = vmatpush.bf16.msrb.mxu1 %v13368_v42  ;;  %v11515_v38 = vld [vmem:[#allocation6 + $0x608] sm:$0xf]  ;;  %v12668_v50 = vor.u32 %v16410_v35, %v12667_v34 }
 0x11a   :  { %v14453_v45 = vld [vmem:[#allocation6 + $0x1d40] sm:$0xf0]  ;;  %v16122_v39 = vld [vmem:[#allocation6 + $0x644] sm:$0xf0] }
 0x11b   :  { %v16433_v46 = vld [vmem:[#allocation6 + $0x1004] sm:$0xf]  ;;  %v14456_v57 = vor.u32 %v16849_v40, %v14453_v45  ;;  %7004 = vmatpush.bf16.msrb.mxu2 %v13944_v53  ;;  %v12156_v40 = vor.u32 %v16282_v31, %v12155_v30  ;;  %v12091_v42 = vld [vmem:[#allocation6 + $0xa88] sm:$0xf] }
 0x11c   :  { %v12789_v47 = vld [vmem:[#allocation6 + $0x1040] sm:$0xf0]  ;;  %v16266_v45 = vld [vmem:[#allocation6 + $0xac4] sm:$0xf0] }
 0x11d   :  { %v16561_v48 = vld [vmem:[#allocation6 + $0x1404] sm:$0xf]  ;;  %v12792_v60 = vor.u32 %v16433_v46, %v12789_v47  ;;  %7017 = vmatpush.bf16.msrb.mxu3 %v14456_v57  ;;  %v11004_v46 = vor.u32 %v15994_v37, %v11003_v36  ;;  %v11516_v47 = vor.u32 %v16122_v39, %v11515_v38  ;;  %v15978_v53 = vld [vmem:[#allocation6 + $0x1c4] sm:$0xf0]  ;;  %v12092_v56 = vor.u32 %v16266_v45, %v12091_v42 }
 0x11e   :  { %v13301_v51 = vld [vmem:[#allocation6 + $0x1440] sm:$0xf0]  ;;  %v10811_v15 = vld [vmem:[#allocation6 + $0x88] sm:$0xf] }
 0x11f   :  { %v16705_v58 = vld [vmem:[#allocation6 + $0x1884] sm:$0xf]  ;;  %v13304_v61 = vor.u32 %v16561_v48, %v13301_v51  ;;  %6980 = vmatpush.bf16.msrb.mxu0 %v12792_v60  ;;  %v12603_v48 = vld [vmem:[#allocation6 + $0xe88] sm:$0xf]  ;;  %v10940_v60 = vor.u32 %v15978_v53, %v10939_v52 }
 0x120   :  { %v13877_v59 = vld [vmem:[#allocation6 + $0x18c0] sm:$0xf0]  ;;  %v16394_v51 = vld [vmem:[#allocation6 + $0xec4] sm:$0xf0] }
 0x121   :  { %v16833_v62 = vld [vmem:[#allocation6 + $0x1c84] sm:$0xf]  ;;  %v13880_v4 = vor.u32 %v16705_v58, %v13877_v59  ;;  %6993 = vmatpush.bf16.msrb.mxu1 %v13304_v61  ;;  %v12604_v57 = vor.u32 %v16394_v51, %v12603_v48  ;;  %v12027_v58 = vld [vmem:[#allocation6 + $0xa08] sm:$0xf]  ;;  %v11452_v61 = vor.u32 %v16106_v55, %v11451_v54 }
 0x122   :  { %v14389_v63 = vld [vmem:[#allocation6 + $0x1cc0] sm:$0xf0]  ;;  %6981 = vmatmul.bf16.vlgmr.msrb.gmra.mxu0 %v17475_v6  ;;  %v16250_v59 = vld [vmem:[#allocation6 + $0xa44] sm:$0xf0] }
 0x123   :  { %v14392_v10 = vor.u32 %v16833_v62, %v14389_v63  ;;  %v16689_v11 = vld [vmem:[#allocation6 + $0x1804] sm:$0xf]  ;;  %7025 = vmatpush.bf16.msra.mxu0 %v11196_v0  ;;  %7005 = vmatpush.bf16.msrb.mxu2 %v13880_v4  ;;  %v12539_v62 = vld [vmem:[#allocation6 + $0xe08] sm:$0xf]  ;;  %v12028_v5 = vor.u32 %v16250_v59, %v12027_v58 }
 0x124   :  { %v13813_v12 = vld [vmem:[#allocation6 + $0x1840] sm:$0xf0]  ;;  %6994 = vmatmul.bf16.vlgmr.msrb.gmra.mxu1 %v17478_v9  ;;  %v16378_v63 = vld [vmem:[#allocation6 + $0xe44] sm:$0xf0] }
 0x125   :  { %v16817_v13 = vld [vmem:[#allocation6 + $0x1c04] sm:$0xf]  ;;  %7038 = vmatpush.bf16.msra.mxu1 %v11708_v1  ;;  %v13816_v2 = vor.u32 %v16689_v11, %v13813_v12  ;;  %7018 = vmatpush.bf16.msrb.mxu3 %v14392_v10  ;;  %v10875_v0 = vld [vmem:[#allocation6 + $0x108] sm:$0xf]  ;;  %v12540_v7 = vor.u32 %v16378_v63, %v12539_v62 }
 0x126   :  { %v14325_v14 = vld [vmem:[#allocation6 + $0x1c40] sm:$0xf0]  ;;  %v15962_v1 = vld [vmem:[#allocation6 + $0x144] sm:$0xf0] }
 0x127   :  { %v14328_v27 = vor.u32 %v16817_v13, %v14325_v14  ;;  %7026 = vmatpush.bf16.msra.mxu0 %v11132_v18  ;;  %7006 = vmatpush.bf16.msrb.mxu2 %v13816_v2  ;;  %v16090_v4 = vld [vmem:[#allocation6 + $0x544] sm:$0xf0]  ;;  %v10876_v11 = vor.u32 %v15962_v1, %v10875_v0 }
 0x128   :  { %v16234_v10 = vld [vmem:[#allocation6 + $0x9c4] sm:$0xf0]  ;;  %v11388_v12 = vor.u32 %v16090_v4, %v11387_v3 }
 0x129   :  { %7039 = vmatpush.bf16.msra.mxu1 %v11644_v19  ;;  %7019 = vmatpush.bf16.msrb.mxu3 %v14328_v27  ;;  %v12475_v13 = vld [vmem:[#allocation6 + $0xd88] sm:$0xf]  ;;  %v11964_v20 = vor.u32 %v16234_v10, %v11963_v8 }
 0x12a   :  { %7007 = vmatmul.bf16.vlgmr.msrb.gmra.mxu2 %v17482_v41  ;;  %v16362_v14 = vld [vmem:[#allocation6 + $0xdc4] sm:$0xf0] }
 0x12b   :  { %7051 = vmatpush.bf16.msra.mxu2 %v12220_v28  ;;  %7027 = vmatpush.bf16.msra.mxu0 %v11068_v32  ;;  %v15946_v16 = vld [vmem:[#allocation6 + $0xc4] sm:$0xf0]  ;;  %v12476_v21 = vor.u32 %v16362_v14, %v12475_v13 }
 0x12c   :  { %7020 = vmatmul.bf16.vlgmr.msrb.gmra.mxu3 %v17484_v44  ;;  %v11323_v18 = vld [vmem:[#allocation6 + $0x488] sm:$0xf]  ;;  %v10812_v25 = vor.u32 %v15946_v16, %v10811_v15 }
 0x12d   :  { %7064 = vmatpush.bf16.msra.mxu3 %v12732_v29  ;;  %7040 = vmatpush.bf16.msra.mxu1 %v11580_v33  ;;  %v16074_v19 = vld [vmem:[#allocation6 + $0x4c4] sm:$0xf0] }
 0x12e   :  { %v11899_v23 = vld [vmem:[#allocation6 + $0x908] sm:$0xf]  ;;  %v11324_v26 = vor.u32 %v16074_v19, %v11323_v18 }
 0x12f   :  { %7052 = vmatpush.bf16.msra.mxu2 %v12156_v40  ;;  %7028 = vmatpush.bf16.msra.mxu0 %v11004_v46  ;;  %v16218_v2 = vld [vmem:[#allocation6 + $0x944] sm:$0xf0] }
 0x130   :  { %v12411_v24 = vld [vmem:[#allocation6 + $0xd08] sm:$0xf]  ;;  %v11900_v33 = vor.u32 %v16218_v2, %v11899_v23 }
 0x131   :  { %7065 = vmatpush.bf16.msra.mxu3 %v12668_v50  ;;  %7041 = vmatpush.bf16.msra.mxu1 %v11516_v47  ;;  %v16346_v27 = vld [vmem:[#allocation6 + $0xd44] sm:$0xf0] }
 0x132   :  { %v10747_v28 = vld [vmem:[#allocation6 + $0x8] sm:$0xf]  ;;  %v12412_v37 = vor.u32 %v16346_v27, %v12411_v24 }
 0x133   :  { %7053 = vmatpush.bf16.msra.mxu2 %v12092_v56  ;;  %7029 = vmatpush.bf16.msra.mxu0 %v10940_v60  ;;  %v15930_v29 = vld [vmem:[#allocation6 + $0x44] sm:$0xf0] }
 0x134   :  { %v11259_v30 = vld [vmem:[#allocation6 + $0x408] sm:$0xf]  ;;  %v10748_v40 = vor.u32 %v15930_v29, %v10747_v28 }
 0x135   :  { %7066 = vmatpush.bf16.msra.mxu3 %v12604_v57  ;;  %7042 = vmatpush.bf16.msra.mxu1 %v11452_v61  ;;  %v16058_v31 = vld [vmem:[#allocation6 + $0x444] sm:$0xf0] }
 0x136   :  { %v13243_v32 = vld [vmem:[#allocation6 + $0x1388] sm:$0xf]  ;;  %v11260_v50 = vor.u32 %v16058_v31, %v11259_v30 }
 0x137   :  { %7054 = vmatpush.bf16.msra.mxu2 %v12028_v5  ;;  %7030 = vmatpush.bf16.msra.mxu0 %v10876_v11  ;;  %v16554_v34 = vld [vmem:[#allocation6 + $0x13c4] sm:$0xf0] }
 0x138   :  { %v13755_v35 = vld [vmem:[#allocation6 + $0x1788] sm:$0xf]  ;;  %v13244_v46 = vor.u32 %v16554_v34, %v13243_v32 }
 0x139   :  { %7067 = vmatpush.bf16.msra.mxu3 %v12540_v7  ;;  %7043 = vmatpush.bf16.msra.mxu1 %v11388_v12  ;;  %v16682_v36 = vld [vmem:[#allocation6 + $0x17c4] sm:$0xf0] }
 0x13a   :  { %v11835_v38 = vld [vmem:[#allocation6 + $0x888] sm:$0xf]  ;;  %v13756_v47 = vor.u32 %v16682_v36, %v13755_v35 }
 0x13b   :  { %7055 = vmatpush.bf16.msra.mxu2 %v11964_v20  ;;  %v16202_v39 = vld [vmem:[#allocation6 + $0x8c4] sm:$0xf0]  ;;  %7031 = vmatpush.bf16.msra.mxu0 %v10812_v25 }
 0x13c   :  { %v12347_v42 = vld [vmem:[#allocation6 + $0xc88] sm:$0xf]  ;;  %v11836_v51 = vor.u32 %v16202_v39, %v11835_v38 }
 0x13d   :  { %7068 = vmatpush.bf16.msra.mxu3 %v12476_v21  ;;  %7044 = vmatpush.bf16.msra.mxu1 %v11324_v26  ;;  %v16330_v45 = vld [vmem:[#allocation6 + $0xcc4] sm:$0xf0] }
 0x13e   :  { %v13179_v48 = vld [vmem:[#allocation6 + $0x1308] sm:$0xf]  ;;  %v12348_v55 = vor.u32 %v16330_v45, %v12347_v42 }
 0x13f   :  { %7056 = vmatpush.bf16.msra.mxu2 %v11900_v33  ;;  %v16538_v52 = vld [vmem:[#allocation6 + $0x1344] sm:$0xf0]  ;;  %7032 = vmatpush.bf16.msra.mxu0 %v10748_v40 }
 0x140   :  { %v13691_v53 = vld [vmem:[#allocation6 + $0x1708] sm:$0xf]  ;;  %v13180_v62 = vor.u32 %v16538_v52, %v13179_v48 }
 0x141   :  { %v16666_v54 = vld [vmem:[#allocation6 + $0x1744] sm:$0xf0]  ;;  %7069 = vmatpush.bf16.msra.mxu3 %v12412_v37  ;;  %7045 = vmatpush.bf16.msra.mxu1 %v11260_v50 }
 0x142   :  { %v11771_v56 = vld [vmem:[#allocation6 + $0x808] sm:$0xf]  ;;  %v13692_v63 = vor.u32 %v16666_v54, %v13691_v53  ;;  %7033 = vmatmul.bf16.vlgmr.msra.gmra.mxu0 %v17459_v17 }
 0x143   :  { %v16186_v57 = vld [vmem:[#allocation6 + $0x844] sm:$0xf0]  ;;  %7077 = vmatpush.bf16.msrb.mxu0 %v13244_v46  ;;  %7057 = vmatpush.bf16.msra.mxu2 %v11836_v51 }
 0x144   :  { %v12283_v58 = vld [vmem:[#allocation6 + $0xc08] sm:$0xf]  ;;  %v11772_v3 = vor.u32 %v16186_v57, %v11771_v56  ;;  %7046 = vmatmul.bf16.vlgmr.msra.gmra.mxu1 %v17462_v22 }
 0x145   :  { %v16314_v59 = vld [vmem:[#allocation6 + $0xc44] sm:$0xf0]  ;;  %7090 = vmatpush.bf16.msrb.mxu1 %v13756_v47  ;;  %7070 = vmatpush.bf16.msra.mxu3 %v12348_v55 }
 0x146   :  { %v14267_v60 = vld [vmem:[#allocation6 + $0x1b88] sm:$0xf]  ;;  %v12284_v7 = vor.u32 %v16314_v59, %v12283_v58 }
 0x147   :  { %v16810_v61 = vld [vmem:[#allocation6 + $0x1bc4] sm:$0xf0]  ;;  %7078 = vmatpush.bf16.msrb.mxu0 %v13180_v62  ;;  %7058 = vmatpush.bf16.msra.mxu2 %v11772_v3 }
 0x148   :  { %v14779_v0 = vld [vmem:[#allocation6 + $0x1f88] sm:$0xf]  ;;  %v14268_v8 = vor.u32 %v16810_v61, %v14267_v60 }
 0x149   :  { %v16938_v1 = vld [vmem:[#allocation6 + $0x1fc4] sm:$0xf0]  ;;  %7091 = vmatpush.bf16.msrb.mxu1 %v13692_v63  ;;  %7071 = vmatpush.bf16.msra.mxu3 %v12284_v7 }
 0x14a   :  { %v13115_v4 = vld [vmem:[#allocation6 + $0x1288] sm:$0xf]  ;;  %v14780_v12 = vor.u32 %v16938_v1, %v14779_v0  ;;  %7059 = vmatmul.bf16.vlgmr.msra.gmra.mxu2 %v17466_v43 }
 0x14b   :  { %v16522_v5 = vld [vmem:[#allocation6 + $0x12c4] sm:$0xf0]  ;;  %7103 = vmatpush.bf16.msrb.mxu2 %v14268_v8 }
 0x14c   :  { %v13627_v10 = vld [vmem:[#allocation6 + $0x1688] sm:$0xf]  ;;  %v13116_v15 = vor.u32 %v16522_v5, %v13115_v4  ;;  %7072 = vmatmul.bf16.vlgmr.msra.gmra.mxu3 %v17468_v49 }
 0x14d   :  { %v16650_v11 = vld [vmem:[#allocation6 + $0x16c4] sm:$0xf0]  ;;  %7116 = vmatpush.bf16.msrb.mxu3 %v14780_v12 }
 0x14e   :  { %v14203_v13 = vld [vmem:[#allocation6 + $0x1b08] sm:$0xf]  ;;  %v13628_v19 = vor.u32 %v16650_v11, %v13627_v10  ;;  %7079 = vmatpush.bf16.msrb.mxu0 %v13116_v15 }
 0x14f   :  { %v16794_v14 = vld [vmem:[#allocation6 + $0x1b44] sm:$0xf0] }
 0x150   :  { %v14715_v16 = vld [vmem:[#allocation6 + $0x1f08] sm:$0xf]  ;;  %v14204_v23 = vor.u32 %v16794_v14, %v14203_v13  ;;  %7092 = vmatpush.bf16.msrb.mxu1 %v13628_v19  ;;  %v16162_v19 = vld [vmem:[#allocation6 + $0x78c] sm:$0xf] }
 0x151   :  { %v16922_v18 = vld [vmem:[#allocation6 + $0x1f44] sm:$0xf0] }
 0x152   :  { %v13051_v20 = vld [vmem:[#allocation6 + $0x1208] sm:$0xf]  ;;  %v14716_v25 = vor.u32 %v16922_v18, %v14715_v16  ;;  %7104 = vmatpush.bf16.msrb.mxu2 %v14204_v23  ;;  %v16034_v16 = vld [vmem:[#allocation6 + $0x38c] sm:$0xf] }
 0x153   :  { %v16506_v21 = vld [vmem:[#allocation6 + $0x1244] sm:$0xf0]  ;;  %v11197_v18 = vld [vmem:[#allocation6 + $0x3c8] sm:$0xf0] }
 0x154   :  { %v13563_v2 = vld [vmem:[#allocation6 + $0x1608] sm:$0xf]  ;;  %v13052_v28 = vor.u32 %v16506_v21, %v13051_v20  ;;  %7117 = vmatpush.bf16.msrb.mxu3 %v14716_v25  ;;  %v11709_v21 = vld [vmem:[#allocation6 + $0x7c8] sm:$0xf0] }
 0x155   :  { %v16634_v24 = vld [vmem:[#allocation6 + $0x1644] sm:$0xf0] }
 0x156   :  { %v14139_v26 = vld [vmem:[#allocation6 + $0x1a88] sm:$0xf]  ;;  %v13564_v31 = vor.u32 %v16634_v24, %v13563_v2  ;;  %7080 = vmatpush.bf16.msrb.mxu0 %v13052_v28  ;;  %v11200_v28 = vor.u32 %v16034_v16, %v11197_v18  ;;  %v16386_v18 = vld [vmem:[#allocation6 + $0xe8c] sm:$0xf] }
 0x157   :  { %v16778_v27 = vld [vmem:[#allocation6 + $0x1ac4] sm:$0xf0] }
 0x158   :  { %v14651_v29 = vld [vmem:[#allocation6 + $0x1e88] sm:$0xf]  ;;  %v14140_v34 = vor.u32 %v16778_v27, %v14139_v26  ;;  %7093 = vmatpush.bf16.msrb.mxu1 %v13564_v31 }
 0x159   :  { %v16906_v30 = vld [vmem:[#allocation6 + $0x1ec4] sm:$0xf0] }
 0x15a   :  { %v12987_v32 = vld [vmem:[#allocation6 + $0x1188] sm:$0xf]  ;;  %v14652_v37 = vor.u32 %v16906_v30, %v14651_v29  ;;  %7105 = vmatpush.bf16.msrb.mxu2 %v14140_v34  ;;  %v16018_v29 = vld [vmem:[#allocation6 + $0x30c] sm:$0xf]  ;;  %v11712_v30 = vor.u32 %v16162_v19, %v11709_v21 }
 0x15b   :  { %v16490_v33 = vld [vmem:[#allocation6 + $0x11c4] sm:$0xf0]  ;;  %v11645_v34 = vld [vmem:[#allocation6 + $0x748] sm:$0xf0] }
 0x15c   :  { %v13499_v35 = vld [vmem:[#allocation6 + $0x1588] sm:$0xf]  ;;  %v12988_v40 = vor.u32 %v16490_v33, %v12987_v32  ;;  %7118 = vmatpush.bf16.msrb.mxu3 %v14652_v37  ;;  %v11133_v32 = vld [vmem:[#allocation6 + $0x348] sm:$0xf0] }
 0x15d   :  { %v16618_v36 = vld [vmem:[#allocation6 + $0x15c4] sm:$0xf0]  ;;  %v16146_v33 = vld [vmem:[#allocation6 + $0x70c] sm:$0xf] }
 0x15e   :  { %v14075_v38 = vld [vmem:[#allocation6 + $0x1a08] sm:$0xf]  ;;  %v13500_v45 = vor.u32 %v16618_v36, %v13499_v35  ;;  %7081 = vmatpush.bf16.msrb.mxu0 %v12988_v40  ;;  %v16290_v40 = vld [vmem:[#allocation6 + $0xb8c] sm:$0xf] }
 0x15f   :  { %v16762_v39 = vld [vmem:[#allocation6 + $0x1a44] sm:$0xf0]  ;;  %v12605_v19 = vld [vmem:[#allocation6 + $0xec8] sm:$0xf0] }
 0x160   :  { %v14587_v50 = vld [vmem:[#allocation6 + $0x1e08] sm:$0xf]  ;;  %v14076_v48 = vor.u32 %v16762_v39, %v14075_v38  ;;  %7094 = vmatpush.bf16.msrb.mxu1 %v13500_v45  ;;  %v16418_v45 = vld [vmem:[#allocation6 + $0xf8c] sm:$0xf] }
 0x161   :  { %v16890_v42 = vld [vmem:[#allocation6 + $0x1e44] sm:$0xf0] }
 0x162   :  { %v12923_v46 = vld [vmem:[#allocation6 + $0x1108] sm:$0xf]  ;;  %v14588_v53 = vor.u32 %v16890_v42, %v14587_v50  ;;  %7106 = vmatpush.bf16.msrb.mxu2 %v14076_v48  ;;  %v12221_v50 = vld [vmem:[#allocation6 + $0xbc8] sm:$0xf0]  ;;  %v11136_v42 = vor.u32 %v16018_v29, %v11133_v32  ;;  %v11648_v48 = vor.u32 %v16146_v33, %v11645_v34 }
 0x163   :  { %v16474_v47 = vld [vmem:[#allocation6 + $0x1144] sm:$0xf0]  ;;  %v12029_v29 = vld [vmem:[#allocation6 + $0xa48] sm:$0xf0] }
 0x164   :  { %v13435_v51 = vld [vmem:[#allocation6 + $0x1508] sm:$0xf]  ;;  %v12924_v56 = vor.u32 %v16474_v47, %v12923_v46  ;;  %7119 = vmatpush.bf16.msrb.mxu3 %v14588_v53  ;;  %v12733_v46 = vld [vmem:[#allocation6 + $0xfc8] sm:$0xf0]  ;;  %v17500_v47 = vld [vmem:[#allocation7] sm:$0xff] }
 0x165   :  { %v16602_v52 = vld [vmem:[#allocation6 + $0x1544] sm:$0xf0]  ;;  %v11069_v53 = vld [vmem:[#allocation6 + $0x2c8] sm:$0xf0] }
 0x166   :  { %v14011_v54 = vld [vmem:[#allocation6 + $0x1988] sm:$0xf]  ;;  %v13436_v59 = vor.u32 %v16602_v52, %v13435_v51  ;;  %7082 = vmatpush.bf16.msrb.mxu0 %v12924_v56  ;;  %v16002_v52 = vld [vmem:[#allocation6 + $0x28c] sm:$0xf] }
 0x167   :  { %v16746_v55 = vld [vmem:[#allocation6 + $0x19c4] sm:$0xf0]  ;;  %v16130_v56 = vld [vmem:[#allocation6 + $0x68c] sm:$0xf] }
 0x168   :  { %v14523_v57 = vld [vmem:[#allocation6 + $0x1d88] sm:$0xf]  ;;  %v14012_v62 = vor.u32 %v16746_v55, %v14011_v54  ;;  %7095 = vmatpush.bf16.msrb.mxu1 %v13436_v59  ;;  %v12224_v55 = vor.u32 %v16290_v40, %v12221_v50  ;;  %v16274_v59 = vld [vmem:[#allocation6 + $0xb0c] sm:$0xf] }
 0x169   :  { %v16874_v58 = vld [vmem:[#allocation6 + $0x1dc4] sm:$0xf0]  ;;  %v12541_v32 = vld [vmem:[#allocation6 + $0xe48] sm:$0xf0] }
 0x16a   :  { %v12859_v60 = vld [vmem:[#allocation6 + $0x1088] sm:$0xf]  ;;  %v14524_v1 = vor.u32 %v16874_v58, %v14523_v57  ;;  %7107 = vmatpush.bf16.msrb.mxu2 %v14012_v62  ;;  %v11581_v57 = vld [vmem:[#allocation6 + $0x6c8] sm:$0xf0]  ;;  %v12736_v58 = vor.u32 %v16418_v45, %v12733_v46  ;;  %v11072_v62 = vor.u32 %v16002_v52, %v11069_v53 }
 0x16b   :  { %v16458_v61 = vld [vmem:[#allocation6 + $0x10c4] sm:$0xf0]  ;;  %v15954_v34 = vld [vmem:[#allocation6 + $0x10c] sm:$0xf] }
 0x16c   :  { %v13371_v63 = vld [vmem:[#allocation6 + $0x1488] sm:$0xf]  ;;  %v12860_v5 = vor.u32 %v16458_v61, %v12859_v60  ;;  %7120 = vmatpush.bf16.msrb.mxu3 %v14524_v1  ;;  %v12157_v60 = vld [vmem:[#allocation6 + $0xb48] sm:$0xf0]  ;;  %v1665_v61 = vperm.slane %v17500_v47, 0  ;;  %v11584_v1 = vor.u32 %v16130_v56, %v11581_v57 }
 0x16d   :  { %v16586_v0 = vld [vmem:[#allocation6 + $0x14c4] sm:$0xf0]  ;;  %v11965_v45 = vld [vmem:[#allocation6 + $0x9c8] sm:$0xf0] }
 0x16e   :  { %v13947_v3 = vld [vmem:[#allocation6 + $0x1908] sm:$0xf]  ;;  %v13372_v11 = vor.u32 %v16586_v0, %v13371_v63  ;;  %7083 = vmatpush.bf16.msrb.mxu0 %v12860_v5  ;;  %v16402_v63 = vld [vmem:[#allocation6 + $0xf0c] sm:$0xf]  ;;  %v12160_v5 = vor.u32 %v16274_v59, %v12157_v60 }
 0x16f   :  { %v16730_v4 = vld [vmem:[#allocation6 + $0x1944] sm:$0xf0]  ;;  %v12669_v0 = vld [vmem:[#allocation6 + $0xf48] sm:$0xf0] }
 0x170   :  { %v14459_v7 = vld [vmem:[#allocation6 + $0x1d08] sm:$0xf]  ;;  %v13948_v15 = vor.u32 %v16730_v4, %v13947_v3  ;;  %7096 = vmatpush.bf16.msrb.mxu1 %v13372_v11  ;;  %v15986_v3 = vld [vmem:[#allocation6 + $0x20c] sm:$0xf]  ;;  %v12672_v11 = vor.u32 %v16402_v63, %v12669_v0  ;;  %v6865_v63 = vpop.f32.mrf.mxu3 }
 0x171   :  { %v16858_v8 = vld [vmem:[#allocation6 + $0x1d44] sm:$0xf0]  ;;  %v11005_v4 = vld [vmem:[#allocation6 + $0x248] sm:$0xf0] }
 0x172   :  { %v12795_v10 = vld [vmem:[#allocation6 + $0x1008] sm:$0xf]  ;;  %v14460_v20 = vor.u32 %v16858_v8, %v14459_v7  ;;  %7108 = vmatpush.bf16.msrb.mxu2 %v13948_v15  ;;  %v6826_v7 = vpop.f32.mrf.mxu0  ;;  %v16114_v8 = vld [vmem:[#allocation6 + $0x60c] sm:$0xf]  ;;  %v11008_v16 = vor.u32 %v15986_v3, %v11005_v4 }
 0x173   :  { %v16442_v12 = vld [vmem:[#allocation6 + $0x1044] sm:$0xf0]  ;;  %v12093_v15 = vld [vmem:[#allocation6 + $0xac8] sm:$0xf0] }
 0x174   :  { %v13307_v13 = vld [vmem:[#allocation6 + $0x1408] sm:$0xf]  ;;  %v12796_v24 = vor.u32 %v16442_v12, %v12795_v10  ;;  %7121 = vmatpush.bf16.msrb.mxu3 %v14460_v20  ;;  %v11517_v10 = vld [vmem:[#allocation6 + $0x648] sm:$0xf0]  ;;  %v6827_v12 = vadd.f32 %v6826_v7, %v1665_v61 }
 0x175   :  { %v16570_v14 = vld [vmem:[#allocation6 + $0x1444] sm:$0xf0]  ;;  %v11520_v20 = vor.u32 %v16114_v8, %v11517_v10  ;;  %v15938_v53 = vld [vmem:[#allocation6 + $0x8c] sm:$0xf] }
 0x176   :  { %v13883_v23 = vld [vmem:[#allocation6 + $0x1888] sm:$0xf]  ;;  %v13308_v27 = vor.u32 %v16570_v14, %v13307_v13  ;;  %7084 = vmatpush.bf16.msrb.mxu0 %v12796_v24  ;;  %v6839_v13 = vpop.f32.mrf.mxu1  ;;  %v16258_v14 = vld [vmem:[#allocation6 + $0xa8c] sm:$0xf] }
 0x177   :  { %v16714_v2 = vld [vmem:[#allocation6 + $0x18c4] sm:$0xf0]  ;;  %v6840_v21 = vadd.f32 %v6839_v13, %v6827_v12  ;;  %v12096_v24 = vor.u32 %v16258_v14, %v12093_v15  ;;  %v16066_v56 = vld [vmem:[#allocation6 + $0x48c] sm:$0xf] }
 0x178   :  { %v14395_v25 = vld [vmem:[#allocation6 + $0x1c88] sm:$0xf]  ;;  %v13884_v31 = vor.u32 %v16714_v2, %v13883_v23  ;;  %7097 = vmatpush.bf16.msrb.mxu1 %v13308_v27  ;;  %v15970_v23 = vld [vmem:[#allocation6 + $0x18c] sm:$0xf]  ;;  %v12608_v27 = vor.u32 %v16386_v18, %v12605_v19 }
 0x179   :  { %v16842_v26 = vld [vmem:[#allocation6 + $0x1cc4] sm:$0xf0]  ;;  %7085 = vmatmul.bf16.vlgmr.msrb.gmra.mxu0 %v17475_v6  ;;  %v10941_v2 = vld [vmem:[#allocation6 + $0x1c8] sm:$0xf0] }
 0x17a   :  { %v14396_v35 = vor.u32 %v16842_v26, %v14395_v25  ;;  %v13819_v36 = vld [vmem:[#allocation6 + $0x1808] sm:$0xf]  ;;  %7129 = vmatpush.bf16.msra.mxu0 %v11200_v28  ;;  %7109 = vmatpush.bf16.msrb.mxu2 %v13884_v31  ;;  %v16098_v25 = vld [vmem:[#allocation6 + $0x58c] sm:$0xf] }
 0x17b   :  { %v16698_v37 = vld [vmem:[#allocation6 + $0x1844] sm:$0xf0]  ;;  %7098 = vmatmul.bf16.vlgmr.msrb.gmra.mxu1 %v17478_v9  ;;  %v11453_v26 = vld [vmem:[#allocation6 + $0x5c8] sm:$0xf0] }
 0x17c   :  { %v14331_v38 = vld [vmem:[#allocation6 + $0x1c08] sm:$0xf]  ;;  %7142 = vmatpush.bf16.msra.mxu1 %v11712_v30  ;;  %v13820_v51 = vor.u32 %v16698_v37, %v13819_v36  ;;  %7122 = vmatpush.bf16.msrb.mxu3 %v14396_v35  ;;  %v16242_v28 = vld [vmem:[#allocation6 + $0xa0c] sm:$0xf]  ;;  %v10944_v30 = vor.u32 %v15970_v23, %v10941_v2  ;;  %v11456_v33 = vor.u32 %v16098_v25, %v11453_v26  ;;  %v6828_v37 = vpop.f32.mrf.mxu0 }
 0x17d   :  { %v16826_v39 = vld [vmem:[#allocation6 + $0x1c44] sm:$0xf0]  ;;  %v16370_v31 = vld [vmem:[#allocation6 + $0xe0c] sm:$0xf]  ;;  %v12032_v36 = vor.u32 %v16242_v28, %v12029_v29  ;;  %v6867_v37 = vpop.f32.mrf.mxu3 }
 0x17e   :  { %v14332_v54 = vor.u32 %v16826_v39, %v14331_v38  ;;  %7130 = vmatpush.bf16.msra.mxu0 %v11136_v42  ;;  %7110 = vmatpush.bf16.msrb.mxu2 %v13820_v51  ;;  %v10877_v35 = vld [vmem:[#allocation6 + $0x148] sm:$0xf0]  ;;  %v12544_v40 = vor.u32 %v16370_v31, %v12541_v32  ;;  %v6841_v50 = vpop.f32.mrf.mxu1 }
 0x17f   :  { %v16082_v38 = vld [vmem:[#allocation6 + $0x50c] sm:$0xf]  ;;  %v10880_v46 = vor.u32 %v15954_v34, %v10877_v35 }
 0x180   :  { %7143 = vmatpush.bf16.msra.mxu1 %v11648_v48  ;;  %7123 = vmatpush.bf16.msrb.mxu3 %v14332_v54  ;;  %v11389_v39 = vld [vmem:[#allocation6 + $0x548] sm:$0xf0] }
 0x181   :  { %7111 = vmatmul.bf16.vlgmr.msrb.gmra.mxu2 %v17482_v41  ;;  %v16226_v42 = vld [vmem:[#allocation6 + $0x98c] sm:$0xf]  ;;  %v11392_v52 = vor.u32 %v16082_v38, %v11389_v39 }
 0x182   :  { %7155 = vmatpush.bf16.msra.mxu2 %v12224_v55  ;;  %7131 = vmatpush.bf16.msra.mxu0 %v11072_v62  ;;  %v16354_v48 = vld [vmem:[#allocation6 + $0xd8c] sm:$0xf]  ;;  %v11968_v55 = vor.u32 %v16226_v42, %v11965_v45 }
 0x183   :  { %7124 = vmatmul.bf16.vlgmr.msrb.gmra.mxu3 %v17484_v44  ;;  %v12477_v51 = vld [vmem:[#allocation6 + $0xdc8] sm:$0xf0] }
 0x184   :  { %7168 = vmatpush.bf16.msra.mxu3 %v12736_v58  ;;  %7144 = vmatpush.bf16.msra.mxu1 %v11584_v1  ;;  %v10813_v54 = vld [vmem:[#allocation6 + $0xc8] sm:$0xf0]  ;;  %v6852_v58 = vpop.f32.mrf.mxu2  ;;  %v12480_v59 = vor.u32 %v16354_v48, %v12477_v51 }
 0x185   :  { %v11325_v57 = vld [vmem:[#allocation6 + $0x4c8] sm:$0xf0]  ;;  %v6853_v62 = vadd.f32 %v6852_v58, %v6840_v21  ;;  %v10816_v0 = vor.u32 %v15938_v53, %v10813_v54 }
 0x186   :  { %7156 = vmatpush.bf16.msra.mxu2 %v12160_v5  ;;  %7132 = vmatpush.bf16.msra.mxu0 %v11008_v16  ;;  %v16210_v60 = vld [vmem:[#allocation6 + $0x90c] sm:$0xf]  ;;  %v11328_v5 = vor.u32 %v16066_v56, %v11325_v57 }
 0x187   :  { %v11901_v61 = vld [vmem:[#allocation6 + $0x948] sm:$0xf0] }
 0x188   :  { %7169 = vmatpush.bf16.msra.mxu3 %v12672_v11  ;;  %7145 = vmatpush.bf16.msra.mxu1 %v11520_v20  ;;  %v16338_v1 = vld [vmem:[#allocation6 + $0xd0c] sm:$0xf]  ;;  %v17507_v11 = vadd.f32 %v6865_v63, %v6853_v62  ;;  %v11904_v12 = vor.u32 %v16210_v60, %v11901_v61 }
 0x189   :  { %v12413_v3 = vld [vmem:[#allocation6 + $0xd48] sm:$0xf0] }
 0x18a   :  { %7157 = vmatpush.bf16.msra.mxu2 %v12096_v24  ;;  %7133 = vmatpush.bf16.msra.mxu0 %v10944_v30  ;;  %v15922_v4 = vld [vmem:[#allocation6 + $0xc] sm:$0xf]  ;;  %v12416_v16 = vor.u32 %v16338_v1, %v12413_v3 }
 0x18b   :  { %v10749_v7 = vld [vmem:[#allocation6 + $0x48] sm:$0xf0] }
 0x18c   :  { %7170 = vmatpush.bf16.msra.mxu3 %v12608_v27  ;;  %7146 = vmatpush.bf16.msra.mxu1 %v11456_v33  ;;  %v16050_v8 = vld [vmem:[#allocation6 + $0x40c] sm:$0xf]  ;;  %v10752_v21 = vor.u32 %v15922_v4, %v10749_v7  ;;  %v6854_v32 = vpop.f32.mrf.mxu2  ;;  %v6878_v7 = vpop.f32.mrf.mxu0 }
 0x18d   :  { %v11261_v10 = vld [vmem:[#allocation6 + $0x448] sm:$0xf0] }
 0x18e   :  { %7158 = vmatpush.bf16.msra.mxu2 %v12032_v36  ;;  %7134 = vmatpush.bf16.msra.mxu0 %v10880_v46  ;;  %v16546_v13 = vld [vmem:[#allocation6 + $0x138c] sm:$0xf]  ;;  %v11264_v24 = vor.u32 %v16050_v8, %v11261_v10 }
 0x18f   :  { %v13245_v14 = vld [vmem:[#allocation6 + $0x13c8] sm:$0xf0] }
 0x190   :  { %7171 = vmatpush.bf16.msra.mxu3 %v12544_v40  ;;  %7147 = vmatpush.bf16.msra.mxu1 %v11392_v52  ;;  %v16674_v15 = vld [vmem:[#allocation6 + $0x178c] sm:$0xf]  ;;  %v13248_v25 = vor.u32 %v16546_v13, %v13245_v14  ;;  %v6879_v13 = vadd.f32 %v6878_v7, %v17507_v11  ;;  %v6891_v14 = vpop.f32.mrf.mxu1 }
 0x191   :  { %v13757_v18 = vld [vmem:[#allocation6 + $0x17c8] sm:$0xf0] }
 0x192   :  { %7159 = vmatpush.bf16.msra.mxu2 %v11968_v55  ;;  %v16194_v19 = vld [vmem:[#allocation6 + $0x88c] sm:$0xf]  ;;  %7135 = vmatpush.bf16.msra.mxu0 %v10816_v0  ;;  %v13760_v27 = vor.u32 %v16674_v15, %v13757_v18 }
 0x193   :  { %v11837_v20 = vld [vmem:[#allocation6 + $0x8c8] sm:$0xf0] }
 0x194   :  { %7172 = vmatpush.bf16.msra.mxu3 %v12480_v59  ;;  %v16322_v23 = vld [vmem:[#allocation6 + $0xc8c] sm:$0xf]  ;;  %7148 = vmatpush.bf16.msra.mxu1 %v11328_v5  ;;  %v11840_v28 = vor.u32 %v16194_v19, %v11837_v20  ;;  %v6880_v37 = vpop.f32.mrf.mxu0 }
 0x195   :  { %v12349_v2 = vld [vmem:[#allocation6 + $0xcc8] sm:$0xf0] }
 0x196   :  { %v16530_v26 = vld [vmem:[#allocation6 + $0x130c] sm:$0xf]  ;;  %7160 = vmatpush.bf16.msra.mxu2 %v11904_v12  ;;  %v12352_v33 = vor.u32 %v16322_v23, %v12349_v2  ;;  %7136 = vmatpush.bf16.msra.mxu0 %v10752_v21  ;;  %v6892_v23 = vadd.f32 %v6891_v14, %v6879_v13  ;;  %v16043_v13 = vld [vmem:[#allocation6 + $0x3cc] sm:$0xf0] }
 0x197   :  { %v13181_v29 = vld [vmem:[#allocation6 + $0x1348] sm:$0xf0]  ;;  %v11715_v14 = vld [vmem:[#allocation6 + $0x790] sm:$0xf] }
 0x198   :  { %v16658_v30 = vld [vmem:[#allocation6 + $0x170c] sm:$0xf]  ;;  %7173 = vmatpush.bf16.msra.mxu3 %v12416_v16  ;;  %7149 = vmatpush.bf16.msra.mxu1 %v11264_v24  ;;  %v13184_v50 = vor.u32 %v16530_v26, %v13181_v29 }
 0x199   :  { %v13693_v31 = vld [vmem:[#allocation6 + $0x1748] sm:$0xf0]  ;;  %7137 = vmatmul.bf16.vlgmr.msra.gmra.mxu0 %v17459_v17 }
 0x19a   :  { %v16178_v34 = vld [vmem:[#allocation6 + $0x80c] sm:$0xf]  ;;  %7181 = vmatpush.bf16.msrb.mxu0 %v13248_v25  ;;  %7161 = vmatpush.bf16.msra.mxu2 %v11840_v28  ;;  %v13696_v46 = vor.u32 %v16658_v30, %v13693_v31 }
 0x19b   :  { %v11773_v35 = vld [vmem:[#allocation6 + $0x848] sm:$0xf0]  ;;  %7150 = vmatmul.bf16.vlgmr.msra.gmra.mxu1 %v17462_v22 }
 0x19c   :  { %v16306_v36 = vld [vmem:[#allocation6 + $0xc0c] sm:$0xf]  ;;  %7194 = vmatpush.bf16.msrb.mxu1 %v13760_v27  ;;  %v11776_v48 = vor.u32 %v16178_v34, %v11773_v35  ;;  %7174 = vmatpush.bf16.msra.mxu3 %v12352_v33 }
 0x19d   :  { %v12285_v38 = vld [vmem:[#allocation6 + $0xc48] sm:$0xf0] }
 0x19e   :  { %v16802_v39 = vld [vmem:[#allocation6 + $0x1b8c] sm:$0xf]  ;;  %v12288_v53 = vor.u32 %v16306_v36, %v12285_v38  ;;  %7182 = vmatpush.bf16.msrb.mxu0 %v13184_v50  ;;  %7162 = vmatpush.bf16.msra.mxu2 %v11776_v48  ;;  %v6893_v50 = vpop.f32.mrf.mxu1 }
 0x19f   :  { %v14269_v40 = vld [vmem:[#allocation6 + $0x1bc8] sm:$0xf0]  ;;  %v12227_v50 = vld [vmem:[#allocation6 + $0xb90] sm:$0xf] }
 0x1a0   :  { %v16930_v42 = vld [vmem:[#allocation6 + $0x1f8c] sm:$0xf]  ;;  %v14272_v54 = vor.u32 %v16802_v39, %v14269_v40  ;;  %7195 = vmatpush.bf16.msrb.mxu1 %v13696_v46  ;;  %7175 = vmatpush.bf16.msra.mxu3 %v12288_v53 }
 0x1a1   :  { %v14781_v45 = vld [vmem:[#allocation6 + $0x1fc8] sm:$0xf0]  ;;  %7163 = vmatmul.bf16.vlgmr.msra.gmra.mxu2 %v17466_v43 }
 0x1a2   :  { %v16514_v51 = vld [vmem:[#allocation6 + $0x128c] sm:$0xf]  ;;  %v14784_v57 = vor.u32 %v16930_v42, %v14781_v45  ;;  %7207 = vmatpush.bf16.msrb.mxu2 %v14272_v54 }
 0x1a3   :  { %v13117_v52 = vld [vmem:[#allocation6 + $0x12c8] sm:$0xf0]  ;;  %7176 = vmatmul.bf16.vlgmr.msra.gmra.mxu3 %v17468_v49 }
 0x1a4   :  { %v16642_v55 = vld [vmem:[#allocation6 + $0x168c] sm:$0xf]  ;;  %v13120_v60 = vor.u32 %v16514_v51, %v13117_v52  ;;  %7220 = vmatpush.bf16.msrb.mxu3 %v14784_v57 }
 0x1a5   :  { %v13629_v56 = vld [vmem:[#allocation6 + $0x16c8] sm:$0xf0] }
 0x1a6   :  { %v16786_v58 = vld [vmem:[#allocation6 + $0x1b0c] sm:$0xf]  ;;  %v13632_v63 = vor.u32 %v16642_v55, %v13629_v56  ;;  %7183 = vmatpush.bf16.msrb.mxu0 %v13120_v60  ;;  %v6904_v60 = vpop.f32.mrf.mxu2 }
 0x1a7   :  { %v14205_v59 = vld [vmem:[#allocation6 + $0x1b48] sm:$0xf0] }
 0x1a8   :  { %v16914_v61 = vld [vmem:[#allocation6 + $0x1f0c] sm:$0xf]  ;;  %v14208_v3 = vor.u32 %v16786_v58, %v14205_v59  ;;  %7196 = vmatpush.bf16.msrb.mxu1 %v13632_v63 }
 0x1a9   :  { %v14717_v62 = vld [vmem:[#allocation6 + $0x1f48] sm:$0xf0] }
 0x1aa   :  { %v16498_v0 = vld [vmem:[#allocation6 + $0x120c] sm:$0xf]  ;;  %v14720_v8 = vor.u32 %v16914_v61, %v14717_v62  ;;  %7208 = vmatpush.bf16.msrb.mxu2 %v14208_v3  ;;  %v1666_v62 = vperm.slane %v17500_v47, 1  ;;  %v6917_v3 = vpop.f32.mrf.mxu3 }
 0x1ab   :  { %v13053_v1 = vld [vmem:[#allocation6 + $0x1248] sm:$0xf0] }
 0x1ac   :  { %v16626_v4 = vld [vmem:[#allocation6 + $0x160c] sm:$0xf]  ;;  %v13056_v15 = vor.u32 %v16498_v0, %v13053_v1  ;;  %7221 = vmatpush.bf16.msrb.mxu3 %v14720_v8  ;;  %v6905_v1 = vadd.f32 %v6904_v60, %v6892_v23  ;;  %v16139_v60 = vld [vmem:[#allocation6 + $0x6cc] sm:$0xf0] }
 0x1ad   :  { %v13565_v5 = vld [vmem:[#allocation6 + $0x1648] sm:$0xf0] }
 0x1ae   :  { %v16770_v10 = vld [vmem:[#allocation6 + $0x1a8c] sm:$0xf]  ;;  %v13568_v19 = vor.u32 %v16626_v4, %v13565_v5  ;;  %7184 = vmatpush.bf16.msrb.mxu0 %v13056_v15  ;;  %v17515_v15 = vadd.f32 %v6917_v3, %v6905_v1  ;;  %v12675_v3 = vld [vmem:[#allocation6 + $0xf10] sm:$0xf] }
 0x1af   :  { %v14141_v12 = vld [vmem:[#allocation6 + $0x1ac8] sm:$0xf0] }
 0x1b0   :  { %v16898_v16 = vld [vmem:[#allocation6 + $0x1e8c] sm:$0xf]  ;;  %v14144_v2 = vor.u32 %v16770_v10, %v14141_v12  ;;  %7197 = vmatpush.bf16.msrb.mxu1 %v13568_v19  ;;  %v11203_v12 = vld [vmem:[#allocation6 + $0x390] sm:$0xf] }
 0x1b1   :  { %v14653_v18 = vld [vmem:[#allocation6 + $0x1ec8] sm:$0xf0]  ;;  %v16171_v19 = vld [vmem:[#allocation6 + $0x7cc] sm:$0xf0] }
 0x1b2   :  { %v16482_v20 = vld [vmem:[#allocation6 + $0x118c] sm:$0xf]  ;;  %v14656_v26 = vor.u32 %v16898_v16, %v14653_v18  ;;  %7209 = vmatpush.bf16.msrb.mxu2 %v14144_v2  ;;  %v6930_v16 = vpop.f32.mrf.mxu0  ;;  %v6943_v2 = vpop.f32.mrf.mxu1 }
 0x1b3   :  { %v12989_v21 = vld [vmem:[#allocation6 + $0x11c8] sm:$0xf0]  ;;  %v6931_v23 = vadd.f32 %v6930_v16, %v1666_v62 }
 0x1b4   :  { %v16610_v24 = vld [vmem:[#allocation6 + $0x158c] sm:$0xf]  ;;  %v12992_v11 = vor.u32 %v16482_v20, %v12989_v21  ;;  %7222 = vmatpush.bf16.msrb.mxu3 %v14656_v26 }
 0x1b5   :  { %v13501_v25 = vld [vmem:[#allocation6 + $0x15c8] sm:$0xf0] }
 0x1b6   :  { %v16754_v27 = vld [vmem:[#allocation6 + $0x1a0c] sm:$0xf]  ;;  %v13504_v31 = vor.u32 %v16610_v24, %v13501_v25  ;;  %7185 = vmatpush.bf16.msrb.mxu0 %v12992_v11  ;;  %v11139_v11 = vld [vmem:[#allocation6 + $0x310] sm:$0xf] }
 0x1b7   :  { %v14077_v28 = vld [vmem:[#allocation6 + $0x1a48] sm:$0xf0] }
 0x1b8   :  { %v16882_v29 = vld [vmem:[#allocation6 + $0x1e0c] sm:$0xf]  ;;  %v14080_v34 = vor.u32 %v16754_v27, %v14077_v28  ;;  %7198 = vmatpush.bf16.msrb.mxu1 %v13504_v31  ;;  %v11204_v28 = vor.u32 %v16043_v13, %v11203_v12  ;;  %v11523_v12 = vld [vmem:[#allocation6 + $0x610] sm:$0xf] }
 0x1b9   :  { %v14589_v30 = vld [vmem:[#allocation6 + $0x1e48] sm:$0xf0]  ;;  %v16123_v13 = vld [vmem:[#allocation6 + $0x64c] sm:$0xf0] }
 0x1ba   :  { %v16466_v32 = vld [vmem:[#allocation6 + $0x110c] sm:$0xf]  ;;  %v14592_v38 = vor.u32 %v16882_v29, %v14589_v30  ;;  %7210 = vmatpush.bf16.msrb.mxu2 %v14080_v34  ;;  %v6944_v29 = vadd.f32 %v6943_v2, %v6931_v23  ;;  %v11716_v30 = vor.u32 %v16171_v19, %v11715_v14  ;;  %v16155_v34 = vld [vmem:[#allocation6 + $0x74c] sm:$0xf0] }
 0x1bb   :  { %v12925_v33 = vld [vmem:[#allocation6 + $0x1148] sm:$0xf0]  ;;  %v16267_v19 = vld [vmem:[#allocation6 + $0xacc] sm:$0xf0] }
 0x1bc   :  { %v16594_v35 = vld [vmem:[#allocation6 + $0x150c] sm:$0xf]  ;;  %v12928_v42 = vor.u32 %v16466_v32, %v12925_v33  ;;  %7223 = vmatpush.bf16.msrb.mxu3 %v14592_v38  ;;  %v16027_v32 = vld [vmem:[#allocation6 + $0x34c] sm:$0xf0] }
 0x1bd   :  { %v13437_v36 = vld [vmem:[#allocation6 + $0x1548] sm:$0xf0]  ;;  %v11651_v33 = vld [vmem:[#allocation6 + $0x710] sm:$0xf] }
 0x1be   :  { %v16738_v39 = vld [vmem:[#allocation6 + $0x198c] sm:$0xf]  ;;  %v13440_v48 = vor.u32 %v16594_v35, %v13437_v36  ;;  %7186 = vmatpush.bf16.msrb.mxu0 %v12928_v42  ;;  %v16299_v42 = vld [vmem:[#allocation6 + $0xbcc] sm:$0xf0] }
 0x1bf   :  { %v14013_v40 = vld [vmem:[#allocation6 + $0x19c8] sm:$0xf0]  ;;  %v12611_v2 = vld [vmem:[#allocation6 + $0xe90] sm:$0xf] }
 0x1c0   :  { %v16866_v45 = vld [vmem:[#allocation6 + $0x1d8c] sm:$0xf]  ;;  %v14016_v53 = vor.u32 %v16738_v39, %v14013_v40  ;;  %7199 = vmatpush.bf16.msrb.mxu1 %v13440_v48  ;;  %v6906_v39 = vpop.f32.mrf.mxu2  ;;  %v12739_v48 = vld [vmem:[#allocation6 + $0xf90] sm:$0xf] }
 0x1c1   :  { %v14525_v46 = vld [vmem:[#allocation6 + $0x1dc8] sm:$0xf0]  ;;  %v16379_v39 = vld [vmem:[#allocation6 + $0xe4c] sm:$0xf0] }
 0x1c2   :  { %v16450_v51 = vld [vmem:[#allocation6 + $0x108c] sm:$0xf]  ;;  %v14528_v56 = vor.u32 %v16866_v45, %v14525_v46  ;;  %7211 = vmatpush.bf16.msrb.mxu2 %v14016_v53  ;;  %v6919_v45 = vpop.f32.mrf.mxu3  ;;  %v11140_v46 = vor.u32 %v16027_v32, %v11139_v11 }
 0x1c3   :  { %v12861_v52 = vld [vmem:[#allocation6 + $0x10c8] sm:$0xf0] }
 0x1c4   :  { %v16578_v54 = vld [vmem:[#allocation6 + $0x148c] sm:$0xf]  ;;  %v12864_v61 = vor.u32 %v16450_v51, %v12861_v52  ;;  %7224 = vmatpush.bf16.msrb.mxu3 %v14528_v56  ;;  %v16427_v51 = vld [vmem:[#allocation6 + $0xfcc] sm:$0xf0]  ;;  %v11652_v52 = vor.u32 %v16155_v34, %v11651_v33  ;;  %v6932_v56 = vpop.f32.mrf.mxu0 }
 0x1c5   :  { %v13373_v55 = vld [vmem:[#allocation6 + $0x14c8] sm:$0xf0]  ;;  %v12740_v62 = vor.u32 %v16427_v51, %v12739_v48  ;;  %v12035_v33 = vld [vmem:[#allocation6 + $0xa10] sm:$0xf] }
 0x1c6   :  { %v16722_v57 = vld [vmem:[#allocation6 + $0x190c] sm:$0xf]  ;;  %v13376_v4 = vor.u32 %v16578_v54, %v13373_v55  ;;  %7187 = vmatpush.bf16.msrb.mxu0 %v12864_v61  ;;  %v11075_v54 = vld [vmem:[#allocation6 + $0x290] sm:$0xf]  ;;  %v6945_v61 = vpop.f32.mrf.mxu1 }
 0x1c7   :  { %v13949_v58 = vld [vmem:[#allocation6 + $0x1948] sm:$0xf0]  ;;  %v16011_v55 = vld [vmem:[#allocation6 + $0x2cc] sm:$0xf0] }
 0x1c8   :  { %v16850_v59 = vld [vmem:[#allocation6 + $0x1d0c] sm:$0xf]  ;;  %v13952_v10 = vor.u32 %v16722_v57, %v13949_v58  ;;  %7200 = vmatpush.bf16.msrb.mxu1 %v13376_v4  ;;  %v12228_v58 = vor.u32 %v16299_v42, %v12227_v50  ;;  %v11076_v1 = vor.u32 %v16011_v55, %v11075_v54  ;;  %v16411_v4 = vld [vmem:[#allocation6 + $0xf4c] sm:$0xf0]  ;;  %v6956_v14 = vpop.f32.mrf.mxu2 }
 0x1c9   :  { %v14461_v63 = vld [vmem:[#allocation6 + $0x1d48] sm:$0xf0]  ;;  %v12676_v16 = vor.u32 %v16411_v4, %v12675_v3  ;;  %v16251_v34 = vld [vmem:[#allocation6 + $0xa4c] sm:$0xf0] }
 0x1ca   :  { %v16434_v0 = vld [vmem:[#allocation6 + $0x100c] sm:$0xf]  ;;  %v14464_v18 = vor.u32 %v16850_v59, %v14461_v63  ;;  %7212 = vmatpush.bf16.msrb.mxu2 %v13952_v10  ;;  %v11587_v59 = vld [vmem:[#allocation6 + $0x690] sm:$0xf] }
 0x1cb   :  { %v12797_v5 = vld [vmem:[#allocation6 + $0x1048] sm:$0xf0]  ;;  %v12163_v63 = vld [vmem:[#allocation6 + $0xb10] sm:$0xf] }
 0x1cc   :  { %v16562_v7 = vld [vmem:[#allocation6 + $0x140c] sm:$0xf]  ;;  %v12800_v24 = vor.u32 %v16434_v0, %v12797_v5  ;;  %7225 = vmatpush.bf16.msrb.mxu3 %v14464_v18  ;;  %v16283_v0 = vld [vmem:[#allocation6 + $0xb4c] sm:$0xf0]  ;;  %v11588_v5 = vor.u32 %v16139_v60, %v11587_v59 }
 0x1cd   :  { %v13309_v8 = vld [vmem:[#allocation6 + $0x1448] sm:$0xf0]  ;;  %v12164_v10 = vor.u32 %v16283_v0, %v12163_v63  ;;  %v12099_v18 = vld [vmem:[#allocation6 + $0xa90] sm:$0xf] }
 0x1ce   :  { %v16706_v20 = vld [vmem:[#allocation6 + $0x188c] sm:$0xf]  ;;  %v13312_v27 = vor.u32 %v16562_v7, %v13309_v8  ;;  %7188 = vmatpush.bf16.msrb.mxu0 %v12800_v24  ;;  %v11011_v7 = vld [vmem:[#allocation6 + $0x210] sm:$0xf]  ;;  %v12100_v11 = vor.u32 %v16267_v19, %v12099_v18 }
 0x1cf   :  { %v13885_v21 = vld [vmem:[#allocation6 + $0x18c8] sm:$0xf0]  ;;  %v15995_v8 = vld [vmem:[#allocation6 + $0x24c] sm:$0xf0] }
 0x1d0   :  { %v16834_v25 = vld [vmem:[#allocation6 + $0x1c8c] sm:$0xf]  ;;  %v13888_v31 = vor.u32 %v16706_v20, %v13885_v21  ;;  %7201 = vmatpush.bf16.msrb.mxu1 %v13312_v27  ;;  %v6957_v20 = vadd.f32 %v6956_v14, %v6944_v29  ;;  %v6969_v21 = vpop.f32.mrf.mxu3  ;;  %v11012_v23 = vor.u32 %v15995_v8, %v11011_v7  ;;  %v16395_v24 = vld [vmem:[#allocation6 + $0xecc] sm:$0xf0]  ;;  %v6982_v29 = vpop.f32.mrf.mxu0 }
 0x1d1   :  { %v14397_v26 = vld [vmem:[#allocation6 + $0x1cc8] sm:$0xf0]  ;;  %7189 = vmatmul.bf16.vlgmr.msrb.gmra.mxu0 %v17475_v6  ;;  %v15979_v27 = vld [vmem:[#allocation6 + $0x1cc] sm:$0xf0]  ;;  %v12612_v32 = vor.u32 %v16395_v24, %v12611_v2 }
 0x1d2   :  { %v14400_v35 = vor.u32 %v16834_v25, %v14397_v26  ;;  %v16690_v36 = vld [vmem:[#allocation6 + $0x180c] sm:$0xf]  ;;  %7233 = vmatpush.bf16.msra.mxu0 %v11204_v28  ;;  %7213 = vmatpush.bf16.msrb.mxu2 %v13888_v31  ;;  %v11524_v25 = vor.u32 %v16123_v13, %v11523_v12  ;;  %v10947_v26 = vld [vmem:[#allocation6 + $0x190] sm:$0xf]  ;;  %v6970_v28 = vadd.f32 %v6969_v21, %v6957_v20 }
 0x1d3   :  { %v13821_v37 = vld [vmem:[#allocation6 + $0x1848] sm:$0xf0]  ;;  %7202 = vmatmul.bf16.vlgmr.msrb.gmra.mxu1 %v17478_v9  ;;  %v16107_v31 = vld [vmem:[#allocation6 + $0x5cc] sm:$0xf0] }
 0x1d4   :  { %v16818_v38 = vld [vmem:[#allocation6 + $0x1c0c] sm:$0xf]  ;;  %7246 = vmatpush.bf16.msra.mxu1 %v11716_v30  ;;  %v13824_v53 = vor.u32 %v16690_v36, %v13821_v37  ;;  %7226 = vmatpush.bf16.msrb.mxu3 %v14400_v35  ;;  %v11459_v30 = vld [vmem:[#allocation6 + $0x590] sm:$0xf]  ;;  %v6983_v35 = vadd.f32 %v6982_v29, %v6970_v28  ;;  %v6995_v36 = vpop.f32.mrf.mxu1  ;;  %v10948_v37 = vor.u32 %v15979_v27, %v10947_v26 }
 0x1d5   :  { %v14333_v40 = vld [vmem:[#allocation6 + $0x1c48] sm:$0xf0]  ;;  %v10883_v50 = vld [vmem:[#allocation6 + $0x110] sm:$0xf] }
 0x1d6   :  { %v14336_v57 = vor.u32 %v16818_v38, %v14333_v40  ;;  %7234 = vmatpush.bf16.msra.mxu0 %v11140_v46  ;;  %7214 = vmatpush.bf16.msrb.mxu2 %v13824_v53  ;;  %v12547_v38 = vld [vmem:[#allocation6 + $0xe10] sm:$0xf]  ;;  %v11460_v40 = vor.u32 %v16107_v31, %v11459_v30  ;;  %v6996_v45 = vadd.f32 %v6995_v36, %v6983_v35 }
 0x1d7   :  { %v15963_v42 = vld [vmem:[#allocation6 + $0x14c] sm:$0xf0]  ;;  %v12036_v46 = vor.u32 %v16251_v34, %v12035_v33  ;;  %v12548_v53 = vor.u32 %v16379_v39, %v12547_v38 }
 0x1d8   :  { %7247 = vmatpush.bf16.msra.mxu1 %v11652_v52  ;;  %7227 = vmatpush.bf16.msrb.mxu3 %v14336_v57  ;;  %v11395_v48 = vld [vmem:[#allocation6 + $0x510] sm:$0xf]  ;;  %v6958_v52 = vpop.f32.mrf.mxu2  ;;  %v6971_v56 = vpop.f32.mrf.mxu3  ;;  %v10884_v57 = vor.u32 %v15963_v42, %v10883_v50 }
 0x1d9   :  { %7215 = vmatmul.bf16.vlgmr.msrb.gmra.mxu2 %v17482_v41  ;;  %v16091_v51 = vld [vmem:[#allocation6 + $0x54c] sm:$0xf0]  ;;  %v6984_v3 = vpop.f32.mrf.mxu0 }
 0x1da   :  { %7259 = vmatpush.bf16.msra.mxu2 %v12228_v58  ;;  %7235 = vmatpush.bf16.msra.mxu0 %v11076_v1  ;;  %v11971_v54 = vld [vmem:[#allocation6 + $0x990] sm:$0xf]  ;;  %v11396_v60 = vor.u32 %v16091_v51, %v11395_v48 }
 0x1db   :  { %7228 = vmatmul.bf16.vlgmr.msrb.gmra.mxu3 %v17484_v44  ;;  %v16235_v55 = vld [vmem:[#allocation6 + $0x9cc] sm:$0xf0] }
 0x1dc   :  { %7272 = vmatpush.bf16.msra.mxu3 %v12740_v62  ;;  %7248 = vmatpush.bf16.msra.mxu1 %v11588_v5  ;;  %v12483_v58 = vld [vmem:[#allocation6 + $0xd90] sm:$0xf]  ;;  %v11972_v63 = vor.u32 %v16235_v55, %v11971_v54  ;;  %v6997_v8 = vpop.f32.mrf.mxu1 }
 0x1dd   :  { %v16363_v59 = vld [vmem:[#allocation6 + $0xdcc] sm:$0xf0] }
 0x1de   :  { %7260 = vmatpush.bf16.msra.mxu2 %v12164_v10  ;;  %7236 = vmatpush.bf16.msra.mxu0 %v11012_v23  ;;  %v10819_v61 = vld [vmem:[#allocation6 + $0x90] sm:$0xf]  ;;  %v12484_v4 = vor.u32 %v16363_v59, %v12483_v58 }
 0x1df   :  { %v15947_v62 = vld [vmem:[#allocation6 + $0xcc] sm:$0xf0] }
 0x1e0   :  { %7273 = vmatpush.bf16.msra.mxu3 %v12676_v16  ;;  %7249 = vmatpush.bf16.msra.mxu1 %v11524_v25  ;;  %v11331_v0 = vld [vmem:[#allocation6 + $0x490] sm:$0xf]  ;;  %v10820_v10 = vor.u32 %v15947_v62, %v10819_v61  ;;  %v7021_v30 = vpop.f32.mrf.mxu3 }
 0x1e1   :  { %v16075_v1 = vld [vmem:[#allocation6 + $0x4cc] sm:$0xf0] }
 0x1e2   :  { %7261 = vmatpush.bf16.msra.mxu2 %v12100_v11  ;;  %7237 = vmatpush.bf16.msra.mxu0 %v10948_v37  ;;  %v11907_v5 = vld [vmem:[#allocation6 + $0x910] sm:$0xf]  ;;  %v11332_v16 = vor.u32 %v16075_v1, %v11331_v0  ;;  %v7008_v11 = vpop.f32.mrf.mxu2 }
 0x1e3   :  { %v16219_v7 = vld [vmem:[#allocation6 + $0x94c] sm:$0xf0]  ;;  %v7009_v33 = vadd.f32 %v7008_v11, %v6996_v45 }
 0x1e4   :  { %7274 = vmatpush.bf16.msra.mxu3 %v12612_v32  ;;  %7250 = vmatpush.bf16.msra.mxu1 %v11460_v40  ;;  %v12419_v12 = vld [vmem:[#allocation6 + $0xd10] sm:$0xf]  ;;  %v11908_v21 = vor.u32 %v16219_v7, %v11907_v5 }
 0x1e5   :  { %v16347_v13 = vld [vmem:[#allocation6 + $0xd4c] sm:$0xf0]  ;;  %v17521_v42 = vadd.f32 %v7021_v30, %v7009_v33 }
 0x1e6   :  { %7262 = vmatpush.bf16.msra.mxu2 %v12036_v46  ;;  %7238 = vmatpush.bf16.msra.mxu0 %v10884_v57  ;;  %v10755_v14 = vld [vmem:[#allocation6 + $0x10] sm:$0xf]  ;;  %v12420_v25 = vor.u32 %v16347_v13, %v12419_v12 }
 0x1e7   :  { %v15931_v18 = vld [vmem:[#allocation6 + $0x4c] sm:$0xf0] }
 0x1e8   :  { %7275 = vmatpush.bf16.msra.mxu3 %v12548_v53  ;;  %7251 = vmatpush.bf16.msra.mxu1 %v11396_v60  ;;  %v11267_v19 = vld [vmem:[#allocation6 + $0x410] sm:$0xf]  ;;  %v10756_v31 = vor.u32 %v15931_v18, %v10755_v14 }
 0x1e9   :  { %v16059_v20 = vld [vmem:[#allocation6 + $0x44c] sm:$0xf0] }
 0x1ea   :  { %7263 = vmatpush.bf16.msra.mxu2 %v11972_v63  ;;  %v13251_v23 = vld [vmem:[#allocation6 + $0x1390] sm:$0xf]  ;;  %7239 = vmatpush.bf16.msra.mxu0 %v10820_v10  ;;  %v11268_v34 = vor.u32 %v16059_v20, %v11267_v19  ;;  %v7010_v3 = vpop.f32.mrf.mxu2 }
 0x1eb   :  { %v16555_v2 = vld [vmem:[#allocation6 + $0x13cc] sm:$0xf0] }
 0x1ec   :  { %v13763_v24 = vld [vmem:[#allocation6 + $0x1790] sm:$0xf]  ;;  %7276 = vmatpush.bf16.msra.mxu3 %v12484_v4  ;;  %7252 = vmatpush.bf16.msra.mxu1 %v11332_v16  ;;  %v13252_v35 = vor.u32 %v16555_v2, %v13251_v23  ;;  %v7023_v4 = vpop.f32.mrf.mxu3 }
 0x1ed   :  { %v16683_v26 = vld [vmem:[#allocation6 + $0x17cc] sm:$0xf0] }
 0x1ee   :  { %v11843_v27 = vld [vmem:[#allocation6 + $0x890] sm:$0xf]  ;;  %7264 = vmatpush.bf16.msra.mxu2 %v11908_v21  ;;  %v13764_v37 = vor.u32 %v16683_v26, %v13763_v24  ;;  %7240 = vmatpush.bf16.msra.mxu0 %v10756_v31 }
 0x1ef   :  { %v16203_v28 = vld [vmem:[#allocation6 + $0x8cc] sm:$0xf0] }
 0x1f0   :  { %v12355_v29 = vld [vmem:[#allocation6 + $0xc90] sm:$0xf]  ;;  %v11844_v38 = vor.u32 %v16203_v28, %v11843_v27  ;;  %7277 = vmatpush.bf16.msra.mxu3 %v12420_v25  ;;  %7253 = vmatpush.bf16.msra.mxu1 %v11268_v34  ;;  %v1667_v25 = vperm.slane %v17500_v47, 2  ;;  %v7034_v34 = vpop.f32.mrf.mxu0  ;;  %v7047_v47 = vpop.f32.mrf.mxu1 }
 0x1f1   :  { %v16331_v32 = vld [vmem:[#allocation6 + $0xccc] sm:$0xf0]  ;;  %7241 = vmatmul.bf16.vlgmr.msra.gmra.mxu0 %v17459_v17 }
 0x1f2   :  { %v13187_v36 = vld [vmem:[#allocation6 + $0x1310] sm:$0xf]  ;;  %v12356_v46 = vor.u32 %v16331_v32, %v12355_v29  ;;  %7285 = vmatpush.bf16.msrb.mxu0 %v13252_v35  ;;  %7265 = vmatpush.bf16.msra.mxu2 %v11844_v38  ;;  %v7035_v38 = vadd.f32 %v7034_v34, %v1667_v25  ;;  %v16163_v25 = vld [vmem:[#allocation6 + $0x794] sm:$0xf] }
 0x1f3   :  { %v16539_v39 = vld [vmem:[#allocation6 + $0x134c] sm:$0xf0]  ;;  %7254 = vmatmul.bf16.vlgmr.msra.gmra.mxu1 %v17462_v22 }
 0x1f4   :  { %v13699_v40 = vld [vmem:[#allocation6 + $0x1710] sm:$0xf]  ;;  %v13188_v55 = vor.u32 %v16539_v39, %v13187_v36  ;;  %7298 = vmatpush.bf16.msrb.mxu1 %v13764_v37  ;;  %7278 = vmatpush.bf16.msra.mxu3 %v12356_v46 }
 0x1f5   :  { %v16667_v50 = vld [vmem:[#allocation6 + $0x174c] sm:$0xf0] }
 0x1f6   :  { %v11779_v48 = vld [vmem:[#allocation6 + $0x810] sm:$0xf]  ;;  %v13700_v58 = vor.u32 %v16667_v50, %v13699_v40  ;;  %7286 = vmatpush.bf16.msrb.mxu0 %v13188_v55 }
 0x1f7   :  { %v16187_v51 = vld [vmem:[#allocation6 + $0x84c] sm:$0xf0] }
 0x1f8   :  { %v12291_v52 = vld [vmem:[#allocation6 + $0xc10] sm:$0xf]  ;;  %v11780_v59 = vor.u32 %v16187_v51, %v11779_v48  ;;  %7299 = vmatpush.bf16.msrb.mxu1 %v13700_v58  ;;  %v7036_v4 = vpop.f32.mrf.mxu0 }
 0x1f9   :  { %v16315_v53 = vld [vmem:[#allocation6 + $0xc4c] sm:$0xf0]  ;;  %v11589_v4 = vld [vmem:[#allocation6 + $0x6d0] sm:$0xf0] }
 0x1fa   :  { %v14275_v45 = vld [vmem:[#allocation6 + $0x1b90] sm:$0xf]  ;;  %v12292_v62 = vor.u32 %v16315_v53, %v12291_v52  ;;  %7266 = vmatpush.bf16.msra.mxu2 %v11780_v59  ;;  %v7048_v52 = vadd.f32 %v7047_v47, %v7035_v38 }
 0x1fb   :  { %v16811_v54 = vld [vmem:[#allocation6 + $0x1bcc] sm:$0xf0] }
 0x1fc   :  { %v14787_v56 = vld [vmem:[#allocation6 + $0x1f90] sm:$0xf]  ;;  %v14276_v63 = vor.u32 %v16811_v54, %v14275_v45  ;;  %7279 = vmatpush.bf16.msra.mxu3 %v12292_v62 }
 0x1fd   :  { %v16939_v57 = vld [vmem:[#allocation6 + $0x1fcc] sm:$0xf0]  ;;  %7267 = vmatmul.bf16.vlgmr.msra.gmra.mxu2 %v17466_v43 }
 0x1fe   :  { %v13123_v60 = vld [vmem:[#allocation6 + $0x1290] sm:$0xf]  ;;  %v14788_v5 = vor.u32 %v16939_v57, %v14787_v56  ;;  %7311 = vmatpush.bf16.msrb.mxu2 %v14276_v63 }
 0x1ff   :  { %v16523_v61 = vld [vmem:[#allocation6 + $0x12cc] sm:$0xf0]  ;;  %7280 = vmatmul.bf16.vlgmr.msra.gmra.mxu3 %v17468_v49 }
 0x200   :  { %v13635_v0 = vld [vmem:[#allocation6 + $0x1690] sm:$0xf]  ;;  %v13124_v10 = vor.u32 %v16523_v61, %v13123_v60  ;;  %7324 = vmatpush.bf16.msrb.mxu3 %v14788_v5 }
 0x201   :  { %v16651_v1 = vld [vmem:[#allocation6 + $0x16cc] sm:$0xf0] }
 0x202   :  { %v14211_v7 = vld [vmem:[#allocation6 + $0x1b10] sm:$0xf]  ;;  %v13636_v14 = vor.u32 %v16651_v1, %v13635_v0  ;;  %7287 = vmatpush.bf16.msrb.mxu0 %v13124_v10  ;;  %v7049_v10 = vpop.f32.mrf.mxu1 }
 0x203   :  { %v16795_v8 = vld [vmem:[#allocation6 + $0x1b4c] sm:$0xf0]  ;;  %v12165_v10 = vld [vmem:[#allocation6 + $0xb50] sm:$0xf0] }
 0x204   :  { %v14723_v12 = vld [vmem:[#allocation6 + $0x1f10] sm:$0xf]  ;;  %v14212_v19 = vor.u32 %v16795_v8, %v14211_v7  ;;  %7300 = vmatpush.bf16.msrb.mxu1 %v13636_v14 }
 0x205   :  { %v16923_v13 = vld [vmem:[#allocation6 + $0x1f4c] sm:$0xf0] }
 0x206   :  { %v13059_v16 = vld [vmem:[#allocation6 + $0x1210] sm:$0xf]  ;;  %v14724_v23 = vor.u32 %v16923_v13, %v14723_v12  ;;  %7312 = vmatpush.bf16.msrb.mxu2 %v14212_v19 }
 0x207   :  { %v16507_v18 = vld [vmem:[#allocation6 + $0x124c] sm:$0xf0] }
 0x208   :  { %v13571_v20 = vld [vmem:[#allocation6 + $0x1610] sm:$0xf]  ;;  %v13060_v26 = vor.u32 %v16507_v18, %v13059_v16  ;;  %7325 = vmatpush.bf16.msrb.mxu3 %v14724_v23 }
 0x209   :  { %v16635_v21 = vld [vmem:[#allocation6 + $0x164c] sm:$0xf0] }
 0x20a   :  { %v14147_v2 = vld [vmem:[#allocation6 + $0x1a90] sm:$0xf]  ;;  %v13572_v11 = vor.u32 %v16635_v21, %v13571_v20  ;;  %7288 = vmatpush.bf16.msrb.mxu0 %v13060_v26  ;;  %v7060_v26 = vpop.f32.mrf.mxu2 }
 0x20b   :  { %v16779_v24 = vld [vmem:[#allocation6 + $0x1acc] sm:$0xf0] }
 0x20c   :  { %v14659_v27 = vld [vmem:[#allocation6 + $0x1e90] sm:$0xf]  ;;  %v14148_v29 = vor.u32 %v16779_v24, %v14147_v2  ;;  %7301 = vmatpush.bf16.msrb.mxu1 %v13572_v11  ;;  %v16035_v2 = vld [vmem:[#allocation6 + $0x394] sm:$0xf] }
 0x20d   :  { %v16907_v28 = vld [vmem:[#allocation6 + $0x1ecc] sm:$0xf0]  ;;  %v11205_v24 = vld [vmem:[#allocation6 + $0x3d0] sm:$0xf0] }
 0x20e   :  { %v12995_v30 = vld [vmem:[#allocation6 + $0x1190] sm:$0xf]  ;;  %v14660_v35 = vor.u32 %v16907_v28, %v14659_v27  ;;  %7313 = vmatpush.bf16.msrb.mxu2 %v14148_v29  ;;  %v11717_v28 = vld [vmem:[#allocation6 + $0x7d0] sm:$0xf0]  ;;  %v7073_v29 = vpop.f32.mrf.mxu3 }
 0x20f   :  { %v16491_v31 = vld [vmem:[#allocation6 + $0x11cc] sm:$0xf0]  ;;  %v11720_v47 = vor.u32 %v16163_v25, %v11717_v28  ;;  %v12101_v25 = vld [vmem:[#allocation6 + $0xad0] sm:$0xf0] }
 0x210   :  { %v13507_v32 = vld [vmem:[#allocation6 + $0x1590] sm:$0xf]  ;;  %v12996_v39 = vor.u32 %v16491_v31, %v12995_v30  ;;  %7326 = vmatpush.bf16.msrb.mxu3 %v14660_v35  ;;  %v7061_v31 = vadd.f32 %v7060_v26, %v7048_v52  ;;  %v12613_v28 = vld [vmem:[#allocation6 + $0xed0] sm:$0xf0] }
 0x211   :  { %v16619_v33 = vld [vmem:[#allocation6 + $0x15cc] sm:$0xf0] }
 0x212   :  { %v14083_v36 = vld [vmem:[#allocation6 + $0x1a10] sm:$0xf]  ;;  %v13508_v46 = vor.u32 %v16619_v33, %v13507_v32  ;;  %7289 = vmatpush.bf16.msrb.mxu0 %v12996_v39  ;;  %v17528_v38 = vadd.f32 %v7073_v29, %v7061_v31  ;;  %v10949_v31 = vld [vmem:[#allocation6 + $0x1d0] sm:$0xf0] }
 0x213   :  { %v16763_v37 = vld [vmem:[#allocation6 + $0x1a4c] sm:$0xf0] }
 0x214   :  { %v14595_v40 = vld [vmem:[#allocation6 + $0x1e10] sm:$0xf]  ;;  %v14084_v53 = vor.u32 %v16763_v37, %v14083_v36  ;;  %7302 = vmatpush.bf16.msrb.mxu1 %v13508_v46  ;;  %v11208_v36 = vor.u32 %v16035_v2, %v11205_v24  ;;  %v16019_v37 = vld [vmem:[#allocation6 + $0x314] sm:$0xf] }
 0x215   :  { %v16891_v50 = vld [vmem:[#allocation6 + $0x1e4c] sm:$0xf0]  ;;  %v11653_v46 = vld [vmem:[#allocation6 + $0x750] sm:$0xf0] }
 0x216   :  { %v12931_v48 = vld [vmem:[#allocation6 + $0x1110] sm:$0xf]  ;;  %v14596_v55 = vor.u32 %v16891_v50, %v14595_v40  ;;  %7314 = vmatpush.bf16.msrb.mxu2 %v14084_v53  ;;  %v11141_v40 = vld [vmem:[#allocation6 + $0x350] sm:$0xf0] }
 0x217   :  { %v16475_v51 = vld [vmem:[#allocation6 + $0x114c] sm:$0xf0]  ;;  %v16147_v50 = vld [vmem:[#allocation6 + $0x714] sm:$0xf] }
 0x218   :  { %v13443_v45 = vld [vmem:[#allocation6 + $0x1510] sm:$0xf]  ;;  %v12932_v58 = vor.u32 %v16475_v51, %v12931_v48  ;;  %7327 = vmatpush.bf16.msrb.mxu3 %v14596_v55  ;;  %v12229_v55 = vld [vmem:[#allocation6 + $0xbd0] sm:$0xf0] }
 0x219   :  { %v16603_v54 = vld [vmem:[#allocation6 + $0x154c] sm:$0xf0]  ;;  %v16259_v24 = vld [vmem:[#allocation6 + $0xa94] sm:$0xf] }
 0x21a   :  { %v14019_v56 = vld [vmem:[#allocation6 + $0x1990] sm:$0xf]  ;;  %v13444_v61 = vor.u32 %v16603_v54, %v13443_v45  ;;  %7290 = vmatpush.bf16.msrb.mxu0 %v12932_v58  ;;  %v16291_v54 = vld [vmem:[#allocation6 + $0xb94] sm:$0xf]  ;;  %v12104_v29 = vor.u32 %v16259_v24, %v12101_v25 }
 0x21b   :  { %v16747_v57 = vld [vmem:[#allocation6 + $0x19cc] sm:$0xf0]  ;;  %v12741_v58 = vld [vmem:[#allocation6 + $0xfd0] sm:$0xf0] }
 0x21c   :  { %v14531_v59 = vld [vmem:[#allocation6 + $0x1d90] sm:$0xf]  ;;  %v14020_v0 = vor.u32 %v16747_v57, %v14019_v56  ;;  %7303 = vmatpush.bf16.msrb.mxu1 %v13444_v61  ;;  %v11144_v56 = vor.u32 %v16019_v37, %v11141_v40  ;;  %v16419_v57 = vld [vmem:[#allocation6 + $0xf94] sm:$0xf] }
 0x21d   :  { %v16875_v60 = vld [vmem:[#allocation6 + $0x1dcc] sm:$0xf0]  ;;  %v16003_v61 = vld [vmem:[#allocation6 + $0x294] sm:$0xf] }
 0x21e   :  { %v12867_v62 = vld [vmem:[#allocation6 + $0x1090] sm:$0xf]  ;;  %v14532_v5 = vor.u32 %v16875_v60, %v14531_v59  ;;  %7315 = vmatpush.bf16.msrb.mxu2 %v14020_v0  ;;  %v11656_v59 = vor.u32 %v16147_v50, %v11653_v46  ;;  %v12037_v37 = vld [vmem:[#allocation6 + $0xa50] sm:$0xf0] }
 0x21f   :  { %v16459_v63 = vld [vmem:[#allocation6 + $0x10cc] sm:$0xf0]  ;;  %v16371_v50 = vld [vmem:[#allocation6 + $0xe14] sm:$0xf] }
 0x220   :  { %v13379_v1 = vld [vmem:[#allocation6 + $0x1490] sm:$0xf]  ;;  %v12868_v12 = vor.u32 %v16459_v63, %v12867_v62  ;;  %7328 = vmatpush.bf16.msrb.mxu3 %v14532_v5  ;;  %v11077_v62 = vld [vmem:[#allocation6 + $0x2d0] sm:$0xf0]  ;;  %v7062_v63 = vpop.f32.mrf.mxu2  ;;  %v7075_v5 = vpop.f32.mrf.mxu3 }
 0x221   :  { %v16587_v3 = vld [vmem:[#allocation6 + $0x14cc] sm:$0xf0]  ;;  %v12549_v46 = vld [vmem:[#allocation6 + $0xe50] sm:$0xf0] }
 0x222   :  { %v13955_v7 = vld [vmem:[#allocation6 + $0x1910] sm:$0xf]  ;;  %v13380_v18 = vor.u32 %v16587_v3, %v13379_v1  ;;  %7291 = vmatpush.bf16.msrb.mxu0 %v12868_v12  ;;  %v12232_v1 = vor.u32 %v16291_v54, %v12229_v55  ;;  %v16131_v3 = vld [vmem:[#allocation6 + $0x694] sm:$0xf]  ;;  %v11080_v12 = vor.u32 %v16003_v61, %v11077_v62 }
 0x223   :  { %v16731_v8 = vld [vmem:[#allocation6 + $0x194c] sm:$0xf0]  ;;  %v16083_v54 = vld [vmem:[#allocation6 + $0x514] sm:$0xf] }
 0x224   :  { %v14467_v13 = vld [vmem:[#allocation6 + $0x1d10] sm:$0xf]  ;;  %v13956_v23 = vor.u32 %v16731_v8, %v13955_v7  ;;  %7304 = vmatpush.bf16.msrb.mxu1 %v13380_v18  ;;  %v12744_v7 = vor.u32 %v16419_v57, %v12741_v58  ;;  %v16275_v8 = vld [vmem:[#allocation6 + $0xb14] sm:$0xf] }
 0x225   :  { %v16859_v14 = vld [vmem:[#allocation6 + $0x1d4c] sm:$0xf0]  ;;  %v15987_v18 = vld [vmem:[#allocation6 + $0x214] sm:$0xf] }
 0x226   :  { %v12803_v16 = vld [vmem:[#allocation6 + $0x1010] sm:$0xf]  ;;  %v14468_v27 = vor.u32 %v16859_v14, %v14467_v13  ;;  %7316 = vmatpush.bf16.msrb.mxu2 %v13956_v23  ;;  %v16403_v13 = vld [vmem:[#allocation6 + $0xf14] sm:$0xf] }
 0x227   :  { %v16443_v19 = vld [vmem:[#allocation6 + $0x104c] sm:$0xf0]  ;;  %v12677_v14 = vld [vmem:[#allocation6 + $0xf50] sm:$0xf0] }
 0x228   :  { %v13315_v20 = vld [vmem:[#allocation6 + $0x1410] sm:$0xf]  ;;  %v12804_v32 = vor.u32 %v16443_v19, %v12803_v16  ;;  %7329 = vmatpush.bf16.msrb.mxu3 %v14468_v27  ;;  %v11592_v16 = vor.u32 %v16131_v3, %v11589_v4  ;;  %v11013_v19 = vld [vmem:[#allocation6 + $0x250] sm:$0xf0]  ;;  %v12680_v2 = vor.u32 %v16403_v13, %v12677_v14 }
 0x229   :  { %v16571_v21 = vld [vmem:[#allocation6 + $0x144c] sm:$0xf0]  ;;  %v11525_v23 = vld [vmem:[#allocation6 + $0x650] sm:$0xf0]  ;;  %v11016_v26 = vor.u32 %v15987_v18, %v11013_v19 }
 0x22a   :  { %v13891_v11 = vld [vmem:[#allocation6 + $0x1890] sm:$0xf]  ;;  %v13316_v35 = vor.u32 %v16571_v21, %v13315_v20  ;;  %7292 = vmatpush.bf16.msrb.mxu0 %v12804_v32  ;;  %v12168_v20 = vor.u32 %v16275_v8, %v12165_v10  ;;  %v16115_v21 = vld [vmem:[#allocation6 + $0x614] sm:$0xf] }
 0x22b   :  { %v16715_v30 = vld [vmem:[#allocation6 + $0x18cc] sm:$0xf0]  ;;  %v16387_v27 = vld [vmem:[#allocation6 + $0xe94] sm:$0xf] }
 0x22c   :  { %v14403_v33 = vld [vmem:[#allocation6 + $0x1c90] sm:$0xf]  ;;  %v13892_v39 = vor.u32 %v16715_v30, %v13891_v11  ;;  %7305 = vmatpush.bf16.msrb.mxu1 %v13316_v35  ;;  %v11528_v11 = vor.u32 %v16115_v21, %v11525_v23  ;;  %v15971_v30 = vld [vmem:[#allocation6 + $0x194] sm:$0xf]  ;;  %v12616_v35 = vor.u32 %v16387_v27, %v12613_v28 }
 0x22d   :  { %v16843_v34 = vld [vmem:[#allocation6 + $0x1ccc] sm:$0xf0]  ;;  %7293 = vmatmul.bf16.vlgmr.msrb.gmra.mxu0 %v17475_v6  ;;  %v16099_v32 = vld [vmem:[#allocation6 + $0x594] sm:$0xf]  ;;  %v10952_v40 = vor.u32 %v15971_v30, %v10949_v31 }
 0x22e   :  { %v14404_v48 = vor.u32 %v16843_v34, %v14403_v33  ;;  %v13827_v51 = vld [vmem:[#allocation6 + $0x1810] sm:$0xf]  ;;  %7337 = vmatpush.bf16.msra.mxu0 %v11208_v36  ;;  %7317 = vmatpush.bf16.msrb.mxu2 %v13892_v39  ;;  %v11461_v33 = vld [vmem:[#allocation6 + $0x5d0] sm:$0xf0]  ;;  %v7086_v34 = vpop.f32.mrf.mxu0  ;;  %v7099_v39 = vpop.f32.mrf.mxu1 }
 0x22f   :  { %v16699_v52 = vld [vmem:[#allocation6 + $0x184c] sm:$0xf0]  ;;  %7306 = vmatmul.bf16.vlgmr.msrb.gmra.mxu1 %v17478_v9  ;;  %v16243_v36 = vld [vmem:[#allocation6 + $0xa14] sm:$0xf] }
 0x230   :  { %v14339_v53 = vld [vmem:[#allocation6 + $0x1c10] sm:$0xf]  ;;  %7350 = vmatpush.bf16.msra.mxu1 %v11720_v47  ;;  %v13828_v60 = vor.u32 %v16699_v52, %v13827_v51  ;;  %7330 = vmatpush.bf16.msrb.mxu3 %v14404_v48  ;;  %v7087_v47 = vadd.f32 %v7086_v34, %v17528_v38  ;;  %v11464_v48 = vor.u32 %v16099_v32, %v11461_v33  ;;  %v15955_v51 = vld [vmem:[#allocation6 + $0x114] sm:$0xf] }
 0x231   :  { %v16827_v45 = vld [vmem:[#allocation6 + $0x1c4c] sm:$0xf0]  ;;  %v10885_v52 = vld [vmem:[#allocation6 + $0x150] sm:$0xf0] }
 0x232   :  { %v14340_v0 = vor.u32 %v16827_v45, %v14339_v53  ;;  %7338 = vmatpush.bf16.msra.mxu0 %v11144_v56  ;;  %7318 = vmatpush.bf16.msrb.mxu2 %v13828_v60  ;;  %v7100_v53 = vadd.f32 %v7099_v39, %v7087_v47  ;;  %v12040_v45 = vor.u32 %v16243_v36, %v12037_v37  ;;  %v11397_v55 = vld [vmem:[#allocation6 + $0x550] sm:$0xf0] }
 0x233   :  { %v12552_v56 = vor.u32 %v16371_v50, %v12549_v46  ;;  %v16227_v57 = vld [vmem:[#allocation6 + $0x994] sm:$0xf]  ;;  %v10888_v38 = vor.u32 %v15955_v51, %v10885_v52  ;;  %v11400_v61 = vor.u32 %v16083_v54, %v11397_v55 }
 0x234   :  { %7351 = vmatpush.bf16.msra.mxu1 %v11656_v59  ;;  %7331 = vmatpush.bf16.msrb.mxu3 %v14340_v0  ;;  %v11973_v58 = vld [vmem:[#allocation6 + $0x9d0] sm:$0xf0] }
 0x235   :  { %7319 = vmatmul.bf16.vlgmr.msrb.gmra.mxu2 %v17482_v41  ;;  %v16355_v59 = vld [vmem:[#allocation6 + $0xd94] sm:$0xf]  ;;  %v11976_v0 = vor.u32 %v16227_v57, %v11973_v58 }
 0x236   :  { %7363 = vmatpush.bf16.msra.mxu2 %v12232_v1  ;;  %7339 = vmatpush.bf16.msra.mxu0 %v11080_v12  ;;  %v12485_v60 = vld [vmem:[#allocation6 + $0xdd0] sm:$0xf0]  ;;  %v7088_v4 = vpop.f32.mrf.mxu0  ;;  %v7101_v10 = vpop.f32.mrf.mxu1 }
 0x237   :  { %7332 = vmatmul.bf16.vlgmr.msrb.gmra.mxu3 %v17484_v44  ;;  %v15939_v62 = vld [vmem:[#allocation6 + $0x94] sm:$0xf]  ;;  %v12488_v5 = vor.u32 %v16355_v59, %v12485_v60 }
 0x238   :  { %7376 = vmatpush.bf16.msra.mxu3 %v12744_v7  ;;  %7352 = vmatpush.bf16.msra.mxu1 %v11592_v16  ;;  %v10821_v63 = vld [vmem:[#allocation6 + $0xd0] sm:$0xf0] }
 0x239   :  { %v16067_v1 = vld [vmem:[#allocation6 + $0x494] sm:$0xf]  ;;  %v10824_v12 = vor.u32 %v15939_v62, %v10821_v63 }
 0x23a   :  { %7364 = vmatpush.bf16.msra.mxu2 %v12168_v20  ;;  %7340 = vmatpush.bf16.msra.mxu0 %v11016_v26  ;;  %v11333_v3 = vld [vmem:[#allocation6 + $0x4d0] sm:$0xf0]  ;;  %v7112_v26 = vpop.f32.mrf.mxu2 }
 0x23b   :  { %v16211_v7 = vld [vmem:[#allocation6 + $0x914] sm:$0xf]  ;;  %v11336_v18 = vor.u32 %v16067_v1, %v11333_v3  ;;  %v7113_v31 = vadd.f32 %v7112_v26, %v7100_v53  ;;  %v17540_v26 = vld [vmem:[#allocation7] sm:$0xff] }
 0x23c   :  { %7377 = vmatpush.bf16.msra.mxu3 %v12680_v2  ;;  %7353 = vmatpush.bf16.msra.mxu1 %v11528_v11  ;;  %v11909_v8 = vld [vmem:[#allocation6 + $0x950] sm:$0xf0] }
 0x23d   :  { %v16339_v13 = vld [vmem:[#allocation6 + $0xd14] sm:$0xf]  ;;  %v11912_v23 = vor.u32 %v16211_v7, %v11909_v8 }
 0x23e   :  { %7365 = vmatpush.bf16.msra.mxu2 %v12104_v29  ;;  %7341 = vmatpush.bf16.msra.mxu0 %v10952_v40  ;;  %v12421_v14 = vld [vmem:[#allocation6 + $0xd50] sm:$0xf0]  ;;  %v7125_v29 = vpop.f32.mrf.mxu3 }
 0x23f   :  { %v15923_v16 = vld [vmem:[#allocation6 + $0x14] sm:$0xf]  ;;  %v12424_v27 = vor.u32 %v16339_v13, %v12421_v14  ;;  %v17535_v47 = vadd.f32 %v7125_v29, %v7113_v31 }
 0x240   :  { %7378 = vmatpush.bf16.msra.mxu3 %v12616_v35  ;;  %7354 = vmatpush.bf16.msra.mxu1 %v11464_v48  ;;  %v10757_v19 = vld [vmem:[#allocation6 + $0x50] sm:$0xf0] }
 0x241   :  { %v16051_v20 = vld [vmem:[#allocation6 + $0x414] sm:$0xf]  ;;  %v10760_v32 = vor.u32 %v15923_v16, %v10757_v19 }
 0x242   :  { %7366 = vmatpush.bf16.msra.mxu2 %v12040_v45  ;;  %7342 = vmatpush.bf16.msra.mxu0 %v10888_v38  ;;  %v11269_v21 = vld [vmem:[#allocation6 + $0x450] sm:$0xf0]  ;;  %v7114_v63 = vpop.f32.mrf.mxu2 }
 0x243   :  { %v16547_v2 = vld [vmem:[#allocation6 + $0x1394] sm:$0xf]  ;;  %v11272_v35 = vor.u32 %v16051_v20, %v11269_v21 }
 0x244   :  { %7379 = vmatpush.bf16.msra.mxu3 %v12552_v56  ;;  %7355 = vmatpush.bf16.msra.mxu1 %v11400_v61  ;;  %v13253_v24 = vld [vmem:[#allocation6 + $0x13d0] sm:$0xf0] }
 0x245   :  { %v16675_v25 = vld [vmem:[#allocation6 + $0x1794] sm:$0xf]  ;;  %v13256_v36 = vor.u32 %v16547_v2, %v13253_v24 }
 0x246   :  { %7367 = vmatpush.bf16.msra.mxu2 %v11976_v0  ;;  %v13765_v28 = vld [vmem:[#allocation6 + $0x17d0] sm:$0xf0]  ;;  %7343 = vmatpush.bf16.msra.mxu0 %v10824_v12 }
 0x247   :  { %v16195_v11 = vld [vmem:[#allocation6 + $0x894] sm:$0xf]  ;;  %v13768_v39 = vor.u32 %v16675_v25, %v13765_v28 }
 0x248   :  { %7380 = vmatpush.bf16.msra.mxu3 %v12488_v5  ;;  %v11845_v30 = vld [vmem:[#allocation6 + $0x8d0] sm:$0xf0]  ;;  %7356 = vmatpush.bf16.msra.mxu1 %v11336_v18  ;;  %v7127_v5 = vpop.f32.mrf.mxu3 }
 0x249   :  { %v16323_v33 = vld [vmem:[#allocation6 + $0xc94] sm:$0xf]  ;;  %v11848_v40 = vor.u32 %v16195_v11, %v11845_v30 }
 0x24a   :  { %v12357_v34 = vld [vmem:[#allocation6 + $0xcd0] sm:$0xf0]  ;;  %7368 = vmatpush.bf16.msra.mxu2 %v11912_v23  ;;  %7344 = vmatpush.bf16.msra.mxu0 %v10760_v32 }
 0x24b   :  { %v16531_v37 = vld [vmem:[#allocation6 + $0x1314] sm:$0xf]  ;;  %v12360_v51 = vor.u32 %v16323_v33, %v12357_v34 }
 0x24c   :  { %v13189_v50 = vld [vmem:[#allocation6 + $0x1350] sm:$0xf0]  ;;  %7381 = vmatpush.bf16.msra.mxu3 %v12424_v27  ;;  %7357 = vmatpush.bf16.msra.mxu1 %v11272_v35  ;;  %v1668_v27 = vperm.slane %v17540_v26, 3 }
 0x24d   :  { %v16659_v46 = vld [vmem:[#allocation6 + $0x1714] sm:$0xf]  ;;  %v13192_v57 = vor.u32 %v16531_v37, %v13189_v50  ;;  %7345 = vmatmul.bf16.vlgmr.msra.gmra.mxu0 %v17459_v17 }
 0x24e   :  { %v13701_v48 = vld [vmem:[#allocation6 + $0x1750] sm:$0xf0]  ;;  %7389 = vmatpush.bf16.msrb.mxu0 %v13256_v36  ;;  %7369 = vmatpush.bf16.msra.mxu2 %v11848_v40  ;;  %v7138_v36 = vpop.f32.mrf.mxu0 }
 0x24f   :  { %v16179_v52 = vld [vmem:[#allocation6 + $0x814] sm:$0xf]  ;;  %v13704_v59 = vor.u32 %v16659_v46, %v13701_v48  ;;  %7358 = vmatmul.bf16.vlgmr.msra.gmra.mxu1 %v17462_v22  ;;  %v7139_v50 = vadd.f32 %v7138_v36, %v1668_v27  ;;  %v7151_v46 = vpop.f32.mrf.mxu1  ;;  %v11211_v27 = vld [vmem:[#allocation6 + $0x398] sm:$0xf] }
 0x250   :  { %v11781_v53 = vld [vmem:[#allocation6 + $0x850] sm:$0xf0]  ;;  %7402 = vmatpush.bf16.msrb.mxu1 %v13768_v39  ;;  %7382 = vmatpush.bf16.msra.mxu3 %v12360_v51 }
 0x251   :  { %v16307_v45 = vld [vmem:[#allocation6 + $0xc14] sm:$0xf]  ;;  %v11784_v60 = vor.u32 %v16179_v52, %v11781_v53 }
 0x252   :  { %v12293_v54 = vld [vmem:[#allocation6 + $0xc50] sm:$0xf0]  ;;  %7390 = vmatpush.bf16.msrb.mxu0 %v13192_v57 }
 0x253   :  { %v16803_v55 = vld [vmem:[#allocation6 + $0x1b94] sm:$0xf]  ;;  %v12296_v0 = vor.u32 %v16307_v45, %v12293_v54  ;;  %7370 = vmatpush.bf16.msra.mxu2 %v11784_v60 }
 0x254   :  { %v14277_v56 = vld [vmem:[#allocation6 + $0x1bd0] sm:$0xf0]  ;;  %7403 = vmatpush.bf16.msrb.mxu1 %v13704_v59 }
 0x255   :  { %v16931_v58 = vld [vmem:[#allocation6 + $0x1f94] sm:$0xf]  ;;  %v14280_v1 = vor.u32 %v16803_v55, %v14277_v56  ;;  %7383 = vmatpush.bf16.msra.mxu3 %v12296_v0  ;;  %v7152_v55 = vadd.f32 %v7151_v46, %v7139_v50  ;;  %v11147_v46 = vld [vmem:[#allocation6 + $0x318] sm:$0xf] }
 0x256   :  { %v14789_v38 = vld [vmem:[#allocation6 + $0x1fd0] sm:$0xf0]  ;;  %7371 = vmatmul.bf16.vlgmr.msra.gmra.mxu2 %v17466_v43 }
 0x257   :  { %v16515_v61 = vld [vmem:[#allocation6 + $0x1294] sm:$0xf]  ;;  %v14792_v7 = vor.u32 %v16931_v58, %v14789_v38  ;;  %7415 = vmatpush.bf16.msrb.mxu2 %v14280_v1 }
 0x258   :  { %v13125_v62 = vld [vmem:[#allocation6 + $0x12d0] sm:$0xf0]  ;;  %7384 = vmatmul.bf16.vlgmr.msra.gmra.mxu3 %v17468_v49 }
 0x259   :  { %v16643_v3 = vld [vmem:[#allocation6 + $0x1694] sm:$0xf]  ;;  %v13128_v12 = vor.u32 %v16515_v61, %v13125_v62  ;;  %7428 = vmatpush.bf16.msrb.mxu3 %v14792_v7 }
 0x25a   :  { %v13637_v4 = vld [vmem:[#allocation6 + $0x16d0] sm:$0xf0] }
 0x25b   :  { %v16787_v8 = vld [vmem:[#allocation6 + $0x1b14] sm:$0xf]  ;;  %v13640_v16 = vor.u32 %v16643_v3, %v13637_v4  ;;  %7391 = vmatpush.bf16.msrb.mxu0 %v13128_v12 }
 0x25c   :  { %v14213_v10 = vld [vmem:[#allocation6 + $0x1b50] sm:$0xf0] }
 0x25d   :  { %v16915_v13 = vld [vmem:[#allocation6 + $0x1f14] sm:$0xf]  ;;  %v14216_v20 = vor.u32 %v16787_v8, %v14213_v10  ;;  %7404 = vmatpush.bf16.msrb.mxu1 %v13640_v16  ;;  %v7140_v8 = vpop.f32.mrf.mxu0 }
 0x25e   :  { %v14725_v14 = vld [vmem:[#allocation6 + $0x1f50] sm:$0xf0] }
 0x25f   :  { %v16499_v18 = vld [vmem:[#allocation6 + $0x1214] sm:$0xf]  ;;  %v14728_v2 = vor.u32 %v16915_v13, %v14725_v14  ;;  %7416 = vmatpush.bf16.msrb.mxu2 %v14216_v20  ;;  %v7153_v14 = vpop.f32.mrf.mxu1 }
 0x260   :  { %v13061_v19 = vld [vmem:[#allocation6 + $0x1250] sm:$0xf0] }
 0x261   :  { %v16627_v21 = vld [vmem:[#allocation6 + $0x1614] sm:$0xf]  ;;  %v13064_v28 = vor.u32 %v16499_v18, %v13061_v19  ;;  %7429 = vmatpush.bf16.msrb.mxu3 %v14728_v2 }
 0x262   :  { %v13573_v23 = vld [vmem:[#allocation6 + $0x1650] sm:$0xf0] }
 0x263   :  { %v16771_v24 = vld [vmem:[#allocation6 + $0x1a94] sm:$0xf]  ;;  %v13576_v31 = vor.u32 %v16627_v21, %v13573_v23  ;;  %7392 = vmatpush.bf16.msrb.mxu0 %v13064_v28  ;;  %v16044_v28 = vld [vmem:[#allocation6 + $0x3d4] sm:$0xf0] }
 0x264   :  { %v14149_v25 = vld [vmem:[#allocation6 + $0x1ad0] sm:$0xf0]  ;;  %v11212_v50 = vor.u32 %v16044_v28, %v11211_v27  ;;  %v11531_v27 = vld [vmem:[#allocation6 + $0x618] sm:$0xf] }
 0x265   :  { %v16899_v11 = vld [vmem:[#allocation6 + $0x1e94] sm:$0xf]  ;;  %v14152_v33 = vor.u32 %v16771_v24, %v14149_v25  ;;  %7405 = vmatpush.bf16.msrb.mxu1 %v13576_v31  ;;  %v16124_v28 = vld [vmem:[#allocation6 + $0x654] sm:$0xf0] }
 0x266   :  { %v14661_v30 = vld [vmem:[#allocation6 + $0x1ed0] sm:$0xf0] }
 0x267   :  { %v16483_v29 = vld [vmem:[#allocation6 + $0x1194] sm:$0xf]  ;;  %v14664_v37 = vor.u32 %v16899_v11, %v14661_v30  ;;  %7417 = vmatpush.bf16.msrb.mxu2 %v14152_v33  ;;  %v11723_v11 = vld [vmem:[#allocation6 + $0x798] sm:$0xf]  ;;  %v7164_v30 = vpop.f32.mrf.mxu2 }
 0x268   :  { %v12997_v32 = vld [vmem:[#allocation6 + $0x11d0] sm:$0xf0] }
 0x269   :  { %v16611_v34 = vld [vmem:[#allocation6 + $0x1594] sm:$0xf]  ;;  %v13000_v48 = vor.u32 %v16483_v29, %v12997_v32  ;;  %7430 = vmatpush.bf16.msrb.mxu3 %v14664_v37  ;;  %v16172_v29 = vld [vmem:[#allocation6 + $0x7d4] sm:$0xf0] }
 0x26a   :  { %v13509_v35 = vld [vmem:[#allocation6 + $0x15d0] sm:$0xf0] }
 0x26b   :  { %v16755_v39 = vld [vmem:[#allocation6 + $0x1a14] sm:$0xf]  ;;  %v13512_v53 = vor.u32 %v16611_v34, %v13509_v35  ;;  %7393 = vmatpush.bf16.msrb.mxu0 %v13000_v48  ;;  %v7165_v34 = vadd.f32 %v7164_v30, %v7152_v55  ;;  %v7177_v35 = vpop.f32.mrf.mxu3  ;;  %v12107_v30 = vld [vmem:[#allocation6 + $0xa98] sm:$0xf] }
 0x26c   :  { %v14085_v40 = vld [vmem:[#allocation6 + $0x1a50] sm:$0xf0] }
 0x26d   :  { %v16883_v51 = vld [vmem:[#allocation6 + $0x1e14] sm:$0xf]  ;;  %v14088_v56 = vor.u32 %v16755_v39, %v14085_v40  ;;  %7406 = vmatpush.bf16.msrb.mxu1 %v13512_v53  ;;  %v17544_v48 = vadd.f32 %v7177_v35, %v7165_v34  ;;  %v16028_v53 = vld [vmem:[#allocation6 + $0x354] sm:$0xf0]  ;;  %v11532_v34 = vor.u32 %v16124_v28, %v11531_v27 }
 0x26e   :  { %v14597_v52 = vld [vmem:[#allocation6 + $0x1e50] sm:$0xf0]  ;;  %v10955_v35 = vld [vmem:[#allocation6 + $0x198] sm:$0xf] }
 0x26f   :  { %v16467_v45 = vld [vmem:[#allocation6 + $0x1114] sm:$0xf]  ;;  %v14600_v38 = vor.u32 %v16883_v51, %v14597_v52  ;;  %7418 = vmatpush.bf16.msrb.mxu2 %v14088_v56  ;;  %v11724_v51 = vor.u32 %v16172_v29, %v11723_v11  ;;  %v15932_v27 = vld [vmem:[#allocation6 + $0x54] sm:$0xf0] }
 0x270   :  { %v12933_v54 = vld [vmem:[#allocation6 + $0x1150] sm:$0xf0]  ;;  %v11275_v28 = vld [vmem:[#allocation6 + $0x418] sm:$0xf] }
 0x271   :  { %v16595_v57 = vld [vmem:[#allocation6 + $0x1514] sm:$0xf]  ;;  %v12936_v61 = vor.u32 %v16467_v45, %v12933_v54  ;;  %7431 = vmatpush.bf16.msrb.mxu3 %v14600_v38  ;;  %v11659_v45 = vld [vmem:[#allocation6 + $0x718] sm:$0xf] }
 0x272   :  { %v13445_v58 = vld [vmem:[#allocation6 + $0x1550] sm:$0xf0]  ;;  %v16156_v54 = vld [vmem:[#allocation6 + $0x754] sm:$0xf0] }
 0x273   :  { %v16739_v59 = vld [vmem:[#allocation6 + $0x1994] sm:$0xf]  ;;  %v13448_v0 = vor.u32 %v16595_v57, %v13445_v58  ;;  %7394 = vmatpush.bf16.msrb.mxu0 %v12936_v61  ;;  %v11148_v61 = vor.u32 %v16028_v53, %v11147_v46 }
 0x274   :  { %v14021_v60 = vld [vmem:[#allocation6 + $0x19d0] sm:$0xf0] }
 0x275   :  { %v16867_v62 = vld [vmem:[#allocation6 + $0x1d94] sm:$0xf]  ;;  %v14024_v4 = vor.u32 %v16739_v59, %v14021_v60  ;;  %7407 = vmatpush.bf16.msrb.mxu1 %v13448_v0  ;;  %v12235_v59 = vld [vmem:[#allocation6 + $0xb98] sm:$0xf]  ;;  %v11660_v0 = vor.u32 %v16156_v54, %v11659_v45  ;;  %v7203_v45 = vpop.f32.mrf.mxu1 }
 0x276   :  { %v14533_v63 = vld [vmem:[#allocation6 + $0x1dd0] sm:$0xf0]  ;;  %v16300_v60 = vld [vmem:[#allocation6 + $0xbd4] sm:$0xf0] }
 0x277   :  { %v16451_v1 = vld [vmem:[#allocation6 + $0x1094] sm:$0xf]  ;;  %v14536_v10 = vor.u32 %v16867_v62, %v14533_v63  ;;  %7419 = vmatpush.bf16.msrb.mxu2 %v14024_v4  ;;  %v12747_v62 = vld [vmem:[#allocation6 + $0xf98] sm:$0xf]  ;;  %v12236_v8 = vor.u32 %v16300_v60, %v12235_v59 }
 0x278   :  { %v12869_v3 = vld [vmem:[#allocation6 + $0x10d0] sm:$0xf0]  ;;  %v16428_v63 = vld [vmem:[#allocation6 + $0xfd4] sm:$0xf0] }
 0x279   :  { %v16579_v5 = vld [vmem:[#allocation6 + $0x1494] sm:$0xf]  ;;  %v12872_v16 = vor.u32 %v16451_v1, %v12869_v3  ;;  %7432 = vmatpush.bf16.msrb.mxu3 %v14536_v10  ;;  %v11083_v3 = vld [vmem:[#allocation6 + $0x298] sm:$0xf]  ;;  %v12748_v14 = vor.u32 %v16428_v63, %v12747_v62 }
 0x27a   :  { %v13381_v7 = vld [vmem:[#allocation6 + $0x14d0] sm:$0xf0]  ;;  %v16012_v4 = vld [vmem:[#allocation6 + $0x2d4] sm:$0xf0] }
 0x27b   :  { %v16723_v12 = vld [vmem:[#allocation6 + $0x1914] sm:$0xf]  ;;  %v13384_v21 = vor.u32 %v16579_v5, %v13381_v7  ;;  %7395 = vmatpush.bf16.msrb.mxu0 %v12872_v16  ;;  %v7166_v5 = vpop.f32.mrf.mxu2  ;;  %v11595_v10 = vld [vmem:[#allocation6 + $0x698] sm:$0xf] }
 0x27c   :  { %v13957_v13 = vld [vmem:[#allocation6 + $0x1950] sm:$0xf0]  ;;  %v12171_v16 = vld [vmem:[#allocation6 + $0xb18] sm:$0xf] }
 0x27d   :  { %v16851_v18 = vld [vmem:[#allocation6 + $0x1d14] sm:$0xf]  ;;  %v13960_v25 = vor.u32 %v16723_v12, %v13957_v13  ;;  %7408 = vmatpush.bf16.msrb.mxu1 %v13384_v21  ;;  %v16140_v12 = vld [vmem:[#allocation6 + $0x6d4] sm:$0xf0]  ;;  %v7179_v13 = vpop.f32.mrf.mxu3 }
 0x27e   :  { %v14469_v19 = vld [vmem:[#allocation6 + $0x1d50] sm:$0xf0]  ;;  %v16412_v21 = vld [vmem:[#allocation6 + $0xf54] sm:$0xf0] }
 0x27f   :  { %v16435_v20 = vld [vmem:[#allocation6 + $0x1014] sm:$0xf]  ;;  %v14472_v31 = vor.u32 %v16851_v18, %v14469_v19  ;;  %7420 = vmatpush.bf16.msrb.mxu2 %v13960_v25  ;;  %v16284_v18 = vld [vmem:[#allocation6 + $0xb54] sm:$0xf0]  ;;  %v11084_v19 = vor.u32 %v16012_v4, %v11083_v3 }
 0x280   :  { %v12805_v23 = vld [vmem:[#allocation6 + $0x1050] sm:$0xf0]  ;;  %v12172_v25 = vor.u32 %v16284_v18, %v12171_v16  ;;  %v16092_v62 = vld [vmem:[#allocation6 + $0x554] sm:$0xf0] }
 0x281   :  { %v16563_v2 = vld [vmem:[#allocation6 + $0x1414] sm:$0xf]  ;;  %v12808_v36 = vor.u32 %v16435_v20, %v12805_v23  ;;  %7433 = vmatpush.bf16.msrb.mxu3 %v14472_v31  ;;  %v12683_v20 = vld [vmem:[#allocation6 + $0xf18] sm:$0xf]  ;;  %v11596_v23 = vor.u32 %v16140_v12, %v11595_v10 }
 0x282   :  { %v13317_v24 = vld [vmem:[#allocation6 + $0x1450] sm:$0xf0]  ;;  %v12684_v11 = vor.u32 %v16412_v21, %v12683_v20  ;;  %v16268_v31 = vld [vmem:[#allocation6 + $0xad4] sm:$0xf0]  ;;  %v7205_v20 = vpop.f32.mrf.mxu1 }
 0x283   :  { %v16707_v32 = vld [vmem:[#allocation6 + $0x1894] sm:$0xf]  ;;  %v13320_v40 = vor.u32 %v16563_v2, %v13317_v24  ;;  %7396 = vmatpush.bf16.msrb.mxu0 %v12808_v36  ;;  %v11019_v2 = vld [vmem:[#allocation6 + $0x218] sm:$0xf] }
 0x284   :  { %v13893_v33 = vld [vmem:[#allocation6 + $0x18d0] sm:$0xf0]  ;;  %v15996_v24 = vld [vmem:[#allocation6 + $0x254] sm:$0xf0] }
 0x285   :  { %v16835_v37 = vld [vmem:[#allocation6 + $0x1c94] sm:$0xf]  ;;  %v13896_v52 = vor.u32 %v16707_v32, %v13893_v33  ;;  %7409 = vmatpush.bf16.msrb.mxu1 %v13320_v40  ;;  %v11020_v29 = vor.u32 %v15996_v24, %v11019_v2  ;;  %v12619_v32 = vld [vmem:[#allocation6 + $0xe98] sm:$0xf] }
 0x286   :  { %v14405_v39 = vld [vmem:[#allocation6 + $0x1cd0] sm:$0xf0]  ;;  %7397 = vmatmul.bf16.vlgmr.msrb.gmra.mxu0 %v17475_v6  ;;  %v16396_v33 = vld [vmem:[#allocation6 + $0xed4] sm:$0xf0] }
 0x287   :  { %v14408_v56 = vor.u32 %v16835_v37, %v14405_v39  ;;  %v16691_v55 = vld [vmem:[#allocation6 + $0x1814] sm:$0xf]  ;;  %7441 = vmatpush.bf16.msra.mxu0 %v11212_v50  ;;  %7421 = vmatpush.bf16.msrb.mxu2 %v13896_v52  ;;  %v15980_v36 = vld [vmem:[#allocation6 + $0x1d4] sm:$0xf0]  ;;  %v12108_v37 = vor.u32 %v16268_v31, %v12107_v30  ;;  %v7190_v50 = vpop.f32.mrf.mxu0  ;;  %v12620_v46 = vor.u32 %v16396_v33, %v12619_v32  ;;  %v7216_v33 = vpop.f32.mrf.mxu2 }
 0x288   :  { %v13829_v57 = vld [vmem:[#allocation6 + $0x1850] sm:$0xf0]  ;;  %7410 = vmatmul.bf16.vlgmr.msrb.gmra.mxu1 %v17478_v9  ;;  %v11467_v39 = vld [vmem:[#allocation6 + $0x598] sm:$0xf]  ;;  %v7191_v53 = vadd.f32 %v7190_v50, %v17544_v48  ;;  %v10956_v54 = vor.u32 %v15980_v36, %v10955_v35 }
 0x289   :  { %v16819_v58 = vld [vmem:[#allocation6 + $0x1c14] sm:$0xf]  ;;  %7454 = vmatpush.bf16.msra.mxu1 %v11724_v51  ;;  %v13832_v1 = vor.u32 %v16691_v55, %v13829_v57  ;;  %7434 = vmatpush.bf16.msrb.mxu3 %v14408_v56  ;;  %v16108_v40 = vld [vmem:[#allocation6 + $0x5d4] sm:$0xf0] }
 0x28a   :  { %v14341_v38 = vld [vmem:[#allocation6 + $0x1c50] sm:$0xf0]  ;;  %v12043_v51 = vld [vmem:[#allocation6 + $0xa18] sm:$0xf]  ;;  %v11468_v57 = vor.u32 %v16108_v40, %v11467_v39  ;;  %v7204_v59 = vadd.f32 %v7203_v45, %v7191_v53  ;;  %v7229_v40 = vpop.f32.mrf.mxu3 }
 0x28b   :  { %v14344_v7 = vor.u32 %v16819_v58, %v14341_v38  ;;  %7442 = vmatpush.bf16.msra.mxu0 %v11148_v61  ;;  %7422 = vmatpush.bf16.msrb.mxu2 %v13832_v1  ;;  %v16252_v52 = vld [vmem:[#allocation6 + $0xa54] sm:$0xf0] }
 0x28c   :  { %v12555_v56 = vld [vmem:[#allocation6 + $0xe18] sm:$0xf]  ;;  %v12044_v60 = vor.u32 %v16252_v52, %v12043_v51  ;;  %v7217_v39 = vadd.f32 %v7216_v33, %v7204_v59 }
 0x28d   :  { %7455 = vmatpush.bf16.msra.mxu1 %v11660_v0  ;;  %7435 = vmatpush.bf16.msrb.mxu3 %v14344_v7  ;;  %v16380_v55 = vld [vmem:[#allocation6 + $0xe54] sm:$0xf0] }
 0x28e   :  { %7423 = vmatmul.bf16.vlgmr.msrb.gmra.mxu2 %v17482_v41  ;;  %v10891_v58 = vld [vmem:[#allocation6 + $0x118] sm:$0xf]  ;;  %v12556_v63 = vor.u32 %v16380_v55, %v12555_v56 }
 0x28f   :  { %7467 = vmatpush.bf16.msra.mxu2 %v12236_v8  ;;  %7443 = vmatpush.bf16.msra.mxu0 %v11084_v19  ;;  %v15964_v38 = vld [vmem:[#allocation6 + $0x154] sm:$0xf0] }
 0x290   :  { %7436 = vmatmul.bf16.vlgmr.msrb.gmra.mxu3 %v17484_v44  ;;  %v11403_v61 = vld [vmem:[#allocation6 + $0x518] sm:$0xf]  ;;  %v10892_v48 = vor.u32 %v15964_v38, %v10891_v58 }
 0x291   :  { %7480 = vmatpush.bf16.msra.mxu3 %v12748_v14  ;;  %7456 = vmatpush.bf16.msra.mxu1 %v11596_v23  ;;  %v11979_v0 = vld [vmem:[#allocation6 + $0x998] sm:$0xf]  ;;  %v11404_v5 = vor.u32 %v16092_v62, %v11403_v61  ;;  %v7192_v14 = vpop.f32.mrf.mxu0 }
 0x292   :  { %v16236_v1 = vld [vmem:[#allocation6 + $0x9d4] sm:$0xf0] }
 0x293   :  { %7468 = vmatpush.bf16.msra.mxu2 %v12172_v25  ;;  %7444 = vmatpush.bf16.msra.mxu0 %v11020_v29  ;;  %v12491_v3 = vld [vmem:[#allocation6 + $0xd98] sm:$0xf]  ;;  %v11980_v10 = vor.u32 %v16236_v1, %v11979_v0 }
 0x294   :  { %v16364_v4 = vld [vmem:[#allocation6 + $0xdd4] sm:$0xf0] }
 0x295   :  { %7481 = vmatpush.bf16.msra.mxu3 %v12684_v11  ;;  %7457 = vmatpush.bf16.msra.mxu1 %v11532_v34  ;;  %v10827_v7 = vld [vmem:[#allocation6 + $0x98] sm:$0xf]  ;;  %v12492_v16 = vor.u32 %v16364_v4, %v12491_v3 }
 0x296   :  { %v15948_v8 = vld [vmem:[#allocation6 + $0xd4] sm:$0xf0] }
 0x297   :  { %7469 = vmatpush.bf16.msra.mxu2 %v12108_v37  ;;  %7445 = vmatpush.bf16.msra.mxu0 %v10956_v54  ;;  %v11339_v12 = vld [vmem:[#allocation6 + $0x498] sm:$0xf]  ;;  %v10828_v21 = vor.u32 %v15948_v8, %v10827_v7  ;;  %v17551_v54 = vadd.f32 %v7229_v40, %v7217_v39 }
 0x298   :  { %v16076_v13 = vld [vmem:[#allocation6 + $0x4d4] sm:$0xf0] }
 0x299   :  { %7482 = vmatpush.bf16.msra.mxu3 %v12620_v46  ;;  %7458 = vmatpush.bf16.msra.mxu1 %v11468_v57  ;;  %v11915_v18 = vld [vmem:[#allocation6 + $0x918] sm:$0xf]  ;;  %v11340_v25 = vor.u32 %v16076_v13, %v11339_v12  ;;  %v7218_v12 = vpop.f32.mrf.mxu2 }
 0x29a   :  { %v16220_v19 = vld [vmem:[#allocation6 + $0x954] sm:$0xf0] }
 0x29b   :  { %7470 = vmatpush.bf16.msra.mxu2 %v12044_v60  ;;  %7446 = vmatpush.bf16.msra.mxu0 %v10892_v48  ;;  %v12427_v23 = vld [vmem:[#allocation6 + $0xd18] sm:$0xf]  ;;  %v11916_v30 = vor.u32 %v16220_v19, %v11915_v18  ;;  %v7231_v19 = vpop.f32.mrf.mxu3 }
 0x29c   :  { %v16348_v2 = vld [vmem:[#allocation6 + $0xd54] sm:$0xf0] }
 0x29d   :  { %7483 = vmatpush.bf16.msra.mxu3 %v12556_v63  ;;  %v10763_v24 = vld [vmem:[#allocation6 + $0x18] sm:$0xf]  ;;  %7459 = vmatpush.bf16.msra.mxu1 %v11404_v5  ;;  %v12428_v34 = vor.u32 %v16348_v2, %v12427_v23 }
 0x29e   :  { %v16060_v11 = vld [vmem:[#allocation6 + $0x454] sm:$0xf0]  ;;  %v10764_v50 = vor.u32 %v15932_v27, %v10763_v24 }
 0x29f   :  { %7471 = vmatpush.bf16.msra.mxu2 %v11980_v10  ;;  %v13259_v31 = vld [vmem:[#allocation6 + $0x1398] sm:$0xf]  ;;  %7447 = vmatpush.bf16.msra.mxu0 %v10828_v21  ;;  %v11276_v52 = vor.u32 %v16060_v11, %v11275_v28 }
 0x2a0   :  { %v16556_v29 = vld [vmem:[#allocation6 + $0x13d4] sm:$0xf0] }
 0x2a1   :  { %v13771_v32 = vld [vmem:[#allocation6 + $0x1798] sm:$0xf]  ;;  %7484 = vmatpush.bf16.msra.mxu3 %v12492_v16  ;;  %7460 = vmatpush.bf16.msra.mxu1 %v11340_v25  ;;  %v13260_v53 = vor.u32 %v16556_v29, %v13259_v31 }
 0x2a2   :  { %v16684_v35 = vld [vmem:[#allocation6 + $0x17d4] sm:$0xf0] }
 0x2a3   :  { %v11851_v36 = vld [vmem:[#allocation6 + $0x898] sm:$0xf]  ;;  %7472 = vmatpush.bf16.msra.mxu2 %v11916_v30  ;;  %v13772_v56 = vor.u32 %v16684_v35, %v13771_v32  ;;  %7448 = vmatpush.bf16.msra.mxu0 %v10764_v50  ;;  %v1669_v35 = vperm.slane %v17540_v26, 4  ;;  %v7255_v26 = vpop.f32.mrf.mxu1 }
 0x2a4   :  { %v16204_v37 = vld [vmem:[#allocation6 + $0x8d4] sm:$0xf0] }
 0x2a5   :  { %v12363_v46 = vld [vmem:[#allocation6 + $0xc98] sm:$0xf]  ;;  %v11852_v55 = vor.u32 %v16204_v37, %v11851_v36  ;;  %7485 = vmatpush.bf16.msra.mxu3 %v12428_v34  ;;  %7461 = vmatpush.bf16.msra.mxu1 %v11276_v52 }
 0x2a6   :  { %v16332_v51 = vld [vmem:[#allocation6 + $0xcd4] sm:$0xf0]  ;;  %7449 = vmatmul.bf16.vlgmr.msra.gmra.mxu0 %v17459_v17 }
 0x2a7   :  { %v13195_v45 = vld [vmem:[#allocation6 + $0x1318] sm:$0xf]  ;;  %v12364_v60 = vor.u32 %v16332_v51, %v12363_v46  ;;  %7493 = vmatpush.bf16.msrb.mxu0 %v13260_v53  ;;  %7473 = vmatpush.bf16.msra.mxu2 %v11852_v55 }
 0x2a8   :  { %v16540_v57 = vld [vmem:[#allocation6 + $0x1354] sm:$0xf0]  ;;  %7462 = vmatmul.bf16.vlgmr.msra.gmra.mxu1 %v17462_v22 }
 0x2a9   :  { %v13707_v58 = vld [vmem:[#allocation6 + $0x1718] sm:$0xf]  ;;  %v13196_v48 = vor.u32 %v16540_v57, %v13195_v45  ;;  %7506 = vmatpush.bf16.msrb.mxu1 %v13772_v56  ;;  %7486 = vmatpush.bf16.msra.mxu3 %v12364_v60  ;;  %v7242_v45 = vpop.f32.mrf.mxu0 }
 0x2aa   :  { %v16668_v38 = vld [vmem:[#allocation6 + $0x1754] sm:$0xf0] }
 0x2ab   :  { %v11787_v59 = vld [vmem:[#allocation6 + $0x818] sm:$0xf]  ;;  %v13708_v5 = vor.u32 %v16668_v38, %v13707_v58  ;;  %7494 = vmatpush.bf16.msrb.mxu0 %v13196_v48  ;;  %v7243_v58 = vadd.f32 %v7242_v45, %v1669_v35  ;;  %v16036_v35 = vld [vmem:[#allocation6 + $0x39c] sm:$0xf] }
 0x2ac   :  { %v16188_v61 = vld [vmem:[#allocation6 + $0x854] sm:$0xf0] }
 0x2ad   :  { %v12299_v62 = vld [vmem:[#allocation6 + $0xc18] sm:$0xf]  ;;  %v11788_v7 = vor.u32 %v16188_v61, %v11787_v59  ;;  %7507 = vmatpush.bf16.msrb.mxu1 %v13708_v5 }
 0x2ae   :  { %v16316_v63 = vld [vmem:[#allocation6 + $0xc54] sm:$0xf0] }
 0x2af   :  { %v14283_v0 = vld [vmem:[#allocation6 + $0x1b98] sm:$0xf]  ;;  %v12300_v13 = vor.u32 %v16316_v63, %v12299_v62  ;;  %7474 = vmatpush.bf16.msra.mxu2 %v11788_v7 }
 0x2b0   :  { %v16812_v1 = vld [vmem:[#allocation6 + $0x1bd4] sm:$0xf0] }
 0x2b1   :  { %v14795_v3 = vld [vmem:[#allocation6 + $0x1f98] sm:$0xf]  ;;  %v14284_v14 = vor.u32 %v16812_v1, %v14283_v0  ;;  %7487 = vmatpush.bf16.msra.mxu3 %v12300_v13  ;;  %v7256_v0 = vadd.f32 %v7255_v26, %v7243_v58  ;;  %v16020_v26 = vld [vmem:[#allocation6 + $0x31c] sm:$0xf] }
 0x2b2   :  { %v16940_v4 = vld [vmem:[#allocation6 + $0x1fd4] sm:$0xf0]  ;;  %7475 = vmatmul.bf16.vlgmr.msra.gmra.mxu2 %v17466_v43 }
 0x2b3   :  { %v13131_v8 = vld [vmem:[#allocation6 + $0x1298] sm:$0xf]  ;;  %v14796_v20 = vor.u32 %v16940_v4, %v14795_v3  ;;  %7519 = vmatpush.bf16.msrb.mxu2 %v14284_v14 }
 0x2b4   :  { %v16524_v10 = vld [vmem:[#allocation6 + $0x12d4] sm:$0xf0]  ;;  %7488 = vmatmul.bf16.vlgmr.msra.gmra.mxu3 %v17468_v49 }
 0x2b5   :  { %v13643_v16 = vld [vmem:[#allocation6 + $0x1698] sm:$0xf]  ;;  %v13132_v2 = vor.u32 %v16524_v10, %v13131_v8  ;;  %7532 = vmatpush.bf16.msrb.mxu3 %v14796_v20 }
 0x2b6   :  { %v16652_v18 = vld [vmem:[#allocation6 + $0x16d4] sm:$0xf0] }
 0x2b7   :  { %v14219_v21 = vld [vmem:[#allocation6 + $0x1b18] sm:$0xf]  ;;  %v13644_v27 = vor.u32 %v16652_v18, %v13643_v16  ;;  %7495 = vmatpush.bf16.msrb.mxu0 %v13132_v2 }
 0x2b8   :  { %v16796_v23 = vld [vmem:[#allocation6 + $0x1b54] sm:$0xf0] }
 0x2b9   :  { %v14731_v24 = vld [vmem:[#allocation6 + $0x1f18] sm:$0xf]  ;;  %v14220_v30 = vor.u32 %v16796_v23, %v14219_v21  ;;  %7508 = vmatpush.bf16.msrb.mxu1 %v13644_v27  ;;  %v7244_v21 = vpop.f32.mrf.mxu0 }
 0x2ba   :  { %v16924_v25 = vld [vmem:[#allocation6 + $0x1f54] sm:$0xf0] }
 0x2bb   :  { %v13067_v28 = vld [vmem:[#allocation6 + $0x1218] sm:$0xf]  ;;  %v14732_v32 = vor.u32 %v16924_v25, %v14731_v24  ;;  %7520 = vmatpush.bf16.msrb.mxu2 %v14220_v30  ;;  %v7257_v25 = vpop.f32.mrf.mxu1 }
 0x2bc   :  { %v16508_v11 = vld [vmem:[#allocation6 + $0x1254] sm:$0xf0] }
 0x2bd   :  { %v13579_v31 = vld [vmem:[#allocation6 + $0x1618] sm:$0xf]  ;;  %v13068_v36 = vor.u32 %v16508_v11, %v13067_v28  ;;  %7533 = vmatpush.bf16.msrb.mxu3 %v14732_v32 }
 0x2be   :  { %v16636_v29 = vld [vmem:[#allocation6 + $0x1654] sm:$0xf0] }
 0x2bf   :  { %v14155_v33 = vld [vmem:[#allocation6 + $0x1a98] sm:$0xf]  ;;  %v13580_v40 = vor.u32 %v16636_v29, %v13579_v31  ;;  %7496 = vmatpush.bf16.msrb.mxu0 %v13068_v36  ;;  %v11213_v36 = vld [vmem:[#allocation6 + $0x3d8] sm:$0xf0] }
 0x2c0   :  { %v16780_v34 = vld [vmem:[#allocation6 + $0x1ad4] sm:$0xf0]  ;;  %v11216_v58 = vor.u32 %v16036_v35, %v11213_v36  ;;  %v16116_v35 = vld [vmem:[#allocation6 + $0x61c] sm:$0xf] }
 0x2c1   :  { %v14667_v37 = vld [vmem:[#allocation6 + $0x1e98] sm:$0xf]  ;;  %v14156_v51 = vor.u32 %v16780_v34, %v14155_v33  ;;  %7509 = vmatpush.bf16.msrb.mxu1 %v13580_v40  ;;  %v11533_v36 = vld [vmem:[#allocation6 + $0x658] sm:$0xf0] }
 0x2c2   :  { %v16908_v39 = vld [vmem:[#allocation6 + $0x1ed4] sm:$0xf0] }
 0x2c3   :  { %v13003_v50 = vld [vmem:[#allocation6 + $0x1198] sm:$0xf]  ;;  %v14668_v56 = vor.u32 %v16908_v39, %v14667_v37  ;;  %7521 = vmatpush.bf16.msrb.mxu2 %v14156_v51  ;;  %v16164_v37 = vld [vmem:[#allocation6 + $0x79c] sm:$0xf]  ;;  %v7268_v39 = vpop.f32.mrf.mxu2 }
 0x2c4   :  { %v16492_v46 = vld [vmem:[#allocation6 + $0x11d4] sm:$0xf0] }
 0x2c5   :  { %v13515_v52 = vld [vmem:[#allocation6 + $0x1598] sm:$0xf]  ;;  %v13004_v38 = vor.u32 %v16492_v46, %v13003_v50  ;;  %7534 = vmatpush.bf16.msrb.mxu3 %v14668_v56  ;;  %v11725_v50 = vld [vmem:[#allocation6 + $0x7d8] sm:$0xf0] }
 0x2c6   :  { %v16620_v53 = vld [vmem:[#allocation6 + $0x15d4] sm:$0xf0] }
 0x2c7   :  { %v14091_v55 = vld [vmem:[#allocation6 + $0x1a18] sm:$0xf]  ;;  %v13516_v61 = vor.u32 %v16620_v53, %v13515_v52  ;;  %7497 = vmatpush.bf16.msrb.mxu0 %v13004_v38  ;;  %v7269_v52 = vadd.f32 %v7268_v39, %v7256_v0  ;;  %v7281_v53 = vpop.f32.mrf.mxu3  ;;  %v16260_v39 = vld [vmem:[#allocation6 + $0xa9c] sm:$0xf] }
 0x2c8   :  { %v16764_v57 = vld [vmem:[#allocation6 + $0x1a54] sm:$0xf0] }
 0x2c9   :  { %v14603_v60 = vld [vmem:[#allocation6 + $0x1e18] sm:$0xf]  ;;  %v14092_v1 = vor.u32 %v16764_v57, %v14091_v55  ;;  %7510 = vmatpush.bf16.msrb.mxu1 %v13516_v61  ;;  %v17558_v38 = vadd.f32 %v7281_v53, %v7269_v52  ;;  %v11149_v61 = vld [vmem:[#allocation6 + $0x358] sm:$0xf0]  ;;  %v11536_v52 = vor.u32 %v16116_v35, %v11533_v36 }
 0x2ca   :  { %v16892_v59 = vld [vmem:[#allocation6 + $0x1e54] sm:$0xf0]  ;;  %v15972_v53 = vld [vmem:[#allocation6 + $0x19c] sm:$0xf] }
 0x2cb   :  { %v12939_v62 = vld [vmem:[#allocation6 + $0x1118] sm:$0xf]  ;;  %v14604_v4 = vor.u32 %v16892_v59, %v14603_v60  ;;  %7522 = vmatpush.bf16.msrb.mxu2 %v14092_v1  ;;  %v11728_v60 = vor.u32 %v16164_v37, %v11725_v50  ;;  %v10765_v35 = vld [vmem:[#allocation6 + $0x58] sm:$0xf0] }
 0x2cc   :  { %v16476_v63 = vld [vmem:[#allocation6 + $0x1154] sm:$0xf0]  ;;  %v16052_v36 = vld [vmem:[#allocation6 + $0x41c] sm:$0xf] }
 0x2cd   :  { %v13451_v48 = vld [vmem:[#allocation6 + $0x1518] sm:$0xf]  ;;  %v12940_v8 = vor.u32 %v16476_v63, %v12939_v62  ;;  %7535 = vmatpush.bf16.msrb.mxu3 %v14604_v4  ;;  %v16148_v62 = vld [vmem:[#allocation6 + $0x71c] sm:$0xf] }
 0x2ce   :  { %v16604_v3 = vld [vmem:[#allocation6 + $0x1554] sm:$0xf0]  ;;  %v11661_v63 = vld [vmem:[#allocation6 + $0x758] sm:$0xf0] }
 0x2cf   :  { %v14027_v5 = vld [vmem:[#allocation6 + $0x1998] sm:$0xf]  ;;  %v13452_v13 = vor.u32 %v16604_v3, %v13451_v48  ;;  %7498 = vmatpush.bf16.msrb.mxu0 %v12940_v8  ;;  %v11152_v8 = vor.u32 %v16020_v26, %v11149_v61 }
 0x2d0   :  { %v16748_v7 = vld [vmem:[#allocation6 + $0x19d4] sm:$0xf0] }
 0x2d1   :  { %v14539_v10 = vld [vmem:[#allocation6 + $0x1d98] sm:$0xf]  ;;  %v14028_v18 = vor.u32 %v16748_v7, %v14027_v5  ;;  %7511 = vmatpush.bf16.msrb.mxu1 %v13452_v13  ;;  %v16292_v5 = vld [vmem:[#allocation6 + $0xb9c] sm:$0xf]  ;;  %v11664_v13 = vor.u32 %v16148_v62, %v11661_v63  ;;  %v7307_v62 = vpop.f32.mrf.mxu1 }
 0x2d2   :  { %v16876_v12 = vld [vmem:[#allocation6 + $0x1dd4] sm:$0xf0]  ;;  %v12237_v7 = vld [vmem:[#allocation6 + $0xbd8] sm:$0xf0] }
 0x2d3   :  { %v12875_v14 = vld [vmem:[#allocation6 + $0x1098] sm:$0xf]  ;;  %v14540_v23 = vor.u32 %v16876_v12, %v14539_v10  ;;  %7523 = vmatpush.bf16.msrb.mxu2 %v14028_v18  ;;  %v16420_v10 = vld [vmem:[#allocation6 + $0xf9c] sm:$0xf]  ;;  %v12240_v21 = vor.u32 %v16292_v5, %v12237_v7 }
 0x2d4   :  { %v16460_v16 = vld [vmem:[#allocation6 + $0x10d4] sm:$0xf0]  ;;  %v12749_v12 = vld [vmem:[#allocation6 + $0xfd8] sm:$0xf0] }
 0x2d5   :  { %v13387_v19 = vld [vmem:[#allocation6 + $0x1498] sm:$0xf]  ;;  %v12876_v27 = vor.u32 %v16460_v16, %v12875_v14  ;;  %7536 = vmatpush.bf16.msrb.mxu3 %v14540_v23  ;;  %v16004_v16 = vld [vmem:[#allocation6 + $0x29c] sm:$0xf]  ;;  %v12752_v25 = vor.u32 %v16420_v10, %v12749_v12 }
 0x2d6   :  { %v16588_v20 = vld [vmem:[#allocation6 + $0x14d4] sm:$0xf0]  ;;  %v11085_v18 = vld [vmem:[#allocation6 + $0x2d8] sm:$0xf0] }
 0x2d7   :  { %v13963_v2 = vld [vmem:[#allocation6 + $0x1918] sm:$0xf]  ;;  %v13388_v31 = vor.u32 %v16588_v20, %v13387_v19  ;;  %7499 = vmatpush.bf16.msrb.mxu0 %v12876_v27  ;;  %v7270_v19 = vpop.f32.mrf.mxu2  ;;  %v16132_v23 = vld [vmem:[#allocation6 + $0x69c] sm:$0xf] }
 0x2d8   :  { %v16732_v24 = vld [vmem:[#allocation6 + $0x1954] sm:$0xf0]  ;;  %v16276_v27 = vld [vmem:[#allocation6 + $0xb1c] sm:$0xf] }
 0x2d9   :  { %v14475_v28 = vld [vmem:[#allocation6 + $0x1d18] sm:$0xf]  ;;  %v13964_v34 = vor.u32 %v16732_v24, %v13963_v2  ;;  %7512 = vmatpush.bf16.msrb.mxu1 %v13388_v31  ;;  %v11597_v2 = vld [vmem:[#allocation6 + $0x6d8] sm:$0xf0]  ;;  %v7283_v24 = vpop.f32.mrf.mxu3 }
 0x2da   :  { %v16860_v11 = vld [vmem:[#allocation6 + $0x1d54] sm:$0xf0]  ;;  %v12685_v31 = vld [vmem:[#allocation6 + $0xf58] sm:$0xf0] }
 0x2db   :  { %v12811_v30 = vld [vmem:[#allocation6 + $0x1018] sm:$0xf]  ;;  %v14476_v40 = vor.u32 %v16860_v11, %v14475_v28  ;;  %7524 = vmatpush.bf16.msrb.mxu2 %v13964_v34  ;;  %v12173_v28 = vld [vmem:[#allocation6 + $0xb58] sm:$0xf0]  ;;  %v11088_v11 = vor.u32 %v16004_v16, %v11085_v18 }
 0x2dc   :  { %v16444_v29 = vld [vmem:[#allocation6 + $0x1054] sm:$0xf0]  ;;  %v12176_v34 = vor.u32 %v16276_v27, %v12173_v28  ;;  %v11405_v10 = vld [vmem:[#allocation6 + $0x558] sm:$0xf0] }
 0x2dd   :  { %v13323_v32 = vld [vmem:[#allocation6 + $0x1418] sm:$0xf]  ;;  %v12812_v45 = vor.u32 %v16444_v29, %v12811_v30  ;;  %7537 = vmatpush.bf16.msrb.mxu3 %v14476_v40  ;;  %v16404_v30 = vld [vmem:[#allocation6 + $0xf1c] sm:$0xf]  ;;  %v11600_v29 = vor.u32 %v16132_v23, %v11597_v2 }
 0x2de   :  { %v16572_v33 = vld [vmem:[#allocation6 + $0x1454] sm:$0xf0]  ;;  %v12688_v37 = vor.u32 %v16404_v30, %v12685_v31  ;;  %v12109_v40 = vld [vmem:[#allocation6 + $0xad8] sm:$0xf0]  ;;  %v7309_v30 = vpop.f32.mrf.mxu1 }
 0x2df   :  { %v13899_v46 = vld [vmem:[#allocation6 + $0x1898] sm:$0xf]  ;;  %v13324_v57 = vor.u32 %v16572_v33, %v13323_v32  ;;  %7500 = vmatpush.bf16.msrb.mxu0 %v12812_v45  ;;  %v15988_v32 = vld [vmem:[#allocation6 + $0x21c] sm:$0xf] }
 0x2e0   :  { %v16716_v51 = vld [vmem:[#allocation6 + $0x18d4] sm:$0xf0]  ;;  %v11021_v33 = vld [vmem:[#allocation6 + $0x258] sm:$0xf0] }
 0x2e1   :  { %v14411_v56 = vld [vmem:[#allocation6 + $0x1c98] sm:$0xf]  ;;  %v13900_v59 = vor.u32 %v16716_v51, %v13899_v46  ;;  %7513 = vmatpush.bf16.msrb.mxu1 %v13324_v57  ;;  %v11024_v50 = vor.u32 %v15988_v32, %v11021_v33  ;;  %v16388_v46 = vld [vmem:[#allocation6 + $0xe9c] sm:$0xf] }
 0x2e2   :  { %v16844_v55 = vld [vmem:[#allocation6 + $0x1cd4] sm:$0xf0]  ;;  %7501 = vmatmul.bf16.vlgmr.msrb.gmra.mxu0 %v17475_v6  ;;  %v12621_v51 = vld [vmem:[#allocation6 + $0xed8] sm:$0xf0] }
 0x2e3   :  { %v14412_v1 = vor.u32 %v16844_v55, %v14411_v56  ;;  %v13835_v0 = vld [vmem:[#allocation6 + $0x1818] sm:$0xf]  ;;  %7545 = vmatpush.bf16.msra.mxu0 %v11216_v58  ;;  %7525 = vmatpush.bf16.msrb.mxu2 %v13900_v59  ;;  %v10957_v45 = vld [vmem:[#allocation6 + $0x1d8] sm:$0xf0]  ;;  %v12112_v56 = vor.u32 %v16260_v39, %v12109_v40  ;;  %v7294_v58 = vpop.f32.mrf.mxu0  ;;  %v12624_v26 = vor.u32 %v16388_v46, %v12621_v51  ;;  %v7320_v51 = vpop.f32.mrf.mxu2 }
 0x2e4   :  { %v16700_v48 = vld [vmem:[#allocation6 + $0x1854] sm:$0xf0]  ;;  %7514 = vmatmul.bf16.vlgmr.msrb.gmra.mxu1 %v17478_v9  ;;  %v16100_v55 = vld [vmem:[#allocation6 + $0x59c] sm:$0xf]  ;;  %v7295_v61 = vadd.f32 %v7294_v58, %v17558_v38  ;;  %v10960_v63 = vor.u32 %v15972_v53, %v10957_v45 }
 0x2e5   :  { %v14347_v3 = vld [vmem:[#allocation6 + $0x1c18] sm:$0xf]  ;;  %7558 = vmatpush.bf16.msra.mxu1 %v11728_v60  ;;  %v13836_v14 = vor.u32 %v16700_v48, %v13835_v0  ;;  %7538 = vmatpush.bf16.msrb.mxu3 %v14412_v1  ;;  %v11469_v57 = vld [vmem:[#allocation6 + $0x5d8] sm:$0xf0] }
 0x2e6   :  { %v16828_v4 = vld [vmem:[#allocation6 + $0x1c54] sm:$0xf0]  ;;  %v16244_v60 = vld [vmem:[#allocation6 + $0xa1c] sm:$0xf]  ;;  %v11472_v48 = vor.u32 %v16100_v55, %v11469_v57  ;;  %v7308_v5 = vadd.f32 %v7307_v62, %v7295_v61  ;;  %v7333_v57 = vpop.f32.mrf.mxu3 }
 0x2e7   :  { %v14348_v20 = vor.u32 %v16828_v4, %v14347_v3  ;;  %7546 = vmatpush.bf16.msra.mxu0 %v11152_v8  ;;  %7526 = vmatpush.bf16.msrb.mxu2 %v13836_v14  ;;  %v12045_v59 = vld [vmem:[#allocation6 + $0xa58] sm:$0xf0] }
 0x2e8   :  { %v16372_v1 = vld [vmem:[#allocation6 + $0xe1c] sm:$0xf]  ;;  %v12048_v7 = vor.u32 %v16244_v60, %v12045_v59  ;;  %v7321_v55 = vadd.f32 %v7320_v51, %v7308_v5 }
 0x2e9   :  { %7559 = vmatpush.bf16.msra.mxu1 %v11664_v13  ;;  %7539 = vmatpush.bf16.msrb.mxu3 %v14348_v20  ;;  %v12557_v0 = vld [vmem:[#allocation6 + $0xe58] sm:$0xf0] }
 0x2ea   :  { %7527 = vmatmul.bf16.vlgmr.msrb.gmra.mxu2 %v17482_v41  ;;  %v15956_v3 = vld [vmem:[#allocation6 + $0x11c] sm:$0xf]  ;;  %v12560_v12 = vor.u32 %v16372_v1, %v12557_v0 }
 0x2eb   :  { %7571 = vmatpush.bf16.msra.mxu2 %v12240_v21  ;;  %7547 = vmatpush.bf16.msra.mxu0 %v11088_v11  ;;  %v10893_v4 = vld [vmem:[#allocation6 + $0x158] sm:$0xf0] }
 0x2ec   :  { %7540 = vmatmul.bf16.vlgmr.msrb.gmra.mxu3 %v17484_v44  ;;  %v16084_v8 = vld [vmem:[#allocation6 + $0x51c] sm:$0xf]  ;;  %v10896_v38 = vor.u32 %v15956_v3, %v10893_v4 }
 0x2ed   :  { %7584 = vmatpush.bf16.msra.mxu3 %v12752_v25  ;;  %7560 = vmatpush.bf16.msra.mxu1 %v11600_v29  ;;  %v16228_v13 = vld [vmem:[#allocation6 + $0x99c] sm:$0xf]  ;;  %v11408_v19 = vor.u32 %v16084_v8, %v11405_v10  ;;  %v7296_v25 = vpop.f32.mrf.mxu0 }
 0x2ee   :  { %v11981_v14 = vld [vmem:[#allocation6 + $0x9d8] sm:$0xf0] }
 0x2ef   :  { %7572 = vmatpush.bf16.msra.mxu2 %v12176_v34  ;;  %7548 = vmatpush.bf16.msra.mxu0 %v11024_v50  ;;  %v16356_v16 = vld [vmem:[#allocation6 + $0xd9c] sm:$0xf]  ;;  %v11984_v23 = vor.u32 %v16228_v13, %v11981_v14 }
 0x2f0   :  { %v12493_v18 = vld [vmem:[#allocation6 + $0xdd8] sm:$0xf0] }
 0x2f1   :  { %7585 = vmatpush.bf16.msra.mxu3 %v12688_v37  ;;  %7561 = vmatpush.bf16.msra.mxu1 %v11536_v52  ;;  %v15940_v20 = vld [vmem:[#allocation6 + $0x9c] sm:$0xf]  ;;  %v12496_v27 = vor.u32 %v16356_v16, %v12493_v18 }
 0x2f2   :  { %v10829_v21 = vld [vmem:[#allocation6 + $0xd8] sm:$0xf0] }
 0x2f3   :  { %7573 = vmatpush.bf16.msra.mxu2 %v12112_v56  ;;  %7549 = vmatpush.bf16.msra.mxu0 %v10960_v63  ;;  %v16068_v2 = vld [vmem:[#allocation6 + $0x49c] sm:$0xf]  ;;  %v10832_v31 = vor.u32 %v15940_v20, %v10829_v21  ;;  %v17565_v63 = vadd.f32 %v7333_v57, %v7321_v55 }
 0x2f4   :  { %v11341_v24 = vld [vmem:[#allocation6 + $0x4d8] sm:$0xf0] }
 0x2f5   :  { %7586 = vmatpush.bf16.msra.mxu3 %v12624_v26  ;;  %7562 = vmatpush.bf16.msra.mxu1 %v11472_v48  ;;  %v16212_v28 = vld [vmem:[#allocation6 + $0x91c] sm:$0xf]  ;;  %v11344_v34 = vor.u32 %v16068_v2, %v11341_v24  ;;  %v7322_v2 = vpop.f32.mrf.mxu2 }
 0x2f6   :  { %v11917_v11 = vld [vmem:[#allocation6 + $0x958] sm:$0xf0] }
 0x2f7   :  { %7574 = vmatpush.bf16.msra.mxu2 %v12048_v7  ;;  %7550 = vmatpush.bf16.msra.mxu0 %v10896_v38  ;;  %v16340_v29 = vld [vmem:[#allocation6 + $0xd1c] sm:$0xf]  ;;  %v11920_v39 = vor.u32 %v16212_v28, %v11917_v11  ;;  %v7335_v11 = vpop.f32.mrf.mxu3 }
 0x2f8   :  { %v12429_v32 = vld [vmem:[#allocation6 + $0xd58] sm:$0xf0] }
 0x2f9   :  { %7587 = vmatpush.bf16.msra.mxu3 %v12560_v12  ;;  %v15924_v33 = vld [vmem:[#allocation6 + $0x1c] sm:$0xf]  ;;  %7563 = vmatpush.bf16.msra.mxu1 %v11408_v19  ;;  %v12432_v52 = vor.u32 %v16340_v29, %v12429_v32 }
 0x2fa   :  { %v11277_v37 = vld [vmem:[#allocation6 + $0x458] sm:$0xf0]  ;;  %v10768_v58 = vor.u32 %v15924_v33, %v10765_v35 }
 0x2fb   :  { %7575 = vmatpush.bf16.msra.mxu2 %v11984_v23  ;;  %v16548_v40 = vld [vmem:[#allocation6 + $0x139c] sm:$0xf]  ;;  %7551 = vmatpush.bf16.msra.mxu0 %v10832_v31  ;;  %v11280_v59 = vor.u32 %v16052_v36, %v11277_v37 }
 0x2fc   :  { %v13261_v50 = vld [vmem:[#allocation6 + $0x13d8] sm:$0xf0] }
 0x2fd   :  { %v16676_v46 = vld [vmem:[#allocation6 + $0x179c] sm:$0xf]  ;;  %7588 = vmatpush.bf16.msra.mxu3 %v12496_v27  ;;  %7564 = vmatpush.bf16.msra.mxu1 %v11344_v34  ;;  %v13264_v61 = vor.u32 %v16548_v40, %v13261_v50 }
 0x2fe   :  { %v13773_v53 = vld [vmem:[#allocation6 + $0x17d8] sm:$0xf0] }
 0x2ff   :  { %v16196_v45 = vld [vmem:[#allocation6 + $0x89c] sm:$0xf]  ;;  %7576 = vmatpush.bf16.msra.mxu2 %v11920_v39  ;;  %v13776_v1 = vor.u32 %v16676_v46, %v13773_v53  ;;  %7552 = vmatpush.bf16.msra.mxu0 %v10768_v58  ;;  %v17570_v53 = vld [vmem:[#allocation7] sm:$0xff] }
 0x300   :  { %v11853_v56 = vld [vmem:[#allocation6 + $0x8d8] sm:$0xf0] }
 0x301   :  { %v16324_v26 = vld [vmem:[#allocation6 + $0xc9c] sm:$0xf]  ;;  %v11856_v0 = vor.u32 %v16196_v45, %v11853_v56  ;;  %7589 = vmatpush.bf16.msra.mxu3 %v12432_v52  ;;  %7565 = vmatpush.bf16.msra.mxu1 %v11280_v59  ;;  %v1670_v45 = vperm.slane %v17570_v53, 5 }
 0x302   :  { %v12365_v60 = vld [vmem:[#allocation6 + $0xcd8] sm:$0xf0]  ;;  %7553 = vmatmul.bf16.vlgmr.msra.gmra.mxu0 %v17459_v17 }
 0x303   :  { %v16532_v62 = vld [vmem:[#allocation6 + $0x131c] sm:$0xf]  ;;  %v12368_v7 = vor.u32 %v16324_v26, %v12365_v60  ;;  %7597 = vmatpush.bf16.msrb.mxu0 %v13264_v61  ;;  %7577 = vmatpush.bf16.msra.mxu2 %v11856_v0 }
 0x304   :  { %v13197_v48 = vld [vmem:[#allocation6 + $0x1358] sm:$0xf0]  ;;  %7566 = vmatmul.bf16.vlgmr.msra.gmra.mxu1 %v17462_v22 }
 0x305   :  { %v16660_v3 = vld [vmem:[#allocation6 + $0x171c] sm:$0xf]  ;;  %v13200_v38 = vor.u32 %v16532_v62, %v13197_v48  ;;  %7610 = vmatpush.bf16.msrb.mxu1 %v13776_v1  ;;  %7590 = vmatpush.bf16.msra.mxu3 %v12368_v7  ;;  %v7346_v1 = vpop.f32.mrf.mxu0  ;;  %v7359_v7 = vpop.f32.mrf.mxu1 }
 0x306   :  { %v13709_v4 = vld [vmem:[#allocation6 + $0x1758] sm:$0xf0] }
 0x307   :  { %v16180_v5 = vld [vmem:[#allocation6 + $0x81c] sm:$0xf]  ;;  %v13712_v19 = vor.u32 %v16660_v3, %v13709_v4  ;;  %7598 = vmatpush.bf16.msrb.mxu0 %v13200_v38  ;;  %v7347_v4 = vadd.f32 %v7346_v1, %v1670_v45 }
 0x308   :  { %v11789_v8 = vld [vmem:[#allocation6 + $0x858] sm:$0xf0] }
 0x309   :  { %v16308_v10 = vld [vmem:[#allocation6 + $0xc1c] sm:$0xf]  ;;  %v11792_v20 = vor.u32 %v16180_v5, %v11789_v8  ;;  %7611 = vmatpush.bf16.msrb.mxu1 %v13712_v19  ;;  %v7360_v38 = vadd.f32 %v7359_v7, %v7347_v4 }
 0x30a   :  { %v12301_v12 = vld [vmem:[#allocation6 + $0xc58] sm:$0xf0] }
 0x30b   :  { %v16804_v13 = vld [vmem:[#allocation6 + $0x1b9c] sm:$0xf]  ;;  %v12304_v24 = vor.u32 %v16308_v10, %v12301_v12  ;;  %7578 = vmatpush.bf16.msra.mxu2 %v11792_v20 }
 0x30c   :  { %v14285_v14 = vld [vmem:[#allocation6 + $0x1bd8] sm:$0xf0] }
 0x30d   :  { %v16932_v16 = vld [vmem:[#allocation6 + $0x1f9c] sm:$0xf]  ;;  %v14288_v25 = vor.u32 %v16804_v13, %v14285_v14  ;;  %7591 = vmatpush.bf16.msra.mxu3 %v12304_v24 }
 0x30e   :  { %v14797_v18 = vld [vmem:[#allocation6 + $0x1fd8] sm:$0xf0]  ;;  %7579 = vmatmul.bf16.vlgmr.msra.gmra.mxu2 %v17466_v43 }
 0x30f   :  { %v16516_v21 = vld [vmem:[#allocation6 + $0x129c] sm:$0xf]  ;;  %v14800_v30 = vor.u32 %v16932_v16, %v14797_v18  ;;  %7623 = vmatpush.bf16.msrb.mxu2 %v14288_v25 }
 0x310   :  { %v13133_v23 = vld [vmem:[#allocation6 + $0x12d8] sm:$0xf0]  ;;  %7592 = vmatmul.bf16.vlgmr.msra.gmra.mxu3 %v17468_v49 }
 0x311   :  { %v16644_v27 = vld [vmem:[#allocation6 + $0x169c] sm:$0xf]  ;;  %v13136_v32 = vor.u32 %v16516_v21, %v13133_v23  ;;  %7636 = vmatpush.bf16.msrb.mxu3 %v14800_v30 }
 0x312   :  { %v13645_v28 = vld [vmem:[#allocation6 + $0x16d8] sm:$0xf0] }
 0x313   :  { %v16788_v31 = vld [vmem:[#allocation6 + $0x1b1c] sm:$0xf]  ;;  %v13648_v35 = vor.u32 %v16644_v27, %v13645_v28  ;;  %7599 = vmatpush.bf16.msrb.mxu0 %v13136_v32  ;;  %v7348_v32 = vpop.f32.mrf.mxu0 }
 0x314   :  { %v14221_v29 = vld [vmem:[#allocation6 + $0x1b58] sm:$0xf0] }
 0x315   :  { %v16916_v33 = vld [vmem:[#allocation6 + $0x1f1c] sm:$0xf]  ;;  %v14224_v39 = vor.u32 %v16788_v31, %v14221_v29  ;;  %7612 = vmatpush.bf16.msrb.mxu1 %v13648_v35 }
 0x316   :  { %v14733_v34 = vld [vmem:[#allocation6 + $0x1f58] sm:$0xf0] }
 0x317   :  { %v16500_v36 = vld [vmem:[#allocation6 + $0x121c] sm:$0xf]  ;;  %v14736_v46 = vor.u32 %v16916_v33, %v14733_v34  ;;  %7624 = vmatpush.bf16.msrb.mxu2 %v14224_v39 }
 0x318   :  { %v13069_v37 = vld [vmem:[#allocation6 + $0x1258] sm:$0xf0] }
 0x319   :  { %v16628_v40 = vld [vmem:[#allocation6 + $0x161c] sm:$0xf]  ;;  %v13072_v56 = vor.u32 %v16500_v36, %v13069_v37  ;;  %7637 = vmatpush.bf16.msrb.mxu3 %v14736_v46  ;;  %v7361_v36 = vpop.f32.mrf.mxu1 }
 0x31a   :  { %v13581_v50 = vld [vmem:[#allocation6 + $0x1658] sm:$0xf0]  ;;  %v16141_v36 = vld [vmem:[#allocation6 + $0x6dc] sm:$0xf0] }
 0x31b   :  { %v16772_v51 = vld [vmem:[#allocation6 + $0x1a9c] sm:$0xf]  ;;  %v13584_v58 = vor.u32 %v16628_v40, %v13581_v50  ;;  %7600 = vmatpush.bf16.msrb.mxu0 %v13072_v56 }
 0x31c   :  { %v14157_v52 = vld [vmem:[#allocation6 + $0x1ad8] sm:$0xf0] }
 0x31d   :  { %v16900_v55 = vld [vmem:[#allocation6 + $0x1e9c] sm:$0xf]  ;;  %v14160_v59 = vor.u32 %v16772_v51, %v14157_v52  ;;  %7613 = vmatpush.bf16.msrb.mxu1 %v13584_v58  ;;  %v11731_v58 = vld [vmem:[#allocation6 + $0x7a0] sm:$0xf] }
 0x31e   :  { %v14669_v57 = vld [vmem:[#allocation6 + $0x1ed8] sm:$0xf0] }
 0x31f   :  { %v16484_v26 = vld [vmem:[#allocation6 + $0x119c] sm:$0xf]  ;;  %v14672_v0 = vor.u32 %v16900_v55, %v14669_v57  ;;  %7625 = vmatpush.bf16.msrb.mxu2 %v14160_v59  ;;  %v11219_v55 = vld [vmem:[#allocation6 + $0x3a0] sm:$0xf] }
 0x320   :  { %v13005_v60 = vld [vmem:[#allocation6 + $0x11d8] sm:$0xf0]  ;;  %v16045_v57 = vld [vmem:[#allocation6 + $0x3dc] sm:$0xf0] }
 0x321   :  { %v16612_v61 = vld [vmem:[#allocation6 + $0x159c] sm:$0xf]  ;;  %v13008_v5 = vor.u32 %v16484_v26, %v13005_v60  ;;  %7638 = vmatpush.bf16.msrb.mxu3 %v14672_v0  ;;  %v7372_v26 = vpop.f32.mrf.mxu2  ;;  %v16173_v59 = vld [vmem:[#allocation6 + $0x7dc] sm:$0xf0]  ;;  %v7385_v0 = vpop.f32.mrf.mxu3 }
 0x322   :  { %v13517_v62 = vld [vmem:[#allocation6 + $0x15d8] sm:$0xf0]  ;;  %v7373_v1 = vadd.f32 %v7372_v26, %v7360_v38  ;;  %v16125_v26 = vld [vmem:[#allocation6 + $0x65c] sm:$0xf0] }
 0x323   :  { %v16756_v48 = vld [vmem:[#allocation6 + $0x1a1c] sm:$0xf]  ;;  %v13520_v12 = vor.u32 %v16612_v61, %v13517_v62  ;;  %7601 = vmatpush.bf16.msrb.mxu0 %v13008_v5  ;;  %v11220_v5 = vor.u32 %v16045_v57, %v11219_v55  ;;  %v15997_v55 = vld [vmem:[#allocation6 + $0x25c] sm:$0xf0] }
 0x324   :  { %v14093_v3 = vld [vmem:[#allocation6 + $0x1a58] sm:$0xf0] }
 0x325   :  { %v16884_v8 = vld [vmem:[#allocation6 + $0x1e1c] sm:$0xf]  ;;  %v14096_v16 = vor.u32 %v16756_v48, %v14093_v3  ;;  %7614 = vmatpush.bf16.msrb.mxu1 %v13520_v12  ;;  %v11732_v12 = vor.u32 %v16173_v59, %v11731_v58  ;;  %v11539_v58 = vld [vmem:[#allocation6 + $0x620] sm:$0xf] }
 0x326   :  { %v14605_v10 = vld [vmem:[#allocation6 + $0x1e58] sm:$0xf0]  ;;  %v12115_v59 = vld [vmem:[#allocation6 + $0xaa0] sm:$0xf] }
 0x327   :  { %v16468_v13 = vld [vmem:[#allocation6 + $0x111c] sm:$0xf]  ;;  %v14608_v20 = vor.u32 %v16884_v8, %v14605_v10  ;;  %7626 = vmatpush.bf16.msrb.mxu2 %v14096_v16  ;;  %v11155_v8 = vld [vmem:[#allocation6 + $0x320] sm:$0xf]  ;;  %v17574_v10 = vadd.f32 %v7385_v0, %v7373_v1 }
 0x328   :  { %v12941_v14 = vld [vmem:[#allocation6 + $0x1158] sm:$0xf0]  ;;  %v11667_v16 = vld [vmem:[#allocation6 + $0x720] sm:$0xf] }
 0x329   :  { %v16596_v18 = vld [vmem:[#allocation6 + $0x151c] sm:$0xf]  ;;  %v12944_v2 = vor.u32 %v16468_v13, %v12941_v14  ;;  %7639 = vmatpush.bf16.msrb.mxu3 %v14608_v20  ;;  %v16029_v14 = vld [vmem:[#allocation6 + $0x35c] sm:$0xf0]  ;;  %v7374_v32 = vpop.f32.mrf.mxu2 }
 0x32a   :  { %v13453_v19 = vld [vmem:[#allocation6 + $0x1558] sm:$0xf0]  ;;  %v12627_v1 = vld [vmem:[#allocation6 + $0xea0] sm:$0xf] }
 0x32b   :  { %v16740_v21 = vld [vmem:[#allocation6 + $0x199c] sm:$0xf]  ;;  %v13456_v27 = vor.u32 %v16596_v18, %v13453_v19  ;;  %7602 = vmatpush.bf16.msrb.mxu0 %v12944_v2  ;;  %v16157_v18 = vld [vmem:[#allocation6 + $0x75c] sm:$0xf0] }
 0x32c   :  { %v14029_v23 = vld [vmem:[#allocation6 + $0x19d8] sm:$0xf0]  ;;  %v12243_v2 = vld [vmem:[#allocation6 + $0xba0] sm:$0xf] }
 0x32d   :  { %v16868_v24 = vld [vmem:[#allocation6 + $0x1d9c] sm:$0xf]  ;;  %v14032_v30 = vor.u32 %v16740_v21, %v14029_v23  ;;  %7615 = vmatpush.bf16.msrb.mxu1 %v13456_v27  ;;  %v12755_v27 = vld [vmem:[#allocation6 + $0xfa0] sm:$0xf] }
 0x32e   :  { %v14541_v25 = vld [vmem:[#allocation6 + $0x1dd8] sm:$0xf0]  ;;  %v16397_v0 = vld [vmem:[#allocation6 + $0xedc] sm:$0xf0] }
 0x32f   :  { %v16452_v28 = vld [vmem:[#allocation6 + $0x109c] sm:$0xf]  ;;  %v14544_v33 = vor.u32 %v16868_v24, %v14541_v25  ;;  %7627 = vmatpush.bf16.msrb.mxu2 %v14032_v30  ;;  %v16301_v24 = vld [vmem:[#allocation6 + $0xbdc] sm:$0xf0]  ;;  %v11156_v25 = vor.u32 %v16029_v14, %v11155_v8 }
 0x330   :  { %v12877_v11 = vld [vmem:[#allocation6 + $0x10d8] sm:$0xf0]  ;;  %v16109_v8 = vld [vmem:[#allocation6 + $0x5dc] sm:$0xf0] }
 0x331   :  { %v16580_v31 = vld [vmem:[#allocation6 + $0x149c] sm:$0xf]  ;;  %v12880_v37 = vor.u32 %v16452_v28, %v12877_v11  ;;  %7640 = vmatpush.bf16.msrb.mxu3 %v14544_v33  ;;  %v16429_v28 = vld [vmem:[#allocation6 + $0xfdc] sm:$0xf0]  ;;  %v11668_v11 = vor.u32 %v16157_v18, %v11667_v16 }
 0x332   :  { %v13389_v29 = vld [vmem:[#allocation6 + $0x14d8] sm:$0xf0]  ;;  %v12051_v14 = vld [vmem:[#allocation6 + $0xa20] sm:$0xf] }
 0x333   :  { %v16724_v34 = vld [vmem:[#allocation6 + $0x191c] sm:$0xf]  ;;  %v13392_v46 = vor.u32 %v16580_v31, %v13389_v29  ;;  %7603 = vmatpush.bf16.msrb.mxu0 %v12880_v37  ;;  %v11091_v31 = vld [vmem:[#allocation6 + $0x2a0] sm:$0xf]  ;;  %v7387_v37 = vpop.f32.mrf.mxu3 }
 0x334   :  { %v13965_v35 = vld [vmem:[#allocation6 + $0x1958] sm:$0xf0]  ;;  %v16013_v29 = vld [vmem:[#allocation6 + $0x2dc] sm:$0xf0] }
 0x335   :  { %v16852_v39 = vld [vmem:[#allocation6 + $0x1d1c] sm:$0xf]  ;;  %v13968_v56 = vor.u32 %v16724_v34, %v13965_v35  ;;  %7616 = vmatpush.bf16.msrb.mxu1 %v13392_v46  ;;  %v12244_v34 = vor.u32 %v16301_v24, %v12243_v2  ;;  %v11603_v35 = vld [vmem:[#allocation6 + $0x6a0] sm:$0xf]  ;;  %v11092_v46 = vor.u32 %v16013_v29, %v11091_v31 }
 0x336   :  { %v14477_v40 = vld [vmem:[#allocation6 + $0x1d58] sm:$0xf0]  ;;  %v16253_v16 = vld [vmem:[#allocation6 + $0xa5c] sm:$0xf0] }
 0x337   :  { %v16436_v50 = vld [vmem:[#allocation6 + $0x101c] sm:$0xf]  ;;  %v14480_v60 = vor.u32 %v16852_v39, %v14477_v40  ;;  %7628 = vmatpush.bf16.msrb.mxu2 %v13968_v56  ;;  %v12756_v39 = vor.u32 %v16429_v28, %v12755_v27  ;;  %v12179_v40 = vld [vmem:[#allocation6 + $0xb20] sm:$0xf]  ;;  %v12052_v27 = vor.u32 %v16253_v16, %v12051_v14 }
 0x338   :  { %v12813_v51 = vld [vmem:[#allocation6 + $0x1058] sm:$0xf0]  ;;  %v11027_v56 = vld [vmem:[#allocation6 + $0x220] sm:$0xf] }
 0x339   :  { %v16564_v52 = vld [vmem:[#allocation6 + $0x141c] sm:$0xf]  ;;  %v12816_v48 = vor.u32 %v16436_v50, %v12813_v51  ;;  %7641 = vmatpush.bf16.msrb.mxu3 %v14480_v60  ;;  %v16285_v50 = vld [vmem:[#allocation6 + $0xb5c] sm:$0xf0] }
 0x33a   :  { %v13325_v45 = vld [vmem:[#allocation6 + $0x1458] sm:$0xf0]  ;;  %v12691_v51 = vld [vmem:[#allocation6 + $0xf20] sm:$0xf]  ;;  %v12180_v57 = vor.u32 %v16285_v50, %v12179_v40 }
 0x33b   :  { %v16708_v61 = vld [vmem:[#allocation6 + $0x189c] sm:$0xf]  ;;  %v13328_v7 = vor.u32 %v16564_v52, %v13325_v45  ;;  %7604 = vmatpush.bf16.msrb.mxu0 %v12816_v48  ;;  %v16413_v52 = vld [vmem:[#allocation6 + $0xf5c] sm:$0xf0]  ;;  %v11604_v45 = vor.u32 %v16141_v36, %v11603_v35  ;;  %v11540_v48 = vor.u32 %v16125_v26, %v11539_v58 }
 0x33c   :  { %v13901_v62 = vld [vmem:[#allocation6 + $0x18d8] sm:$0xf0]  ;;  %v12692_v60 = vor.u32 %v16413_v52, %v12691_v51  ;;  %v10899_v2 = vld [vmem:[#allocation6 + $0x120] sm:$0xf] }
 0x33d   :  { %v16836_v3 = vld [vmem:[#allocation6 + $0x1c9c] sm:$0xf]  ;;  %v13904_v13 = vor.u32 %v16708_v61, %v13901_v62  ;;  %7617 = vmatpush.bf16.msrb.mxu1 %v13328_v7  ;;  %v16269_v61 = vld [vmem:[#allocation6 + $0xadc] sm:$0xf0]  ;;  %v11028_v62 = vor.u32 %v15997_v55, %v11027_v56 }
 0x33e   :  { %v14413_v4 = vld [vmem:[#allocation6 + $0x1cd8] sm:$0xf0]  ;;  %7605 = vmatmul.bf16.vlgmr.msrb.gmra.mxu0 %v17475_v6  ;;  %v12116_v7 = vor.u32 %v16269_v61, %v12115_v59  ;;  %v15965_v24 = vld [vmem:[#allocation6 + $0x15c] sm:$0xf0] }
 0x33f   :  { %v14416_v19 = vor.u32 %v16836_v3, %v14413_v4  ;;  %v16692_v38 = vld [vmem:[#allocation6 + $0x181c] sm:$0xf]  ;;  %7649 = vmatpush.bf16.msra.mxu0 %v11220_v5  ;;  %7629 = vmatpush.bf16.msrb.mxu2 %v13904_v13  ;;  %v10963_v3 = vld [vmem:[#allocation6 + $0x1a0] sm:$0xf]  ;;  %v12628_v13 = vor.u32 %v16397_v0, %v12627_v1 }
 0x340   :  { %v13837_v20 = vld [vmem:[#allocation6 + $0x1858] sm:$0xf0]  ;;  %7618 = vmatmul.bf16.vlgmr.msrb.gmra.mxu1 %v17478_v9  ;;  %v15981_v4 = vld [vmem:[#allocation6 + $0x1dc] sm:$0xf0] }
 0x341   :  { %v16820_v21 = vld [vmem:[#allocation6 + $0x1c1c] sm:$0xf]  ;;  %7662 = vmatpush.bf16.msra.mxu1 %v11732_v12  ;;  %v13840_v30 = vor.u32 %v16692_v38, %v13837_v20  ;;  %7642 = vmatpush.bf16.msrb.mxu3 %v14416_v19  ;;  %v11475_v5 = vld [vmem:[#allocation6 + $0x5a0] sm:$0xf]  ;;  %v7398_v12 = vpop.f32.mrf.mxu0  ;;  %v7411_v19 = vpop.f32.mrf.mxu1  ;;  %v10964_v38 = vor.u32 %v15981_v4, %v10963_v3 }
 0x342   :  { %v14349_v23 = vld [vmem:[#allocation6 + $0x1c58] sm:$0xf0]  ;;  %v7399_v18 = vadd.f32 %v7398_v12, %v17574_v10  ;;  %v12563_v20 = vld [vmem:[#allocation6 + $0xe20] sm:$0xf]  ;;  %v10900_v10 = vor.u32 %v15965_v24, %v10899_v2  ;;  %v7424_v3 = vpop.f32.mrf.mxu2 }
 0x343   :  { %v14352_v33 = vor.u32 %v16820_v21, %v14349_v23  ;;  %7650 = vmatpush.bf16.msra.mxu0 %v11156_v25  ;;  %7630 = vmatpush.bf16.msrb.mxu2 %v13840_v30  ;;  %v16381_v21 = vld [vmem:[#allocation6 + $0xe5c] sm:$0xf0]  ;;  %v11476_v23 = vor.u32 %v16109_v8, %v11475_v5 }
 0x344   :  { %v7412_v25 = vadd.f32 %v7411_v19, %v7399_v18  ;;  %v11411_v28 = vld [vmem:[#allocation6 + $0x520] sm:$0xf]  ;;  %v12564_v30 = vor.u32 %v16381_v21, %v12563_v20 }
 0x345   :  { %7663 = vmatpush.bf16.msra.mxu1 %v11668_v11  ;;  %7643 = vmatpush.bf16.msrb.mxu3 %v14352_v33  ;;  %v16093_v11 = vld [vmem:[#allocation6 + $0x55c] sm:$0xf0] }
 0x346   :  { %7631 = vmatmul.bf16.vlgmr.msrb.gmra.mxu2 %v17482_v41  ;;  %v11987_v31 = vld [vmem:[#allocation6 + $0x9a0] sm:$0xf]  ;;  %v7425_v12 = vadd.f32 %v7424_v3, %v7412_v25 }
 0x347   :  { %7675 = vmatpush.bf16.msra.mxu2 %v12244_v34  ;;  %7651 = vmatpush.bf16.msra.mxu0 %v11092_v46  ;;  %v16237_v29 = vld [vmem:[#allocation6 + $0x9dc] sm:$0xf0]  ;;  %v11412_v34 = vor.u32 %v16093_v11, %v11411_v28 }
 0x348   :  { %7644 = vmatmul.bf16.vlgmr.msrb.gmra.mxu3 %v17484_v44  ;;  %v12499_v32 = vld [vmem:[#allocation6 + $0xda0] sm:$0xf]  ;;  %v11988_v37 = vor.u32 %v16237_v29, %v11987_v31 }
 0x349   :  { %7688 = vmatpush.bf16.msra.mxu3 %v12756_v39  ;;  %7664 = vmatpush.bf16.msra.mxu1 %v11604_v45  ;;  %v16365_v33 = vld [vmem:[#allocation6 + $0xddc] sm:$0xf0]  ;;  %v7400_v50 = vpop.f32.mrf.mxu0  ;;  %v7413_v45 = vpop.f32.mrf.mxu1 }
 0x34a   :  { %v10835_v35 = vld [vmem:[#allocation6 + $0xa0] sm:$0xf]  ;;  %v12500_v46 = vor.u32 %v16365_v33, %v12499_v32  ;;  %v7426_v50 = vpop.f32.mrf.mxu2 }
 0x34b   :  { %7676 = vmatpush.bf16.msra.mxu2 %v12180_v57  ;;  %7652 = vmatpush.bf16.msra.mxu0 %v11028_v62  ;;  %v15949_v36 = vld [vmem:[#allocation6 + $0xdc] sm:$0xf0] }
 0x34c   :  { %v11347_v39 = vld [vmem:[#allocation6 + $0x4a0] sm:$0xf]  ;;  %v10836_v56 = vor.u32 %v15949_v36, %v10835_v35 }
 0x34d   :  { %7689 = vmatpush.bf16.msra.mxu3 %v12692_v60  ;;  %7665 = vmatpush.bf16.msra.mxu1 %v11540_v48  ;;  %v16077_v40 = vld [vmem:[#allocation6 + $0x4dc] sm:$0xf0] }
 0x34e   :  { %v11923_v51 = vld [vmem:[#allocation6 + $0x920] sm:$0xf]  ;;  %v11348_v26 = vor.u32 %v16077_v40, %v11347_v39 }
 0x34f   :  { %7677 = vmatpush.bf16.msra.mxu2 %v12116_v7  ;;  %7653 = vmatpush.bf16.msra.mxu0 %v10964_v38  ;;  %v16221_v52 = vld [vmem:[#allocation6 + $0x95c] sm:$0xf0] }
 0x350   :  { %v12435_v55 = vld [vmem:[#allocation6 + $0xd20] sm:$0xf]  ;;  %v11924_v62 = vor.u32 %v16221_v52, %v11923_v51 }
 0x351   :  { %7690 = vmatpush.bf16.msra.mxu3 %v12628_v13  ;;  %7666 = vmatpush.bf16.msra.mxu1 %v11476_v23  ;;  %v16349_v57 = vld [vmem:[#allocation6 + $0xd5c] sm:$0xf0]  ;;  %v7437_v13 = vpop.f32.mrf.mxu3 }
 0x352   :  { %v10771_v58 = vld [vmem:[#allocation6 + $0x20] sm:$0xf]  ;;  %v12436_v4 = vor.u32 %v16349_v57, %v12435_v55  ;;  %v17581_v21 = vadd.f32 %v7437_v13, %v7425_v12 }
 0x353   :  { %7678 = vmatpush.bf16.msra.mxu2 %v12052_v27  ;;  %7654 = vmatpush.bf16.msra.mxu0 %v10900_v10  ;;  %v15933_v60 = vld [vmem:[#allocation6 + $0x5c] sm:$0xf0] }
 0x354   :  { %v11283_v59 = vld [vmem:[#allocation6 + $0x420] sm:$0xf]  ;;  %v10772_v14 = vor.u32 %v15933_v60, %v10771_v58 }
 0x355   :  { %7691 = vmatpush.bf16.msra.mxu3 %v12564_v30  ;;  %7667 = vmatpush.bf16.msra.mxu1 %v11412_v34  ;;  %v16061_v61 = vld [vmem:[#allocation6 + $0x45c] sm:$0xf0] }
 0x356   :  { %v13267_v1 = vld [vmem:[#allocation6 + $0x13a0] sm:$0xf]  ;;  %v11284_v19 = vor.u32 %v16061_v61, %v11283_v59 }
 0x357   :  { %7679 = vmatpush.bf16.msra.mxu2 %v11988_v37  ;;  %v16557_v0 = vld [vmem:[#allocation6 + $0x13dc] sm:$0xf0]  ;;  %7655 = vmatpush.bf16.msra.mxu0 %v10836_v56 }
 0x358   :  { %v13779_v48 = vld [vmem:[#allocation6 + $0x17a0] sm:$0xf]  ;;  %v13268_v38 = vor.u32 %v16557_v0, %v13267_v1 }
 0x359   :  { %7692 = vmatpush.bf16.msra.mxu3 %v12500_v46  ;;  %v16685_v7 = vld [vmem:[#allocation6 + $0x17dc] sm:$0xf0]  ;;  %7668 = vmatpush.bf16.msra.mxu1 %v11348_v26  ;;  %v7439_v56 = vpop.f32.mrf.mxu3 }
 0x35a   :  { %v11859_v5 = vld [vmem:[#allocation6 + $0x8a0] sm:$0xf]  ;;  %v13780_v23 = vor.u32 %v16685_v7, %v13779_v48 }
 0x35b   :  { %v16205_v8 = vld [vmem:[#allocation6 + $0x8dc] sm:$0xf0]  ;;  %7680 = vmatpush.bf16.msra.mxu2 %v11924_v62  ;;  %7656 = vmatpush.bf16.msra.mxu0 %v10772_v14 }
 0x35c   :  { %v12371_v16 = vld [vmem:[#allocation6 + $0xca0] sm:$0xf]  ;;  %v11860_v2 = vor.u32 %v16205_v8, %v11859_v5  ;;  %v1671_v8 = vperm.slane %v17570_v53, 6  ;;  %v7463_v53 = vpop.f32.mrf.mxu1 }
 0x35d   :  { %v16333_v18 = vld [vmem:[#allocation6 + $0xcdc] sm:$0xf0]  ;;  %7693 = vmatpush.bf16.msra.mxu3 %v12436_v4  ;;  %7669 = vmatpush.bf16.msra.mxu1 %v11284_v19 }
 0x35e   :  { %v13203_v20 = vld [vmem:[#allocation6 + $0x1320] sm:$0xf]  ;;  %v12372_v11 = vor.u32 %v16333_v18, %v12371_v16  ;;  %7657 = vmatmul.bf16.vlgmr.msra.gmra.mxu0 %v17459_v17 }
 0x35f   :  { %v16541_v24 = vld [vmem:[#allocation6 + $0x135c] sm:$0xf0]  ;;  %7701 = vmatpush.bf16.msrb.mxu0 %v13268_v38  ;;  %7681 = vmatpush.bf16.msra.mxu2 %v11860_v2  ;;  %v7450_v2 = vpop.f32.mrf.mxu0 }
 0x360   :  { %v13715_v27 = vld [vmem:[#allocation6 + $0x1720] sm:$0xf]  ;;  %v13204_v33 = vor.u32 %v16541_v24, %v13203_v20  ;;  %7670 = vmatmul.bf16.vlgmr.msra.gmra.mxu1 %v17462_v22 }
 0x361   :  { %v16669_v28 = vld [vmem:[#allocation6 + $0x175c] sm:$0xf0]  ;;  %7714 = vmatpush.bf16.msrb.mxu1 %v13780_v23  ;;  %7694 = vmatpush.bf16.msra.mxu3 %v12372_v11  ;;  %v7451_v11 = vadd.f32 %v7450_v2, %v1671_v8 }
 0x362   :  { %v11795_v25 = vld [vmem:[#allocation6 + $0x820] sm:$0xf]  ;;  %v13716_v36 = vor.u32 %v16669_v28, %v13715_v27 }
 0x363   :  { %v16189_v30 = vld [vmem:[#allocation6 + $0x85c] sm:$0xf0]  ;;  %7702 = vmatpush.bf16.msrb.mxu0 %v13204_v33  ;;  %v7464_v33 = vadd.f32 %v7463_v53, %v7451_v11 }
 0x364   :  { %v12307_v31 = vld [vmem:[#allocation6 + $0xc20] sm:$0xf]  ;;  %v11796_v37 = vor.u32 %v16189_v30, %v11795_v25 }
 0x365   :  { %v16317_v29 = vld [vmem:[#allocation6 + $0xc5c] sm:$0xf0]  ;;  %7715 = vmatpush.bf16.msrb.mxu1 %v13716_v36 }
 0x366   :  { %v14291_v10 = vld [vmem:[#allocation6 + $0x1ba0] sm:$0xf]  ;;  %v12308_v46 = vor.u32 %v16317_v29, %v12307_v31  ;;  %7682 = vmatpush.bf16.msra.mxu2 %v11796_v37 }
 0x367   :  { %v16813_v32 = vld [vmem:[#allocation6 + $0x1bdc] sm:$0xf0] }
 0x368   :  { %v14803_v34 = vld [vmem:[#allocation6 + $0x1fa0] sm:$0xf]  ;;  %v14292_v51 = vor.u32 %v16813_v32, %v14291_v10  ;;  %7695 = vmatpush.bf16.msra.mxu3 %v12308_v46 }
 0x369   :  { %v16941_v35 = vld [vmem:[#allocation6 + $0x1fdc] sm:$0xf0]  ;;  %7683 = vmatmul.bf16.vlgmr.msra.gmra.mxu2 %v17466_v43 }
 0x36a   :  { %v13139_v39 = vld [vmem:[#allocation6 + $0x12a0] sm:$0xf]  ;;  %v14804_v55 = vor.u32 %v16941_v35, %v14803_v34  ;;  %7727 = vmatpush.bf16.msrb.mxu2 %v14292_v51 }
 0x36b   :  { %v16525_v40 = vld [vmem:[#allocation6 + $0x12dc] sm:$0xf0]  ;;  %7696 = vmatmul.bf16.vlgmr.msra.gmra.mxu3 %v17468_v49 }
 0x36c   :  { %v13651_v52 = vld [vmem:[#allocation6 + $0x16a0] sm:$0xf]  ;;  %v13140_v26 = vor.u32 %v16525_v40, %v13139_v39  ;;  %7740 = vmatpush.bf16.msrb.mxu3 %v14804_v55 }
 0x36d   :  { %v16653_v45 = vld [vmem:[#allocation6 + $0x16dc] sm:$0xf0] }
 0x36e   :  { %v14227_v57 = vld [vmem:[#allocation6 + $0x1b20] sm:$0xf]  ;;  %v13652_v61 = vor.u32 %v16653_v45, %v13651_v52  ;;  %7703 = vmatpush.bf16.msrb.mxu0 %v13140_v26  ;;  %v7452_v26 = vpop.f32.mrf.mxu0 }
 0x36f   :  { %v16797_v58 = vld [vmem:[#allocation6 + $0x1b5c] sm:$0xf0] }
 0x370   :  { %v14739_v60 = vld [vmem:[#allocation6 + $0x1f20] sm:$0xf]  ;;  %v14228_v0 = vor.u32 %v16797_v58, %v14227_v57  ;;  %7716 = vmatpush.bf16.msrb.mxu1 %v13652_v61 }
 0x371   :  { %v16925_v59 = vld [vmem:[#allocation6 + $0x1f5c] sm:$0xf0] }
 0x372   :  { %v13075_v62 = vld [vmem:[#allocation6 + $0x1220] sm:$0xf]  ;;  %v14740_v4 = vor.u32 %v16925_v59, %v14739_v60  ;;  %7728 = vmatpush.bf16.msrb.mxu2 %v14228_v0 }
 0x373   :  { %v16509_v1 = vld [vmem:[#allocation6 + $0x125c] sm:$0xf0] }
 0x374   :  { %v13587_v48 = vld [vmem:[#allocation6 + $0x1620] sm:$0xf]  ;;  %v13076_v12 = vor.u32 %v16509_v1, %v13075_v62  ;;  %7741 = vmatpush.bf16.msrb.mxu3 %v14740_v4  ;;  %v7465_v62 = vpop.f32.mrf.mxu1 }
 0x375   :  { %v16637_v3 = vld [vmem:[#allocation6 + $0x165c] sm:$0xf0]  ;;  %v11605_v62 = vld [vmem:[#allocation6 + $0x6e0] sm:$0xf0] }
 0x376   :  { %v14163_v7 = vld [vmem:[#allocation6 + $0x1aa0] sm:$0xf]  ;;  %v13588_v16 = vor.u32 %v16637_v3, %v13587_v48  ;;  %7704 = vmatpush.bf16.msrb.mxu0 %v13076_v12 }
 0x377   :  { %v16781_v5 = vld [vmem:[#allocation6 + $0x1adc] sm:$0xf0] }
 0x378   :  { %v14675_v13 = vld [vmem:[#allocation6 + $0x1ea0] sm:$0xf]  ;;  %v14164_v38 = vor.u32 %v16781_v5, %v14163_v7  ;;  %7717 = vmatpush.bf16.msrb.mxu1 %v13588_v16  ;;  %v16165_v16 = vld [vmem:[#allocation6 + $0x7a4] sm:$0xf] }
 0x379   :  { %v16909_v14 = vld [vmem:[#allocation6 + $0x1edc] sm:$0xf0] }
 0x37a   :  { %v13011_v18 = vld [vmem:[#allocation6 + $0x11a0] sm:$0xf]  ;;  %v14676_v24 = vor.u32 %v16909_v14, %v14675_v13  ;;  %7729 = vmatpush.bf16.msrb.mxu2 %v14164_v38  ;;  %v16037_v13 = vld [vmem:[#allocation6 + $0x3a4] sm:$0xf] }
 0x37b   :  { %v16493_v19 = vld [vmem:[#allocation6 + $0x11dc] sm:$0xf0]  ;;  %v11221_v14 = vld [vmem:[#allocation6 + $0x3e0] sm:$0xf0] }
 0x37c   :  { %v13523_v20 = vld [vmem:[#allocation6 + $0x15a0] sm:$0xf]  ;;  %v13012_v25 = vor.u32 %v16493_v19, %v13011_v18  ;;  %7742 = vmatpush.bf16.msrb.mxu3 %v14676_v24  ;;  %v7476_v18 = vpop.f32.mrf.mxu2  ;;  %v11733_v38 = vld [vmem:[#allocation6 + $0x7e0] sm:$0xf0]  ;;  %v7489_v24 = vpop.f32.mrf.mxu3 }
 0x37d   :  { %v16621_v23 = vld [vmem:[#allocation6 + $0x15dc] sm:$0xf0]  ;;  %v7477_v2 = vadd.f32 %v7476_v18, %v7464_v33  ;;  %v11541_v18 = vld [vmem:[#allocation6 + $0x660] sm:$0xf0] }
 0x37e   :  { %v14099_v27 = vld [vmem:[#allocation6 + $0x1a20] sm:$0xf]  ;;  %v13524_v29 = vor.u32 %v16621_v23, %v13523_v20  ;;  %7705 = vmatpush.bf16.msrb.mxu0 %v13012_v25  ;;  %v11224_v25 = vor.u32 %v16037_v13, %v11221_v14  ;;  %v11029_v13 = vld [vmem:[#allocation6 + $0x260] sm:$0xf0] }
 0x37f   :  { %v16765_v28 = vld [vmem:[#allocation6 + $0x1a5c] sm:$0xf0] }
 0x380   :  { %v14611_v30 = vld [vmem:[#allocation6 + $0x1e20] sm:$0xf]  ;;  %v14100_v34 = vor.u32 %v16765_v28, %v14099_v27  ;;  %7718 = vmatpush.bf16.msrb.mxu1 %v13524_v29  ;;  %v11736_v29 = vor.u32 %v16165_v16, %v11733_v38  ;;  %v16117_v16 = vld [vmem:[#allocation6 + $0x624] sm:$0xf] }
 0x381   :  { %v16893_v31 = vld [vmem:[#allocation6 + $0x1e5c] sm:$0xf0]  ;;  %v16261_v38 = vld [vmem:[#allocation6 + $0xaa4] sm:$0xf] }
 0x382   :  { %v12947_v10 = vld [vmem:[#allocation6 + $0x1120] sm:$0xf]  ;;  %v14612_v37 = vor.u32 %v16893_v31, %v14611_v30  ;;  %7730 = vmatpush.bf16.msrb.mxu2 %v14100_v34  ;;  %v16021_v30 = vld [vmem:[#allocation6 + $0x324] sm:$0xf]  ;;  %v17588_v31 = vadd.f32 %v7489_v24, %v7477_v2 }
 0x383   :  { %v16477_v32 = vld [vmem:[#allocation6 + $0x115c] sm:$0xf0]  ;;  %v16149_v34 = vld [vmem:[#allocation6 + $0x724] sm:$0xf] }
 0x384   :  { %v13459_v35 = vld [vmem:[#allocation6 + $0x1520] sm:$0xf]  ;;  %v12948_v50 = vor.u32 %v16477_v32, %v12947_v10  ;;  %7743 = vmatpush.bf16.msrb.mxu3 %v14612_v37  ;;  %v11157_v32 = vld [vmem:[#allocation6 + $0x360] sm:$0xf0]  ;;  %v7478_v26 = vpop.f32.mrf.mxu2 }
 0x385   :  { %v16605_v36 = vld [vmem:[#allocation6 + $0x155c] sm:$0xf0]  ;;  %v16389_v2 = vld [vmem:[#allocation6 + $0xea4] sm:$0xf] }
 0x386   :  { %v14035_v39 = vld [vmem:[#allocation6 + $0x19a0] sm:$0xf]  ;;  %v13460_v52 = vor.u32 %v16605_v36, %v13459_v35  ;;  %7706 = vmatpush.bf16.msrb.mxu0 %v12948_v50  ;;  %v11669_v35 = vld [vmem:[#allocation6 + $0x760] sm:$0xf0] }
 0x387   :  { %v16749_v40 = vld [vmem:[#allocation6 + $0x19dc] sm:$0xf0]  ;;  %v16293_v50 = vld [vmem:[#allocation6 + $0xba4] sm:$0xf] }
 0x388   :  { %v14547_v46 = vld [vmem:[#allocation6 + $0x1da0] sm:$0xf]  ;;  %v14036_v55 = vor.u32 %v16749_v40, %v14035_v39  ;;  %7719 = vmatpush.bf16.msrb.mxu1 %v13460_v52  ;;  %v16421_v52 = vld [vmem:[#allocation6 + $0xfa4] sm:$0xf] }
 0x389   :  { %v16877_v51 = vld [vmem:[#allocation6 + $0x1ddc] sm:$0xf0]  ;;  %v12629_v24 = vld [vmem:[#allocation6 + $0xee0] sm:$0xf0] }
 0x38a   :  { %v12883_v45 = vld [vmem:[#allocation6 + $0x10a0] sm:$0xf]  ;;  %v14548_v60 = vor.u32 %v16877_v51, %v14547_v46  ;;  %7731 = vmatpush.bf16.msrb.mxu2 %v14036_v55  ;;  %v12245_v46 = vld [vmem:[#allocation6 + $0xbe0] sm:$0xf0]  ;;  %v11160_v51 = vor.u32 %v16021_v30, %v11157_v32 }
 0x38b   :  { %v16461_v56 = vld [vmem:[#allocation6 + $0x10dc] sm:$0xf0]  ;;  %v11477_v30 = vld [vmem:[#allocation6 + $0x5e0] sm:$0xf0] }
 0x38c   :  { %v13395_v57 = vld [vmem:[#allocation6 + $0x14a0] sm:$0xf]  ;;  %v12884_v1 = vor.u32 %v16461_v56, %v12883_v45  ;;  %7744 = vmatpush.bf16.msrb.mxu3 %v14548_v60  ;;  %v12757_v45 = vld [vmem:[#allocation6 + $0xfe0] sm:$0xf0]  ;;  %v11672_v56 = vor.u32 %v16149_v34, %v11669_v35 }
 0x38d   :  { %v16589_v58 = vld [vmem:[#allocation6 + $0x14dc] sm:$0xf0]  ;;  %v16245_v32 = vld [vmem:[#allocation6 + $0xa24] sm:$0xf] }
 0x38e   :  { %v13971_v59 = vld [vmem:[#allocation6 + $0x1920] sm:$0xf]  ;;  %v13396_v4 = vor.u32 %v16589_v58, %v13395_v57  ;;  %7707 = vmatpush.bf16.msrb.mxu0 %v12884_v1  ;;  %v16005_v57 = vld [vmem:[#allocation6 + $0x2a4] sm:$0xf]  ;;  %v7491_v1 = vpop.f32.mrf.mxu3 }
 0x38f   :  { %v16733_v61 = vld [vmem:[#allocation6 + $0x195c] sm:$0xf0]  ;;  %v11093_v58 = vld [vmem:[#allocation6 + $0x2e0] sm:$0xf0] }
 0x390   :  { %v14483_v0 = vld [vmem:[#allocation6 + $0x1d20] sm:$0xf]  ;;  %v13972_v12 = vor.u32 %v16733_v61, %v13971_v59  ;;  %7720 = vmatpush.bf16.msrb.mxu1 %v13396_v4  ;;  %v12248_v59 = vor.u32 %v16293_v50, %v12245_v46  ;;  %v16133_v61 = vld [vmem:[#allocation6 + $0x6a4] sm:$0xf]  ;;  %v11096_v4 = vor.u32 %v16005_v57, %v11093_v58 }
 0x391   :  { %v16861_v48 = vld [vmem:[#allocation6 + $0x1d5c] sm:$0xf0]  ;;  %v12053_v34 = vld [vmem:[#allocation6 + $0xa60] sm:$0xf0] }
 0x392   :  { %v12819_v3 = vld [vmem:[#allocation6 + $0x1020] sm:$0xf]  ;;  %v14484_v19 = vor.u32 %v16861_v48, %v14483_v0  ;;  %7732 = vmatpush.bf16.msrb.mxu2 %v13972_v12  ;;  %v12760_v0 = vor.u32 %v16421_v52, %v12757_v45  ;;  %v16277_v48 = vld [vmem:[#allocation6 + $0xb24] sm:$0xf]  ;;  %v12056_v52 = vor.u32 %v16245_v32, %v12053_v34 }
 0x393   :  { %v16445_v7 = vld [vmem:[#allocation6 + $0x105c] sm:$0xf0]  ;;  %v15989_v12 = vld [vmem:[#allocation6 + $0x224] sm:$0xf] }
 0x394   :  { %v13331_v5 = vld [vmem:[#allocation6 + $0x1420] sm:$0xf]  ;;  %v12820_v27 = vor.u32 %v16445_v7, %v12819_v3  ;;  %7745 = vmatpush.bf16.msrb.mxu3 %v14484_v19  ;;  %v12181_v3 = vld [vmem:[#allocation6 + $0xb60] sm:$0xf0] }
 0x395   :  { %v16573_v8 = vld [vmem:[#allocation6 + $0x145c] sm:$0xf0]  ;;  %v16405_v7 = vld [vmem:[#allocation6 + $0xf24] sm:$0xf]  ;;  %v12184_v14 = vor.u32 %v16277_v48, %v12181_v3 }
 0x396   :  { %v13907_v20 = vld [vmem:[#allocation6 + $0x18a0] sm:$0xf]  ;;  %v13332_v53 = vor.u32 %v16573_v8, %v13331_v5  ;;  %7708 = vmatpush.bf16.msrb.mxu0 %v12820_v27  ;;  %v12693_v5 = vld [vmem:[#allocation6 + $0xf60] sm:$0xf0]  ;;  %v11608_v8 = vor.u32 %v16133_v61, %v11605_v62  ;;  %v11544_v27 = vor.u32 %v16117_v16, %v11541_v18 }
 0x397   :  { %v16717_v23 = vld [vmem:[#allocation6 + $0x18dc] sm:$0xf0]  ;;  %v12696_v19 = vor.u32 %v16405_v7, %v12693_v5  ;;  %v15957_v50 = vld [vmem:[#allocation6 + $0x124] sm:$0xf] }
 0x398   :  { %v14419_v28 = vld [vmem:[#allocation6 + $0x1ca0] sm:$0xf]  ;;  %v13908_v10 = vor.u32 %v16717_v23, %v13907_v20  ;;  %7721 = vmatpush.bf16.msrb.mxu1 %v13332_v53  ;;  %v12117_v20 = vld [vmem:[#allocation6 + $0xae0] sm:$0xf0]  ;;  %v11032_v23 = vor.u32 %v15989_v12, %v11029_v13 }
 0x399   :  { %v16845_v11 = vld [vmem:[#allocation6 + $0x1cdc] sm:$0xf0]  ;;  %7709 = vmatmul.bf16.vlgmr.msrb.gmra.mxu0 %v17475_v6  ;;  %v12120_v53 = vor.u32 %v16261_v38, %v12117_v20  ;;  %v10901_v46 = vld [vmem:[#allocation6 + $0x160] sm:$0xf0] }
 0x39a   :  { %v14420_v36 = vor.u32 %v16845_v11, %v14419_v28  ;;  %v13843_v33 = vld [vmem:[#allocation6 + $0x1820] sm:$0xf]  ;;  %7753 = vmatpush.bf16.msra.mxu0 %v11224_v25  ;;  %7733 = vmatpush.bf16.msrb.mxu2 %v13908_v10  ;;  %v15973_v28 = vld [vmem:[#allocation6 + $0x1a4] sm:$0xf]  ;;  %v12632_v10 = vor.u32 %v16389_v2, %v12629_v24 }
 0x39b   :  { %v16701_v37 = vld [vmem:[#allocation6 + $0x185c] sm:$0xf0]  ;;  %7722 = vmatmul.bf16.vlgmr.msrb.gmra.mxu1 %v17478_v9  ;;  %v10965_v11 = vld [vmem:[#allocation6 + $0x1e0] sm:$0xf0] }
 0x39c   :  { %v14355_v39 = vld [vmem:[#allocation6 + $0x1c20] sm:$0xf]  ;;  %7766 = vmatpush.bf16.msra.mxu1 %v11736_v29  ;;  %v13844_v55 = vor.u32 %v16701_v37, %v13843_v33  ;;  %7746 = vmatpush.bf16.msrb.mxu3 %v14420_v36  ;;  %v16101_v25 = vld [vmem:[#allocation6 + $0x5a4] sm:$0xf]  ;;  %v7502_v29 = vpop.f32.mrf.mxu0  ;;  %v7515_v36 = vpop.f32.mrf.mxu1  ;;  %v10968_v33 = vor.u32 %v15973_v28, %v10965_v11 }
 0x39d   :  { %v16829_v40 = vld [vmem:[#allocation6 + $0x1c5c] sm:$0xf0]  ;;  %v7503_v35 = vadd.f32 %v7502_v29, %v17588_v31  ;;  %v16373_v37 = vld [vmem:[#allocation6 + $0xe24] sm:$0xf]  ;;  %v10904_v31 = vor.u32 %v15957_v50, %v10901_v46  ;;  %v7528_v28 = vpop.f32.mrf.mxu2 }
 0x39e   :  { %v14356_v60 = vor.u32 %v16829_v40, %v14355_v39  ;;  %7754 = vmatpush.bf16.msra.mxu0 %v11160_v51  ;;  %7734 = vmatpush.bf16.msrb.mxu2 %v13844_v55  ;;  %v12565_v39 = vld [vmem:[#allocation6 + $0xe60] sm:$0xf0]  ;;  %v11480_v40 = vor.u32 %v16101_v25, %v11477_v30 }
 0x39f   :  { %v7516_v51 = vadd.f32 %v7515_v36, %v7503_v35  ;;  %v16085_v45 = vld [vmem:[#allocation6 + $0x524] sm:$0xf]  ;;  %v12568_v55 = vor.u32 %v16373_v37, %v12565_v39 }
 0x3a0   :  { %7767 = vmatpush.bf16.msra.mxu1 %v11672_v56  ;;  %7747 = vmatpush.bf16.msrb.mxu3 %v14356_v60  ;;  %v11413_v56 = vld [vmem:[#allocation6 + $0x560] sm:$0xf0] }
 0x3a1   :  { %7735 = vmatmul.bf16.vlgmr.msrb.gmra.mxu2 %v17482_v41  ;;  %v16229_v57 = vld [vmem:[#allocation6 + $0x9a4] sm:$0xf]  ;;  %v7529_v29 = vadd.f32 %v7528_v28, %v7516_v51 }
 0x3a2   :  { %7779 = vmatpush.bf16.msra.mxu2 %v12248_v59  ;;  %7755 = vmatpush.bf16.msra.mxu0 %v11096_v4  ;;  %v11989_v58 = vld [vmem:[#allocation6 + $0x9e0] sm:$0xf0]  ;;  %v11416_v59 = vor.u32 %v16085_v45, %v11413_v56 }
 0x3a3   :  { %7748 = vmatmul.bf16.vlgmr.msrb.gmra.mxu3 %v17484_v44  ;;  %v16357_v26 = vld [vmem:[#allocation6 + $0xda4] sm:$0xf]  ;;  %v11992_v1 = vor.u32 %v16229_v57, %v11989_v58 }
 0x3a4   :  { %7792 = vmatpush.bf16.msra.mxu3 %v12760_v0  ;;  %7768 = vmatpush.bf16.msra.mxu1 %v11608_v8  ;;  %v12501_v60 = vld [vmem:[#allocation6 + $0xde0] sm:$0xf0]  ;;  %v7504_v3 = vpop.f32.mrf.mxu0  ;;  %v7517_v8 = vpop.f32.mrf.mxu1 }
 0x3a5   :  { %v15941_v61 = vld [vmem:[#allocation6 + $0xa4] sm:$0xf]  ;;  %v12504_v4 = vor.u32 %v16357_v26, %v12501_v60  ;;  %v7530_v3 = vpop.f32.mrf.mxu2 }
 0x3a6   :  { %7780 = vmatpush.bf16.msra.mxu2 %v12184_v14  ;;  %7756 = vmatpush.bf16.msra.mxu0 %v11032_v23  ;;  %v10837_v62 = vld [vmem:[#allocation6 + $0xe0] sm:$0xf0] }
 0x3a7   :  { %v16069_v0 = vld [vmem:[#allocation6 + $0x4a4] sm:$0xf]  ;;  %v10840_v12 = vor.u32 %v15941_v61, %v10837_v62 }
 0x3a8   :  { %7793 = vmatpush.bf16.msra.mxu3 %v12696_v19  ;;  %7769 = vmatpush.bf16.msra.mxu1 %v11544_v27  ;;  %v11349_v48 = vld [vmem:[#allocation6 + $0x4e0] sm:$0xf0] }
 0x3a9   :  { %v16213_v7 = vld [vmem:[#allocation6 + $0x924] sm:$0xf]  ;;  %v11352_v18 = vor.u32 %v16069_v0, %v11349_v48 }
 0x3aa   :  { %7781 = vmatpush.bf16.msra.mxu2 %v12120_v53  ;;  %7757 = vmatpush.bf16.msra.mxu0 %v10968_v33  ;;  %v11925_v5 = vld [vmem:[#allocation6 + $0x960] sm:$0xf0] }
 0x3ab   :  { %v16341_v13 = vld [vmem:[#allocation6 + $0xd24] sm:$0xf]  ;;  %v11928_v23 = vor.u32 %v16213_v7, %v11925_v5 }
 0x3ac   :  { %7794 = vmatpush.bf16.msra.mxu3 %v12632_v10  ;;  %7770 = vmatpush.bf16.msra.mxu1 %v11480_v40  ;;  %v12437_v14 = vld [vmem:[#allocation6 + $0xd60] sm:$0xf0]  ;;  %v7541_v10 = vpop.f32.mrf.mxu3 }
 0x3ad   :  { %v15925_v16 = vld [vmem:[#allocation6 + $0x24] sm:$0xf]  ;;  %v12440_v11 = vor.u32 %v16341_v13, %v12437_v14  ;;  %v17595_v39 = vadd.f32 %v7541_v10, %v7529_v29 }
 0x3ae   :  { %7782 = vmatpush.bf16.msra.mxu2 %v12056_v52  ;;  %7758 = vmatpush.bf16.msra.mxu0 %v10904_v31  ;;  %v10773_v19 = vld [vmem:[#allocation6 + $0x60] sm:$0xf0] }
 0x3af   :  { %v16053_v38 = vld [vmem:[#allocation6 + $0x424] sm:$0xf]  ;;  %v10776_v32 = vor.u32 %v15925_v16, %v10773_v19 }
 0x3b0   :  { %7795 = vmatpush.bf16.msra.mxu3 %v12568_v55  ;;  %7771 = vmatpush.bf16.msra.mxu1 %v11416_v59  ;;  %v11285_v20 = vld [vmem:[#allocation6 + $0x460] sm:$0xf0] }
 0x3b1   :  { %v16549_v2 = vld [vmem:[#allocation6 + $0x13a4] sm:$0xf]  ;;  %v11288_v36 = vor.u32 %v16053_v38, %v11285_v20 }
 0x3b2   :  { %7783 = vmatpush.bf16.msra.mxu2 %v11992_v1  ;;  %v13269_v24 = vld [vmem:[#allocation6 + $0x13e0] sm:$0xf0]  ;;  %7759 = vmatpush.bf16.msra.mxu0 %v10840_v12 }
 0x3b3   :  { %v16677_v27 = vld [vmem:[#allocation6 + $0x17a4] sm:$0xf]  ;;  %v13272_v33 = vor.u32 %v16549_v2, %v13269_v24 }
 0x3b4   :  { %7796 = vmatpush.bf16.msra.mxu3 %v12504_v4  ;;  %v13781_v53 = vld [vmem:[#allocation6 + $0x17e0] sm:$0xf0]  ;;  %7772 = vmatpush.bf16.msra.mxu1 %v11352_v18  ;;  %v7543_v12 = vpop.f32.mrf.mxu3 }
 0x3b5   :  { %v16197_v25 = vld [vmem:[#allocation6 + $0x8a4] sm:$0xf]  ;;  %v13784_v40 = vor.u32 %v16677_v27, %v13781_v53 }
 0x3b6   :  { %v11861_v30 = vld [vmem:[#allocation6 + $0x8e0] sm:$0xf0]  ;;  %7784 = vmatpush.bf16.msra.mxu2 %v11928_v23  ;;  %7760 = vmatpush.bf16.msra.mxu0 %v10776_v32 }
 0x3b7   :  { %v16325_v34 = vld [vmem:[#allocation6 + $0xca4] sm:$0xf]  ;;  %v11864_v50 = vor.u32 %v16197_v25, %v11861_v30 }
 0x3b8   :  { %v12373_v35 = vld [vmem:[#allocation6 + $0xce0] sm:$0xf0]  ;;  %7797 = vmatpush.bf16.msra.mxu3 %v12440_v11  ;;  %7773 = vmatpush.bf16.msra.mxu1 %v11288_v36 }
 0x3b9   :  { %v16533_v37 = vld [vmem:[#allocation6 + $0x1324] sm:$0xf]  ;;  %v12376_v56 = vor.u32 %v16325_v34, %v12373_v35  ;;  %7761 = vmatmul.bf16.vlgmr.msra.gmra.mxu0 %v17459_v17 }
 0x3ba   :  { %v13205_v46 = vld [vmem:[#allocation6 + $0x1360] sm:$0xf0]  ;;  %7805 = vmatpush.bf16.msrb.mxu0 %v13272_v33  ;;  %7785 = vmatpush.bf16.msra.mxu2 %v11864_v50 }
 0x3bb   :  { %v16661_v52 = vld [vmem:[#allocation6 + $0x1724] sm:$0xf]  ;;  %v13208_v60 = vor.u32 %v16533_v37, %v13205_v46  ;;  %7774 = vmatmul.bf16.vlgmr.msra.gmra.mxu1 %v17462_v22  ;;  %v7554_v46 = vpop.f32.mrf.mxu0 }
 0x3bc   :  { %v13717_v45 = vld [vmem:[#allocation6 + $0x1760] sm:$0xf0]  ;;  %7818 = vmatpush.bf16.msrb.mxu1 %v13784_v40  ;;  %7798 = vmatpush.bf16.msra.mxu3 %v12376_v56 }
 0x3bd   :  { %v16181_v51 = vld [vmem:[#allocation6 + $0x824] sm:$0xf]  ;;  %v13720_v62 = vor.u32 %v16661_v52, %v13717_v45 }
 0x3be   :  { %v11797_v55 = vld [vmem:[#allocation6 + $0x860] sm:$0xf0]  ;;  %7806 = vmatpush.bf16.msrb.mxu0 %v13208_v60 }
 0x3bf   :  { %v16309_v57 = vld [vmem:[#allocation6 + $0xc24] sm:$0xf]  ;;  %v11800_v1 = vor.u32 %v16181_v51, %v11797_v55  ;;  %v7567_v55 = vpop.f32.mrf.mxu1 }
 0x3c0   :  { %v12309_v58 = vld [vmem:[#allocation6 + $0xc60] sm:$0xf0]  ;;  %7819 = vmatpush.bf16.msrb.mxu1 %v13720_v62 }
 0x3c1   :  { %v16805_v31 = vld [vmem:[#allocation6 + $0x1ba4] sm:$0xf]  ;;  %v12312_v4 = vor.u32 %v16309_v57, %v12309_v58  ;;  %7786 = vmatpush.bf16.msra.mxu2 %v11800_v1 }
 0x3c2   :  { %v14293_v26 = vld [vmem:[#allocation6 + $0x1be0] sm:$0xf0] }
 0x3c3   :  { %v16933_v59 = vld [vmem:[#allocation6 + $0x1fa4] sm:$0xf]  ;;  %v14296_v7 = vor.u32 %v16805_v31, %v14293_v26  ;;  %7799 = vmatpush.bf16.msra.mxu3 %v12312_v4 }
 0x3c4   :  { %v14805_v61 = vld [vmem:[#allocation6 + $0x1fe0] sm:$0xf0]  ;;  %7787 = vmatmul.bf16.vlgmr.msra.gmra.mxu2 %v17466_v43 }
 0x3c5   :  { %v16517_v0 = vld [vmem:[#allocation6 + $0x12a4] sm:$0xf]  ;;  %v14808_v13 = vor.u32 %v16933_v59, %v14805_v61  ;;  %7831 = vmatpush.bf16.msrb.mxu2 %v14296_v7 }
 0x3c6   :  { %v13141_v48 = vld [vmem:[#allocation6 + $0x12e0] sm:$0xf0]  ;;  %7800 = vmatmul.bf16.vlgmr.msra.gmra.mxu3 %v17468_v49 }
 0x3c7   :  { %v16645_v5 = vld [vmem:[#allocation6 + $0x16a4] sm:$0xf]  ;;  %v13144_v18 = vor.u32 %v16517_v0, %v13141_v48  ;;  %7844 = vmatpush.bf16.msrb.mxu3 %v14808_v13 }
 0x3c8   :  { %v13653_v8 = vld [vmem:[#allocation6 + $0x16e0] sm:$0xf0] }
 0x3c9   :  { %v16789_v14 = vld [vmem:[#allocation6 + $0x1b24] sm:$0xf]  ;;  %v13656_v20 = vor.u32 %v16645_v5, %v13653_v8  ;;  %7807 = vmatpush.bf16.msrb.mxu0 %v13144_v18 }
 0x3ca   :  { %v14229_v16 = vld [vmem:[#allocation6 + $0x1b60] sm:$0xf0] }
 0x3cb   :  { %v16917_v19 = vld [vmem:[#allocation6 + $0x1f24] sm:$0xf]  ;;  %v14232_v24 = vor.u32 %v16789_v14, %v14229_v16  ;;  %7820 = vmatpush.bf16.msrb.mxu1 %v13656_v20 }
 0x3cc   :  { %v14741_v38 = vld [vmem:[#allocation6 + $0x1f60] sm:$0xf0] }
 0x3cd   :  { %v16501_v23 = vld [vmem:[#allocation6 + $0x1224] sm:$0xf]  ;;  %v14744_v11 = vor.u32 %v16917_v19, %v14741_v38  ;;  %7832 = vmatpush.bf16.msrb.mxu2 %v14232_v24  ;;  %v7556_v38 = vpop.f32.mrf.mxu0  ;;  %v7569_v24 = vpop.f32.mrf.mxu1 }
 0x3ce   :  { %v13077_v2 = vld [vmem:[#allocation6 + $0x1260] sm:$0xf0]  ;;  %v16014_v38 = vld [vmem:[#allocation6 + $0x2e4] sm:$0xf0] }
 0x3cf   :  { %v16629_v27 = vld [vmem:[#allocation6 + $0x1624] sm:$0xf]  ;;  %v13080_v10 = vor.u32 %v16501_v23, %v13077_v2  ;;  %7845 = vmatpush.bf16.msrb.mxu3 %v14744_v11  ;;  %v11611_v24 = vld [vmem:[#allocation6 + $0x6a8] sm:$0xf] }
 0x3d0   :  { %v13589_v28 = vld [vmem:[#allocation6 + $0x1660] sm:$0xf0] }
 0x3d1   :  { %v16773_v53 = vld [vmem:[#allocation6 + $0x1aa4] sm:$0xf]  ;;  %v13592_v35 = vor.u32 %v16629_v27, %v13589_v28  ;;  %7808 = vmatpush.bf16.msrb.mxu0 %v13080_v10 }
 0x3d2   :  { %v14165_v25 = vld [vmem:[#allocation6 + $0x1ae0] sm:$0xf0] }
 0x3d3   :  { %v17215_v30 = vld [vmem:[#allocation7] sm:$0xff]  ;;  %v14168_v37 = vor.u32 %v16773_v53, %v14165_v25  ;;  %7821 = vmatpush.bf16.msrb.mxu1 %v13592_v35  ;;  %v16046_v35 = vld [vmem:[#allocation6 + $0x3e4] sm:$0xf0] }
 0x3d4   :  { %v1672_v29 = vperm.slane %v17215_v30, 7  ;;  %v16901_v32 = vld [vmem:[#allocation6 + $0x1ea4] sm:$0xf] }
 0x3d5   :  { %v14677_v34 = vld [vmem:[#allocation6 + $0x1ee0] sm:$0xf0]  ;;  %7833 = vmatpush.bf16.msrb.mxu2 %v14168_v37 }
 0x3d6   :  { %v16485_v36 = vld [vmem:[#allocation6 + $0x11a4] sm:$0xf]  ;;  %v14680_v52 = vor.u32 %v16901_v32, %v14677_v34  ;;  %v7555_v51 = vadd.f32 %v7554_v46, %v1672_v29  ;;  %v11227_v34 = vld [vmem:[#allocation6 + $0x3a8] sm:$0xf] }
 0x3d7   :  { %v13013_v33 = vld [vmem:[#allocation6 + $0x11e0] sm:$0xf0] }
 0x3d8   :  { %v16613_v40 = vld [vmem:[#allocation6 + $0x15a4] sm:$0xf]  ;;  %v13016_v57 = vor.u32 %v16485_v36, %v13013_v33  ;;  %v7568_v61 = vadd.f32 %v7567_v55, %v7555_v51  ;;  %7846 = vmatpush.bf16.msrb.mxu3 %v14680_v52  ;;  %v11739_v36 = vld [vmem:[#allocation6 + $0x7a8] sm:$0xf]  ;;  %v7580_v33 = vpop.f32.mrf.mxu2 }
 0x3d9   :  { %v13525_v50 = vld [vmem:[#allocation6 + $0x15e0] sm:$0xf0] }
 0x3da   :  { %v16757_v45 = vld [vmem:[#allocation6 + $0x1a24] sm:$0xf]  ;;  %v13528_v26 = vor.u32 %v16613_v40, %v13525_v50  ;;  %7809 = vmatpush.bf16.msrb.mxu0 %v13016_v57  ;;  %v16174_v40 = vld [vmem:[#allocation6 + $0x7e4] sm:$0xf0]  ;;  %v7581_v52 = vadd.f32 %v7580_v33, %v7568_v61 }
 0x3db   :  { %v14101_v56 = vld [vmem:[#allocation6 + $0x1a60] sm:$0xf0]  ;;  %v11547_v33 = vld [vmem:[#allocation6 + $0x628] sm:$0xf] }
 0x3dc   :  { %v16885_v58 = vld [vmem:[#allocation6 + $0x1e24] sm:$0xf]  ;;  %v14104_v62 = vor.u32 %v16757_v45, %v14101_v56  ;;  %7822 = vmatpush.bf16.msrb.mxu1 %v13528_v26  ;;  %v7593_v45 = vpop.f32.mrf.mxu3 }
 0x3dd   :  { %v14613_v31 = vld [vmem:[#allocation6 + $0x1e60] sm:$0xf0]  ;;  %v17601_v26 = vadd.f32 %v7593_v45, %v7581_v52  ;;  %v12635_v45 = vld [vmem:[#allocation6 + $0xea8] sm:$0xf] }
 0x3de   :  { %v16469_v60 = vld [vmem:[#allocation6 + $0x1124] sm:$0xf]  ;;  %v14616_v48 = vor.u32 %v16885_v58, %v14613_v31  ;;  %7834 = vmatpush.bf16.msrb.mxu2 %v14104_v62  ;;  %v11228_v58 = vor.u32 %v16046_v35, %v11227_v34  ;;  %v11163_v31 = vld [vmem:[#allocation6 + $0x328] sm:$0xf] }
 0x3df   :  { %v12949_v59 = vld [vmem:[#allocation6 + $0x1160] sm:$0xf0]  ;;  %v16030_v62 = vld [vmem:[#allocation6 + $0x364] sm:$0xf0] }
 0x3e0   :  { %v16597_v1 = vld [vmem:[#allocation6 + $0x1524] sm:$0xf]  ;;  %v12952_v7 = vor.u32 %v16469_v60, %v12949_v59  ;;  %7847 = vmatpush.bf16.msrb.mxu3 %v14616_v48  ;;  %v11740_v60 = vor.u32 %v16174_v40, %v11739_v36  ;;  %v11035_v34 = vld [vmem:[#allocation6 + $0x228] sm:$0xf] }
 0x3e1   :  { %v13461_v0 = vld [vmem:[#allocation6 + $0x1560] sm:$0xf0]  ;;  %v15998_v35 = vld [vmem:[#allocation6 + $0x264] sm:$0xf0] }
 0x3e2   :  { %v16741_v3 = vld [vmem:[#allocation6 + $0x19a4] sm:$0xf]  ;;  %v13464_v12 = vor.u32 %v16597_v1, %v13461_v0  ;;  %7810 = vmatpush.bf16.msrb.mxu0 %v12952_v7  ;;  %v11675_v1 = vld [vmem:[#allocation6 + $0x728] sm:$0xf]  ;;  %v11036_v52 = vor.u32 %v15998_v35, %v11035_v34 }
 0x3e3   :  { %v14037_v4 = vld [vmem:[#allocation6 + $0x19e0] sm:$0xf0]  ;;  %v16158_v0 = vld [vmem:[#allocation6 + $0x764] sm:$0xf0] }
 0x3e4   :  { %v16869_v5 = vld [vmem:[#allocation6 + $0x1da4] sm:$0xf]  ;;  %v14040_v16 = vor.u32 %v16741_v3, %v14037_v4  ;;  %7823 = vmatpush.bf16.msrb.mxu1 %v13464_v12  ;;  %v11164_v12 = vor.u32 %v16030_v62, %v11163_v31  ;;  %v11483_v31 = vld [vmem:[#allocation6 + $0x5a8] sm:$0xf] }
 0x3e5   :  { %v14549_v8 = vld [vmem:[#allocation6 + $0x1de0] sm:$0xf0] }
 0x3e6   :  { %v16453_v13 = vld [vmem:[#allocation6 + $0x10a4] sm:$0xf]  ;;  %v14552_v20 = vor.u32 %v16869_v5, %v14549_v8  ;;  %7835 = vmatpush.bf16.msrb.mxu2 %v14040_v16  ;;  %v12251_v5 = vld [vmem:[#allocation6 + $0xba8] sm:$0xf]  ;;  %v11676_v16 = vor.u32 %v16158_v0, %v11675_v1 }
 0x3e7   :  { %v12885_v14 = vld [vmem:[#allocation6 + $0x10e0] sm:$0xf0]  ;;  %v16302_v8 = vld [vmem:[#allocation6 + $0xbe4] sm:$0xf0] }
 0x3e8   :  { %v16581_v18 = vld [vmem:[#allocation6 + $0x14a4] sm:$0xf]  ;;  %v12888_v27 = vor.u32 %v16453_v13, %v12885_v14  ;;  %7848 = vmatpush.bf16.msrb.mxu3 %v14552_v20  ;;  %v12763_v13 = vld [vmem:[#allocation6 + $0xfa8] sm:$0xf]  ;;  %v7582_v20 = vpop.f32.mrf.mxu2 }
 0x3e9   :  { %v13397_v19 = vld [vmem:[#allocation6 + $0x14e0] sm:$0xf0]  ;;  %v16430_v14 = vld [vmem:[#allocation6 + $0xfe4] sm:$0xf0] }
 0x3ea   :  { %v16725_v23 = vld [vmem:[#allocation6 + $0x1924] sm:$0xf]  ;;  %v13400_v25 = vor.u32 %v16581_v18, %v13397_v19  ;;  %7811 = vmatpush.bf16.msrb.mxu0 %v12888_v27  ;;  %v11099_v19 = vld [vmem:[#allocation6 + $0x2a8] sm:$0xf] }
 0x3eb   :  { %v13973_v2 = vld [vmem:[#allocation6 + $0x1960] sm:$0xf0]  ;;  %v16142_v27 = vld [vmem:[#allocation6 + $0x6e4] sm:$0xf0] }
 0x3ec   :  { %v16853_v28 = vld [vmem:[#allocation6 + $0x1d24] sm:$0xf]  ;;  %v13976_v32 = vor.u32 %v16725_v23, %v13973_v2  ;;  %7824 = vmatpush.bf16.msrb.mxu1 %v13400_v25  ;;  %v12252_v2 = vor.u32 %v16302_v8, %v12251_v5  ;;  %v16286_v25 = vld [vmem:[#allocation6 + $0xb64] sm:$0xf0] }
 0x3ed   :  { %v14485_v11 = vld [vmem:[#allocation6 + $0x1d60] sm:$0xf0]  ;;  %v12059_v1 = vld [vmem:[#allocation6 + $0xa28] sm:$0xf] }
 0x3ee   :  { %v16437_v53 = vld [vmem:[#allocation6 + $0x1024] sm:$0xf]  ;;  %v14488_v37 = vor.u32 %v16853_v28, %v14485_v11  ;;  %7836 = vmatpush.bf16.msrb.mxu2 %v13976_v32  ;;  %v7595_v28 = vpop.f32.mrf.mxu3  ;;  %v12764_v11 = vor.u32 %v16430_v14, %v12763_v13  ;;  %v11612_v32 = vor.u32 %v16142_v27, %v11611_v24  ;;  %v16254_v0 = vld [vmem:[#allocation6 + $0xa64] sm:$0xf0] }
 0x3ef   :  { %v12821_v30 = vld [vmem:[#allocation6 + $0x1060] sm:$0xf0]  ;;  %v10907_v8 = vld [vmem:[#allocation6 + $0x128] sm:$0xf]  ;;  %v12060_v14 = vor.u32 %v16254_v0, %v12059_v1 }
 0x3f0   :  { %v16565_v29 = vld [vmem:[#allocation6 + $0x1424] sm:$0xf]  ;;  %v12824_v56 = vor.u32 %v16437_v53, %v12821_v30  ;;  %7849 = vmatpush.bf16.msrb.mxu3 %v14488_v37  ;;  %v12187_v53 = vld [vmem:[#allocation6 + $0xb28] sm:$0xf]  ;;  %v11100_v30 = vor.u32 %v16014_v38, %v11099_v19 }
 0x3f1   :  { %v13333_v10 = vld [vmem:[#allocation6 + $0x1460] sm:$0xf0]  ;;  %v12188_v36 = vor.u32 %v16286_v25, %v12187_v53  ;;  %v16126_v37 = vld [vmem:[#allocation6 + $0x664] sm:$0xf0] }
 0x3f2   :  { %v16709_v50 = vld [vmem:[#allocation6 + $0x18a4] sm:$0xf]  ;;  %v13336_v57 = vor.u32 %v16565_v29, %v13333_v10  ;;  %7812 = vmatpush.bf16.msrb.mxu0 %v12824_v56  ;;  %v12699_v29 = vld [vmem:[#allocation6 + $0xf28] sm:$0xf] }
 0x3f3   :  { %v13909_v46 = vld [vmem:[#allocation6 + $0x18e0] sm:$0xf0]  ;;  %v16414_v10 = vld [vmem:[#allocation6 + $0xf64] sm:$0xf0] }
 0x3f4   :  { %v16837_v51 = vld [vmem:[#allocation6 + $0x1ca4] sm:$0xf]  ;;  %v13912_v59 = vor.u32 %v16709_v50, %v13909_v46  ;;  %7825 = vmatpush.bf16.msrb.mxu1 %v13336_v57  ;;  %v12700_v40 = vor.u32 %v16414_v10, %v12699_v29  ;;  %v12123_v50 = vld [vmem:[#allocation6 + $0xaa8] sm:$0xf] }
 0x3f5   :  { %v14421_v55 = vld [vmem:[#allocation6 + $0x1ce0] sm:$0xf0]  ;;  %7813 = vmatmul.bf16.vlgmr.msrb.gmra.mxu0 %v17475_v6  ;;  %v16270_v46 = vld [vmem:[#allocation6 + $0xae4] sm:$0xf0] }
 0x3f6   :  { %v14424_v48 = vor.u32 %v16837_v51, %v14421_v55  ;;  %v16693_v61 = vld [vmem:[#allocation6 + $0x1824] sm:$0xf]  ;;  %7857 = vmatpush.bf16.msra.mxu0 %v11228_v58  ;;  %7837 = vmatpush.bf16.msrb.mxu2 %v13912_v59  ;;  %v16398_v56 = vld [vmem:[#allocation6 + $0xee4] sm:$0xf0]  ;;  %v11548_v51 = vor.u32 %v16126_v37, %v11547_v33  ;;  %v12124_v58 = vor.u32 %v16270_v46, %v12123_v50  ;;  %v7606_v59 = vpop.f32.mrf.mxu0  ;;  %v7645_v1 = vpop.f32.mrf.mxu3 }
 0x3f7   :  { %v13845_v3 = vld [vmem:[#allocation6 + $0x1860] sm:$0xf0]  ;;  %7826 = vmatmul.bf16.vlgmr.msrb.gmra.mxu1 %v17478_v9  ;;  %v10971_v55 = vld [vmem:[#allocation6 + $0x1a8] sm:$0xf]  ;;  %v12636_v62 = vor.u32 %v16398_v56, %v12635_v45 }
 0x3f8   :  { %v16821_v4 = vld [vmem:[#allocation6 + $0x1c24] sm:$0xf]  ;;  %7870 = vmatpush.bf16.msra.mxu1 %v11740_v60  ;;  %v13848_v18 = vor.u32 %v16693_v61, %v13845_v3  ;;  %7850 = vmatpush.bf16.msrb.mxu3 %v14424_v48  ;;  %v15982_v57 = vld [vmem:[#allocation6 + $0x1e4] sm:$0xf0]  ;;  %v7607_v48 = vadd.f32 %v7606_v59, %v17601_v26  ;;  %v7619_v61 = vpop.f32.mrf.mxu1 }
 0x3f9   :  { %v14357_v7 = vld [vmem:[#allocation6 + $0x1c60] sm:$0xf0]  ;;  %v16110_v60 = vld [vmem:[#allocation6 + $0x5e4] sm:$0xf0]  ;;  %v10972_v3 = vor.u32 %v15982_v57, %v10971_v55  ;;  %v7632_v57 = vpop.f32.mrf.mxu2 }
 0x3fa   :  { %v14360_v23 = vor.u32 %v16821_v4, %v14357_v7  ;;  %7858 = vmatpush.bf16.msra.mxu0 %v11164_v12  ;;  %7838 = vmatpush.bf16.msrb.mxu2 %v13848_v18  ;;  %v12571_v4 = vld [vmem:[#allocation6 + $0xe28] sm:$0xf]  ;;  %v11484_v5 = vor.u32 %v16110_v60, %v11483_v31  ;;  %v7620_v13 = vadd.f32 %v7619_v61, %v7607_v48 }
 0x3fb   :  { %v16382_v7 = vld [vmem:[#allocation6 + $0xe64] sm:$0xf0] }
 0x3fc   :  { %7871 = vmatpush.bf16.msra.mxu1 %v11676_v16  ;;  %7851 = vmatpush.bf16.msrb.mxu3 %v14360_v23  ;;  %v15966_v12 = vld [vmem:[#allocation6 + $0x164] sm:$0xf0]  ;;  %v12572_v19 = vor.u32 %v16382_v7, %v12571_v4 }
 0x3fd   :  { %7839 = vmatmul.bf16.vlgmr.msrb.gmra.mxu2 %v17482_v41  ;;  %v11419_v16 = vld [vmem:[#allocation6 + $0x528] sm:$0xf]  ;;  %v10908_v26 = vor.u32 %v15966_v12, %v10907_v8 }
 0x3fe   :  { %7883 = vmatpush.bf16.msra.mxu2 %v12252_v2  ;;  %7859 = vmatpush.bf16.msra.mxu0 %v11100_v30  ;;  %v16094_v18 = vld [vmem:[#allocation6 + $0x564] sm:$0xf0]  ;;  %v7608_v30 = vpop.f32.mrf.mxu0 }
 0x3ff   :  { %7852 = vmatmul.bf16.vlgmr.msrb.gmra.mxu3 %v17484_v44  ;;  %v11995_v38 = vld [vmem:[#allocation6 + $0x9a8] sm:$0xf]  ;;  %v11420_v24 = vor.u32 %v16094_v18, %v11419_v16 }
 0x400   :  { %7896 = vmatpush.bf16.msra.mxu3 %v12764_v11  ;;  %7872 = vmatpush.bf16.msra.mxu1 %v11612_v32  ;;  %v16238_v20 = vld [vmem:[#allocation6 + $0x9e4] sm:$0xf0]  ;;  %v7621_v34 = vpop.f32.mrf.mxu1 }
 0x401   :  { %v12507_v23 = vld [vmem:[#allocation6 + $0xda8] sm:$0xf]  ;;  %v11996_v11 = vor.u32 %v16238_v20, %v11995_v38 }
 0x402   :  { %7884 = vmatpush.bf16.msra.mxu2 %v12188_v36  ;;  %7860 = vmatpush.bf16.msra.mxu0 %v11036_v52  ;;  %v16366_v2 = vld [vmem:[#allocation6 + $0xde4] sm:$0xf0] }
 0x403   :  { %v10843_v27 = vld [vmem:[#allocation6 + $0xa8] sm:$0xf]  ;;  %v12508_v29 = vor.u32 %v16366_v2, %v12507_v23 }
 0x404   :  { %7897 = vmatpush.bf16.msra.mxu3 %v12700_v40  ;;  %7873 = vmatpush.bf16.msra.mxu1 %v11548_v51  ;;  %v15950_v28 = vld [vmem:[#allocation6 + $0xe4] sm:$0xf0] }
 0x405   :  { %v11355_v53 = vld [vmem:[#allocation6 + $0x4a8] sm:$0xf]  ;;  %v10844_v35 = vor.u32 %v15950_v28, %v10843_v27 }
 0x406   :  { %7885 = vmatpush.bf16.msra.mxu2 %v12124_v58  ;;  %7861 = vmatpush.bf16.msra.mxu0 %v10972_v3  ;;  %v16078_v25 = vld [vmem:[#allocation6 + $0x4e4] sm:$0xf0] }
 0x407   :  { %v11931_v10 = vld [vmem:[#allocation6 + $0x928] sm:$0xf]  ;;  %v11356_v40 = vor.u32 %v16078_v25, %v11355_v53 }
 0x408   :  { %7898 = vmatpush.bf16.msra.mxu3 %v12636_v62  ;;  %7874 = vmatpush.bf16.msra.mxu1 %v11484_v5  ;;  %v16222_v32 = vld [vmem:[#allocation6 + $0x964] sm:$0xf0]  ;;  %v7633_v62 = vadd.f32 %v7632_v57, %v7620_v13 }
 0x409   :  { %v12443_v36 = vld [vmem:[#allocation6 + $0xd28] sm:$0xf]  ;;  %v11932_v45 = vor.u32 %v16222_v32, %v11931_v10 }
 0x40a   :  { %7886 = vmatpush.bf16.msra.mxu2 %v12060_v14  ;;  %7862 = vmatpush.bf16.msra.mxu0 %v10908_v26  ;;  %v16350_v33 = vld [vmem:[#allocation6 + $0xd64] sm:$0xf0]  ;;  %v17608_v5 = vadd.f32 %v7645_v1, %v7633_v62 }
 0x40b   :  { %v10779_v37 = vld [vmem:[#allocation6 + $0x28] sm:$0xf]  ;;  %v12444_v58 = vor.u32 %v16350_v33, %v12443_v36  ;;  %v7647_v36 = vpop.f32.mrf.mxu3 }
 0x40c   :  { %7899 = vmatpush.bf16.msra.mxu3 %v12572_v19  ;;  %7875 = vmatpush.bf16.msra.mxu1 %v11420_v24  ;;  %v15934_v50 = vld [vmem:[#allocation6 + $0x64] sm:$0xf0] }
 0x40d   :  { %v11291_v46 = vld [vmem:[#allocation6 + $0x428] sm:$0xf]  ;;  %v10780_v0 = vor.u32 %v15934_v50, %v10779_v37 }
 0x40e   :  { %v16062_v52 = vld [vmem:[#allocation6 + $0x464] sm:$0xf0]  ;;  %7887 = vmatpush.bf16.msra.mxu2 %v11996_v11  ;;  %7863 = vmatpush.bf16.msra.mxu0 %v10844_v35 }
 0x40f   :  { %v13275_v56 = vld [vmem:[#allocation6 + $0x13a8] sm:$0xf]  ;;  %v11292_v3 = vor.u32 %v16062_v52, %v11291_v46 }
 0x410   :  { %v16558_v51 = vld [vmem:[#allocation6 + $0x13e4] sm:$0xf0]  ;;  %7900 = vmatpush.bf16.msra.mxu3 %v12508_v29  ;;  %7876 = vmatpush.bf16.msra.mxu1 %v11356_v40  ;;  %v7634_v29 = vpop.f32.mrf.mxu2 }
 0x411   :  { %v13787_v55 = vld [vmem:[#allocation6 + $0x17a8] sm:$0xf]  ;;  %v13276_v4 = vor.u32 %v16558_v51, %v13275_v56 }
 0x412   :  { %v16686_v31 = vld [vmem:[#allocation6 + $0x17e4] sm:$0xf0]  ;;  %7888 = vmatpush.bf16.msra.mxu2 %v11932_v45  ;;  %7864 = vmatpush.bf16.msra.mxu0 %v10780_v0 }
 0x413   :  { %v11867_v60 = vld [vmem:[#allocation6 + $0x8a8] sm:$0xf]  ;;  %v13788_v8 = vor.u32 %v16686_v31, %v13787_v55 }
 0x414   :  { %v16206_v59 = vld [vmem:[#allocation6 + $0x8e4] sm:$0xf0]  ;;  %7901 = vmatpush.bf16.msra.mxu3 %v12444_v58  ;;  %7877 = vmatpush.bf16.msra.mxu1 %v11292_v3 }
 0x415   :  { %v12379_v48 = vld [vmem:[#allocation6 + $0xca8] sm:$0xf]  ;;  %v11868_v12 = vor.u32 %v16206_v59, %v11867_v60  ;;  %7865 = vmatmul.bf16.vlgmr.msra.gmra.mxu0 %v17459_v17 }
 0x416   :  { %v16334_v61 = vld [vmem:[#allocation6 + $0xce4] sm:$0xf0]  ;;  %7909 = vmatpush.bf16.msrb.mxu0 %v13276_v4 }
 0x417   :  { %v13211_v7 = vld [vmem:[#allocation6 + $0x1328] sm:$0xf]  ;;  %v12380_v19 = vor.u32 %v16334_v61, %v12379_v48  ;;  %7889 = vmatpush.bf16.msra.mxu2 %v11868_v12  ;;  %7878 = vmatmul.bf16.vlgmr.msra.gmra.mxu1 %v17462_v22 }
 0x418   :  { %v16542_v14 = vld [vmem:[#allocation6 + $0x1364] sm:$0xf0]  ;;  %7922 = vmatpush.bf16.msrb.mxu1 %v13788_v8 }
 0x419   :  { %v13723_v16 = vld [vmem:[#allocation6 + $0x1728] sm:$0xf]  ;;  %v13212_v24 = vor.u32 %v16542_v14, %v13211_v7  ;;  %7902 = vmatpush.bf16.msra.mxu3 %v12380_v19 }
 0x41a   :  { %v16670_v18 = vld [vmem:[#allocation6 + $0x1764] sm:$0xf0] }
 0x41b   :  { %v11803_v13 = vld [vmem:[#allocation6 + $0x828] sm:$0xf]  ;;  %v13724_v11 = vor.u32 %v16670_v18, %v13723_v16  ;;  %7910 = vmatpush.bf16.msrb.mxu0 %v13212_v24  ;;  %v7658_v16 = vpop.f32.mrf.mxu0 }
 0x41c   :  { %v16190_v38 = vld [vmem:[#allocation6 + $0x864] sm:$0xf0] }
 0x41d   :  { %v12315_v20 = vld [vmem:[#allocation6 + $0xc28] sm:$0xf]  ;;  %v11804_v53 = vor.u32 %v16190_v38, %v11803_v13  ;;  %7923 = vmatpush.bf16.msrb.mxu1 %v13724_v11 }
 0x41e   :  { %v16318_v26 = vld [vmem:[#allocation6 + $0xc64] sm:$0xf0] }
 0x41f   :  { %v14299_v23 = vld [vmem:[#allocation6 + $0x1ba8] sm:$0xf]  ;;  %v12316_v10 = vor.u32 %v16318_v26, %v12315_v20  ;;  %7890 = vmatpush.bf16.msra.mxu2 %v11804_v53  ;;  %v7671_v20 = vpop.f32.mrf.mxu1 }
 0x420   :  { %v16814_v2 = vld [vmem:[#allocation6 + $0x1be4] sm:$0xf0] }
 0x421   :  { %v14811_v27 = vld [vmem:[#allocation6 + $0x1fa8] sm:$0xf]  ;;  %v14300_v32 = vor.u32 %v16814_v2, %v14299_v23  ;;  %7903 = vmatpush.bf16.msra.mxu3 %v12316_v10 }
 0x422   :  { %v16942_v28 = vld [vmem:[#allocation6 + $0x1fe4] sm:$0xf0]  ;;  %7891 = vmatmul.bf16.vlgmr.msra.gmra.mxu2 %v17466_v43 }
 0x423   :  { %v13147_v25 = vld [vmem:[#allocation6 + $0x12a8] sm:$0xf]  ;;  %v14812_v33 = vor.u32 %v16942_v28, %v14811_v27  ;;  %7935 = vmatpush.bf16.msrb.mxu2 %v14300_v32 }
 0x424   :  { %v16526_v30 = vld [vmem:[#allocation6 + $0x12e4] sm:$0xf0]  ;;  %7904 = vmatmul.bf16.vlgmr.msra.gmra.mxu3 %v17468_v49 }
 0x425   :  { %v13659_v34 = vld [vmem:[#allocation6 + $0x16a8] sm:$0xf]  ;;  %v13148_v50 = vor.u32 %v16526_v30, %v13147_v25  ;;  %7948 = vmatpush.bf16.msrb.mxu3 %v14812_v33 }
 0x426   :  { %v16654_v35 = vld [vmem:[#allocation6 + $0x16e4] sm:$0xf0] }
 0x427   :  { %v14235_v37 = vld [vmem:[#allocation6 + $0x1b28] sm:$0xf]  ;;  %v13660_v45 = vor.u32 %v16654_v35, %v13659_v34  ;;  %7911 = vmatpush.bf16.msrb.mxu0 %v13148_v50 }
 0x428   :  { %v16798_v40 = vld [vmem:[#allocation6 + $0x1b64] sm:$0xf0] }
 0x429   :  { %v14747_v46 = vld [vmem:[#allocation6 + $0x1f28] sm:$0xf]  ;;  %v14236_v57 = vor.u32 %v16798_v40, %v14235_v37  ;;  %7924 = vmatpush.bf16.msrb.mxu1 %v13660_v45  ;;  %v7660_v45 = vpop.f32.mrf.mxu0 }
 0x42a   :  { %v16926_v52 = vld [vmem:[#allocation6 + $0x1f64] sm:$0xf0] }
 0x42b   :  { %v17612_v56 = vld [vmem:[#allocation7 + $0x8] sm:$0xff]  ;;  %v14748_v60 = vor.u32 %v16926_v52, %v14747_v46  ;;  %7936 = vmatpush.bf16.msrb.mxu2 %v14236_v57 }
 0x42c   :  { %v13083_v51 = vld [vmem:[#allocation6 + $0x1228] sm:$0xf]  ;;  %v1673_v1 = vperm.slane %v17612_v56, 0 }
 0x42d   :  { %v16510_v55 = vld [vmem:[#allocation6 + $0x1264] sm:$0xf0]  ;;  %7949 = vmatpush.bf16.msrb.mxu3 %v14748_v60 }
 0x42e   :  { %v13595_v58 = vld [vmem:[#allocation6 + $0x1628] sm:$0xf]  ;;  %v13084_v0 = vor.u32 %v16510_v55, %v13083_v51  ;;  %v7659_v38 = vadd.f32 %v7658_v16, %v1673_v1  ;;  %v11741_v16 = vld [vmem:[#allocation6 + $0x7e8] sm:$0xf0] }
 0x42f   :  { %v16638_v31 = vld [vmem:[#allocation6 + $0x1664] sm:$0xf0] }
 0x430   :  { %v14171_v59 = vld [vmem:[#allocation6 + $0x1aa8] sm:$0xf]  ;;  %v13596_v3 = vor.u32 %v16638_v31, %v13595_v58  ;;  %7912 = vmatpush.bf16.msrb.mxu0 %v13084_v0  ;;  %v7672_v11 = vadd.f32 %v7671_v20, %v7659_v38  ;;  %v7673_v58 = vpop.f32.mrf.mxu1  ;;  %v7697_v38 = vpop.f32.mrf.mxu3 }
 0x431   :  { %v16782_v62 = vld [vmem:[#allocation6 + $0x1ae4] sm:$0xf0] }
 0x432   :  { %v14683_v48 = vld [vmem:[#allocation6 + $0x1ea8] sm:$0xf]  ;;  %v14172_v8 = vor.u32 %v16782_v62, %v14171_v59  ;;  %7925 = vmatpush.bf16.msrb.mxu1 %v13596_v3 }
 0x433   :  { %v16910_v61 = vld [vmem:[#allocation6 + $0x1ee4] sm:$0xf0] }
 0x434   :  { %v13019_v4 = vld [vmem:[#allocation6 + $0x11a8] sm:$0xf]  ;;  %v14684_v18 = vor.u32 %v16910_v61, %v14683_v48  ;;  %7937 = vmatpush.bf16.msrb.mxu2 %v14172_v8  ;;  %v16166_v8 = vld [vmem:[#allocation6 + $0x7ac] sm:$0xf] }
 0x435   :  { %v16494_v7 = vld [vmem:[#allocation6 + $0x11e4] sm:$0xf0] }
 0x436   :  { %v13531_v12 = vld [vmem:[#allocation6 + $0x15a8] sm:$0xf]  ;;  %v13020_v26 = vor.u32 %v16494_v7, %v13019_v4  ;;  %7950 = vmatpush.bf16.msrb.mxu3 %v14684_v18  ;;  %v16038_v4 = vld [vmem:[#allocation6 + $0x3ac] sm:$0xf] }
 0x437   :  { %v16622_v14 = vld [vmem:[#allocation6 + $0x15e4] sm:$0xf0]  ;;  %v11229_v7 = vld [vmem:[#allocation6 + $0x3e8] sm:$0xf0] }
 0x438   :  { %v14107_v19 = vld [vmem:[#allocation6 + $0x1a28] sm:$0xf]  ;;  %v13532_v24 = vor.u32 %v16622_v14, %v13531_v12  ;;  %7913 = vmatpush.bf16.msrb.mxu0 %v13020_v26  ;;  %v7684_v12 = vpop.f32.mrf.mxu2 }
 0x439   :  { %v16766_v13 = vld [vmem:[#allocation6 + $0x1a64] sm:$0xf0] }
 0x43a   :  { %v14619_v23 = vld [vmem:[#allocation6 + $0x1e28] sm:$0xf]  ;;  %v14108_v53 = vor.u32 %v16766_v13, %v14107_v19  ;;  %7926 = vmatpush.bf16.msrb.mxu1 %v13532_v24  ;;  %v7685_v13 = vadd.f32 %v7684_v12, %v7672_v11  ;;  %v11232_v24 = vor.u32 %v16038_v4, %v11229_v7  ;;  %v12701_v4 = vld [vmem:[#allocation6 + $0xf68] sm:$0xf0] }
 0x43b   :  { %v16894_v2 = vld [vmem:[#allocation6 + $0x1e64] sm:$0xf0]  ;;  %v11037_v12 = vld [vmem:[#allocation6 + $0x268] sm:$0xf0] }
 0x43c   :  { %v12955_v27 = vld [vmem:[#allocation6 + $0x1128] sm:$0xf]  ;;  %v14620_v29 = vor.u32 %v16894_v2, %v14619_v23  ;;  %7938 = vmatpush.bf16.msrb.mxu2 %v14108_v53  ;;  %v11744_v53 = vor.u32 %v16166_v8, %v11741_v16  ;;  %v15990_v8 = vld [vmem:[#allocation6 + $0x22c] sm:$0xf] }
 0x43d   :  { %v16478_v28 = vld [vmem:[#allocation6 + $0x1164] sm:$0xf0]  ;;  %v16118_v16 = vld [vmem:[#allocation6 + $0x62c] sm:$0xf] }
 0x43e   :  { %v13467_v25 = vld [vmem:[#allocation6 + $0x1528] sm:$0xf]  ;;  %v12956_v34 = vor.u32 %v16478_v28, %v12955_v27  ;;  %7951 = vmatpush.bf16.msrb.mxu3 %v14620_v29  ;;  %v16022_v27 = vld [vmem:[#allocation6 + $0x32c] sm:$0xf]  ;;  %v17617_v28 = vadd.f32 %v7697_v38, %v7685_v13 }
 0x43f   :  { %v16606_v30 = vld [vmem:[#allocation6 + $0x1564] sm:$0xf0]  ;;  %v16150_v29 = vld [vmem:[#allocation6 + $0x72c] sm:$0xf] }
 0x440   :  { %v14043_v10 = vld [vmem:[#allocation6 + $0x19a8] sm:$0xf]  ;;  %v13468_v33 = vor.u32 %v16606_v30, %v13467_v25  ;;  %7914 = vmatpush.bf16.msrb.mxu0 %v12956_v34  ;;  %v11165_v30 = vld [vmem:[#allocation6 + $0x368] sm:$0xf0] }
 0x441   :  { %v16750_v32 = vld [vmem:[#allocation6 + $0x19e4] sm:$0xf0]  ;;  %v16262_v13 = vld [vmem:[#allocation6 + $0xaac] sm:$0xf] }
 0x442   :  { %v14555_v35 = vld [vmem:[#allocation6 + $0x1da8] sm:$0xf]  ;;  %v14044_v50 = vor.u32 %v16750_v32, %v14043_v10  ;;  %7927 = vmatpush.bf16.msrb.mxu1 %v13468_v33  ;;  %v11677_v10 = vld [vmem:[#allocation6 + $0x768] sm:$0xf0] }
 0x443   :  { %v16878_v36 = vld [vmem:[#allocation6 + $0x1de4] sm:$0xf0]  ;;  %v16294_v33 = vld [vmem:[#allocation6 + $0xbac] sm:$0xf] }
 0x444   :  { %v12891_v37 = vld [vmem:[#allocation6 + $0x10a8] sm:$0xf]  ;;  %v14556_v51 = vor.u32 %v16878_v36, %v14555_v35  ;;  %7939 = vmatpush.bf16.msrb.mxu2 %v14044_v50  ;;  %v16422_v50 = vld [vmem:[#allocation6 + $0xfac] sm:$0xf] }
 0x445   :  { %v16462_v40 = vld [vmem:[#allocation6 + $0x10e4] sm:$0xf0]  ;;  %v12125_v38 = vld [vmem:[#allocation6 + $0xae8] sm:$0xf0] }
 0x446   :  { %v13403_v46 = vld [vmem:[#allocation6 + $0x14a8] sm:$0xf]  ;;  %v12892_v31 = vor.u32 %v16462_v40, %v12891_v37  ;;  %7952 = vmatpush.bf16.msrb.mxu3 %v14556_v51  ;;  %v12253_v37 = vld [vmem:[#allocation6 + $0xbe8] sm:$0xf0]  ;;  %v11168_v40 = vor.u32 %v16022_v27, %v11165_v30 }
 0x447   :  { %v16590_v52 = vld [vmem:[#allocation6 + $0x14e4] sm:$0xf0]  ;;  %v16006_v51 = vld [vmem:[#allocation6 + $0x2ac] sm:$0xf] }
 0x448   :  { %v13979_v55 = vld [vmem:[#allocation6 + $0x1928] sm:$0xf]  ;;  %v13404_v1 = vor.u32 %v16590_v52, %v13403_v46  ;;  %7915 = vmatpush.bf16.msrb.mxu0 %v12892_v31  ;;  %v12765_v46 = vld [vmem:[#allocation6 + $0xfe8] sm:$0xf0]  ;;  %v11680_v52 = vor.u32 %v16150_v29, %v11677_v10  ;;  %v12256_v31 = vor.u32 %v16294_v33, %v12253_v37  ;;  %v7710_v29 = vpop.f32.mrf.mxu0 }
 0x449   :  { %v16734_v57 = vld [vmem:[#allocation6 + $0x1964] sm:$0xf0]  ;;  %v10973_v27 = vld [vmem:[#allocation6 + $0x1e8] sm:$0xf0] }
 0x44a   :  { %v14491_v60 = vld [vmem:[#allocation6 + $0x1d28] sm:$0xf]  ;;  %v13980_v3 = vor.u32 %v16734_v57, %v13979_v55  ;;  %7928 = vmatpush.bf16.msrb.mxu1 %v13404_v1  ;;  %v11101_v55 = vld [vmem:[#allocation6 + $0x2e8] sm:$0xf0]  ;;  %v7686_v57 = vpop.f32.mrf.mxu2  ;;  %v12768_v1 = vor.u32 %v16422_v50, %v12765_v46 }
 0x44b   :  { %v16862_v59 = vld [vmem:[#allocation6 + $0x1d64] sm:$0xf0]  ;;  %v11485_v30 = vld [vmem:[#allocation6 + $0x5e8] sm:$0xf0] }
 0x44c   :  { %v12827_v62 = vld [vmem:[#allocation6 + $0x1028] sm:$0xf]  ;;  %v14492_v14 = vor.u32 %v16862_v59, %v14491_v60  ;;  %7940 = vmatpush.bf16.msrb.mxu2 %v13980_v3  ;;  %v16134_v60 = vld [vmem:[#allocation6 + $0x6ac] sm:$0xf] }
 0x44d   :  { %v16446_v0 = vld [vmem:[#allocation6 + $0x1064] sm:$0xf0]  ;;  %v11613_v59 = vld [vmem:[#allocation6 + $0x6e8] sm:$0xf0] }
 0x44e   :  { %v13339_v48 = vld [vmem:[#allocation6 + $0x1428] sm:$0xf]  ;;  %v12828_v20 = vor.u32 %v16446_v0, %v12827_v62  ;;  %7953 = vmatpush.bf16.msrb.mxu3 %v14492_v14  ;;  %v7699_v62 = vpop.f32.mrf.mxu3  ;;  %v16278_v0 = vld [vmem:[#allocation6 + $0xb2c] sm:$0xf]  ;;  %v11616_v7 = vor.u32 %v16134_v60, %v11613_v59 }
 0x44f   :  { %v16574_v61 = vld [vmem:[#allocation6 + $0x1464] sm:$0xf0]  ;;  %v16406_v3 = vld [vmem:[#allocation6 + $0xf2c] sm:$0xf] }
 0x450   :  { %v13915_v18 = vld [vmem:[#allocation6 + $0x18a8] sm:$0xf]  ;;  %v13340_v2 = vor.u32 %v16574_v61, %v13339_v48  ;;  %7916 = vmatpush.bf16.msrb.mxu0 %v12828_v20  ;;  %v12189_v48 = vld [vmem:[#allocation6 + $0xb68] sm:$0xf0]  ;;  %v11104_v61 = vor.u32 %v16006_v51, %v11101_v55  ;;  %v11040_v20 = vor.u32 %v15990_v8, %v11037_v12 }
 0x451   :  { %v16718_v19 = vld [vmem:[#allocation6 + $0x18e4] sm:$0xf0]  ;;  %v12192_v14 = vor.u32 %v16278_v0, %v12189_v48  ;;  %v16374_v33 = vld [vmem:[#allocation6 + $0xe2c] sm:$0xf] }
 0x452   :  { %v14427_v26 = vld [vmem:[#allocation6 + $0x1ca8] sm:$0xf]  ;;  %v13916_v25 = vor.u32 %v16718_v19, %v13915_v18  ;;  %7929 = vmatpush.bf16.msrb.mxu1 %v13340_v2  ;;  %v11549_v18 = vld [vmem:[#allocation6 + $0x668] sm:$0xf0]  ;;  %v12704_v19 = vor.u32 %v16406_v3, %v12701_v4  ;;  %v7712_v4 = vpop.f32.mrf.mxu0 }
 0x453   :  { %v16846_v23 = vld [vmem:[#allocation6 + $0x1ce4] sm:$0xf0]  ;;  %7917 = vmatmul.bf16.vlgmr.msrb.gmra.mxu0 %v17475_v6  ;;  %v11552_v2 = vor.u32 %v16118_v16, %v11549_v18  ;;  %v12573_v37 = vld [vmem:[#allocation6 + $0xe68] sm:$0xf0] }
 0x454   :  { %v14428_v32 = vor.u32 %v16846_v23, %v14427_v26  ;;  %v13851_v11 = vld [vmem:[#allocation6 + $0x1828] sm:$0xf]  ;;  %7961 = vmatpush.bf16.msra.mxu0 %v11232_v24  ;;  %7941 = vmatpush.bf16.msrb.mxu2 %v13916_v25  ;;  %v16390_v26 = vld [vmem:[#allocation6 + $0xeac] sm:$0xf]  ;;  %v12576_v57 = vor.u32 %v16374_v33, %v12573_v37 }
 0x455   :  { %v16702_v34 = vld [vmem:[#allocation6 + $0x1864] sm:$0xf0]  ;;  %7930 = vmatmul.bf16.vlgmr.msrb.gmra.mxu1 %v17478_v9  ;;  %v12637_v23 = vld [vmem:[#allocation6 + $0xee8] sm:$0xf0] }
 0x456   :  { %v14363_v35 = vld [vmem:[#allocation6 + $0x1c28] sm:$0xf]  ;;  %7974 = vmatpush.bf16.msra.mxu1 %v11744_v53  ;;  %v13852_v45 = vor.u32 %v16702_v34, %v13851_v11  ;;  %7954 = vmatpush.bf16.msrb.mxu3 %v14428_v32  ;;  %v15974_v24 = vld [vmem:[#allocation6 + $0x1ac] sm:$0xf]  ;;  %v12128_v53 = vor.u32 %v16262_v13, %v12125_v38  ;;  %v12640_v10 = vor.u32 %v16390_v26, %v12637_v23 }
 0x457   :  { %v16830_v36 = vld [vmem:[#allocation6 + $0x1c64] sm:$0xf0]  ;;  %v16102_v25 = vld [vmem:[#allocation6 + $0x5ac] sm:$0xf]  ;;  %v7711_v34 = vadd.f32 %v7710_v29, %v17617_v28 }
 0x458   :  { %v14364_v58 = vor.u32 %v16830_v36, %v14363_v35  ;;  %7962 = vmatpush.bf16.msra.mxu0 %v11168_v40  ;;  %7942 = vmatpush.bf16.msrb.mxu2 %v13852_v45  ;;  %v16246_v32 = vld [vmem:[#allocation6 + $0xa2c] sm:$0xf]  ;;  %v7723_v35 = vpop.f32.mrf.mxu1  ;;  %v10976_v36 = vor.u32 %v15974_v24, %v10973_v27  ;;  %v11488_v40 = vor.u32 %v16102_v25, %v11485_v30  ;;  %v7736_v25 = vpop.f32.mrf.mxu2 }
 0x459   :  { %v12061_v11 = vld [vmem:[#allocation6 + $0xa68] sm:$0xf0] }
 0x45a   :  { %7975 = vmatpush.bf16.msra.mxu1 %v11680_v52  ;;  %7955 = vmatpush.bf16.msrb.mxu3 %v14364_v58  ;;  %v15958_v50 = vld [vmem:[#allocation6 + $0x12c] sm:$0xf]  ;;  %v7724_v52 = vadd.f32 %v7723_v35, %v7711_v34  ;;  %v12064_v45 = vor.u32 %v16246_v32, %v12061_v11  ;;  %v7749_v34 = vpop.f32.mrf.mxu3 }
 0x45b   :  { %7943 = vmatmul.bf16.vlgmr.msrb.gmra.mxu2 %v17482_v41  ;;  %v10909_v46 = vld [vmem:[#allocation6 + $0x168] sm:$0xf0] }
 0x45c   :  { %7987 = vmatpush.bf16.msra.mxu2 %v12256_v31  ;;  %7963 = vmatpush.bf16.msra.mxu0 %v11104_v61  ;;  %v16086_v51 = vld [vmem:[#allocation6 + $0x52c] sm:$0xf]  ;;  %v10912_v28 = vor.u32 %v15958_v50, %v10909_v46  ;;  %v7737_v11 = vadd.f32 %v7736_v25, %v7724_v52 }
 0x45d   :  { %7956 = vmatmul.bf16.vlgmr.msrb.gmra.mxu3 %v17484_v44  ;;  %v11421_v55 = vld [vmem:[#allocation6 + $0x568] sm:$0xf0] }
 0x45e   :  { %8000 = vmatpush.bf16.msra.mxu3 %v12768_v1  ;;  %7976 = vmatpush.bf16.msra.mxu1 %v11616_v7  ;;  %v16230_v58 = vld [vmem:[#allocation6 + $0x9ac] sm:$0xf]  ;;  %v11424_v62 = vor.u32 %v16086_v51, %v11421_v55  ;;  %v17624_v46 = vadd.f32 %v7749_v34, %v7737_v11 }
 0x45f   :  { %v11997_v31 = vld [vmem:[#allocation6 + $0x9e8] sm:$0xf0] }
 0x460   :  { %7988 = vmatpush.bf16.msra.mxu2 %v12192_v14  ;;  %7964 = vmatpush.bf16.msra.mxu0 %v11040_v20  ;;  %v16358_v60 = vld [vmem:[#allocation6 + $0xdac] sm:$0xf]  ;;  %v12000_v48 = vor.u32 %v16230_v58, %v11997_v31  ;;  %v7725_v14 = vpop.f32.mrf.mxu1 }
 0x461   :  { %v12509_v59 = vld [vmem:[#allocation6 + $0xde8] sm:$0xf0] }
 0x462   :  { %8001 = vmatpush.bf16.msra.mxu3 %v12704_v19  ;;  %7977 = vmatpush.bf16.msra.mxu1 %v11552_v2  ;;  %v15942_v1 = vld [vmem:[#allocation6 + $0xac] sm:$0xf]  ;;  %v12512_v7 = vor.u32 %v16358_v60, %v12509_v59 }
 0x463   :  { %v10845_v0 = vld [vmem:[#allocation6 + $0xe8] sm:$0xf0] }
 0x464   :  { %7989 = vmatpush.bf16.msra.mxu2 %v12128_v53  ;;  %7965 = vmatpush.bf16.msra.mxu0 %v10976_v36  ;;  %v16070_v61 = vld [vmem:[#allocation6 + $0x4ac] sm:$0xf]  ;;  %v10848_v16 = vor.u32 %v15942_v1, %v10845_v0 }
 0x465   :  { %v11357_v3 = vld [vmem:[#allocation6 + $0x4e8] sm:$0xf0] }
 0x466   :  { %8002 = vmatpush.bf16.msra.mxu3 %v12640_v10  ;;  %7978 = vmatpush.bf16.msra.mxu1 %v11488_v40  ;;  %v16214_v8 = vld [vmem:[#allocation6 + $0x92c] sm:$0xf]  ;;  %v11360_v38 = vor.u32 %v16070_v61, %v11357_v3 }
 0x467   :  { %v11933_v12 = vld [vmem:[#allocation6 + $0x968] sm:$0xf0] }
 0x468   :  { %7990 = vmatpush.bf16.msra.mxu2 %v12064_v45  ;;  %7966 = vmatpush.bf16.msra.mxu0 %v10912_v28  ;;  %v16342_v18 = vld [vmem:[#allocation6 + $0xd2c] sm:$0xf]  ;;  %v11936_v2 = vor.u32 %v16214_v8, %v11933_v12  ;;  %v7738_v12 = vpop.f32.mrf.mxu2 }
 0x469   :  { %v12445_v19 = vld [vmem:[#allocation6 + $0xd68] sm:$0xf0] }
 0x46a   :  { %8003 = vmatpush.bf16.msra.mxu3 %v12576_v57  ;;  %v15926_v13 = vld [vmem:[#allocation6 + $0x2c] sm:$0xf]  ;;  %7979 = vmatpush.bf16.msra.mxu1 %v11424_v62  ;;  %v12448_v30 = vor.u32 %v16342_v18, %v12445_v19 }
 0x46b   :  { %v10781_v20 = vld [vmem:[#allocation6 + $0x68] sm:$0xf0] }
 0x46c   :  { %v16054_v26 = vld [vmem:[#allocation6 + $0x42c] sm:$0xf]  ;;  %7991 = vmatpush.bf16.msra.mxu2 %v12000_v48  ;;  %7967 = vmatpush.bf16.msra.mxu0 %v10848_v16  ;;  %v10784_v35 = vor.u32 %v15926_v13, %v10781_v20  ;;  %v7751_v13 = vpop.f32.mrf.mxu3 }
 0x46d   :  { %v11293_v23 = vld [vmem:[#allocation6 + $0x468] sm:$0xf0] }
 0x46e   :  { %v16550_v24 = vld [vmem:[#allocation6 + $0x13ac] sm:$0xf]  ;;  %8004 = vmatpush.bf16.msra.mxu3 %v12512_v7  ;;  %7980 = vmatpush.bf16.msra.mxu1 %v11360_v38  ;;  %v11296_v37 = vor.u32 %v16054_v26, %v11293_v23 }
 0x46f   :  { %v13277_v27 = vld [vmem:[#allocation6 + $0x13e8] sm:$0xf0] }
 0x470   :  { %v16678_v53 = vld [vmem:[#allocation6 + $0x17ac] sm:$0xf]  ;;  %v13280_v40 = vor.u32 %v16550_v24, %v13277_v27  ;;  %7992 = vmatpush.bf16.msra.mxu2 %v11936_v2  ;;  %7968 = vmatpush.bf16.msra.mxu0 %v10784_v35  ;;  %v1674_v35 = vperm.slane %v17612_v56, 1  ;;  %v7775_v56 = vpop.f32.mrf.mxu1 }
 0x471   :  { %v13789_v29 = vld [vmem:[#allocation6 + $0x17e8] sm:$0xf0] }
 0x472   :  { %v16198_v10 = vld [vmem:[#allocation6 + $0x8ac] sm:$0xf]  ;;  %v13792_v45 = vor.u32 %v16678_v53, %v13789_v29  ;;  %8005 = vmatpush.bf16.msra.mxu3 %v12448_v30  ;;  %7981 = vmatpush.bf16.msra.mxu1 %v11296_v37 }
 0x473   :  { %v11869_v32 = vld [vmem:[#allocation6 + $0x8e8] sm:$0xf0]  ;;  %7969 = vmatmul.bf16.vlgmr.msra.gmra.mxu0 %v17459_v17 }
 0x474   :  { %v16326_v36 = vld [vmem:[#allocation6 + $0xcac] sm:$0xf]  ;;  %v11872_v51 = vor.u32 %v16198_v10, %v11869_v32  ;;  %8013 = vmatpush.bf16.msrb.mxu0 %v13280_v40 }
 0x475   :  { %v12381_v33 = vld [vmem:[#allocation6 + $0xce8] sm:$0xf0]  ;;  %7982 = vmatmul.bf16.vlgmr.msra.gmra.mxu1 %v17462_v22 }
 0x476   :  { %v16534_v50 = vld [vmem:[#allocation6 + $0x132c] sm:$0xf]  ;;  %v12384_v31 = vor.u32 %v16326_v36, %v12381_v33  ;;  %8026 = vmatpush.bf16.msrb.mxu1 %v13792_v45  ;;  %7993 = vmatpush.bf16.msra.mxu2 %v11872_v51 }
 0x477   :  { %v13213_v55 = vld [vmem:[#allocation6 + $0x1368] sm:$0xf0] }
 0x478   :  { %v16662_v57 = vld [vmem:[#allocation6 + $0x172c] sm:$0xf]  ;;  %v13216_v0 = vor.u32 %v16534_v50, %v13213_v55  ;;  %8006 = vmatpush.bf16.msra.mxu3 %v12384_v31 }
 0x479   :  { %v13725_v58 = vld [vmem:[#allocation6 + $0x1768] sm:$0xf0] }
 0x47a   :  { %v16182_v52 = vld [vmem:[#allocation6 + $0x82c] sm:$0xf]  ;;  %v13728_v3 = vor.u32 %v16662_v57, %v13725_v58  ;;  %8014 = vmatpush.bf16.msrb.mxu0 %v13216_v0  ;;  %v7762_v58 = vpop.f32.mrf.mxu0 }
 0x47b   :  { %v11805_v28 = vld [vmem:[#allocation6 + $0x868] sm:$0xf0] }
 0x47c   :  { %v16310_v60 = vld [vmem:[#allocation6 + $0xc2c] sm:$0xf]  ;;  %v11808_v4 = vor.u32 %v16182_v52, %v11805_v28  ;;  %8027 = vmatpush.bf16.msrb.mxu1 %v13728_v3 }
 0x47d   :  { %v12317_v59 = vld [vmem:[#allocation6 + $0xc68] sm:$0xf0] }
 0x47e   :  { %v16806_v62 = vld [vmem:[#allocation6 + $0x1bac] sm:$0xf]  ;;  %v12320_v14 = vor.u32 %v16310_v60, %v12317_v59  ;;  %7994 = vmatpush.bf16.msra.mxu2 %v11808_v4  ;;  %v7763_v60 = vadd.f32 %v7762_v58, %v1674_v35  ;;  %v16175_v58 = vld [vmem:[#allocation6 + $0x7ec] sm:$0xf0] }
 0x47f   :  { %v14301_v1 = vld [vmem:[#allocation6 + $0x1be8] sm:$0xf0] }
 0x480   :  { %v16934_v48 = vld [vmem:[#allocation6 + $0x1fac] sm:$0xf]  ;;  %v14304_v16 = vor.u32 %v16806_v62, %v14301_v1  ;;  %8007 = vmatpush.bf16.msra.mxu3 %v12320_v14  ;;  %v7776_v3 = vadd.f32 %v7775_v56, %v7763_v60  ;;  %v7801_v60 = vpop.f32.mrf.mxu3 }
 0x481   :  { %v14813_v61 = vld [vmem:[#allocation6 + $0x1fe8] sm:$0xf0]  ;;  %7995 = vmatmul.bf16.vlgmr.msra.gmra.mxu2 %v17466_v43 }
 0x482   :  { %v16518_v7 = vld [vmem:[#allocation6 + $0x12ac] sm:$0xf]  ;;  %v14816_v38 = vor.u32 %v16934_v48, %v14813_v61  ;;  %8039 = vmatpush.bf16.msrb.mxu2 %v14304_v16 }
 0x483   :  { %v13149_v8 = vld [vmem:[#allocation6 + $0x12e8] sm:$0xf0]  ;;  %8008 = vmatmul.bf16.vlgmr.msra.gmra.mxu3 %v17468_v49 }
 0x484   :  { %v16646_v18 = vld [vmem:[#allocation6 + $0x16ac] sm:$0xf]  ;;  %v13152_v23 = vor.u32 %v16518_v7, %v13149_v8  ;;  %8052 = vmatpush.bf16.msrb.mxu3 %v14816_v38 }
 0x485   :  { %v13661_v19 = vld [vmem:[#allocation6 + $0x16e8] sm:$0xf0] }
 0x486   :  { %v16790_v20 = vld [vmem:[#allocation6 + $0x1b2c] sm:$0xf]  ;;  %v13664_v27 = vor.u32 %v16646_v18, %v13661_v19  ;;  %8015 = vmatpush.bf16.msrb.mxu0 %v13152_v23 }
 0x487   :  { %v14237_v26 = vld [vmem:[#allocation6 + $0x1b68] sm:$0xf0] }
 0x488   :  { %v16918_v2 = vld [vmem:[#allocation6 + $0x1f2c] sm:$0xf]  ;;  %v14240_v30 = vor.u32 %v16790_v20, %v14237_v26  ;;  %8028 = vmatpush.bf16.msrb.mxu1 %v13664_v27  ;;  %v7764_v27 = vpop.f32.mrf.mxu0 }
 0x489   :  { %v14749_v24 = vld [vmem:[#allocation6 + $0x1f68] sm:$0xf0] }
 0x48a   :  { %v16502_v53 = vld [vmem:[#allocation6 + $0x122c] sm:$0xf]  ;;  %v14752_v32 = vor.u32 %v16918_v2, %v14749_v24  ;;  %8040 = vmatpush.bf16.msrb.mxu2 %v14240_v30 }
 0x48b   :  { %v13085_v25 = vld [vmem:[#allocation6 + $0x1268] sm:$0xf0] }
 0x48c   :  { %v16630_v29 = vld [vmem:[#allocation6 + $0x162c] sm:$0xf]  ;;  %v13088_v36 = vor.u32 %v16502_v53, %v13085_v25  ;;  %8053 = vmatpush.bf16.msrb.mxu3 %v14752_v32 }
 0x48d   :  { %v13597_v10 = vld [vmem:[#allocation6 + $0x1668] sm:$0xf0] }
 0x48e   :  { %v16774_v11 = vld [vmem:[#allocation6 + $0x1aac] sm:$0xf]  ;;  %v13600_v40 = vor.u32 %v16630_v29, %v13597_v10  ;;  %8016 = vmatpush.bf16.msrb.mxu0 %v13088_v36  ;;  %v7777_v29 = vpop.f32.mrf.mxu1 }
 0x48f   :  { %v14173_v34 = vld [vmem:[#allocation6 + $0x1ae8] sm:$0xf0] }
 0x490   :  { %v16902_v33 = vld [vmem:[#allocation6 + $0x1eac] sm:$0xf]  ;;  %v14176_v51 = vor.u32 %v16774_v11, %v14173_v34  ;;  %8029 = vmatpush.bf16.msrb.mxu1 %v13600_v40 }
 0x491   :  { %v14685_v37 = vld [vmem:[#allocation6 + $0x1ee8] sm:$0xf0] }
 0x492   :  { %v16486_v50 = vld [vmem:[#allocation6 + $0x11ac] sm:$0xf]  ;;  %v14688_v31 = vor.u32 %v16902_v33, %v14685_v37  ;;  %8041 = vmatpush.bf16.msrb.mxu2 %v14176_v51  ;;  %v11747_v51 = vld [vmem:[#allocation6 + $0x7b0] sm:$0xf] }
 0x493   :  { %v13021_v45 = vld [vmem:[#allocation6 + $0x11e8] sm:$0xf0] }
 0x494   :  { %v16614_v55 = vld [vmem:[#allocation6 + $0x15ac] sm:$0xf]  ;;  %v13024_v59 = vor.u32 %v16486_v50, %v13021_v45  ;;  %8054 = vmatpush.bf16.msrb.mxu3 %v14688_v31  ;;  %v11235_v50 = vld [vmem:[#allocation6 + $0x3b0] sm:$0xf] }
 0x495   :  { %v13533_v57 = vld [vmem:[#allocation6 + $0x15e8] sm:$0xf0]  ;;  %v16047_v45 = vld [vmem:[#allocation6 + $0x3ec] sm:$0xf0] }
 0x496   :  { %v16758_v52 = vld [vmem:[#allocation6 + $0x1a2c] sm:$0xf]  ;;  %v13536_v0 = vor.u32 %v16614_v55, %v13533_v57  ;;  %8017 = vmatpush.bf16.msrb.mxu0 %v13024_v59  ;;  %v7788_v55 = vpop.f32.mrf.mxu2 }
 0x497   :  { %v14109_v28 = vld [vmem:[#allocation6 + $0x1a68] sm:$0xf0] }
 0x498   :  { %v16886_v62 = vld [vmem:[#allocation6 + $0x1e2c] sm:$0xf]  ;;  %v14112_v4 = vor.u32 %v16758_v52, %v14109_v28  ;;  %8030 = vmatpush.bf16.msrb.mxu1 %v13536_v0  ;;  %v7789_v28 = vadd.f32 %v7788_v55, %v7776_v3  ;;  %v11236_v0 = vor.u32 %v16047_v45, %v11235_v50  ;;  %v16415_v50 = vld [vmem:[#allocation6 + $0xf6c] sm:$0xf0] }
 0x499   :  { %v14621_v1 = vld [vmem:[#allocation6 + $0x1e68] sm:$0xf0]  ;;  %v15999_v55 = vld [vmem:[#allocation6 + $0x26c] sm:$0xf0] }
 0x49a   :  { %v16470_v48 = vld [vmem:[#allocation6 + $0x112c] sm:$0xf]  ;;  %v14624_v12 = vor.u32 %v16886_v62, %v14621_v1  ;;  %8042 = vmatpush.bf16.msrb.mxu2 %v14112_v4  ;;  %v11748_v4 = vor.u32 %v16175_v58, %v11747_v51  ;;  %v11043_v51 = vld [vmem:[#allocation6 + $0x230] sm:$0xf] }
 0x49b   :  { %v12957_v61 = vld [vmem:[#allocation6 + $0x1168] sm:$0xf0]  ;;  %v11555_v58 = vld [vmem:[#allocation6 + $0x630] sm:$0xf] }
 0x49c   :  { %v16598_v7 = vld [vmem:[#allocation6 + $0x152c] sm:$0xf]  ;;  %v12960_v18 = vor.u32 %v16470_v48, %v12957_v61  ;;  %8055 = vmatpush.bf16.msrb.mxu3 %v14624_v12  ;;  %v11171_v48 = vld [vmem:[#allocation6 + $0x330] sm:$0xf]  ;;  %v17631_v61 = vadd.f32 %v7801_v60, %v7789_v28 }
 0x49d   :  { %v13469_v8 = vld [vmem:[#allocation6 + $0x1568] sm:$0xf0]  ;;  %v11683_v12 = vld [vmem:[#allocation6 + $0x730] sm:$0xf] }
 0x49e   :  { %v16742_v14 = vld [vmem:[#allocation6 + $0x19ac] sm:$0xf]  ;;  %v13472_v38 = vor.u32 %v16598_v7, %v13469_v8  ;;  %8018 = vmatpush.bf16.msrb.mxu0 %v12960_v18  ;;  %v16031_v8 = vld [vmem:[#allocation6 + $0x36c] sm:$0xf0] }
 0x49f   :  { %v14045_v16 = vld [vmem:[#allocation6 + $0x19e8] sm:$0xf0]  ;;  %v12131_v28 = vld [vmem:[#allocation6 + $0xab0] sm:$0xf] }
 0x4a0   :  { %v16870_v19 = vld [vmem:[#allocation6 + $0x1dac] sm:$0xf]  ;;  %v14048_v23 = vor.u32 %v16742_v14, %v14045_v16  ;;  %8031 = vmatpush.bf16.msrb.mxu1 %v13472_v38  ;;  %v16159_v14 = vld [vmem:[#allocation6 + $0x76c] sm:$0xf0] }
 0x4a1   :  { %v14557_v13 = vld [vmem:[#allocation6 + $0x1de8] sm:$0xf0]  ;;  %v12259_v38 = vld [vmem:[#allocation6 + $0xbb0] sm:$0xf] }
 0x4a2   :  { %v16454_v20 = vld [vmem:[#allocation6 + $0x10ac] sm:$0xf]  ;;  %v14560_v53 = vor.u32 %v16870_v19, %v14557_v13  ;;  %8043 = vmatpush.bf16.msrb.mxu2 %v14048_v23  ;;  %v12771_v23 = vld [vmem:[#allocation6 + $0xfb0] sm:$0xf] }
 0x4a3   :  { %v12893_v26 = vld [vmem:[#allocation6 + $0x10e8] sm:$0xf0]  ;;  %v16271_v60 = vld [vmem:[#allocation6 + $0xaec] sm:$0xf0] }
 0x4a4   :  { %v16582_v2 = vld [vmem:[#allocation6 + $0x14ac] sm:$0xf]  ;;  %v12896_v10 = vor.u32 %v16454_v20, %v12893_v26  ;;  %8056 = vmatpush.bf16.msrb.mxu3 %v14560_v53  ;;  %v16303_v20 = vld [vmem:[#allocation6 + $0xbec] sm:$0xf0]  ;;  %v11172_v26 = vor.u32 %v16031_v8, %v11171_v48 }
 0x4a5   :  { %v13405_v24 = vld [vmem:[#allocation6 + $0x14e8] sm:$0xf0]  ;;  %v11107_v53 = vld [vmem:[#allocation6 + $0x2b0] sm:$0xf] }
 0x4a6   :  { %v16726_v25 = vld [vmem:[#allocation6 + $0x192c] sm:$0xf]  ;;  %v13408_v35 = vor.u32 %v16582_v2, %v13405_v24  ;;  %8019 = vmatpush.bf16.msrb.mxu0 %v12896_v10  ;;  %v16431_v2 = vld [vmem:[#allocation6 + $0xfec] sm:$0xf0]  ;;  %v11684_v24 = vor.u32 %v16159_v14, %v11683_v12  ;;  %v12260_v10 = vor.u32 %v16303_v20, %v12259_v38  ;;  %v7814_v12 = vpop.f32.mrf.mxu0 }
 0x4a7   :  { %v13981_v30 = vld [vmem:[#allocation6 + $0x1968] sm:$0xf0]  ;;  %v15983_v48 = vld [vmem:[#allocation6 + $0x1ec] sm:$0xf0] }
 0x4a8   :  { %v16854_v32 = vld [vmem:[#allocation6 + $0x1d2c] sm:$0xf]  ;;  %v13984_v40 = vor.u32 %v16726_v25, %v13981_v30  ;;  %8032 = vmatpush.bf16.msrb.mxu1 %v13408_v35  ;;  %v16015_v25 = vld [vmem:[#allocation6 + $0x2ec] sm:$0xf0]  ;;  %v7790_v30 = vpop.f32.mrf.mxu2  ;;  %v12772_v35 = vor.u32 %v16431_v2, %v12771_v23 }
 0x4a9   :  { %v14493_v11 = vld [vmem:[#allocation6 + $0x1d68] sm:$0xf0]  ;;  %v16111_v8 = vld [vmem:[#allocation6 + $0x5ec] sm:$0xf0] }
 0x4aa   :  { %v16438_v34 = vld [vmem:[#allocation6 + $0x102c] sm:$0xf]  ;;  %v14496_v57 = vor.u32 %v16854_v32, %v14493_v11  ;;  %8044 = vmatpush.bf16.msrb.mxu2 %v13984_v40  ;;  %v11619_v32 = vld [vmem:[#allocation6 + $0x6b0] sm:$0xf] }
 0x4ab   :  { %v12829_v36 = vld [vmem:[#allocation6 + $0x1068] sm:$0xf0]  ;;  %v16143_v11 = vld [vmem:[#allocation6 + $0x6ec] sm:$0xf0] }
 0x4ac   :  { %v16566_v33 = vld [vmem:[#allocation6 + $0x142c] sm:$0xf]  ;;  %v12832_v56 = vor.u32 %v16438_v34, %v12829_v36  ;;  %8057 = vmatpush.bf16.msrb.mxu3 %v14496_v57  ;;  %v7803_v34 = vpop.f32.mrf.mxu3  ;;  %v12195_v36 = vld [vmem:[#allocation6 + $0xb30] sm:$0xf]  ;;  %v11620_v45 = vor.u32 %v16143_v11, %v11619_v32 }
 0x4ad   :  { %v13341_v37 = vld [vmem:[#allocation6 + $0x1468] sm:$0xf0]  ;;  %v12707_v40 = vld [vmem:[#allocation6 + $0xf30] sm:$0xf] }
 0x4ae   :  { %v16710_v31 = vld [vmem:[#allocation6 + $0x18ac] sm:$0xf]  ;;  %v13344_v1 = vor.u32 %v16566_v33, %v13341_v37  ;;  %8020 = vmatpush.bf16.msrb.mxu0 %v12832_v56  ;;  %v16287_v33 = vld [vmem:[#allocation6 + $0xb6c] sm:$0xf0]  ;;  %v11108_v37 = vor.u32 %v16015_v25, %v11107_v53  ;;  %v11044_v56 = vor.u32 %v15999_v55, %v11043_v51 }
 0x4af   :  { %v13917_v52 = vld [vmem:[#allocation6 + $0x18e8] sm:$0xf0]  ;;  %v12196_v57 = vor.u32 %v16287_v33, %v12195_v36  ;;  %v12579_v38 = vld [vmem:[#allocation6 + $0xe30] sm:$0xf] }
 0x4b0   :  { %v16838_v59 = vld [vmem:[#allocation6 + $0x1cac] sm:$0xf]  ;;  %v13920_v7 = vor.u32 %v16710_v31, %v13917_v52  ;;  %8033 = vmatpush.bf16.msrb.mxu1 %v13344_v1  ;;  %v16127_v31 = vld [vmem:[#allocation6 + $0x66c] sm:$0xf0]  ;;  %v12708_v52 = vor.u32 %v16415_v50, %v12707_v40  ;;  %v7816_v50 = vpop.f32.mrf.mxu0 }
 0x4b1   :  { %v14429_v62 = vld [vmem:[#allocation6 + $0x1ce8] sm:$0xf0]  ;;  %8021 = vmatmul.bf16.vlgmr.msrb.gmra.mxu0 %v17475_v6  ;;  %v11556_v1 = vor.u32 %v16127_v31, %v11555_v58  ;;  %v16383_v20 = vld [vmem:[#allocation6 + $0xe6c] sm:$0xf0] }
 0x4b2   :  { %v14432_v16 = vor.u32 %v16838_v59, %v14429_v62  ;;  %v16694_v3 = vld [vmem:[#allocation6 + $0x182c] sm:$0xf]  ;;  %8065 = vmatpush.bf16.msra.mxu0 %v11236_v0  ;;  %8045 = vmatpush.bf16.msrb.mxu2 %v13920_v7  ;;  %v12643_v59 = vld [vmem:[#allocation6 + $0xeb0] sm:$0xf]  ;;  %v12580_v30 = vor.u32 %v16383_v20, %v12579_v38 }
 0x4b3   :  { %v13853_v18 = vld [vmem:[#allocation6 + $0x1868] sm:$0xf0]  ;;  %8034 = vmatmul.bf16.vlgmr.msrb.gmra.mxu1 %v17478_v9  ;;  %v16399_v62 = vld [vmem:[#allocation6 + $0xeec] sm:$0xf0] }
 0x4b4   :  { %v16822_v19 = vld [vmem:[#allocation6 + $0x1c2c] sm:$0xf]  ;;  %8078 = vmatpush.bf16.msra.mxu1 %v11748_v4  ;;  %v13856_v27 = vor.u32 %v16694_v3, %v13853_v18  ;;  %8058 = vmatpush.bf16.msrb.mxu3 %v14432_v16  ;;  %v10979_v0 = vld [vmem:[#allocation6 + $0x1b0] sm:$0xf]  ;;  %v12132_v4 = vor.u32 %v16271_v60, %v12131_v28  ;;  %v12644_v14 = vor.u32 %v16399_v62, %v12643_v59 }
 0x4b5   :  { %v14365_v13 = vld [vmem:[#allocation6 + $0x1c68] sm:$0xf0]  ;;  %v11491_v7 = vld [vmem:[#allocation6 + $0x5b0] sm:$0xf]  ;;  %v7815_v18 = vadd.f32 %v7814_v12, %v17631_v61 }
 0x4b6   :  { %v14368_v29 = vor.u32 %v16822_v19, %v14365_v13  ;;  %8066 = vmatpush.bf16.msra.mxu0 %v11172_v26  ;;  %8046 = vmatpush.bf16.msrb.mxu2 %v13856_v27  ;;  %v12067_v16 = vld [vmem:[#allocation6 + $0xa30] sm:$0xf]  ;;  %v7827_v19 = vpop.f32.mrf.mxu1  ;;  %v10980_v13 = vor.u32 %v15983_v48, %v10979_v0  ;;  %v11492_v26 = vor.u32 %v16111_v8, %v11491_v7  ;;  %v7840_v7 = vpop.f32.mrf.mxu2 }
 0x4b7   :  { %v16255_v3 = vld [vmem:[#allocation6 + $0xa6c] sm:$0xf0] }
 0x4b8   :  { %8079 = vmatpush.bf16.msra.mxu1 %v11684_v24  ;;  %8059 = vmatpush.bf16.msrb.mxu3 %v14368_v29  ;;  %v10915_v23 = vld [vmem:[#allocation6 + $0x130] sm:$0xf]  ;;  %v7828_v24 = vadd.f32 %v7827_v19, %v7815_v18  ;;  %v12068_v27 = vor.u32 %v16255_v3, %v12067_v16  ;;  %v7853_v18 = vpop.f32.mrf.mxu3 }
 0x4b9   :  { %8047 = vmatmul.bf16.vlgmr.msrb.gmra.mxu2 %v17482_v41  ;;  %v15967_v2 = vld [vmem:[#allocation6 + $0x16c] sm:$0xf0] }
 0x4ba   :  { %8091 = vmatpush.bf16.msra.mxu2 %v12260_v10  ;;  %8067 = vmatpush.bf16.msra.mxu0 %v11108_v37  ;;  %v11427_v53 = vld [vmem:[#allocation6 + $0x530] sm:$0xf]  ;;  %v10916_v61 = vor.u32 %v15967_v2, %v10915_v23  ;;  %v7841_v3 = vadd.f32 %v7840_v7, %v7828_v24 }
 0x4bb   :  { %8060 = vmatmul.bf16.vlgmr.msrb.gmra.mxu3 %v17484_v44  ;;  %v16095_v25 = vld [vmem:[#allocation6 + $0x56c] sm:$0xf0] }
 0x4bc   :  { %8104 = vmatpush.bf16.msra.mxu3 %v12772_v35  ;;  %8080 = vmatpush.bf16.msra.mxu1 %v11620_v45  ;;  %v12003_v29 = vld [vmem:[#allocation6 + $0x9b0] sm:$0xf]  ;;  %v11428_v34 = vor.u32 %v16095_v25, %v11427_v53  ;;  %v17638_v2 = vadd.f32 %v7853_v18, %v7841_v3 }
 0x4bd   :  { %v16239_v10 = vld [vmem:[#allocation6 + $0x9ec] sm:$0xf0] }
 0x4be   :  { %8092 = vmatpush.bf16.msra.mxu2 %v12196_v57  ;;  %8068 = vmatpush.bf16.msra.mxu0 %v11044_v56  ;;  %v12515_v32 = vld [vmem:[#allocation6 + $0xdb0] sm:$0xf]  ;;  %v12004_v33 = vor.u32 %v16239_v10, %v12003_v29  ;;  %v7829_v57 = vpop.f32.mrf.mxu1 }
 0x4bf   :  { %v16367_v11 = vld [vmem:[#allocation6 + $0xdec] sm:$0xf0] }
 0x4c0   :  { %8105 = vmatpush.bf16.msra.mxu3 %v12708_v52  ;;  %8081 = vmatpush.bf16.msra.mxu1 %v11556_v1  ;;  %v10851_v35 = vld [vmem:[#allocation6 + $0xb0] sm:$0xf]  ;;  %v12516_v45 = vor.u32 %v16367_v11, %v12515_v32 }
 0x4c1   :  { %v15951_v36 = vld [vmem:[#allocation6 + $0xec] sm:$0xf0] }
 0x4c2   :  { %8093 = vmatpush.bf16.msra.mxu2 %v12132_v4  ;;  %8069 = vmatpush.bf16.msra.mxu0 %v10980_v13  ;;  %v11363_v37 = vld [vmem:[#allocation6 + $0x4b0] sm:$0xf]  ;;  %v10852_v58 = vor.u32 %v15951_v36, %v10851_v35 }
 0x4c3   :  { %v16079_v40 = vld [vmem:[#allocation6 + $0x4ec] sm:$0xf0] }
 0x4c4   :  { %8106 = vmatpush.bf16.msra.mxu3 %v12644_v14  ;;  %8082 = vmatpush.bf16.msra.mxu1 %v11492_v26  ;;  %v11939_v51 = vld [vmem:[#allocation6 + $0x930] sm:$0xf]  ;;  %v11364_v60 = vor.u32 %v16079_v40, %v11363_v37 }
 0x4c5   :  { %v16223_v55 = vld [vmem:[#allocation6 + $0x96c] sm:$0xf0] }
 0x4c6   :  { %8094 = vmatpush.bf16.msra.mxu2 %v12068_v27  ;;  %8070 = vmatpush.bf16.msra.mxu0 %v10916_v61  ;;  %v12451_v31 = vld [vmem:[#allocation6 + $0xd30] sm:$0xf]  ;;  %v11940_v1 = vor.u32 %v16223_v55, %v11939_v51  ;;  %v7842_v55 = vpop.f32.mrf.mxu2 }
 0x4c7   :  { %v16351_v52 = vld [vmem:[#allocation6 + $0xd6c] sm:$0xf0] }
 0x4c8   :  { %8107 = vmatpush.bf16.msra.mxu3 %v12580_v30  ;;  %v10787_v28 = vld [vmem:[#allocation6 + $0x30] sm:$0xf]  ;;  %8083 = vmatpush.bf16.msra.mxu1 %v11428_v34  ;;  %v12452_v8 = vor.u32 %v16351_v52, %v12451_v31 }
 0x4c9   :  { %v15935_v56 = vld [vmem:[#allocation6 + $0x6c] sm:$0xf0] }
 0x4ca   :  { %v11299_v59 = vld [vmem:[#allocation6 + $0x430] sm:$0xf]  ;;  %8095 = vmatpush.bf16.msra.mxu2 %v12004_v33  ;;  %8071 = vmatpush.bf16.msra.mxu0 %v10852_v58  ;;  %v10788_v19 = vor.u32 %v15935_v56, %v10787_v28  ;;  %v7855_v28 = vpop.f32.mrf.mxu3 }
 0x4cb   :  { %v16063_v62 = vld [vmem:[#allocation6 + $0x46c] sm:$0xf0] }
 0x4cc   :  { %v13283_v0 = vld [vmem:[#allocation6 + $0x13b0] sm:$0xf]  ;;  %8108 = vmatpush.bf16.msra.mxu3 %v12516_v45  ;;  %8084 = vmatpush.bf16.msra.mxu1 %v11364_v60  ;;  %v11300_v20 = vor.u32 %v16063_v62, %v11299_v59 }
 0x4cd   :  { %v16559_v48 = vld [vmem:[#allocation6 + $0x13ec] sm:$0xf0] }
 0x4ce   :  { %v13795_v4 = vld [vmem:[#allocation6 + $0x17b0] sm:$0xf]  ;;  %v13284_v26 = vor.u32 %v16559_v48, %v13283_v0  ;;  %8096 = vmatpush.bf16.msra.mxu2 %v11940_v1  ;;  %8072 = vmatpush.bf16.msra.mxu0 %v10788_v19  ;;  %v17643_v19 = vld [vmem:[#allocation7 + $0x8] sm:$0xff] }
 0x4cf   :  { %v16687_v12 = vld [vmem:[#allocation6 + $0x17ec] sm:$0xf0] }
 0x4d0   :  { %v11875_v14 = vld [vmem:[#allocation6 + $0x8b0] sm:$0xf]  ;;  %v13796_v27 = vor.u32 %v16687_v12, %v13795_v4  ;;  %8109 = vmatpush.bf16.msra.mxu3 %v12452_v8  ;;  %8085 = vmatpush.bf16.msra.mxu1 %v11300_v20 }
 0x4d1   :  { %v16207_v16 = vld [vmem:[#allocation6 + $0x8ec] sm:$0xf0]  ;;  %8073 = vmatmul.bf16.vlgmr.msra.gmra.mxu0 %v17459_v17 }
 0x4d2   :  { %v12387_v13 = vld [vmem:[#allocation6 + $0xcb0] sm:$0xf]  ;;  %v11876_v53 = vor.u32 %v16207_v16, %v11875_v14  ;;  %8117 = vmatpush.bf16.msrb.mxu0 %v13284_v26 }
 0x4d3   :  { %v16335_v38 = vld [vmem:[#allocation6 + $0xcec] sm:$0xf0]  ;;  %8086 = vmatmul.bf16.vlgmr.msra.gmra.mxu1 %v17462_v22 }
 0x4d4   :  { %v13219_v23 = vld [vmem:[#allocation6 + $0x1330] sm:$0xf]  ;;  %v12388_v10 = vor.u32 %v16335_v38, %v12387_v13  ;;  %8130 = vmatpush.bf16.msrb.mxu1 %v13796_v27  ;;  %8097 = vmatpush.bf16.msra.mxu2 %v11876_v53  ;;  %v1675_v13 = vperm.slane %v17643_v19, 2 }
 0x4d5   :  { %v16543_v25 = vld [vmem:[#allocation6 + $0x136c] sm:$0xf0] }
 0x4d6   :  { %v13731_v30 = vld [vmem:[#allocation6 + $0x1730] sm:$0xf]  ;;  %v13220_v36 = vor.u32 %v16543_v25, %v13219_v23  ;;  %8110 = vmatpush.bf16.msra.mxu3 %v12388_v10  ;;  %v7866_v10 = vpop.f32.mrf.mxu0 }
 0x4d7   :  { %v16671_v29 = vld [vmem:[#allocation6 + $0x176c] sm:$0xf0] }
 0x4d8   :  { %v11811_v24 = vld [vmem:[#allocation6 + $0x830] sm:$0xf]  ;;  %v13732_v40 = vor.u32 %v16671_v29, %v13731_v30  ;;  %8118 = vmatpush.bf16.msrb.mxu0 %v13220_v36 }
 0x4d9   :  { %v16191_v61 = vld [vmem:[#allocation6 + $0x86c] sm:$0xf0] }
 0x4da   :  { %v12323_v32 = vld [vmem:[#allocation6 + $0xc30] sm:$0xf]  ;;  %v11812_v50 = vor.u32 %v16191_v61, %v11811_v24  ;;  %8131 = vmatpush.bf16.msrb.mxu1 %v13732_v40 }
 0x4db   :  { %v16319_v11 = vld [vmem:[#allocation6 + $0xc6c] sm:$0xf0] }
 0x4dc   :  { %v14307_v34 = vld [vmem:[#allocation6 + $0x1bb0] sm:$0xf]  ;;  %v12324_v57 = vor.u32 %v16319_v11, %v12323_v32  ;;  %8098 = vmatpush.bf16.msra.mxu2 %v11812_v50  ;;  %v7867_v11 = vadd.f32 %v7866_v10, %v1675_v13  ;;  %v7892_v10 = vpop.f32.mrf.mxu2 }
 0x4dd   :  { %v16815_v35 = vld [vmem:[#allocation6 + $0x1bec] sm:$0xf0] }
 0x4de   :  { %v14819_v33 = vld [vmem:[#allocation6 + $0x1fb0] sm:$0xf]  ;;  %v14308_v58 = vor.u32 %v16815_v35, %v14307_v34  ;;  %8111 = vmatpush.bf16.msra.mxu3 %v12324_v57  ;;  %v7879_v34 = vpop.f32.mrf.mxu1 }
 0x4df   :  { %v16943_v37 = vld [vmem:[#allocation6 + $0x1fec] sm:$0xf0]  ;;  %8099 = vmatmul.bf16.vlgmr.msra.gmra.mxu2 %v17466_v43 }
 0x4e0   :  { %v13155_v45 = vld [vmem:[#allocation6 + $0x12b0] sm:$0xf]  ;;  %v14820_v60 = vor.u32 %v16943_v37, %v14819_v33  ;;  %8143 = vmatpush.bf16.msrb.mxu2 %v14308_v58 }
 0x4e1   :  { %v16527_v51 = vld [vmem:[#allocation6 + $0x12ec] sm:$0xf0]  ;;  %8112 = vmatmul.bf16.vlgmr.msra.gmra.mxu3 %v17468_v49 }
 0x4e2   :  { %v13667_v31 = vld [vmem:[#allocation6 + $0x16b0] sm:$0xf]  ;;  %v13156_v62 = vor.u32 %v16527_v51, %v13155_v45  ;;  %8156 = vmatpush.bf16.msrb.mxu3 %v14820_v60  ;;  %v7880_v45 = vadd.f32 %v7879_v34, %v7867_v11 }
 0x4e3   :  { %v16655_v52 = vld [vmem:[#allocation6 + $0x16ec] sm:$0xf0] }
 0x4e4   :  { %v14243_v56 = vld [vmem:[#allocation6 + $0x1b30] sm:$0xf]  ;;  %v13668_v48 = vor.u32 %v16655_v52, %v13667_v31  ;;  %8119 = vmatpush.bf16.msrb.mxu0 %v13156_v62  ;;  %v7893_v34 = vadd.f32 %v7892_v10, %v7880_v45 }
 0x4e5   :  { %v16799_v59 = vld [vmem:[#allocation6 + $0x1b6c] sm:$0xf0] }
 0x4e6   :  { %v14755_v1 = vld [vmem:[#allocation6 + $0x1f30] sm:$0xf]  ;;  %v14244_v8 = vor.u32 %v16799_v59, %v14243_v56  ;;  %8132 = vmatpush.bf16.msrb.mxu1 %v13668_v48 }
 0x4e7   :  { %v16927_v0 = vld [vmem:[#allocation6 + $0x1f6c] sm:$0xf0] }
 0x4e8   :  { %v13091_v4 = vld [vmem:[#allocation6 + $0x1230] sm:$0xf]  ;;  %v14756_v16 = vor.u32 %v16927_v0, %v14755_v1  ;;  %8144 = vmatpush.bf16.msrb.mxu2 %v14244_v8 }
 0x4e9   :  { %v16511_v7 = vld [vmem:[#allocation6 + $0x126c] sm:$0xf0] }
 0x4ea   :  { %v13603_v12 = vld [vmem:[#allocation6 + $0x1630] sm:$0xf]  ;;  %v13092_v38 = vor.u32 %v16511_v7, %v13091_v4  ;;  %8157 = vmatpush.bf16.msrb.mxu3 %v14756_v16  ;;  %v7868_v7 = vpop.f32.mrf.mxu0  ;;  %v7881_v16 = vpop.f32.mrf.mxu1 }
 0x4eb   :  { %v16639_v14 = vld [vmem:[#allocation6 + $0x166c] sm:$0xf0]  ;;  %v12773_v7 = vld [vmem:[#allocation6 + $0xff0] sm:$0xf0] }
 0x4ec   :  { %v14179_v3 = vld [vmem:[#allocation6 + $0x1ab0] sm:$0xf]  ;;  %v13604_v23 = vor.u32 %v16639_v14, %v13603_v12  ;;  %8120 = vmatpush.bf16.msrb.mxu0 %v13092_v38  ;;  %v11109_v16 = vld [vmem:[#allocation6 + $0x2f0] sm:$0xf0] }
 0x4ed   :  { %v16783_v18 = vld [vmem:[#allocation6 + $0x1aec] sm:$0xf0] }
 0x4ee   :  { %v14691_v20 = vld [vmem:[#allocation6 + $0x1eb0] sm:$0xf]  ;;  %v14180_v25 = vor.u32 %v16783_v18, %v14179_v3  ;;  %8133 = vmatpush.bf16.msrb.mxu1 %v13604_v23 }
 0x4ef   :  { %v16911_v26 = vld [vmem:[#allocation6 + $0x1eec] sm:$0xf0] }
 0x4f0   :  { %v13027_v27 = vld [vmem:[#allocation6 + $0x11b0] sm:$0xf]  ;;  %v14692_v24 = vor.u32 %v16911_v26, %v14691_v20  ;;  %8145 = vmatpush.bf16.msrb.mxu2 %v14180_v25  ;;  %v16039_v25 = vld [vmem:[#allocation6 + $0x3b4] sm:$0xf] }
 0x4f1   :  { %v16495_v53 = vld [vmem:[#allocation6 + $0x11ec] sm:$0xf0] }
 0x4f2   :  { %v13539_v30 = vld [vmem:[#allocation6 + $0x15b0] sm:$0xf]  ;;  %v13028_v35 = vor.u32 %v16495_v53, %v13027_v27  ;;  %8158 = vmatpush.bf16.msrb.mxu3 %v14692_v24 }
 0x4f3   :  { %v16623_v29 = vld [vmem:[#allocation6 + $0x15ec] sm:$0xf0] }
 0x4f4   :  { %v14115_v61 = vld [vmem:[#allocation6 + $0x1a30] sm:$0xf]  ;;  %v13540_v37 = vor.u32 %v16623_v29, %v13539_v30  ;;  %8121 = vmatpush.bf16.msrb.mxu0 %v13028_v35  ;;  %v11237_v30 = vld [vmem:[#allocation6 + $0x3f0] sm:$0xf0]  ;;  %v7905_v35 = vpop.f32.mrf.mxu3 }
 0x4f5   :  { %v16767_v32 = vld [vmem:[#allocation6 + $0x1a6c] sm:$0xf0]  ;;  %v16167_v29 = vld [vmem:[#allocation6 + $0x7b4] sm:$0xf] }
 0x4f6   :  { %v14627_v36 = vld [vmem:[#allocation6 + $0x1e30] sm:$0xf]  ;;  %v14116_v51 = vor.u32 %v16767_v32, %v14115_v61  ;;  %8134 = vmatpush.bf16.msrb.mxu1 %v13540_v37  ;;  %v11749_v61 = vld [vmem:[#allocation6 + $0x7f0] sm:$0xf0] }
 0x4f7   :  { %v16895_v33 = vld [vmem:[#allocation6 + $0x1e6c] sm:$0xf0] }
 0x4f8   :  { %v12963_v40 = vld [vmem:[#allocation6 + $0x1130] sm:$0xf]  ;;  %v14628_v58 = vor.u32 %v16895_v33, %v14627_v36  ;;  %8146 = vmatpush.bf16.msrb.mxu2 %v14116_v51  ;;  %v16023_v51 = vld [vmem:[#allocation6 + $0x334] sm:$0xf] }
 0x4f9   :  { %v16479_v50 = vld [vmem:[#allocation6 + $0x116c] sm:$0xf0] }
 0x4fa   :  { %v13475_v55 = vld [vmem:[#allocation6 + $0x1530] sm:$0xf]  ;;  %v12964_v28 = vor.u32 %v16479_v50, %v12963_v40  ;;  %8159 = vmatpush.bf16.msrb.mxu3 %v14628_v58  ;;  %v11240_v50 = vor.u32 %v16039_v25, %v11237_v30  ;;  %v16407_v30 = vld [vmem:[#allocation6 + $0xf34] sm:$0xf] }
 0x4fb   :  { %v16607_v57 = vld [vmem:[#allocation6 + $0x156c] sm:$0xf0] }
 0x4fc   :  { %v14051_v31 = vld [vmem:[#allocation6 + $0x19b0] sm:$0xf]  ;;  %v13476_v59 = vor.u32 %v16607_v57, %v13475_v55  ;;  %8122 = vmatpush.bf16.msrb.mxu0 %v12964_v28  ;;  %v17647_v55 = vadd.f32 %v7905_v35, %v7893_v34  ;;  %v11752_v57 = vor.u32 %v16167_v29, %v11749_v61  ;;  %v11685_v28 = vld [vmem:[#allocation6 + $0x770] sm:$0xf0] }
 0x4fd   :  { %v16751_v52 = vld [vmem:[#allocation6 + $0x19ec] sm:$0xf0]  ;;  %v12709_v29 = vld [vmem:[#allocation6 + $0xf70] sm:$0xf0] }
 0x4fe   :  { %v14563_v60 = vld [vmem:[#allocation6 + $0x1db0] sm:$0xf]  ;;  %v14052_v0 = vor.u32 %v16751_v52, %v14051_v31  ;;  %8135 = vmatpush.bf16.msrb.mxu1 %v13476_v59  ;;  %v11173_v31 = vld [vmem:[#allocation6 + $0x370] sm:$0xf0]  ;;  %v12712_v35 = vor.u32 %v16407_v30, %v12709_v29 }
 0x4ff   :  { %v16879_v56 = vld [vmem:[#allocation6 + $0x1dec] sm:$0xf0]  ;;  %v16151_v52 = vld [vmem:[#allocation6 + $0x734] sm:$0xf] }
 0x500   :  { %v12899_v62 = vld [vmem:[#allocation6 + $0x10b0] sm:$0xf]  ;;  %v14564_v8 = vor.u32 %v16879_v56, %v14563_v60  ;;  %8147 = vmatpush.bf16.msrb.mxu2 %v14052_v0  ;;  %v12261_v0 = vld [vmem:[#allocation6 + $0xbf0] sm:$0xf0] }
 0x501   :  { %v16463_v1 = vld [vmem:[#allocation6 + $0x10ec] sm:$0xf0]  ;;  %v11045_v61 = vld [vmem:[#allocation6 + $0x270] sm:$0xf0] }
 0x502   :  { %v13411_v48 = vld [vmem:[#allocation6 + $0x14b0] sm:$0xf]  ;;  %v12900_v3 = vor.u32 %v16463_v1, %v12899_v62  ;;  %8160 = vmatpush.bf16.msrb.mxu3 %v14564_v8  ;;  %v16295_v1 = vld [vmem:[#allocation6 + $0xbb4] sm:$0xf]  ;;  %v11688_v8 = vor.u32 %v16151_v52, %v11685_v28 }
 0x503   :  { %v16591_v4 = vld [vmem:[#allocation6 + $0x14ec] sm:$0xf0]  ;;  %v11557_v34 = vld [vmem:[#allocation6 + $0x670] sm:$0xf0] }
 0x504   :  { %v13987_v12 = vld [vmem:[#allocation6 + $0x1930] sm:$0xf]  ;;  %v13412_v20 = vor.u32 %v16591_v4, %v13411_v48  ;;  %8123 = vmatpush.bf16.msrb.mxu0 %v12900_v3  ;;  %v11176_v48 = vor.u32 %v16023_v51, %v11173_v31  ;;  %v16423_v4 = vld [vmem:[#allocation6 + $0xfb4] sm:$0xf]  ;;  %v7894_v3 = vpop.f32.mrf.mxu2 }
 0x505   :  { %v16735_v14 = vld [vmem:[#allocation6 + $0x196c] sm:$0xf0]  ;;  %v16103_v52 = vld [vmem:[#allocation6 + $0x5b4] sm:$0xf] }
 0x506   :  { %v14499_v18 = vld [vmem:[#allocation6 + $0x1d30] sm:$0xf]  ;;  %v13988_v53 = vor.u32 %v16735_v14, %v13987_v12  ;;  %8136 = vmatpush.bf16.msrb.mxu1 %v13412_v20  ;;  %v16007_v14 = vld [vmem:[#allocation6 + $0x2b4] sm:$0xf] }
 0x507   :  { %v16863_v13 = vld [vmem:[#allocation6 + $0x1d6c] sm:$0xf0]  ;;  %v11621_v20 = vld [vmem:[#allocation6 + $0x6f0] sm:$0xf0]  ;;  %v11112_v25 = vor.u32 %v16007_v14, %v11109_v16 }
 0x508   :  { %v12835_v38 = vld [vmem:[#allocation6 + $0x1030] sm:$0xf]  ;;  %v14500_v24 = vor.u32 %v16863_v13, %v14499_v18  ;;  %8148 = vmatpush.bf16.msrb.mxu2 %v13988_v53  ;;  %v12264_v13 = vor.u32 %v16295_v1, %v12261_v0  ;;  %v12197_v53 = vld [vmem:[#allocation6 + $0xb70] sm:$0xf0]  ;;  %v7931_v1 = vpop.f32.mrf.mxu1 }
 0x509   :  { %v16447_v26 = vld [vmem:[#allocation6 + $0x106c] sm:$0xf0]  ;;  %v11493_v28 = vld [vmem:[#allocation6 + $0x5f0] sm:$0xf0] }
 0x50a   :  { %v13347_v23 = vld [vmem:[#allocation6 + $0x1430] sm:$0xf]  ;;  %v12836_v36 = vor.u32 %v16447_v26, %v12835_v38  ;;  %8161 = vmatpush.bf16.msrb.mxu3 %v14500_v24  ;;  %v16135_v38 = vld [vmem:[#allocation6 + $0x6b4] sm:$0xf]  ;;  %v7907_v26 = vpop.f32.mrf.mxu3 }
 0x50b   :  { %v16575_v27 = vld [vmem:[#allocation6 + $0x146c] sm:$0xf0]  ;;  %v11624_v10 = vor.u32 %v16135_v38, %v11621_v20  ;;  %v15991_v24 = vld [vmem:[#allocation6 + $0x234] sm:$0xf] }
 0x50c   :  { %v13923_v32 = vld [vmem:[#allocation6 + $0x18b0] sm:$0xf]  ;;  %v13348_v40 = vor.u32 %v16575_v27, %v13347_v23  ;;  %8124 = vmatpush.bf16.msrb.mxu0 %v12836_v36  ;;  %v12776_v23 = vor.u32 %v16423_v4, %v12773_v7  ;;  %v16279_v27 = vld [vmem:[#allocation6 + $0xb34] sm:$0xf]  ;;  %v11496_v7 = vor.u32 %v16103_v52, %v11493_v28 }
 0x50d   :  { %v16719_v11 = vld [vmem:[#allocation6 + $0x18ec] sm:$0xf0]  ;;  %v16263_v36 = vld [vmem:[#allocation6 + $0xab4] sm:$0xf] }
 0x50e   :  { %v14435_v33 = vld [vmem:[#allocation6 + $0x1cb0] sm:$0xf]  ;;  %v13924_v58 = vor.u32 %v16719_v11, %v13923_v32  ;;  %8137 = vmatpush.bf16.msrb.mxu1 %v13348_v40  ;;  %v12200_v32 = vor.u32 %v16279_v27, %v12197_v53  ;;  %v16119_v11 = vld [vmem:[#allocation6 + $0x634] sm:$0xf] }
 0x50f   :  { %v16847_v37 = vld [vmem:[#allocation6 + $0x1cec] sm:$0xf0]  ;;  %8125 = vmatmul.bf16.vlgmr.msrb.gmra.mxu0 %v17475_v6  ;;  %v16391_v40 = vld [vmem:[#allocation6 + $0xeb4] sm:$0xf]  ;;  %v11560_v51 = vor.u32 %v16119_v11, %v11557_v34 }
 0x510   :  { %v14436_v60 = vor.u32 %v16847_v37, %v14435_v33  ;;  %v13859_v45 = vld [vmem:[#allocation6 + $0x1830] sm:$0xf]  ;;  %8169 = vmatpush.bf16.msra.mxu0 %v11240_v50  ;;  %8149 = vmatpush.bf16.msrb.mxu2 %v13924_v58  ;;  %v12133_v33 = vld [vmem:[#allocation6 + $0xaf0] sm:$0xf0]  ;;  %v11048_v37 = vor.u32 %v15991_v24, %v11045_v61  ;;  %v7933_v34 = vpop.f32.mrf.mxu1 }
 0x511   :  { %v16703_v56 = vld [vmem:[#allocation6 + $0x186c] sm:$0xf0]  ;;  %8138 = vmatmul.bf16.vlgmr.msrb.gmra.mxu1 %v17478_v9  ;;  %v12645_v50 = vld [vmem:[#allocation6 + $0xef0] sm:$0xf0]  ;;  %v12136_v31 = vor.u32 %v16263_v36, %v12133_v33 }
 0x512   :  { %v14371_v59 = vld [vmem:[#allocation6 + $0x1c30] sm:$0xf]  ;;  %8182 = vmatpush.bf16.msra.mxu1 %v11752_v57  ;;  %v13860_v12 = vor.u32 %v16703_v56, %v13859_v45  ;;  %8162 = vmatpush.bf16.msrb.mxu3 %v14436_v60  ;;  %v15975_v57 = vld [vmem:[#allocation6 + $0x1b4] sm:$0xf]  ;;  %v7918_v60 = vpop.f32.mrf.mxu0  ;;  %v12648_v45 = vor.u32 %v16391_v40, %v12645_v50 }
 0x513   :  { %v16831_v62 = vld [vmem:[#allocation6 + $0x1c6c] sm:$0xf0]  ;;  %v10981_v58 = vld [vmem:[#allocation6 + $0x1f0] sm:$0xf0] }
 0x514   :  { %v14372_v18 = vor.u32 %v16831_v62, %v14371_v59  ;;  %8170 = vmatpush.bf16.msra.mxu0 %v11176_v48  ;;  %8150 = vmatpush.bf16.msrb.mxu2 %v13860_v12  ;;  %v16247_v56 = vld [vmem:[#allocation6 + $0xa34] sm:$0xf]  ;;  %v7919_v62 = vadd.f32 %v7918_v60, %v17647_v55  ;;  %v10984_v0 = vor.u32 %v15975_v57, %v10981_v58  ;;  %v7944_v60 = vpop.f32.mrf.mxu2 }
 0x515   :  { %v12069_v59 = vld [vmem:[#allocation6 + $0xa70] sm:$0xf0] }
 0x516   :  { %8183 = vmatpush.bf16.msra.mxu1 %v11688_v8  ;;  %8163 = vmatpush.bf16.msrb.mxu3 %v14372_v18  ;;  %v16375_v48 = vld [vmem:[#allocation6 + $0xe34] sm:$0xf]  ;;  %v7932_v14 = vadd.f32 %v7931_v1, %v7919_v62  ;;  %v12072_v16 = vor.u32 %v16247_v56, %v12069_v59 }
 0x517   :  { %8151 = vmatmul.bf16.vlgmr.msrb.gmra.mxu2 %v17482_v41  ;;  %v12581_v4 = vld [vmem:[#allocation6 + $0xe70] sm:$0xf0] }
 0x518   :  { %8195 = vmatpush.bf16.msra.mxu2 %v12264_v13  ;;  %8171 = vmatpush.bf16.msra.mxu0 %v11112_v25  ;;  %v15959_v8 = vld [vmem:[#allocation6 + $0x134] sm:$0xf]  ;;  %v12584_v13 = vor.u32 %v16375_v48, %v12581_v4  ;;  %v7945_v1 = vadd.f32 %v7944_v60, %v7932_v14 }
 0x519   :  { %8164 = vmatmul.bf16.vlgmr.msrb.gmra.mxu3 %v17484_v44  ;;  %v10917_v12 = vld [vmem:[#allocation6 + $0x170] sm:$0xf0] }
 0x51a   :  { %8208 = vmatpush.bf16.msra.mxu3 %v12776_v23  ;;  %8184 = vmatpush.bf16.msra.mxu1 %v11624_v10  ;;  %v16087_v3 = vld [vmem:[#allocation6 + $0x534] sm:$0xf]  ;;  %v10920_v55 = vor.u32 %v15959_v8, %v10917_v12  ;;  %v7920_v24 = vpop.f32.mrf.mxu0 }
 0x51b   :  { %v11429_v18 = vld [vmem:[#allocation6 + $0x570] sm:$0xf0] }
 0x51c   :  { %8196 = vmatpush.bf16.msra.mxu2 %v12200_v32  ;;  %8172 = vmatpush.bf16.msra.mxu0 %v11048_v37  ;;  %v16231_v38 = vld [vmem:[#allocation6 + $0x9b4] sm:$0xf]  ;;  %v11432_v27 = vor.u32 %v16087_v3, %v11429_v18 }
 0x51d   :  { %v12005_v20 = vld [vmem:[#allocation6 + $0x9f0] sm:$0xf0] }
 0x51e   :  { %8209 = vmatpush.bf16.msra.mxu3 %v12712_v35  ;;  %8185 = vmatpush.bf16.msra.mxu1 %v11560_v51  ;;  %v16359_v26 = vld [vmem:[#allocation6 + $0xdb4] sm:$0xf]  ;;  %v12008_v30 = vor.u32 %v16231_v38, %v12005_v20 }
 0x51f   :  { %v12517_v23 = vld [vmem:[#allocation6 + $0xdf0] sm:$0xf0] }
 0x520   :  { %8197 = vmatpush.bf16.msra.mxu2 %v12136_v31  ;;  %8173 = vmatpush.bf16.msra.mxu0 %v10984_v0  ;;  %v15943_v53 = vld [vmem:[#allocation6 + $0xb4] sm:$0xf]  ;;  %v12520_v61 = vor.u32 %v16359_v26, %v12517_v23  ;;  %v7957_v0 = vpop.f32.mrf.mxu3 }
 0x521   :  { %v10853_v25 = vld [vmem:[#allocation6 + $0xf0] sm:$0xf0]  ;;  %v17654_v3 = vadd.f32 %v7957_v0, %v7945_v1 }
 0x522   :  { %8210 = vmatpush.bf16.msra.mxu3 %v12648_v45  ;;  %8186 = vmatpush.bf16.msra.mxu1 %v11496_v7  ;;  %v16071_v29 = vld [vmem:[#allocation6 + $0x4b4] sm:$0xf]  ;;  %v10856_v35 = vor.u32 %v15943_v53, %v10853_v25 }
 0x523   :  { %v11365_v10 = vld [vmem:[#allocation6 + $0x4f0] sm:$0xf0] }
 0x524   :  { %8198 = vmatpush.bf16.msra.mxu2 %v12072_v16  ;;  %v16215_v32 = vld [vmem:[#allocation6 + $0x934] sm:$0xf]  ;;  %8174 = vmatpush.bf16.msra.mxu0 %v10920_v55  ;;  %v11368_v40 = vor.u32 %v16071_v29, %v11365_v10 }
 0x525   :  { %v11941_v11 = vld [vmem:[#allocation6 + $0x970] sm:$0xf0] }
 0x526   :  { %8211 = vmatpush.bf16.msra.mxu3 %v12584_v13  ;;  %v16343_v36 = vld [vmem:[#allocation6 + $0xd34] sm:$0xf]  ;;  %8187 = vmatpush.bf16.msra.mxu1 %v11432_v27  ;;  %v11944_v58 = vor.u32 %v16215_v32, %v11941_v11 }
 0x527   :  { %v12453_v33 = vld [vmem:[#allocation6 + $0xd70] sm:$0xf0] }
 0x528   :  { %v15927_v37 = vld [vmem:[#allocation6 + $0x34] sm:$0xf]  ;;  %8199 = vmatpush.bf16.msra.mxu2 %v12008_v30  ;;  %v12456_v45 = vor.u32 %v16343_v36, %v12453_v33  ;;  %8175 = vmatpush.bf16.msra.mxu0 %v10856_v35  ;;  %v7946_v35 = vpop.f32.mrf.mxu2 }
 0x529   :  { %v10789_v50 = vld [vmem:[#allocation6 + $0x70] sm:$0xf0] }
 0x52a   :  { %v16055_v51 = vld [vmem:[#allocation6 + $0x434] sm:$0xf]  ;;  %8212 = vmatpush.bf16.msra.mxu3 %v12520_v61  ;;  %v10792_v48 = vor.u32 %v15927_v37, %v10789_v50  ;;  %8188 = vmatpush.bf16.msra.mxu1 %v11368_v40  ;;  %v7959_v50 = vpop.f32.mrf.mxu3 }
 0x52b   :  { %v11301_v57 = vld [vmem:[#allocation6 + $0x470] sm:$0xf0] }
 0x52c   :  { %v16551_v31 = vld [vmem:[#allocation6 + $0x13b4] sm:$0xf]  ;;  %v11304_v8 = vor.u32 %v16055_v51, %v11301_v57  ;;  %8200 = vmatpush.bf16.msra.mxu2 %v11944_v58  ;;  %8176 = vmatpush.bf16.msra.mxu0 %v10792_v48 }
 0x52d   :  { %v13285_v52 = vld [vmem:[#allocation6 + $0x13f0] sm:$0xf0] }
 0x52e   :  { %v16679_v28 = vld [vmem:[#allocation6 + $0x17b4] sm:$0xf]  ;;  %v13288_v12 = vor.u32 %v16551_v31, %v13285_v52  ;;  %8213 = vmatpush.bf16.msra.mxu3 %v12456_v45  ;;  %8189 = vmatpush.bf16.msra.mxu1 %v11304_v8 }
 0x52f   :  { %v13797_v56 = vld [vmem:[#allocation6 + $0x17f0] sm:$0xf0]  ;;  %8177 = vmatmul.bf16.vlgmr.msra.gmra.mxu0 %v17459_v17 }
 0x530   :  { %v16199_v59 = vld [vmem:[#allocation6 + $0x8b4] sm:$0xf]  ;;  %v13800_v18 = vor.u32 %v16679_v28, %v13797_v56  ;;  %8221 = vmatpush.bf16.msrb.mxu0 %v13288_v12 }
 0x531   :  { %v11877_v62 = vld [vmem:[#allocation6 + $0x8f0] sm:$0xf0]  ;;  %8190 = vmatmul.bf16.vlgmr.msra.gmra.mxu1 %v17462_v22 }
 0x532   :  { %v16327_v4 = vld [vmem:[#allocation6 + $0xcb4] sm:$0xf]  ;;  %v11880_v13 = vor.u32 %v16199_v59, %v11877_v62  ;;  %8234 = vmatpush.bf16.msrb.mxu1 %v13800_v18 }
 0x533   :  { %v12389_v7 = vld [vmem:[#allocation6 + $0xcf0] sm:$0xf0] }
 0x534   :  { %v16535_v16 = vld [vmem:[#allocation6 + $0x1334] sm:$0xf]  ;;  %v12392_v26 = vor.u32 %v16327_v4, %v12389_v7  ;;  %8201 = vmatpush.bf16.msra.mxu2 %v11880_v13  ;;  %v1676_v7 = vperm.slane %v17643_v19, 3  ;;  %v7983_v19 = vpop.f32.mrf.mxu1 }
 0x535   :  { %v13221_v38 = vld [vmem:[#allocation6 + $0x1370] sm:$0xf0] }
 0x536   :  { %v16663_v20 = vld [vmem:[#allocation6 + $0x1734] sm:$0xf]  ;;  %v13224_v29 = vor.u32 %v16535_v16, %v13221_v38  ;;  %8214 = vmatpush.bf16.msra.mxu3 %v12392_v26 }
 0x537   :  { %v13733_v55 = vld [vmem:[#allocation6 + $0x1770] sm:$0xf0] }
 0x538   :  { %v16183_v14 = vld [vmem:[#allocation6 + $0x834] sm:$0xf]  ;;  %v13736_v61 = vor.u32 %v16663_v20, %v13733_v55  ;;  %8222 = vmatpush.bf16.msrb.mxu0 %v13224_v29 }
 0x539   :  { %v11813_v23 = vld [vmem:[#allocation6 + $0x870] sm:$0xf0] }
 0x53a   :  { %v16311_v27 = vld [vmem:[#allocation6 + $0xc34] sm:$0xf]  ;;  %v11816_v32 = vor.u32 %v16183_v14, %v11813_v23  ;;  %8235 = vmatpush.bf16.msrb.mxu1 %v13736_v61  ;;  %v7970_v14 = vpop.f32.mrf.mxu0 }
 0x53b   :  { %v12325_v53 = vld [vmem:[#allocation6 + $0xc70] sm:$0xf0] }
 0x53c   :  { %v16807_v25 = vld [vmem:[#allocation6 + $0x1bb4] sm:$0xf]  ;;  %v12328_v36 = vor.u32 %v16311_v27, %v12325_v53  ;;  %8202 = vmatpush.bf16.msra.mxu2 %v11816_v32 }
 0x53d   :  { %v14309_v30 = vld [vmem:[#allocation6 + $0x1bf0] sm:$0xf0] }
 0x53e   :  { %v16935_v10 = vld [vmem:[#allocation6 + $0x1fb4] sm:$0xf]  ;;  %v14312_v33 = vor.u32 %v16807_v25, %v14309_v30  ;;  %8215 = vmatpush.bf16.msra.mxu3 %v12328_v36  ;;  %v7971_v25 = vadd.f32 %v7970_v14, %v1676_v7  ;;  %v7996_v14 = vpop.f32.mrf.mxu2 }
 0x53f   :  { %v14821_v24 = vld [vmem:[#allocation6 + $0x1ff0] sm:$0xf0]  ;;  %8203 = vmatmul.bf16.vlgmr.msra.gmra.mxu2 %v17466_v43 }
 0x540   :  { %v16519_v11 = vld [vmem:[#allocation6 + $0x12b4] sm:$0xf]  ;;  %v14824_v51 = vor.u32 %v16935_v10, %v14821_v24  ;;  %8247 = vmatpush.bf16.msrb.mxu2 %v14312_v33 }
 0x541   :  { %v13157_v34 = vld [vmem:[#allocation6 + $0x12f0] sm:$0xf0]  ;;  %8216 = vmatmul.bf16.vlgmr.msra.gmra.mxu3 %v17468_v49 }
 0x542   :  { %v16647_v37 = vld [vmem:[#allocation6 + $0x16b4] sm:$0xf]  ;;  %v13160_v31 = vor.u32 %v16519_v11, %v13157_v34  ;;  %8260 = vmatpush.bf16.msrb.mxu3 %v14824_v51  ;;  %v7984_v11 = vadd.f32 %v7983_v19, %v7971_v25 }
 0x543   :  { %v13669_v40 = vld [vmem:[#allocation6 + $0x16f0] sm:$0xf0] }
 0x544   :  { %v16791_v57 = vld [vmem:[#allocation6 + $0x1b34] sm:$0xf]  ;;  %v13672_v60 = vor.u32 %v16647_v37, %v13669_v40  ;;  %8223 = vmatpush.bf16.msrb.mxu0 %v13160_v31  ;;  %v7997_v19 = vadd.f32 %v7996_v14, %v7984_v11 }
 0x545   :  { %v14245_v58 = vld [vmem:[#allocation6 + $0x1b70] sm:$0xf0] }
 0x546   :  { %v16919_v52 = vld [vmem:[#allocation6 + $0x1f34] sm:$0xf]  ;;  %v14248_v59 = vor.u32 %v16791_v57, %v14245_v58  ;;  %8236 = vmatpush.bf16.msrb.mxu1 %v13672_v60 }
 0x547   :  { %v14757_v28 = vld [vmem:[#allocation6 + $0x1f70] sm:$0xf0] }
 0x548   :  { %v16503_v45 = vld [vmem:[#allocation6 + $0x1234] sm:$0xf]  ;;  %v14760_v0 = vor.u32 %v16919_v52, %v14757_v28  ;;  %8248 = vmatpush.bf16.msrb.mxu2 %v14248_v59 }
 0x549   :  { %v13093_v56 = vld [vmem:[#allocation6 + $0x1270] sm:$0xf0] }
 0x54a   :  { %v16631_v62 = vld [vmem:[#allocation6 + $0x1634] sm:$0xf]  ;;  %v13096_v8 = vor.u32 %v16503_v45, %v13093_v56  ;;  %8261 = vmatpush.bf16.msrb.mxu3 %v14760_v0  ;;  %v7972_v56 = vpop.f32.mrf.mxu0  ;;  %v7985_v0 = vpop.f32.mrf.mxu1 }
 0x54b   :  { %v13605_v1 = vld [vmem:[#allocation6 + $0x1670] sm:$0xf0]  ;;  %v16432_v56 = vld [vmem:[#allocation6 + $0xff4] sm:$0xf0] }
 0x54c   :  { %v16775_v48 = vld [vmem:[#allocation6 + $0x1ab4] sm:$0xf]  ;;  %v13608_v18 = vor.u32 %v16631_v62, %v13605_v1  ;;  %8224 = vmatpush.bf16.msrb.mxu0 %v13096_v8  ;;  %v16016_v0 = vld [vmem:[#allocation6 + $0x2f4] sm:$0xf0] }
 0x54d   :  { %v14181_v4 = vld [vmem:[#allocation6 + $0x1af0] sm:$0xf0] }
 0x54e   :  { %v16903_v12 = vld [vmem:[#allocation6 + $0x1eb4] sm:$0xf]  ;;  %v14184_v20 = vor.u32 %v16775_v48, %v14181_v4  ;;  %8237 = vmatpush.bf16.msrb.mxu1 %v13608_v18 }
 0x54f   :  { %v14693_v16 = vld [vmem:[#allocation6 + $0x1ef0] sm:$0xf0] }
 0x550   :  { %v16487_v13 = vld [vmem:[#allocation6 + $0x11b4] sm:$0xf]  ;;  %v14696_v23 = vor.u32 %v16903_v12, %v14693_v16  ;;  %8249 = vmatpush.bf16.msrb.mxu2 %v14184_v20  ;;  %v11243_v20 = vld [vmem:[#allocation6 + $0x3b8] sm:$0xf] }
 0x551   :  { %v13029_v38 = vld [vmem:[#allocation6 + $0x11f0] sm:$0xf0] }
 0x552   :  { %v16615_v55 = vld [vmem:[#allocation6 + $0x15b4] sm:$0xf]  ;;  %v13032_v30 = vor.u32 %v16487_v13, %v13029_v38  ;;  %8262 = vmatpush.bf16.msrb.mxu3 %v14696_v23 }
 0x553   :  { %v13541_v26 = vld [vmem:[#allocation6 + $0x15f0] sm:$0xf0] }
 0x554   :  { %v16759_v27 = vld [vmem:[#allocation6 + $0x1a34] sm:$0xf]  ;;  %v13544_v24 = vor.u32 %v16615_v55, %v13541_v26  ;;  %8225 = vmatpush.bf16.msrb.mxu0 %v13032_v30  ;;  %v16048_v55 = vld [vmem:[#allocation6 + $0x3f4] sm:$0xf0]  ;;  %v8009_v30 = vpop.f32.mrf.mxu3 }
 0x555   :  { %v14117_v53 = vld [vmem:[#allocation6 + $0x1a70] sm:$0xf0]  ;;  %v11755_v26 = vld [vmem:[#allocation6 + $0x7b8] sm:$0xf] }
 0x556   :  { %v16887_v29 = vld [vmem:[#allocation6 + $0x1e34] sm:$0xf]  ;;  %v14120_v34 = vor.u32 %v16759_v27, %v14117_v53  ;;  %8238 = vmatpush.bf16.msrb.mxu1 %v13544_v24  ;;  %v16176_v27 = vld [vmem:[#allocation6 + $0x7f4] sm:$0xf0] }
 0x557   :  { %v14629_v10 = vld [vmem:[#allocation6 + $0x1e70] sm:$0xf0] }
 0x558   :  { %v16471_v61 = vld [vmem:[#allocation6 + $0x1134] sm:$0xf]  ;;  %v14632_v33 = vor.u32 %v16887_v29, %v14629_v10  ;;  %8250 = vmatpush.bf16.msrb.mxu2 %v14120_v34  ;;  %v11179_v34 = vld [vmem:[#allocation6 + $0x338] sm:$0xf] }
 0x559   :  { %v12965_v32 = vld [vmem:[#allocation6 + $0x1170] sm:$0xf0] }
 0x55a   :  { %v16599_v35 = vld [vmem:[#allocation6 + $0x1534] sm:$0xf]  ;;  %v12968_v50 = vor.u32 %v16471_v61, %v12965_v32  ;;  %8263 = vmatpush.bf16.msrb.mxu3 %v14632_v33  ;;  %v11244_v32 = vor.u32 %v16048_v55, %v11243_v20  ;;  %v12715_v55 = vld [vmem:[#allocation6 + $0xf38] sm:$0xf] }
 0x55b   :  { %v13477_v36 = vld [vmem:[#allocation6 + $0x1570] sm:$0xf0] }
 0x55c   :  { %v16743_v37 = vld [vmem:[#allocation6 + $0x19b4] sm:$0xf]  ;;  %v13480_v58 = vor.u32 %v16599_v35, %v13477_v36  ;;  %8226 = vmatpush.bf16.msrb.mxu0 %v12968_v50  ;;  %v17661_v35 = vadd.f32 %v8009_v30, %v7997_v19  ;;  %v11756_v36 = vor.u32 %v16176_v27, %v11755_v26  ;;  %v16160_v50 = vld [vmem:[#allocation6 + $0x774] sm:$0xf0] }
 0x55d   :  { %v14053_v40 = vld [vmem:[#allocation6 + $0x19f0] sm:$0xf0]  ;;  %v16416_v26 = vld [vmem:[#allocation6 + $0xf74] sm:$0xf0] }
 0x55e   :  { %v16871_v51 = vld [vmem:[#allocation6 + $0x1db4] sm:$0xf]  ;;  %v14056_v28 = vor.u32 %v16743_v37, %v14053_v40  ;;  %8239 = vmatpush.bf16.msrb.mxu1 %v13480_v58  ;;  %v16032_v37 = vld [vmem:[#allocation6 + $0x374] sm:$0xf0]  ;;  %v12716_v30 = vor.u32 %v16416_v26, %v12715_v55 }
 0x55f   :  { %v14565_v57 = vld [vmem:[#allocation6 + $0x1df0] sm:$0xf0]  ;;  %v11691_v40 = vld [vmem:[#allocation6 + $0x738] sm:$0xf] }
 0x560   :  { %v16455_v31 = vld [vmem:[#allocation6 + $0x10b4] sm:$0xf]  ;;  %v14568_v59 = vor.u32 %v16871_v51, %v14565_v57  ;;  %8251 = vmatpush.bf16.msrb.mxu2 %v14056_v28  ;;  %v16304_v28 = vld [vmem:[#allocation6 + $0xbf4] sm:$0xf0] }
 0x561   :  { %v12901_v52 = vld [vmem:[#allocation6 + $0x10f0] sm:$0xf0]  ;;  %v16000_v27 = vld [vmem:[#allocation6 + $0x274] sm:$0xf0] }
 0x562   :  { %v16583_v60 = vld [vmem:[#allocation6 + $0x14b4] sm:$0xf]  ;;  %v12904_v48 = vor.u32 %v16455_v31, %v12901_v52  ;;  %8264 = vmatpush.bf16.msrb.mxu3 %v14568_v59  ;;  %v12267_v52 = vld [vmem:[#allocation6 + $0xbb8] sm:$0xf]  ;;  %v11692_v59 = vor.u32 %v16160_v50, %v11691_v40 }
 0x563   :  { %v13413_v45 = vld [vmem:[#allocation6 + $0x14f0] sm:$0xf0]  ;;  %v16128_v19 = vld [vmem:[#allocation6 + $0x674] sm:$0xf0] }
 0x564   :  { %v16727_v62 = vld [vmem:[#allocation6 + $0x1934] sm:$0xf]  ;;  %v13416_v12 = vor.u32 %v16583_v60, %v13413_v45  ;;  %8227 = vmatpush.bf16.msrb.mxu0 %v12904_v48  ;;  %v11180_v60 = vor.u32 %v16032_v37, %v11179_v34  ;;  %v12779_v45 = vld [vmem:[#allocation6 + $0xfb8] sm:$0xf]  ;;  %v7998_v48 = vpop.f32.mrf.mxu2 }
 0x565   :  { %v13989_v1 = vld [vmem:[#allocation6 + $0x1970] sm:$0xf0]  ;;  %v11499_v40 = vld [vmem:[#allocation6 + $0x5b8] sm:$0xf] }
 0x566   :  { %v16855_v4 = vld [vmem:[#allocation6 + $0x1d34] sm:$0xf]  ;;  %v13992_v38 = vor.u32 %v16727_v62, %v13989_v1  ;;  %8240 = vmatpush.bf16.msrb.mxu1 %v13416_v12  ;;  %v11115_v1 = vld [vmem:[#allocation6 + $0x2b8] sm:$0xf] }
 0x567   :  { %v14501_v7 = vld [vmem:[#allocation6 + $0x1d70] sm:$0xf0]  ;;  %v16144_v12 = vld [vmem:[#allocation6 + $0x6f4] sm:$0xf0]  ;;  %v11116_v20 = vor.u32 %v16016_v0, %v11115_v1 }
 0x568   :  { %v16439_v8 = vld [vmem:[#allocation6 + $0x1034] sm:$0xf]  ;;  %v14504_v23 = vor.u32 %v16855_v4, %v14501_v7  ;;  %8252 = vmatpush.bf16.msrb.mxu2 %v13992_v38  ;;  %v12268_v7 = vor.u32 %v16304_v28, %v12267_v52  ;;  %v16288_v38 = vld [vmem:[#allocation6 + $0xb74] sm:$0xf0]  ;;  %v8035_v52 = vpop.f32.mrf.mxu1 }
 0x569   :  { %v12837_v16 = vld [vmem:[#allocation6 + $0x1070] sm:$0xf0]  ;;  %v16112_v50 = vld [vmem:[#allocation6 + $0x5f4] sm:$0xf0] }
 0x56a   :  { %v16567_v18 = vld [vmem:[#allocation6 + $0x1434] sm:$0xf]  ;;  %v12840_v29 = vor.u32 %v16439_v8, %v12837_v16  ;;  %8265 = vmatpush.bf16.msrb.mxu3 %v14504_v23  ;;  %v11627_v8 = vld [vmem:[#allocation6 + $0x6b8] sm:$0xf]  ;;  %v8011_v16 = vpop.f32.mrf.mxu3 }
 0x56b   :  { %v13349_v13 = vld [vmem:[#allocation6 + $0x1470] sm:$0xf0]  ;;  %v11628_v14 = vor.u32 %v16144_v12, %v11627_v8  ;;  %v11051_v23 = vld [vmem:[#allocation6 + $0x238] sm:$0xf] }
 0x56c   :  { %v16711_v53 = vld [vmem:[#allocation6 + $0x18b4] sm:$0xf]  ;;  %v13352_v61 = vor.u32 %v16567_v18, %v13349_v13  ;;  %8228 = vmatpush.bf16.msrb.mxu0 %v12840_v29  ;;  %v12780_v18 = vor.u32 %v16432_v56, %v12779_v45  ;;  %v12203_v13 = vld [vmem:[#allocation6 + $0xb38] sm:$0xf]  ;;  %v11500_v56 = vor.u32 %v16112_v50, %v11499_v40 }
 0x56d   :  { %v13925_v25 = vld [vmem:[#allocation6 + $0x18f0] sm:$0xf0]  ;;  %v12139_v29 = vld [vmem:[#allocation6 + $0xab8] sm:$0xf] }
 0x56e   :  { %v16839_v10 = vld [vmem:[#allocation6 + $0x1cb4] sm:$0xf]  ;;  %v13928_v33 = vor.u32 %v16711_v53, %v13925_v25  ;;  %8241 = vmatpush.bf16.msrb.mxu1 %v13352_v61  ;;  %v12204_v53 = vor.u32 %v16288_v38, %v12203_v13  ;;  %v11563_v25 = vld [vmem:[#allocation6 + $0x638] sm:$0xf] }
 0x56f   :  { %v14437_v24 = vld [vmem:[#allocation6 + $0x1cf0] sm:$0xf0]  ;;  %8229 = vmatmul.bf16.vlgmr.msrb.gmra.mxu0 %v17475_v6  ;;  %v12651_v61 = vld [vmem:[#allocation6 + $0xeb8] sm:$0xf]  ;;  %v11564_v34 = vor.u32 %v16128_v19, %v11563_v25 }
 0x570   :  { %v14440_v51 = vor.u32 %v16839_v10, %v14437_v24  ;;  %v16695_v11 = vld [vmem:[#allocation6 + $0x1834] sm:$0xf]  ;;  %8273 = vmatpush.bf16.msra.mxu0 %v11244_v32  ;;  %8253 = vmatpush.bf16.msrb.mxu2 %v13928_v33  ;;  %v16272_v10 = vld [vmem:[#allocation6 + $0xaf4] sm:$0xf0]  ;;  %v11052_v24 = vor.u32 %v16000_v27, %v11051_v23  ;;  %v8037_v19 = vpop.f32.mrf.mxu1 }
 0x571   :  { %v13861_v57 = vld [vmem:[#allocation6 + $0x1870] sm:$0xf0]  ;;  %8242 = vmatmul.bf16.vlgmr.msrb.gmra.mxu1 %v17478_v9  ;;  %v16400_v32 = vld [vmem:[#allocation6 + $0xef4] sm:$0xf0]  ;;  %v12140_v37 = vor.u32 %v16272_v10, %v12139_v29 }
 0x572   :  { %v16823_v58 = vld [vmem:[#allocation6 + $0x1c34] sm:$0xf]  ;;  %8286 = vmatpush.bf16.msra.mxu1 %v11756_v36  ;;  %v13864_v62 = vor.u32 %v16695_v11, %v13861_v57  ;;  %8266 = vmatpush.bf16.msrb.mxu3 %v14440_v51  ;;  %v10987_v36 = vld [vmem:[#allocation6 + $0x1b8] sm:$0xf]  ;;  %v8022_v51 = vpop.f32.mrf.mxu0  ;;  %v12652_v11 = vor.u32 %v16400_v32, %v12651_v61 }
 0x573   :  { %v14373_v31 = vld [vmem:[#allocation6 + $0x1c70] sm:$0xf0]  ;;  %v15984_v33 = vld [vmem:[#allocation6 + $0x1f4] sm:$0xf0] }
 0x574   :  { %v14376_v4 = vor.u32 %v16823_v58, %v14373_v31  ;;  %8274 = vmatpush.bf16.msra.mxu0 %v11180_v60  ;;  %8254 = vmatpush.bf16.msrb.mxu2 %v13864_v62  ;;  %v12075_v57 = vld [vmem:[#allocation6 + $0xa38] sm:$0xf]  ;;  %v8023_v31 = vadd.f32 %v8022_v51, %v17661_v35  ;;  %v10988_v28 = vor.u32 %v15984_v33, %v10987_v36  ;;  %v8048_v51 = vpop.f32.mrf.mxu2 }
 0x575   :  { %v16256_v58 = vld [vmem:[#allocation6 + $0xa74] sm:$0xf0] }
 0x576   :  { %8287 = vmatpush.bf16.msra.mxu1 %v11692_v59  ;;  %8267 = vmatpush.bf16.msrb.mxu3 %v14376_v4  ;;  %v12587_v60 = vld [vmem:[#allocation6 + $0xe38] sm:$0xf]  ;;  %v8036_v1 = vadd.f32 %v8035_v52, %v8023_v31  ;;  %v12076_v0 = vor.u32 %v16256_v58, %v12075_v57 }
 0x577   :  { %8255 = vmatmul.bf16.vlgmr.msrb.gmra.mxu2 %v17482_v41  ;;  %v16384_v45 = vld [vmem:[#allocation6 + $0xe74] sm:$0xf0] }
 0x578   :  { %8299 = vmatpush.bf16.msra.mxu2 %v12268_v7  ;;  %8275 = vmatpush.bf16.msra.mxu0 %v11116_v20  ;;  %v10923_v59 = vld [vmem:[#allocation6 + $0x138] sm:$0xf]  ;;  %v12588_v7 = vor.u32 %v16384_v45, %v12587_v60  ;;  %v8049_v52 = vadd.f32 %v8048_v51, %v8036_v1 }
 0x579   :  { %8268 = vmatmul.bf16.vlgmr.msrb.gmra.mxu3 %v17484_v44  ;;  %v15968_v62 = vld [vmem:[#allocation6 + $0x174] sm:$0xf0] }
 0x57a   :  { %8312 = vmatpush.bf16.msra.mxu3 %v12780_v18  ;;  %8288 = vmatpush.bf16.msra.mxu1 %v11628_v14  ;;  %v11435_v48 = vld [vmem:[#allocation6 + $0x538] sm:$0xf]  ;;  %v10924_v35 = vor.u32 %v15968_v62, %v10923_v59  ;;  %v8024_v23 = vpop.f32.mrf.mxu0 }
 0x57b   :  { %v16096_v4 = vld [vmem:[#allocation6 + $0x574] sm:$0xf0] }
 0x57c   :  { %8300 = vmatpush.bf16.msra.mxu2 %v12204_v53  ;;  %8276 = vmatpush.bf16.msra.mxu0 %v11052_v24  ;;  %v12011_v8 = vld [vmem:[#allocation6 + $0x9b8] sm:$0xf]  ;;  %v11436_v13 = vor.u32 %v16096_v4, %v11435_v48 }
 0x57d   :  { %v16240_v12 = vld [vmem:[#allocation6 + $0x9f4] sm:$0xf0] }
 0x57e   :  { %8313 = vmatpush.bf16.msra.mxu3 %v12716_v30  ;;  %8289 = vmatpush.bf16.msra.mxu1 %v11564_v34  ;;  %v12523_v16 = vld [vmem:[#allocation6 + $0xdb8] sm:$0xf]  ;;  %v12012_v55 = vor.u32 %v16240_v12, %v12011_v8 }
 0x57f   :  { %v16368_v18 = vld [vmem:[#allocation6 + $0xdf4] sm:$0xf0] }
 0x580   :  { %8301 = vmatpush.bf16.msra.mxu2 %v12140_v37  ;;  %8277 = vmatpush.bf16.msra.mxu0 %v10988_v28  ;;  %v10859_v38 = vld [vmem:[#allocation6 + $0xb8] sm:$0xf]  ;;  %v12524_v27 = vor.u32 %v16368_v18, %v12523_v16  ;;  %v8061_v28 = vpop.f32.mrf.mxu3 }
 0x581   :  { %v15952_v20 = vld [vmem:[#allocation6 + $0xf4] sm:$0xf0]  ;;  %v17668_v48 = vadd.f32 %v8061_v28, %v8049_v52 }
 0x582   :  { %8314 = vmatpush.bf16.msra.mxu3 %v12652_v11  ;;  %8290 = vmatpush.bf16.msra.mxu1 %v11500_v56  ;;  %v11371_v26 = vld [vmem:[#allocation6 + $0x4b8] sm:$0xf]  ;;  %v10860_v30 = vor.u32 %v15952_v20, %v10859_v38 }
 0x583   :  { %v16080_v14 = vld [vmem:[#allocation6 + $0x4f4] sm:$0xf0] }
 0x584   :  { %8302 = vmatpush.bf16.msra.mxu2 %v12076_v0  ;;  %v11947_v53 = vld [vmem:[#allocation6 + $0x938] sm:$0xf]  ;;  %8278 = vmatpush.bf16.msra.mxu0 %v10924_v35  ;;  %v11372_v61 = vor.u32 %v16080_v14, %v11371_v26 }
 0x585   :  { %v16224_v25 = vld [vmem:[#allocation6 + $0x974] sm:$0xf0] }
 0x586   :  { %8315 = vmatpush.bf16.msra.mxu3 %v12588_v7  ;;  %v12459_v29 = vld [vmem:[#allocation6 + $0xd38] sm:$0xf]  ;;  %8291 = vmatpush.bf16.msra.mxu1 %v11436_v13  ;;  %v11948_v33 = vor.u32 %v16224_v25, %v11947_v53 }
 0x587   :  { %v16352_v10 = vld [vmem:[#allocation6 + $0xd74] sm:$0xf0] }
 0x588   :  { %v10795_v24 = vld [vmem:[#allocation6 + $0x38] sm:$0xf]  ;;  %8303 = vmatpush.bf16.msra.mxu2 %v12012_v55  ;;  %v12460_v11 = vor.u32 %v16352_v10, %v12459_v29  ;;  %8279 = vmatpush.bf16.msra.mxu0 %v10860_v30  ;;  %v8050_v30 = vpop.f32.mrf.mxu2 }
 0x589   :  { %v15936_v32 = vld [vmem:[#allocation6 + $0x74] sm:$0xf0] }
 0x58a   :  { %v11307_v34 = vld [vmem:[#allocation6 + $0x438] sm:$0xf]  ;;  %8316 = vmatpush.bf16.msra.mxu3 %v12524_v27  ;;  %v10796_v60 = vor.u32 %v15936_v32, %v10795_v24  ;;  %8292 = vmatpush.bf16.msra.mxu1 %v11372_v61  ;;  %v8063_v32 = vpop.f32.mrf.mxu3 }
 0x58b   :  { %v16064_v36 = vld [vmem:[#allocation6 + $0x474] sm:$0xf0] }
 0x58c   :  { %v13291_v37 = vld [vmem:[#allocation6 + $0x13b8] sm:$0xf]  ;;  %v11308_v59 = vor.u32 %v16064_v36, %v11307_v34  ;;  %8304 = vmatpush.bf16.msra.mxu2 %v11948_v33  ;;  %8280 = vmatpush.bf16.msra.mxu0 %v10796_v60 }
 0x58d   :  { %v16560_v40 = vld [vmem:[#allocation6 + $0x13f4] sm:$0xf0] }
 0x58e   :  { %v13803_v50 = vld [vmem:[#allocation6 + $0x17b8] sm:$0xf]  ;;  %v13292_v62 = vor.u32 %v16560_v40, %v13291_v37  ;;  %8317 = vmatpush.bf16.msra.mxu3 %v12460_v11  ;;  %8293 = vmatpush.bf16.msra.mxu1 %v11308_v59 }
 0x58f   :  { %v16688_v57 = vld [vmem:[#allocation6 + $0x17f4] sm:$0xf0]  ;;  %8281 = vmatmul.bf16.vlgmr.msra.gmra.mxu0 %v17459_v17 }
 0x590   :  { %v11883_v58 = vld [vmem:[#allocation6 + $0x8b8] sm:$0xf]  ;;  %v13804_v4 = vor.u32 %v16688_v57, %v13803_v50  ;;  %8325 = vmatpush.bf16.msrb.mxu0 %v13292_v62 }
 0x591   :  { %v16208_v31 = vld [vmem:[#allocation6 + $0x8f4] sm:$0xf0]  ;;  %8294 = vmatmul.bf16.vlgmr.msra.gmra.mxu1 %v17462_v22 }
 0x592   :  { %v12395_v45 = vld [vmem:[#allocation6 + $0xcb8] sm:$0xf]  ;;  %v11884_v7 = vor.u32 %v16208_v31, %v11883_v58  ;;  %8338 = vmatpush.bf16.msrb.mxu1 %v13804_v4 }
 0x593   :  { %v16336_v56 = vld [vmem:[#allocation6 + $0xcf4] sm:$0xf0] }
 0x594   :  { %v13227_v0 = vld [vmem:[#allocation6 + $0x1338] sm:$0xf]  ;;  %v12396_v16 = vor.u32 %v16336_v56, %v12395_v45  ;;  %8305 = vmatpush.bf16.msra.mxu2 %v11884_v7  ;;  %v17673_v56 = vld [vmem:[#allocation7 + $0x8] sm:$0xff] }
 0x595   :  { %v16544_v8 = vld [vmem:[#allocation6 + $0x1374] sm:$0xf0]  ;;  %v1677_v59 = vperm.slane %v17673_v56, 4 }
 0x596   :  { %v13739_v12 = vld [vmem:[#allocation6 + $0x1738] sm:$0xf]  ;;  %v13228_v26 = vor.u32 %v16544_v8, %v13227_v0  ;;  %8318 = vmatpush.bf16.msra.mxu3 %v12396_v16 }
 0x597   :  { %v16672_v35 = vld [vmem:[#allocation6 + $0x1774] sm:$0xf0] }
 0x598   :  { %v11819_v1 = vld [vmem:[#allocation6 + $0x838] sm:$0xf]  ;;  %v13740_v27 = vor.u32 %v16672_v35, %v13739_v12  ;;  %8326 = vmatpush.bf16.msrb.mxu0 %v13228_v26  ;;  %v8087_v26 = vpop.f32.mrf.mxu1 }
 0x599   :  { %v16192_v18 = vld [vmem:[#allocation6 + $0x874] sm:$0xf0] }
 0x59a   :  { %v12331_v13 = vld [vmem:[#allocation6 + $0xc38] sm:$0xf]  ;;  %v11820_v53 = vor.u32 %v16192_v18, %v11819_v1  ;;  %8339 = vmatpush.bf16.msrb.mxu1 %v13740_v27  ;;  %v8074_v18 = vpop.f32.mrf.mxu0 }
 0x59b   :  { %v16320_v38 = vld [vmem:[#allocation6 + $0xc74] sm:$0xf0] }
 0x59c   :  { %v14315_v20 = vld [vmem:[#allocation6 + $0x1bb8] sm:$0xf]  ;;  %v12332_v29 = vor.u32 %v16320_v38, %v12331_v13  ;;  %8306 = vmatpush.bf16.msra.mxu2 %v11820_v53 }
 0x59d   :  { %v16816_v55 = vld [vmem:[#allocation6 + $0x1bf4] sm:$0xf0] }
 0x59e   :  { %v14827_v14 = vld [vmem:[#allocation6 + $0x1fb8] sm:$0xf]  ;;  %v14316_v10 = vor.u32 %v16816_v55, %v14315_v20  ;;  %8319 = vmatpush.bf16.msra.mxu3 %v12332_v29  ;;  %v8075_v55 = vadd.f32 %v8074_v18, %v1677_v59  ;;  %v11245_v18 = vld [vmem:[#allocation6 + $0x3f8] sm:$0xf0] }
 0x59f   :  { %v16944_v23 = vld [vmem:[#allocation6 + $0x1ff4] sm:$0xf0]  ;;  %8307 = vmatmul.bf16.vlgmr.msra.gmra.mxu2 %v17466_v43 }
 0x5a0   :  { %v13163_v25 = vld [vmem:[#allocation6 + $0x12b8] sm:$0xf]  ;;  %v14828_v34 = vor.u32 %v16944_v23, %v14827_v14  ;;  %8351 = vmatpush.bf16.msrb.mxu2 %v14316_v10  ;;  %v8088_v30 = vadd.f32 %v8087_v26, %v8075_v55  ;;  %v11757_v55 = vld [vmem:[#allocation6 + $0x7f8] sm:$0xf0] }
 0x5a1   :  { %v16528_v19 = vld [vmem:[#allocation6 + $0x12f4] sm:$0xf0]  ;;  %8320 = vmatmul.bf16.vlgmr.msra.gmra.mxu3 %v17468_v49 }
 0x5a2   :  { %v13675_v24 = vld [vmem:[#allocation6 + $0x16b8] sm:$0xf]  ;;  %v13164_v37 = vor.u32 %v16528_v19, %v13163_v25  ;;  %8364 = vmatpush.bf16.msrb.mxu3 %v14828_v34 }
 0x5a3   :  { %v16656_v61 = vld [vmem:[#allocation6 + $0x16f4] sm:$0xf0] }
 0x5a4   :  { %v14251_v36 = vld [vmem:[#allocation6 + $0x1b38] sm:$0xf]  ;;  %v13676_v51 = vor.u32 %v16656_v61, %v13675_v24  ;;  %8327 = vmatpush.bf16.msrb.mxu0 %v13164_v37 }
 0x5a5   :  { %v16800_v33 = vld [vmem:[#allocation6 + $0x1b74] sm:$0xf0] }
 0x5a6   :  { %v14763_v40 = vld [vmem:[#allocation6 + $0x1f38] sm:$0xf]  ;;  %v14252_v58 = vor.u32 %v16800_v33, %v14251_v36  ;;  %8340 = vmatpush.bf16.msrb.mxu1 %v13676_v51 }
 0x5a7   :  { %v16928_v50 = vld [vmem:[#allocation6 + $0x1f74] sm:$0xf0] }
 0x5a8   :  { %v13099_v11 = vld [vmem:[#allocation6 + $0x1238] sm:$0xf]  ;;  %v14764_v28 = vor.u32 %v16928_v50, %v14763_v40  ;;  %8352 = vmatpush.bf16.msrb.mxu2 %v14252_v58 }
 0x5a9   :  { %v16512_v57 = vld [vmem:[#allocation6 + $0x1274] sm:$0xf0] }
 0x5aa   :  { %v13611_v31 = vld [vmem:[#allocation6 + $0x1638] sm:$0xf]  ;;  %v13100_v62 = vor.u32 %v16512_v57, %v13099_v11  ;;  %8365 = vmatpush.bf16.msrb.mxu3 %v14764_v28 }
 0x5ab   :  { %v16640_v52 = vld [vmem:[#allocation6 + $0x1674] sm:$0xf0] }
 0x5ac   :  { %v14187_v60 = vld [vmem:[#allocation6 + $0x1ab8] sm:$0xf]  ;;  %v13612_v7 = vor.u32 %v16640_v52, %v13611_v31  ;;  %8328 = vmatpush.bf16.msrb.mxu0 %v13100_v62  ;;  %v8076_v31 = vpop.f32.mrf.mxu0 }
 0x5ad   :  { %v16784_v45 = vld [vmem:[#allocation6 + $0x1af4] sm:$0xf0] }
 0x5ae   :  { %v14699_v0 = vld [vmem:[#allocation6 + $0x1eb8] sm:$0xf]  ;;  %v14188_v35 = vor.u32 %v16784_v45, %v14187_v60  ;;  %8341 = vmatpush.bf16.msrb.mxu1 %v13612_v7  ;;  %v8089_v45 = vpop.f32.mrf.mxu1 }
 0x5af   :  { %v16912_v4 = vld [vmem:[#allocation6 + $0x1ef4] sm:$0xf0] }
 0x5b0   :  { %v13035_v8 = vld [vmem:[#allocation6 + $0x11b8] sm:$0xf]  ;;  %v14700_v13 = vor.u32 %v16912_v4, %v14699_v0  ;;  %8353 = vmatpush.bf16.msrb.mxu2 %v14188_v35 }
 0x5b1   :  { %v16496_v12 = vld [vmem:[#allocation6 + $0x11f4] sm:$0xf0] }
 0x5b2   :  { %v13547_v16 = vld [vmem:[#allocation6 + $0x15b8] sm:$0xf]  ;;  %v13036_v14 = vor.u32 %v16496_v12, %v13035_v8  ;;  %8366 = vmatpush.bf16.msrb.mxu3 %v14700_v13  ;;  %v16168_v13 = vld [vmem:[#allocation6 + $0x7bc] sm:$0xf] }
 0x5b3   :  { %v16624_v1 = vld [vmem:[#allocation6 + $0x15f4] sm:$0xf0] }
 0x5b4   :  { %v14123_v38 = vld [vmem:[#allocation6 + $0x1a38] sm:$0xf]  ;;  %v13548_v53 = vor.u32 %v16624_v1, %v13547_v16  ;;  %8329 = vmatpush.bf16.msrb.mxu0 %v13036_v14  ;;  %v16040_v1 = vld [vmem:[#allocation6 + $0x3bc] sm:$0xf] }
 0x5b5   :  { %v16768_v20 = vld [vmem:[#allocation6 + $0x1a74] sm:$0xf0] }
 0x5b6   :  { %v14635_v23 = vld [vmem:[#allocation6 + $0x1e38] sm:$0xf]  ;;  %v14124_v29 = vor.u32 %v16768_v20, %v14123_v38  ;;  %8342 = vmatpush.bf16.msrb.mxu1 %v13548_v53  ;;  %v8100_v38 = vpop.f32.mrf.mxu2 }
 0x5b7   :  { %v16896_v27 = vld [vmem:[#allocation6 + $0x1e74] sm:$0xf0] }
 0x5b8   :  { %v12971_v25 = vld [vmem:[#allocation6 + $0x1138] sm:$0xf]  ;;  %v14636_v61 = vor.u32 %v16896_v27, %v14635_v23  ;;  %8354 = vmatpush.bf16.msrb.mxu2 %v14124_v29  ;;  %v8101_v23 = vadd.f32 %v8100_v38, %v8088_v30  ;;  %v8113_v27 = vpop.f32.mrf.mxu3  ;;  %v16408_v38 = vld [vmem:[#allocation6 + $0xf3c] sm:$0xf] }
 0x5b9   :  { %v16480_v19 = vld [vmem:[#allocation6 + $0x1174] sm:$0xf0] }
 0x5ba   :  { %v13483_v10 = vld [vmem:[#allocation6 + $0x1538] sm:$0xf]  ;;  %v12972_v36 = vor.u32 %v16480_v19, %v12971_v25  ;;  %8367 = vmatpush.bf16.msrb.mxu3 %v14636_v61  ;;  %v17677_v61 = vadd.f32 %v8113_v27, %v8101_v23  ;;  %v16120_v27 = vld [vmem:[#allocation6 + $0x63c] sm:$0xf] }
 0x5bb   :  { %v16608_v24 = vld [vmem:[#allocation6 + $0x1574] sm:$0xf0] }
 0x5bc   :  { %v14059_v32 = vld [vmem:[#allocation6 + $0x19b8] sm:$0xf]  ;;  %v13484_v40 = vor.u32 %v16608_v24, %v13483_v10  ;;  %8330 = vmatpush.bf16.msrb.mxu0 %v12972_v36  ;;  %v11248_v10 = vor.u32 %v16040_v1, %v11245_v18  ;;  %v16024_v24 = vld [vmem:[#allocation6 + $0x33c] sm:$0xf] }
 0x5bd   :  { %v16752_v34 = vld [vmem:[#allocation6 + $0x19f4] sm:$0xf0]  ;;  %v11181_v36 = vld [vmem:[#allocation6 + $0x378] sm:$0xf0] }
 0x5be   :  { %v14571_v33 = vld [vmem:[#allocation6 + $0x1db8] sm:$0xf]  ;;  %v14060_v11 = vor.u32 %v16752_v34, %v14059_v32  ;;  %8343 = vmatpush.bf16.msrb.mxu1 %v13484_v40  ;;  %v11760_v32 = vor.u32 %v16168_v13, %v11757_v55  ;;  %v11184_v31 = vor.u32 %v16024_v24, %v11181_v36  ;;  %v16280_v1 = vld [vmem:[#allocation6 + $0xb3c] sm:$0xf] }
 0x5bf   :  { %v16880_v37 = vld [vmem:[#allocation6 + $0x1df4] sm:$0xf0]  ;;  %v12205_v18 = vld [vmem:[#allocation6 + $0xb78] sm:$0xf0] }
 0x5c0   :  { %v12907_v50 = vld [vmem:[#allocation6 + $0x10b8] sm:$0xf]  ;;  %v14572_v52 = vor.u32 %v16880_v37, %v14571_v33  ;;  %8355 = vmatpush.bf16.msrb.mxu2 %v14060_v11  ;;  %v16152_v33 = vld [vmem:[#allocation6 + $0x73c] sm:$0xf]  ;;  %v12208_v23 = vor.u32 %v16280_v1, %v12205_v18 }
 0x5c1   :  { %v16464_v51 = vld [vmem:[#allocation6 + $0x10f4] sm:$0xf0]  ;;  %v11693_v37 = vld [vmem:[#allocation6 + $0x778] sm:$0xf0] }
 0x5c2   :  { %v13419_v57 = vld [vmem:[#allocation6 + $0x14b8] sm:$0xf]  ;;  %v12908_v59 = vor.u32 %v16464_v51, %v12907_v50  ;;  %8368 = vmatpush.bf16.msrb.mxu3 %v14572_v52  ;;  %v16424_v52 = vld [vmem:[#allocation6 + $0xfbc] sm:$0xf] }
 0x5c3   :  { %v16592_v58 = vld [vmem:[#allocation6 + $0x14f4] sm:$0xf0]  ;;  %v16392_v24 = vld [vmem:[#allocation6 + $0xebc] sm:$0xf] }
 0x5c4   :  { %v13995_v28 = vld [vmem:[#allocation6 + $0x1938] sm:$0xf]  ;;  %v13420_v7 = vor.u32 %v16592_v58, %v13419_v57  ;;  %8331 = vmatpush.bf16.msrb.mxu0 %v12908_v59  ;;  %v16296_v57 = vld [vmem:[#allocation6 + $0xbbc] sm:$0xf] }
 0x5c5   :  { %v16736_v60 = vld [vmem:[#allocation6 + $0x1974] sm:$0xf0]  ;;  %v12269_v58 = vld [vmem:[#allocation6 + $0xbf8] sm:$0xf0] }
 0x5c6   :  { %v14507_v62 = vld [vmem:[#allocation6 + $0x1d38] sm:$0xf]  ;;  %v13996_v16 = vor.u32 %v16736_v60, %v13995_v28  ;;  %8344 = vmatpush.bf16.msrb.mxu1 %v13420_v7  ;;  %v12781_v28 = vld [vmem:[#allocation6 + $0xff8] sm:$0xf0]  ;;  %v11696_v60 = vor.u32 %v16152_v33, %v11693_v37  ;;  %v12272_v7 = vor.u32 %v16296_v57, %v12269_v58 }
 0x5c7   :  { %v16864_v0 = vld [vmem:[#allocation6 + $0x1d74] sm:$0xf0]  ;;  %v16008_v59 = vld [vmem:[#allocation6 + $0x2bc] sm:$0xf] }
 0x5c8   :  { %v12843_v4 = vld [vmem:[#allocation6 + $0x1038] sm:$0xf]  ;;  %v14508_v20 = vor.u32 %v16864_v0, %v14507_v62  ;;  %8356 = vmatpush.bf16.msrb.mxu2 %v13996_v16  ;;  %v11117_v62 = vld [vmem:[#allocation6 + $0x2f8] sm:$0xf0]  ;;  %v8102_v0 = vpop.f32.mrf.mxu2  ;;  %v12784_v16 = vor.u32 %v16424_v52, %v12781_v28 }
 0x5c9   :  { %v16448_v8 = vld [vmem:[#allocation6 + $0x1074] sm:$0xf0]  ;;  %v11120_v13 = vor.u32 %v16008_v59, %v11117_v62  ;;  %v15976_v36 = vld [vmem:[#allocation6 + $0x1bc] sm:$0xf] }
 0x5ca   :  { %v13355_v12 = vld [vmem:[#allocation6 + $0x1438] sm:$0xf]  ;;  %v12844_v53 = vor.u32 %v16448_v8, %v12843_v4  ;;  %8369 = vmatpush.bf16.msrb.mxu3 %v14508_v20  ;;  %v16136_v8 = vld [vmem:[#allocation6 + $0x6bc] sm:$0xf] }
 0x5cb   :  { %v16576_v35 = vld [vmem:[#allocation6 + $0x1474] sm:$0xf0]  ;;  %v12717_v20 = vld [vmem:[#allocation6 + $0xf78] sm:$0xf0] }
 0x5cc   :  { %v13931_v26 = vld [vmem:[#allocation6 + $0x18b8] sm:$0xf]  ;;  %v13356_v29 = vor.u32 %v16576_v35, %v13355_v12  ;;  %8332 = vmatpush.bf16.msrb.mxu0 %v12844_v53  ;;  %v11629_v12 = vld [vmem:[#allocation6 + $0x6f8] sm:$0xf0]  ;;  %v8115_v35 = vpop.f32.mrf.mxu3 }
 0x5cd   :  { %v16720_v14 = vld [vmem:[#allocation6 + $0x18f4] sm:$0xf0]  ;;  %v11632_v55 = vor.u32 %v16136_v8, %v11629_v12  ;;  %v11565_v53 = vld [vmem:[#allocation6 + $0x678] sm:$0xf0] }
 0x5ce   :  { %v14443_v25 = vld [vmem:[#allocation6 + $0x1cb8] sm:$0xf]  ;;  %v13932_v34 = vor.u32 %v16720_v14, %v13931_v26  ;;  %8345 = vmatpush.bf16.msrb.mxu1 %v13356_v29  ;;  %v15992_v26 = vld [vmem:[#allocation6 + $0x23c] sm:$0xf] }
 0x5cf   :  { %v16848_v19 = vld [vmem:[#allocation6 + $0x1cf4] sm:$0xf0]  ;;  %8333 = vmatmul.bf16.vlgmr.msrb.gmra.mxu0 %v17475_v6  ;;  %v11053_v14 = vld [vmem:[#allocation6 + $0x278] sm:$0xf0] }
 0x5d0   :  { %v14444_v40 = vor.u32 %v16848_v19, %v14443_v25  ;;  %v13867_v30 = vld [vmem:[#allocation6 + $0x1838] sm:$0xf]  ;;  %8377 = vmatpush.bf16.msra.mxu0 %v11248_v10  ;;  %8357 = vmatpush.bf16.msrb.mxu2 %v13932_v34  ;;  %v12720_v25 = vor.u32 %v16408_v38, %v12717_v20  ;;  %v16264_v19 = vld [vmem:[#allocation6 + $0xabc] sm:$0xf]  ;;  %v11056_v10 = vor.u32 %v15992_v26, %v11053_v14 }
 0x5d1   :  { %v16704_v50 = vld [vmem:[#allocation6 + $0x1874] sm:$0xf0]  ;;  %8346 = vmatmul.bf16.vlgmr.msrb.gmra.mxu1 %v17478_v9  ;;  %v12141_v29 = vld [vmem:[#allocation6 + $0xaf8] sm:$0xf0]  ;;  %v11568_v34 = vor.u32 %v16120_v27, %v11565_v53 }
 0x5d2   :  { %v14379_v51 = vld [vmem:[#allocation6 + $0x1c38] sm:$0xf]  ;;  %8390 = vmatpush.bf16.msra.mxu1 %v11760_v32  ;;  %v13868_v45 = vor.u32 %v16704_v50, %v13867_v30  ;;  %8370 = vmatpush.bf16.msrb.mxu3 %v14444_v40  ;;  %v12653_v32 = vld [vmem:[#allocation6 + $0xef8] sm:$0xf0]  ;;  %v12144_v37 = vor.u32 %v16264_v19, %v12141_v29  ;;  %v8126_v50 = vpop.f32.mrf.mxu0 }
 0x5d3   :  { %v16832_v11 = vld [vmem:[#allocation6 + $0x1c74] sm:$0xf0]  ;;  %v10989_v33 = vld [vmem:[#allocation6 + $0x1f8] sm:$0xf0]  ;;  %v8127_v58 = vadd.f32 %v8126_v50, %v17677_v61 }
 0x5d4   :  { %v14380_v4 = vor.u32 %v16832_v11, %v14379_v51  ;;  %8378 = vmatpush.bf16.msra.mxu0 %v11184_v31  ;;  %8358 = vmatpush.bf16.msrb.mxu2 %v13868_v45  ;;  %v16104_v40 = vld [vmem:[#allocation6 + $0x5bc] sm:$0xf]  ;;  %v12656_v51 = vor.u32 %v16392_v24, %v12653_v32  ;;  %v8139_v31 = vpop.f32.mrf.mxu1  ;;  %v10992_v52 = vor.u32 %v15976_v36, %v10989_v33 }
 0x5d5   :  { %v11501_v30 = vld [vmem:[#allocation6 + $0x5f8] sm:$0xf0]  ;;  %v8140_v0 = vadd.f32 %v8139_v31, %v8127_v58 }
 0x5d6   :  { %8391 = vmatpush.bf16.msra.mxu1 %v11696_v60  ;;  %8371 = vmatpush.bf16.msrb.mxu3 %v14380_v4  ;;  %v16248_v11 = vld [vmem:[#allocation6 + $0xa3c] sm:$0xf]  ;;  %v11504_v45 = vor.u32 %v16104_v40, %v11501_v30 }
 0x5d7   :  { %8359 = vmatmul.bf16.vlgmr.msrb.gmra.mxu2 %v17482_v41  ;;  %v12077_v57 = vld [vmem:[#allocation6 + $0xa78] sm:$0xf0] }
 0x5d8   :  { %8403 = vmatpush.bf16.msra.mxu2 %v12272_v7  ;;  %8379 = vmatpush.bf16.msra.mxu0 %v11120_v13  ;;  %v16376_v28 = vld [vmem:[#allocation6 + $0xe3c] sm:$0xf]  ;;  %v12080_v4 = vor.u32 %v16248_v11, %v12077_v57  ;;  %v8152_v11 = vpop.f32.mrf.mxu2 }
 0x5d9   :  { %8372 = vmatmul.bf16.vlgmr.msrb.gmra.mxu3 %v17484_v44  ;;  %v12589_v60 = vld [vmem:[#allocation6 + $0xe78] sm:$0xf0] }
 0x5da   :  { %8416 = vmatpush.bf16.msra.mxu3 %v12784_v16  ;;  %8392 = vmatpush.bf16.msra.mxu1 %v11632_v55  ;;  %v15960_v59 = vld [vmem:[#allocation6 + $0x13c] sm:$0xf]  ;;  %v12592_v12 = vor.u32 %v16376_v28, %v12589_v60  ;;  %v8153_v28 = vadd.f32 %v8152_v11, %v8140_v0  ;;  %v8165_v60 = vpop.f32.mrf.mxu3 }
 0x5db   :  { %v10925_v62 = vld [vmem:[#allocation6 + $0x178] sm:$0xf0] }
 0x5dc   :  { %8404 = vmatpush.bf16.msra.mxu2 %v12208_v23  ;;  %8380 = vmatpush.bf16.msra.mxu0 %v11056_v10  ;;  %v16088_v7 = vld [vmem:[#allocation6 + $0x53c] sm:$0xf]  ;;  %v10928_v61 = vor.u32 %v15960_v59, %v10925_v62  ;;  %v8128_v23 = vpop.f32.mrf.mxu0  ;;  %v8141_v19 = vpop.f32.mrf.mxu1 }
 0x5dd   :  { %v11437_v8 = vld [vmem:[#allocation6 + $0x578] sm:$0xf0] }
 0x5de   :  { %8417 = vmatpush.bf16.msra.mxu3 %v12720_v25  ;;  %8393 = vmatpush.bf16.msra.mxu1 %v11568_v34  ;;  %v16232_v35 = vld [vmem:[#allocation6 + $0x9bc] sm:$0xf]  ;;  %v11440_v13 = vor.u32 %v16088_v7, %v11437_v8 }
 0x5df   :  { %v12013_v16 = vld [vmem:[#allocation6 + $0x9f8] sm:$0xf0] }
 0x5e0   :  { %8405 = vmatpush.bf16.msra.mxu2 %v12144_v37  ;;  %8381 = vmatpush.bf16.msra.mxu0 %v10992_v52  ;;  %v16360_v1 = vld [vmem:[#allocation6 + $0xdbc] sm:$0xf]  ;;  %v12016_v55 = vor.u32 %v16232_v35, %v12013_v16 }
 0x5e1   :  { %v12525_v18 = vld [vmem:[#allocation6 + $0xdf8] sm:$0xf0] }
 0x5e2   :  { %8418 = vmatpush.bf16.msra.mxu3 %v12656_v51  ;;  %8394 = vmatpush.bf16.msra.mxu1 %v11504_v45  ;;  %v15944_v38 = vld [vmem:[#allocation6 + $0xbc] sm:$0xf]  ;;  %v12528_v27 = vor.u32 %v16360_v1, %v12525_v18 }
 0x5e3   :  { %v10861_v20 = vld [vmem:[#allocation6 + $0xf8] sm:$0xf0] }
 0x5e4   :  { %8406 = vmatpush.bf16.msra.mxu2 %v12080_v4  ;;  %v16072_v26 = vld [vmem:[#allocation6 + $0x4bc] sm:$0xf]  ;;  %8382 = vmatpush.bf16.msra.mxu0 %v10928_v61  ;;  %v10864_v29 = vor.u32 %v15944_v38, %v10861_v20 }
 0x5e5   :  { %v11373_v14 = vld [vmem:[#allocation6 + $0x4f8] sm:$0xf0] }
 0x5e6   :  { %8419 = vmatpush.bf16.msra.mxu3 %v12592_v12  ;;  %v16216_v53 = vld [vmem:[#allocation6 + $0x93c] sm:$0xf]  ;;  %8395 = vmatpush.bf16.msra.mxu1 %v11440_v13  ;;  %v11376_v34 = vor.u32 %v16072_v26, %v11373_v14  ;;  %v17684_v12 = vadd.f32 %v8165_v60, %v8153_v28 }
 0x5e7   :  { %v11949_v25 = vld [vmem:[#allocation6 + $0x978] sm:$0xf0] }
 0x5e8   :  { %v16344_v10 = vld [vmem:[#allocation6 + $0xd3c] sm:$0xf]  ;;  %8407 = vmatpush.bf16.msra.mxu2 %v12016_v55  ;;  %v11952_v40 = vor.u32 %v16216_v53, %v11949_v25  ;;  %8383 = vmatpush.bf16.msra.mxu0 %v10864_v29 }
 0x5e9   :  { %v12461_v24 = vld [vmem:[#allocation6 + $0xd78] sm:$0xf0] }
 0x5ea   :  { %v15928_v32 = vld [vmem:[#allocation6 + $0x3c] sm:$0xf]  ;;  %8420 = vmatpush.bf16.msra.mxu3 %v12528_v27  ;;  %v12464_v57 = vor.u32 %v16344_v10, %v12461_v24  ;;  %8396 = vmatpush.bf16.msra.mxu1 %v11376_v34  ;;  %v8154_v24 = vpop.f32.mrf.mxu2 }
 0x5eb   :  { %v10797_v36 = vld [vmem:[#allocation6 + $0x78] sm:$0xf0] }
 0x5ec   :  { %v16056_v33 = vld [vmem:[#allocation6 + $0x43c] sm:$0xf]  ;;  %v10800_v45 = vor.u32 %v15928_v32, %v10797_v36  ;;  %8408 = vmatpush.bf16.msra.mxu2 %v11952_v40 }
 0x5ed   :  { %v11309_v37 = vld [vmem:[#allocation6 + $0x478] sm:$0xf0] }
 0x5ee   :  { %v16552_v30 = vld [vmem:[#allocation6 + $0x13bc] sm:$0xf]  ;;  %v11312_v4 = vor.u32 %v16056_v33, %v11309_v37  ;;  %8421 = vmatpush.bf16.msra.mxu3 %v12464_v57  ;;  %8384 = vmatpush.bf16.msra.mxu0 %v10800_v45  ;;  %v8167_v37 = vpop.f32.mrf.mxu3 }
 0x5ef   :  { %v13293_v50 = vld [vmem:[#allocation6 + $0x13f8] sm:$0xf0] }
 0x5f0   :  { %v16680_v51 = vld [vmem:[#allocation6 + $0x17bc] sm:$0xf]  ;;  %v13296_v7 = vor.u32 %v16552_v30, %v13293_v50  ;;  %8397 = vmatpush.bf16.msra.mxu1 %v11312_v4 }
 0x5f1   :  { %v13805_v58 = vld [vmem:[#allocation6 + $0x17f8] sm:$0xf0]  ;;  %8385 = vmatmul.bf16.vlgmr.msra.gmra.mxu0 %v17459_v17 }
 0x5f2   :  { %v16200_v31 = vld [vmem:[#allocation6 + $0x8bc] sm:$0xf]  ;;  %v13808_v35 = vor.u32 %v16680_v51, %v13805_v58  ;;  %8429 = vmatpush.bf16.msrb.mxu0 %v13296_v7 }
 0x5f3   :  { %v11885_v52 = vld [vmem:[#allocation6 + $0x8f8] sm:$0xf0]  ;;  %8398 = vmatmul.bf16.vlgmr.msra.gmra.mxu1 %v17462_v22 }
 0x5f4   :  { %v16328_v59 = vld [vmem:[#allocation6 + $0xcbc] sm:$0xf]  ;;  %v11888_v16 = vor.u32 %v16200_v31, %v11885_v52  ;;  %8442 = vmatpush.bf16.msrb.mxu1 %v13808_v35 }
 0x5f5   :  { %v12397_v62 = vld [vmem:[#allocation6 + $0xcf8] sm:$0xf0] }
 0x5f6   :  { %v16536_v8 = vld [vmem:[#allocation6 + $0x133c] sm:$0xf]  ;;  %v12400_v13 = vor.u32 %v16328_v59, %v12397_v62  ;;  %8409 = vmatpush.bf16.msra.mxu2 %v11888_v16  ;;  %v1678_v62 = vperm.slane %v17673_v56, 5  ;;  %v8191_v56 = vpop.f32.mrf.mxu1 }
 0x5f7   :  { %v13229_v61 = vld [vmem:[#allocation6 + $0x1378] sm:$0xf0] }
 0x5f8   :  { %v16664_v1 = vld [vmem:[#allocation6 + $0x173c] sm:$0xf]  ;;  %v13232_v23 = vor.u32 %v16536_v8, %v13229_v61  ;;  %8422 = vmatpush.bf16.msra.mxu3 %v12400_v13 }
 0x5f9   :  { %v13741_v18 = vld [vmem:[#allocation6 + $0x1778] sm:$0xf0] }
 0x5fa   :  { %v16184_v0 = vld [vmem:[#allocation6 + $0x83c] sm:$0xf]  ;;  %v13744_v25 = vor.u32 %v16664_v1, %v13741_v18  ;;  %8430 = vmatpush.bf16.msrb.mxu0 %v13232_v23 }
 0x5fb   :  { %v11821_v38 = vld [vmem:[#allocation6 + $0x878] sm:$0xf0] }
 0x5fc   :  { %v16312_v20 = vld [vmem:[#allocation6 + $0xc3c] sm:$0xf]  ;;  %v11824_v19 = vor.u32 %v16184_v0, %v11821_v38  ;;  %8443 = vmatpush.bf16.msrb.mxu1 %v13744_v25  ;;  %v8178_v0 = vpop.f32.mrf.mxu0 }
 0x5fd   :  { %v12333_v55 = vld [vmem:[#allocation6 + $0xc78] sm:$0xf0] }
 0x5fe   :  { %v16808_v26 = vld [vmem:[#allocation6 + $0x1bbc] sm:$0xf]  ;;  %v12336_v32 = vor.u32 %v16312_v20, %v12333_v55  ;;  %8410 = vmatpush.bf16.msra.mxu2 %v11824_v19  ;;  %v8179_v55 = vadd.f32 %v8178_v0, %v1678_v62  ;;  %v16976_v0 = vld [vmem:[#allocation9 + $0xf4] sm:$0xf0] }
 0x5ff   :  { %v14317_v14 = vld [vmem:[#allocation6 + $0x1bf8] sm:$0xf0] }
 0x600   :  { %v16936_v27 = vld [vmem:[#allocation6 + $0x1fbc] sm:$0xf]  ;;  %v14320_v34 = vor.u32 %v16808_v26, %v14317_v14  ;;  %8423 = vmatpush.bf16.msra.mxu3 %v12336_v32  ;;  %v8192_v25 = vadd.f32 %v8191_v56, %v8179_v55  ;;  %v8217_v55 = vpop.f32.mrf.mxu3 }
 0x601   :  { %v14829_v53 = vld [vmem:[#allocation6 + $0x1ff8] sm:$0xf0]  ;;  %8411 = vmatmul.bf16.vlgmr.msra.gmra.mxu2 %v17466_v43 }
 0x602   :  { %v16520_v29 = vld [vmem:[#allocation6 + $0x12bc] sm:$0xf]  ;;  %v14832_v40 = vor.u32 %v16936_v27, %v14829_v53  ;;  %8455 = vmatpush.bf16.msrb.mxu2 %v14320_v34 }
 0x603   :  { %v13165_v10 = vld [vmem:[#allocation6 + $0x12f8] sm:$0xf0]  ;;  %8424 = vmatmul.bf16.vlgmr.msra.gmra.mxu3 %v17468_v49 }
 0x604   :  { %v16648_v36 = vld [vmem:[#allocation6 + $0x16bc] sm:$0xf]  ;;  %v13168_v51 = vor.u32 %v16520_v29, %v13165_v10  ;;  %8468 = vmatpush.bf16.msrb.mxu3 %v14832_v40 }
 0x605   :  { %v13677_v33 = vld [vmem:[#allocation6 + $0x16f8] sm:$0xf0] }
 0x606   :  { %v16792_v30 = vld [vmem:[#allocation6 + $0x1b3c] sm:$0xf]  ;;  %v13680_v58 = vor.u32 %v16648_v36, %v13677_v33  ;;  %8431 = vmatpush.bf16.msrb.mxu0 %v13168_v51 }
 0x607   :  { %v14253_v50 = vld [vmem:[#allocation6 + $0x1b78] sm:$0xf0] }
 0x608   :  { %v16920_v11 = vld [vmem:[#allocation6 + $0x1f3c] sm:$0xf]  ;;  %v14256_v17 = vor.u32 %v16792_v30, %v14253_v50  ;;  %8444 = vmatpush.bf16.msrb.mxu1 %v13680_v58  ;;  %v8180_v58 = vpop.f32.mrf.mxu0 }
 0x609   :  { %v14765_v57 = vld [vmem:[#allocation6 + $0x1f78] sm:$0xf0] }
 0x60a   :  { %v16504_v31 = vld [vmem:[#allocation6 + $0x123c] sm:$0xf]  ;;  %v14768_v45 = vor.u32 %v16920_v11, %v14765_v57  ;;  %8456 = vmatpush.bf16.msrb.mxu2 %v14256_v17 }
 0x60b   :  { %v13101_v52 = vld [vmem:[#allocation6 + $0x1278] sm:$0xf0] }
 0x60c   :  { %v16632_v28 = vld [vmem:[#allocation6 + $0x163c] sm:$0xf]  ;;  %v13104_v4 = vor.u32 %v16504_v31, %v13101_v52  ;;  %8469 = vmatpush.bf16.msrb.mxu3 %v14768_v45 }
 0x60d   :  { %v13613_v60 = vld [vmem:[#allocation6 + $0x1678] sm:$0xf0] }
 0x60e   :  { %v16776_v22 = vld [vmem:[#allocation6 + $0x1abc] sm:$0xf]  ;;  %v13616_v35 = vor.u32 %v16632_v28, %v13613_v60  ;;  %8432 = vmatpush.bf16.msrb.mxu0 %v13104_v4  ;;  %v8193_v28 = vpop.f32.mrf.mxu1 }
 0x60f   :  { %v14189_v59 = vld [vmem:[#allocation6 + $0x1af8] sm:$0xf0] }
 0x610   :  { %v16904_v7 = vld [vmem:[#allocation6 + $0x1ebc] sm:$0xf]  ;;  %v14192_v1 = vor.u32 %v16776_v22, %v14189_v59  ;;  %8445 = vmatpush.bf16.msrb.mxu1 %v13616_v35 }
 0x611   :  { %v14701_v8 = vld [vmem:[#allocation6 + $0x1ef8] sm:$0xf0] }
 0x612   :  { %v16488_v16 = vld [vmem:[#allocation6 + $0x11bc] sm:$0xf]  ;;  %v14704_v38 = vor.u32 %v16904_v7, %v14701_v8  ;;  %8457 = vmatpush.bf16.msrb.mxu2 %v14192_v1  ;;  %v14955_v1 = vld [vmem:[#allocation9 + $0xf0] sm:$0xf] }
 0x613   :  { %v13037_v61 = vld [vmem:[#allocation6 + $0x11f8] sm:$0xf0] }
 0x614   :  { %v16616_v18 = vld [vmem:[#allocation6 + $0x15bc] sm:$0xf]  ;;  %v13040_v26 = vor.u32 %v16488_v16, %v13037_v61  ;;  %8470 = vmatpush.bf16.msrb.mxu3 %v14704_v38  ;;  %v14891_v16 = vld [vmem:[#allocation9 + $0x70] sm:$0xf]  ;;  %v16960_v61 = vld [vmem:[#allocation9 + $0x74] sm:$0xf0] }
 0x615   :  { %v13549_v13 = vld [vmem:[#allocation6 + $0x15f8] sm:$0xf0] }
 0x616   :  { %v16760_v43 = vld [vmem:[#allocation6 + $0x1a3c] sm:$0xf]  ;;  %v13552_v49 = vor.u32 %v16616_v18, %v13549_v13  ;;  %8433 = vmatpush.bf16.msrb.mxu0 %v13040_v26  ;;  %v8204_v18 = vpop.f32.mrf.mxu2 }
 0x617   :  { %v14125_v20 = vld [vmem:[#allocation6 + $0x1a78] sm:$0xf0] }
 0x618   :  { %v16888_v14 = vld [vmem:[#allocation6 + $0x1e3c] sm:$0xf]  ;;  %v14128_v19 = vor.u32 %v16760_v43, %v14125_v20  ;;  %8446 = vmatpush.bf16.msrb.mxu1 %v13552_v49  ;;  %v8205_v20 = vadd.f32 %v8204_v18, %v8192_v25  ;;  %v14892_v49 = vor.u32 %v16960_v61, %v14891_v16  ;;  %v17006_v16 = vld [vmem:[#allocation9 + $0x1e4] sm:$0xf0] }
 0x619   :  { %v14637_v23 = vld [vmem:[#allocation6 + $0x1e78] sm:$0xf0]  ;;  %v16954_v18 = vld [vmem:[#allocation9 + $0x44] sm:$0xf0] }
 0x61a   :  { %v16472_v27 = vld [vmem:[#allocation6 + $0x113c] sm:$0xf]  ;;  %v14640_v24 = vor.u32 %v16888_v14, %v14637_v23  ;;  %8458 = vmatpush.bf16.msrb.mxu2 %v14128_v19  ;;  %v14956_v19 = vor.u32 %v16976_v0, %v14955_v1  ;;  %v14867_v1 = vld [vmem:[#allocation9 + $0x40] sm:$0xf]  ;;  %v16970_v0 = vld [vmem:[#allocation9 + $0xc4] sm:$0xf0] }
 0x61b   :  { %v12973_v53 = vld [vmem:[#allocation6 + $0x1178] sm:$0xf0] }
 0x61c   :  { %v16600_v29 = vld [vmem:[#allocation6 + $0x153c] sm:$0xf]  ;;  %v12976_v36 = vor.u32 %v16472_v27, %v12973_v53  ;;  %8471 = vmatpush.bf16.msrb.mxu3 %v14640_v24  ;;  %v14883_v27 = vld [vmem:[#allocation9 + $0x60] sm:$0xf]  ;;  %v17691_v53 = vadd.f32 %v8217_v55, %v8205_v20  ;;  %v14868_v20 = vor.u32 %v16954_v18, %v14867_v1  ;;  %v15067_v55 = vld [vmem:[#allocation9 + $0x1d0] sm:$0xf] }
 0x61d   :  { %v13485_v10 = vld [vmem:[#allocation6 + $0x1578] sm:$0xf0]  ;;  %v14947_v24 = vld [vmem:[#allocation9 + $0xe0] sm:$0xf]  ;;  %v16998_v18 = vld [vmem:[#allocation9 + $0x1a4] sm:$0xf0] }
 0x61e   :  { %v16744_v32 = vld [vmem:[#allocation6 + $0x19bc] sm:$0xf]  ;;  %v13488_v40 = vor.u32 %v16600_v29, %v13485_v10  ;;  %8434 = vmatpush.bf16.msrb.mxu0 %v12976_v36  ;;  %v16958_v10 = vld [vmem:[#allocation9 + $0x64] sm:$0xf0]  ;;  %v15043_v1 = vld [vmem:[#allocation9 + $0x1a0] sm:$0xf] }
 0x61f   :  { %v14061_v34 = vld [vmem:[#allocation6 + $0x19f8] sm:$0xf0] }
 0x620   :  { %v16872_v33 = vld [vmem:[#allocation6 + $0x1dbc] sm:$0xf]  ;;  %v14064_v51 = vor.u32 %v16744_v32, %v14061_v34  ;;  %8447 = vmatpush.bf16.msrb.mxu1 %v13488_v40  ;;  %v16974_v32 = vld [vmem:[#allocation9 + $0xe4] sm:$0xf0]  ;;  %v15019_v40 = vld [vmem:[#allocation9 + $0x170] sm:$0xf] }
 0x621   :  { %v14573_v37 = vld [vmem:[#allocation6 + $0x1df8] sm:$0xf0] }
 0x622   :  { %v16456_v30 = vld [vmem:[#allocation6 + $0x10bc] sm:$0xf]  ;;  %v14576_v31 = vor.u32 %v16872_v33, %v14573_v37  ;;  %8459 = vmatpush.bf16.msrb.mxu2 %v14064_v51  ;;  %v15083_v51 = vld [vmem:[#allocation9 + $0x1f0] sm:$0xf] }
 0x623   :  { %v12909_v50 = vld [vmem:[#allocation6 + $0x10f8] sm:$0xf0] }
 0x624   :  { %v16584_v11 = vld [vmem:[#allocation6 + $0x14bc] sm:$0xf]  ;;  %v12912_v60 = vor.u32 %v16456_v30, %v12909_v50  ;;  %8472 = vmatpush.bf16.msrb.mxu3 %v14576_v31  ;;  %v16992_v30 = vld [vmem:[#allocation9 + $0x174] sm:$0xf0]  ;;  %v14884_v50 = vor.u32 %v16958_v10, %v14883_v27  ;;  %v14875_v31 = vld [vmem:[#allocation9 + $0x50] sm:$0xf] }
 0x625   :  { %v13421_v57 = vld [vmem:[#allocation6 + $0x14f8] sm:$0xf0]  ;;  %v14923_v27 = vld [vmem:[#allocation9 + $0xb0] sm:$0xf] }
 0x626   :  { %v16728_v52 = vld [vmem:[#allocation6 + $0x193c] sm:$0xf]  ;;  %v13424_v62 = vor.u32 %v16584_v11, %v13421_v57  ;;  %8435 = vmatpush.bf16.msrb.mxu0 %v12912_v60  ;;  %v17008_v11 = vld [vmem:[#allocation9 + $0x1f4] sm:$0xf0]  ;;  %v14948_v57 = vor.u32 %v16974_v32, %v14947_v24  ;;  %v15020_v60 = vor.u32 %v16992_v30, %v15019_v40  ;;  %v14995_v24 = vld [vmem:[#allocation9 + $0x140] sm:$0xf] }
 0x627   :  { %v13997_v17 = vld [vmem:[#allocation6 + $0x1978] sm:$0xf0]  ;;  %v16986_v32 = vld [vmem:[#allocation9 + $0x144] sm:$0xf0] }
 0x628   :  { %v16856_v45 = vld [vmem:[#allocation6 + $0x1d3c] sm:$0xf]  ;;  %v14000_v35 = vor.u32 %v16728_v52, %v13997_v17  ;;  %8448 = vmatpush.bf16.msrb.mxu1 %v13424_v62  ;;  %v16956_v52 = vld [vmem:[#allocation9 + $0x54] sm:$0xf0]  ;;  %v8206_v17 = vpop.f32.mrf.mxu2  ;;  %v15084_v62 = vor.u32 %v17008_v11, %v15083_v51  ;;  %v16950_v40 = vld [vmem:[#allocation9 + $0x24] sm:$0xf0] }
 0x629   :  { %v14509_v22 = vld [vmem:[#allocation6 + $0x1d78] sm:$0xf0]  ;;  %v14915_v51 = vld [vmem:[#allocation9 + $0xa0] sm:$0xf]  ;;  %v16966_v11 = vld [vmem:[#allocation9 + $0xa4] sm:$0xf0] }
 0x62a   :  { %v16440_v59 = vld [vmem:[#allocation6 + $0x103c] sm:$0xf]  ;;  %v14512_v13 = vor.u32 %v16856_v45, %v14509_v22  ;;  %8460 = vmatpush.bf16.msrb.mxu2 %v14000_v35  ;;  %v14939_v45 = vld [vmem:[#allocation9 + $0xd0] sm:$0xf]  ;;  %v16972_v22 = vld [vmem:[#allocation9 + $0xd4] sm:$0xf0] }
 0x62b   :  { %v12845_v4 = vld [vmem:[#allocation6 + $0x1078] sm:$0xf0]  ;;  %v15075_v35 = vld [vmem:[#allocation9 + $0x1e0] sm:$0xf]  ;;  %v14940_v61 = vor.u32 %v16972_v22, %v14939_v45  ;;  %v17000_v17 = vld [vmem:[#allocation9 + $0x1b4] sm:$0xf0] }
 0x62c   :  { %v16568_v7 = vld [vmem:[#allocation6 + $0x143c] sm:$0xf]  ;;  %v12848_v56 = vor.u32 %v16440_v59, %v12845_v4  ;;  %8473 = vmatpush.bf16.msrb.mxu3 %v14512_v13  ;;  %v8219_v59 = vpop.f32.mrf.mxu3  ;;  %v15011_v4 = vld [vmem:[#allocation9 + $0x160] sm:$0xf]  ;;  %v16948_v45 = vld [vmem:[#allocation9 + $0x14] sm:$0xf0] }
 0x62d   :  { %v13357_v8 = vld [vmem:[#allocation6 + $0x1478] sm:$0xf0]  ;;  %v14931_v13 = vld [vmem:[#allocation9 + $0xc0] sm:$0xf]  ;;  %v14907_v59 = vld [vmem:[#allocation9 + $0x90] sm:$0xf] }
 0x62e   :  { %v16712_v38 = vld [vmem:[#allocation6 + $0x18bc] sm:$0xf]  ;;  %v13360_v23 = vor.u32 %v16568_v7, %v13357_v8  ;;  %8436 = vmatpush.bf16.msrb.mxu0 %v12848_v56  ;;  %v16990_v7 = vld [vmem:[#allocation9 + $0x164] sm:$0xf0]  ;;  %v14876_v8 = vor.u32 %v16956_v52, %v14875_v31  ;;  %v17004_v56 = vld [vmem:[#allocation9 + $0x1d4] sm:$0xf0] }
 0x62f   :  { %v13933_v43 = vld [vmem:[#allocation6 + $0x18f8] sm:$0xf0]  ;;  %v15068_v10 = vor.u32 %v17004_v56, %v15067_v55  ;;  %v16984_v31 = vld [vmem:[#allocation9 + $0x134] sm:$0xf0]  ;;  %v15051_v52 = vld [vmem:[#allocation9 + $0x1b0] sm:$0xf] }
 0x630   :  { %v16840_v26 = vld [vmem:[#allocation6 + $0x1cbc] sm:$0xf]  ;;  %v13936_v29 = vor.u32 %v16712_v38, %v13933_v43  ;;  %8449 = vmatpush.bf16.msrb.mxu1 %v13360_v23  ;;  %v15076_v38 = vor.u32 %v17006_v16, %v15075_v35  ;;  %v16988_v43 = vld [vmem:[#allocation9 + $0x154] sm:$0xf0]  ;;  %v16982_v35 = vld [vmem:[#allocation9 + $0x124] sm:$0xf0] }
 0x631   :  { %v14445_v14 = vld [vmem:[#allocation6 + $0x1cf8] sm:$0xf0]  ;;  %8437 = vmatmul.bf16.vlgmr.msrb.gmra.mxu0 %v17475_v6  ;;  %v15012_v6 = vor.u32 %v16990_v7, %v15011_v4  ;;  %v16952_v23 = vld [vmem:[#allocation9 + $0x34] sm:$0xf0]  ;;  %v15052_v7 = vor.u32 %v17000_v17, %v15051_v52  ;;  %v15211_v56 = vld [vmem:[#allocation9 + $0x2f0] sm:$0xf] }
 0x632   :  { %v14448_v34 = vor.u32 %v16840_v26, %v14445_v14  ;;  %v16696_v25 = vld [vmem:[#allocation6 + $0x183c] sm:$0xf]  ;;  %10055 = vmatpush.bf16.msra.mxu0 %v14892_v49  ;;  %8461 = vmatpush.bf16.msrb.mxu2 %v13936_v29  ;;  %v14932_v26 = vor.u32 %v16970_v0, %v14931_v13  ;;  %v14859_v14 = vld [vmem:[#allocation9 + $0x30] sm:$0xf]  ;;  %v8230_v29 = vpop.f32.mrf.mxu0  ;;  %v16946_v0 = vld [vmem:[#allocation9 + $0x4] sm:$0xf0] }
 0x633   :  { %v13869_v36 = vld [vmem:[#allocation6 + $0x1878] sm:$0xf0]  ;;  %8450 = vmatmul.bf16.vlgmr.msrb.gmra.mxu1 %v17478_v9  ;;  %v15003_v9 = vld [vmem:[#allocation9 + $0x150] sm:$0xf]  ;;  %v17024_v55 = vld [vmem:[#allocation9 + $0x274] sm:$0xf0] }
 0x634   :  { %v16824_v33 = vld [vmem:[#allocation6 + $0x1c3c] sm:$0xf]  ;;  %10068 = vmatpush.bf16.msra.mxu1 %v14956_v19  ;;  %v13872_v58 = vor.u32 %v16696_v25, %v13869_v36  ;;  %8474 = vmatpush.bf16.msrb.mxu3 %v14448_v34  ;;  %v15004_v49 = vor.u32 %v16988_v43, %v15003_v9  ;;  %v16968_v19 = vld [vmem:[#allocation9 + $0xb4] sm:$0xf0]  ;;  %v8243_v34 = vpop.f32.mrf.mxu1  ;;  %v14860_v25 = vor.u32 %v16952_v23, %v14859_v14  ;;  %v15059_v36 = vld [vmem:[#allocation9 + $0x1c0] sm:$0xf] }
 0x635   :  { %v14381_v37 = vld [vmem:[#allocation6 + $0x1c78] sm:$0xf0]  ;;  %v16962_v9 = vld [vmem:[#allocation9 + $0x84] sm:$0xf0]  ;;  %v15044_v14 = vor.u32 %v16998_v18, %v15043_v1  ;;  %v17040_v23 = vld [vmem:[#allocation9 + $0x2f4] sm:$0xf0] }
 0x636   :  { %v14384_v28 = vor.u32 %v16824_v33, %v14381_v37  ;;  %10056 = vmatpush.bf16.msra.mxu0 %v14884_v50  ;;  %8462 = vmatpush.bf16.msrb.mxu2 %v13872_v58  ;;  %v14924_v33 = vor.u32 %v16968_v19, %v14923_v27  ;;  %v14851_v37 = vld [vmem:[#allocation9 + $0x20] sm:$0xf]  ;;  %v14996_v50 = vor.u32 %v16986_v32, %v14995_v24  ;;  %v14987_v58 = vld [vmem:[#allocation9 + $0x130] sm:$0xf]  ;;  %v16980_v27 = vld [vmem:[#allocation9 + $0x114] sm:$0xf0] }
 0x637   :  { %v14988_v22 = vor.u32 %v16984_v31, %v14987_v58  ;;  %v15035_v24 = vld [vmem:[#allocation9 + $0x190] sm:$0xf]  ;;  %v16996_v32 = vld [vmem:[#allocation9 + $0x194] sm:$0xf0]  ;;  %v16978_v58 = vld [vmem:[#allocation9 + $0x104] sm:$0xf0] }
 0x638   :  { %10069 = vmatpush.bf16.msra.mxu1 %v14948_v57  ;;  %8475 = vmatpush.bf16.msrb.mxu3 %v14384_v28  ;;  %v14916_v28 = vor.u32 %v16966_v11, %v14915_v51  ;;  %v17038_v51 = vld [vmem:[#allocation9 + $0x2e4] sm:$0xf0]  ;;  %v15036_v11 = vor.u32 %v16996_v32, %v15035_v24  ;;  %v15027_v31 = vld [vmem:[#allocation9 + $0x180] sm:$0xf]  ;;  %v17036_v1 = vld [vmem:[#allocation9 + $0x2d4] sm:$0xf0] }
 0x639   :  { %8463 = vmatmul.bf16.vlgmr.msrb.gmra.mxu2 %v17482_v41  ;;  %v8231_v41 = vadd.f32 %v8230_v29, %v17691_v53  ;;  %v14852_v53 = vor.u32 %v16950_v40, %v14851_v37  ;;  %v8269_v29 = vpop.f32.mrf.mxu3  ;;  %v15212_v37 = vor.u32 %v17040_v23, %v15211_v56  ;;  %v8484_v18 = vmax.f32 %v17551_v54, 0.0  ;;  %v17018_v56 = vld [vmem:[#allocation9 + $0x244] sm:$0xf0]  ;;  %v15323_v24 = vld [vmem:[#allocation9 + $0x3d0] sm:$0xf] }
 0x63a   :  { %10081 = vmatpush.bf16.msra.mxu2 %v15020_v60  ;;  %10057 = vmatpush.bf16.msra.mxu0 %v14876_v8  ;;  %v14843_v60 = vld [vmem:[#allocation9 + $0x10] sm:$0xf]  ;;  %v8232_v4 = vpop.f32.mrf.mxu0  ;;  %v14979_v8 = vld [vmem:[#allocation9 + $0x120] sm:$0xf]  ;;  %v17034_v23 = vld [vmem:[#allocation9 + $0x2c4] sm:$0xf0] }
 0x63b   :  { %8476 = vmatmul.bf16.vlgmr.msrb.gmra.mxu3 %v17484_v44  ;;  %v17002_v44 = vld [vmem:[#allocation9 + $0x1c4] sm:$0xf0]  ;;  %v8244_v30 = vadd.f32 %v8243_v34, %v8231_v41  ;;  %v14980_v43 = vor.u32 %v16982_v35, %v14979_v8  ;;  %v8481_v41 = vmax.f32 %v17515_v15, 0.0  ;;  %v8482_v34 = vmax.f32 %v17521_v42, 0.0  ;;  %v15275_v42 = vld [vmem:[#allocation9 + $0x370] sm:$0xf] }
 0x63c   :  { %10094 = vmatpush.bf16.msra.mxu3 %v15084_v62  ;;  %10070 = vmatpush.bf16.msra.mxu1 %v14940_v61  ;;  %v15060_v57 = vor.u32 %v17002_v44, %v15059_v36  ;;  %v16964_v62 = vld [vmem:[#allocation9 + $0x94] sm:$0xf0]  ;;  %v8245_v16 = vpop.f32.mrf.mxu1  ;;  %v14844_v61 = vor.u32 %v16948_v45, %v14843_v60  ;;  %v15139_v44 = vld [vmem:[#allocation9 + $0x260] sm:$0xf]  ;;  %v16994_v15 = vld [vmem:[#allocation9 + $0x184] sm:$0xf0] }
 0x63d   :  { %v14908_v13 = vor.u32 %v16964_v62, %v14907_v59  ;;  %v17702_v52 = vpack.c.bf16 %v8481_v41, %v8481_v41  ;;  %v17072_v60 = vld [vmem:[#allocation9 + $0x3f4] sm:$0xf0]  ;;  %v17704_v45 = vpack.c.bf16 %v8482_v34, %v8482_v34  ;;  %v15131_v62 = vld [vmem:[#allocation9 + $0x250] sm:$0xf]  ;;  %v15028_v35 = vor.u32 %v16994_v15, %v15027_v31  ;;  %v17066_v31 = vld [vmem:[#allocation9 + $0x3c4] sm:$0xf0] }
 0x63e   :  { %10082 = vmatpush.bf16.msra.mxu2 %v15012_v6  ;;  %10058 = vmatpush.bf16.msra.mxu0 %v14868_v20  ;;  %v14835_v6 = vld [vmem:[#allocation9] sm:$0xf]  ;;  %v15147_v20 = vld [vmem:[#allocation9 + $0x270] sm:$0xf]  ;;  %v17020_v4 = vld [vmem:[#allocation9 + $0x254] sm:$0xf0] }
 0x63f   :  { %v15148_v36 = vor.u32 %v17024_v55, %v15147_v20  ;;  %v15123_v55 = vld [vmem:[#allocation9 + $0x240] sm:$0xf]  ;;  %v17068_v32 = vld [vmem:[#allocation9 + $0x3d4] sm:$0xf0]  ;;  %v15115_v34 = vld [vmem:[#allocation9 + $0x230] sm:$0xf] }
 0x640   :  { %10095 = vmatpush.bf16.msra.mxu3 %v15076_v38  ;;  %10071 = vmatpush.bf16.msra.mxu1 %v14932_v26  ;;  %v14899_v38 = vld [vmem:[#allocation9 + $0x80] sm:$0xf]  ;;  %v8256_v26 = vpop.f32.mrf.mxu2 }
 0x641   :  { %v8257_v19 = vadd.f32 %v8256_v26, %v8244_v30  ;;  %v15203_v30 = vld [vmem:[#allocation9 + $0x2e0] sm:$0xf] }
 0x642   :  { %10083 = vmatpush.bf16.msra.mxu2 %v15004_v49  ;;  %10059 = vmatpush.bf16.msra.mxu0 %v14860_v25  ;;  %v14971_v49 = vld [vmem:[#allocation9 + $0x110] sm:$0xf]  ;;  %v14900_v25 = vor.u32 %v16962_v9, %v14899_v38  ;;  %v17054_v38 = vld [vmem:[#allocation9 + $0x364] sm:$0xf0]  ;;  %v15132_v9 = vor.u32 %v17020_v4, %v15131_v62  ;;  %v17048_v62 = vld [vmem:[#allocation9 + $0x334] sm:$0xf0] }
 0x643   :  { %v14972_v40 = vor.u32 %v16980_v27, %v14971_v49  ;;  %v17712_v49 = vpack.c.bf16 %v8484_v18, %v8484_v18  ;;  %v15163_v18 = vld [vmem:[#allocation9 + $0x290] sm:$0xf] }
 0x644   :  { %10096 = vmatpush.bf16.msra.mxu3 %v15068_v10  ;;  %10072 = vmatpush.bf16.msra.mxu1 %v14924_v33  ;;  %v14836_v10 = vor.u32 %v16946_v0, %v14835_v6  ;;  %v17700_v33 = vadd.f32 %v8269_v29, %v8257_v19  ;;  %v8271_v6 = vpop.f32.mrf.mxu3  ;;  %v15267_v0 = vld [vmem:[#allocation9 + $0x360] sm:$0xf]  ;;  %v15259_v19 = vld [vmem:[#allocation9 + $0x350] sm:$0xf]  ;;  %v17052_v29 = vld [vmem:[#allocation9 + $0x354] sm:$0xf0] }
 0x645   :  { %v15268_v54 = vor.u32 %v17054_v38, %v15267_v0  ;;  %v17028_v6 = vld [vmem:[#allocation9 + $0x294] sm:$0xf0]  ;;  %v15235_v38 = vld [vmem:[#allocation9 + $0x320] sm:$0xf] }
 0x646   :  { %10084 = vmatpush.bf16.msra.mxu2 %v14996_v50  ;;  %10060 = vmatpush.bf16.msra.mxu0 %v14852_v53  ;;  %v17022_v50 = vld [vmem:[#allocation9 + $0x264] sm:$0xf0]  ;;  %v17056_v53 = vld [vmem:[#allocation9 + $0x374] sm:$0xf0] }
 0x647   :  { %v15140_v17 = vor.u32 %v17022_v50, %v15139_v44  ;;  %v15276_v16 = vor.u32 %v17056_v53, %v15275_v42  ;;  %v15179_v44 = vld [vmem:[#allocation9 + $0x2b0] sm:$0xf]  ;;  %v15324_v50 = vor.u32 %v17068_v32, %v15323_v24  ;;  %v15107_v42 = vld [vmem:[#allocation9 + $0x220] sm:$0xf]  ;;  %v17014_v53 = vld [vmem:[#allocation9 + $0x224] sm:$0xf0] }
 0x648   :  { %10097 = vmatpush.bf16.msra.mxu3 %v15060_v57  ;;  %10073 = vmatpush.bf16.msra.mxu1 %v14916_v28  ;;  %v14963_v57 = vld [vmem:[#allocation9 + $0x100] sm:$0xf]  ;;  %v15339_v28 = vld [vmem:[#allocation9 + $0x3f0] sm:$0xf]  ;;  %v8258_v8 = vpop.f32.mrf.mxu2  ;;  %v15108_v4 = vor.u32 %v17014_v53, %v15107_v42 }
 0x649   :  { %v14964_v59 = vor.u32 %v16978_v58, %v14963_v57  ;;  %v15315_v58 = vld [vmem:[#allocation9 + $0x3c0] sm:$0xf]  ;;  %v17064_v8 = vld [vmem:[#allocation9 + $0x3b4] sm:$0xf0]  ;;  %v15467_v24 = vld [vmem:[#allocation9 + $0x4f0] sm:$0xf] }
 0x64a   :  { %10085 = vmatpush.bf16.msra.mxu2 %v14988_v22  ;;  %10061 = vmatpush.bf16.msra.mxu0 %v14844_v61  ;;  %v15204_v22 = vor.u32 %v17038_v51, %v15203_v30  ;;  %v15195_v61 = vld [vmem:[#allocation9 + $0x2d0] sm:$0xf]  ;;  %v15251_v30 = vld [vmem:[#allocation9 + $0x340] sm:$0xf]  ;;  %v17050_v51 = vld [vmem:[#allocation9 + $0x344] sm:$0xf0] }
 0x64b   :  { %v15196_v20 = vor.u32 %v17036_v1, %v15195_v61  ;;  %v17012_v61 = vld [vmem:[#allocation9 + $0x214] sm:$0xf0] }
 0x64c   :  { %10098 = vmatpush.bf16.msra.mxu3 %v15052_v7  ;;  %10074 = vmatpush.bf16.msra.mxu1 %v14908_v13  ;;  %v8483_v7 = vmax.f32 %v17535_v47, 0.0  ;;  %v15340_v13 = vor.u32 %v17072_v60, %v15339_v28  ;;  %v17070_v47 = vld [vmem:[#allocation9 + $0x3e4] sm:$0xf0]  ;;  %v15171_v28 = vld [vmem:[#allocation9 + $0x2a0] sm:$0xf] }
 0x64d   :  { %v17030_v60 = vld [vmem:[#allocation9 + $0x2a4] sm:$0xf0] }
 0x64e   :  { %10086 = vmatpush.bf16.msra.mxu2 %v14980_v43  ;;  %10062 = vmatpush.bf16.msra.mxu0 %v14836_v10  ;;  %v15331_v43 = vld [vmem:[#allocation9 + $0x3e0] sm:$0xf]  ;;  %v17710_v26 = vpack.c.bf16 %v8483_v7, %v8483_v7  ;;  %v15124_v10 = vor.u32 %v17018_v56, %v15123_v55  ;;  %v15307_v7 = vld [vmem:[#allocation9 + $0x3b0] sm:$0xf]  ;;  %v17062_v55 = vld [vmem:[#allocation9 + $0x3a4] sm:$0xf0] }
 0x64f   :  { %v15332_v27 = vor.u32 %v17070_v47, %v15331_v43  ;;  %v15308_v0 = vor.u32 %v17064_v8, %v15307_v7  ;;  %v15091_v56 = vld [vmem:[#allocation9 + $0x200] sm:$0xf]  ;;  %v17058_v7 = vld [vmem:[#allocation9 + $0x384] sm:$0xf0]  ;;  %v17120_v8 = vld [vmem:[#allocation9 + $0x574] sm:$0xf0] }
 0x650   :  { %10099 = vmatpush.bf16.msra.mxu3 %v15044_v14  ;;  %10075 = vmatpush.bf16.msra.mxu1 %v14900_v25  ;;  %v15187_v14 = vld [vmem:[#allocation9 + $0x2c0] sm:$0xf]  ;;  %v17016_v25 = vld [vmem:[#allocation9 + $0x234] sm:$0xf0]  ;;  %v17720_v32 = vpop.f32.mrf.mxu2 }
 0x651   :  { %10063 = vmatmul.bf16.vlgmr.msra.gmra.mxu0 %v17702_v52  ;;  %v15188_v41 = vor.u32 %v17034_v23, %v15187_v14  ;;  %v15116_v57 = vor.u32 %v17016_v25, %v15115_v34  ;;  %v17010_v14 = vld [vmem:[#allocation9 + $0x204] sm:$0xf0]  ;;  %v15155_v23 = vld [vmem:[#allocation9 + $0x280] sm:$0xf]  ;;  %v17104_v34 = vld [vmem:[#allocation9 + $0x4f4] sm:$0xf0] }
 0x652   :  { %10107 = vmatpush.bf16.msrb.mxu0 %v15148_v36  ;;  %10087 = vmatpush.bf16.msra.mxu2 %v14972_v40  ;;  %v15260_v36 = vor.u32 %v17052_v29, %v15259_v19  ;;  %v17716_v40 = vpop.f32.mrf.mxu0  ;;  %v15403_v29 = vld [vmem:[#allocation9 + $0x470] sm:$0xf]  ;;  %v15468_v42 = vor.u32 %v17104_v34, %v15467_v24  ;;  %v15379_v24 = vld [vmem:[#allocation9 + $0x440] sm:$0xf] }
 0x653   :  { %10076 = vmatmul.bf16.vlgmr.msra.gmra.mxu1 %v17704_v45  ;;  %v15227_v25 = vld [vmem:[#allocation9 + $0x310] sm:$0xf] }
 0x654   :  { %10120 = vmatpush.bf16.msrb.mxu1 %v15212_v37  ;;  %10100 = vmatpush.bf16.msra.mxu3 %v15036_v11  ;;  %v17032_v37 = vld [vmem:[#allocation9 + $0x2b4] sm:$0xf0]  ;;  %v17718_v11 = vpop.f32.mrf.mxu1 }
 0x655   :  { %v15180_v15 = vor.u32 %v17032_v37, %v15179_v44  ;;  %v17722_v44 = vpop.f32.mrf.mxu3  ;;  %v15092_v37 = vor.u32 %v17010_v14, %v15091_v56  ;;  %v8488_v56 = vmax.f32 %v17608_v5, 0.0 }
 0x656   :  { %10108 = vmatpush.bf16.msrb.mxu0 %v15140_v17  ;;  %10088 = vmatpush.bf16.msra.mxu2 %v14964_v59  ;;  %v15252_v17 = vor.u32 %v17050_v51, %v15251_v30  ;;  %v15243_v59 = vld [vmem:[#allocation9 + $0x330] sm:$0xf]  ;;  %v17060_v30 = vld [vmem:[#allocation9 + $0x394] sm:$0xf0]  ;;  %v8485_v51 = vmax.f32 %v17565_v63, 0.0 }
 0x657   :  { %v15244_v1 = vor.u32 %v17048_v62, %v15243_v59  ;;  %v15219_v59 = vld [vmem:[#allocation9 + $0x300] sm:$0xf]  ;;  %v17042_v62 = vld [vmem:[#allocation9 + $0x304] sm:$0xf0]  ;;  %v15531_v63 = vld [vmem:[#allocation9 + $0x570] sm:$0xf] }
 0x658   :  { %10121 = vmatpush.bf16.msrb.mxu1 %v15204_v22  ;;  %10101 = vmatpush.bf16.msra.mxu3 %v15028_v35  ;;  %v15316_v22 = vor.u32 %v17066_v31, %v15315_v58  ;;  %v15172_v35 = vor.u32 %v17030_v60, %v15171_v28  ;;  %v15459_v28 = vld [vmem:[#allocation9 + $0x4e0] sm:$0xf]  ;;  %v17102_v60 = vld [vmem:[#allocation9 + $0x4e4] sm:$0xf0] }
 0x659   :  { %10089 = vmatmul.bf16.vlgmr.msra.gmra.mxu2 %v17710_v26 }
 0x65a   :  { %10133 = vmatpush.bf16.msrb.mxu2 %v15276_v16  ;;  %10109 = vmatpush.bf16.msrb.mxu0 %v15132_v9  ;;  %v15099_v16 = vld [vmem:[#allocation9 + $0x210] sm:$0xf]  ;;  %v17046_v9 = vld [vmem:[#allocation9 + $0x324] sm:$0xf0] }
 0x65b   :  { %10102 = vmatmul.bf16.vlgmr.msra.gmra.mxu3 %v17712_v49  ;;  %v15100_v47 = vor.u32 %v17012_v61, %v15099_v16  ;;  %v15236_v19 = vor.u32 %v17046_v9, %v15235_v38  ;;  %v15595_v16 = vld [vmem:[#allocation9 + $0x5f0] sm:$0xf]  ;;  %v17136_v61 = vld [vmem:[#allocation9 + $0x5f4] sm:$0xf0]  ;;  %v8487_v38 = vmax.f32 %v17595_v39, 0.0  ;;  %v8310_v9 = vpop.f32.mrf.mxu2 }
 0x65c   :  { %10146 = vmatpush.bf16.msrb.mxu3 %v15340_v13  ;;  %10122 = vmatpush.bf16.msrb.mxu1 %v15196_v20  ;;  %v8284_v13 = vpop.f32.mrf.mxu0  ;;  %v8297_v43 = vpop.f32.mrf.mxu1  ;;  %v15299_v20 = vld [vmem:[#allocation9 + $0x3a0] sm:$0xf]  ;;  %v15596_v14 = vor.u32 %v17136_v61, %v15595_v16  ;;  %v17134_v39 = vld [vmem:[#allocation9 + $0x5e4] sm:$0xf0]  ;;  %v15499_v9 = vld [vmem:[#allocation9 + $0x530] sm:$0xf] }
 0x65d   :  { %v15387_v13 = vld [vmem:[#allocation9 + $0x450] sm:$0xf]  ;;  %v17734_v34 = vpack.c.bf16 %v8487_v38, %v8487_v38  ;;  %v15363_v61 = vld [vmem:[#allocation9 + $0x420] sm:$0xf] }
 0x65e   :  { %10134 = vmatpush.bf16.msrb.mxu2 %v15268_v54  ;;  %10110 = vmatpush.bf16.msrb.mxu0 %v15124_v10  ;;  %v15164_v54 = vor.u32 %v17028_v6, %v15163_v18  ;;  %v17088_v10 = vld [vmem:[#allocation9 + $0x474] sm:$0xf0]  ;;  %v15460_v18 = vor.u32 %v17102_v60, %v15459_v28  ;;  %v15220_v6 = vor.u32 %v17042_v62, %v15219_v59  ;;  %v15435_v28 = vld [vmem:[#allocation9 + $0x4b0] sm:$0xf]  ;;  %v15507_v62 = vld [vmem:[#allocation9 + $0x540] sm:$0xf] }
 0x65f   :  { %v15404_v31 = vor.u32 %v17088_v10, %v15403_v29  ;;  %v15587_v29 = vld [vmem:[#allocation9 + $0x5e0] sm:$0xf]  ;;  %v17096_v60 = vld [vmem:[#allocation9 + $0x4b4] sm:$0xf0] }
 0x660   :  { %10147 = vmatpush.bf16.msrb.mxu3 %v15332_v27  ;;  %10123 = vmatpush.bf16.msrb.mxu1 %v15188_v41  ;;  %v17026_v27 = vld [vmem:[#allocation9 + $0x284] sm:$0xf0]  ;;  %v15300_v41 = vor.u32 %v17062_v55, %v15299_v20  ;;  %v15451_v20 = vld [vmem:[#allocation9 + $0x4d0] sm:$0xf]  ;;  %v17100_v55 = vld [vmem:[#allocation9 + $0x4d4] sm:$0xf0]  ;;  %v15436_v16 = vor.u32 %v17096_v60, %v15435_v28 }
 0x661   :  { %v15156_v58 = vor.u32 %v17026_v27, %v15155_v23  ;;  %v15523_v23 = vld [vmem:[#allocation9 + $0x560] sm:$0xf]  ;;  %v17118_v27 = vld [vmem:[#allocation9 + $0x564] sm:$0xf0]  ;;  %v15452_v10 = vor.u32 %v17100_v55, %v15451_v20  ;;  %v15563_v20 = vld [vmem:[#allocation9 + $0x5b0] sm:$0xf] }
 0x662   :  { %10135 = vmatpush.bf16.msrb.mxu2 %v15260_v36  ;;  %10111 = vmatpush.bf16.msrb.mxu0 %v15116_v57  ;;  %v17044_v36 = vld [vmem:[#allocation9 + $0x314] sm:$0xf0]  ;;  %v8486_v57 = vmax.f32 %v17581_v21, 0.0  ;;  %v17726_v21 = vpack.c.bf16 %v8485_v51, %v8485_v51  ;;  %v15524_v5 = vor.u32 %v17118_v27, %v15523_v23  ;;  %v15419_v27 = vld [vmem:[#allocation9 + $0x490] sm:$0xf] }
 0x663   :  { %v15228_v53 = vor.u32 %v17044_v36, %v15227_v25  ;;  %v15443_v25 = vld [vmem:[#allocation9 + $0x4c0] sm:$0xf]  ;;  %v17098_v36 = vld [vmem:[#allocation9 + $0x4c4] sm:$0xf0]  ;;  %v17116_v51 = vld [vmem:[#allocation9 + $0x554] sm:$0xf0] }
 0x664   :  { %10148 = vmatpush.bf16.msrb.mxu3 %v15324_v50  ;;  %10124 = vmatpush.bf16.msrb.mxu1 %v15180_v15  ;;  %v15291_v50 = vld [vmem:[#allocation9 + $0x390] sm:$0xf]  ;;  %v15395_v15 = vld [vmem:[#allocation9 + $0x460] sm:$0xf]  ;;  %v17128_v55 = vld [vmem:[#allocation9 + $0x5b4] sm:$0xf0] }
 0x665   :  { %v17168_v60 = vld [vmem:[#allocation9 + $0x6f4] sm:$0xf0] }
 0x666   :  { %10136 = vmatpush.bf16.msrb.mxu2 %v15252_v17  ;;  %10112 = vmatpush.bf16.msrb.mxu0 %v15108_v4  ;;  %v17086_v17 = vld [vmem:[#allocation9 + $0x464] sm:$0xf0]  ;;  %v15283_v4 = vld [vmem:[#allocation9 + $0x380] sm:$0xf] }
 0x667   :  { %v15284_v43 = vor.u32 %v17058_v7, %v15283_v4  ;;  %v17114_v4 = vld [vmem:[#allocation9 + $0x544] sm:$0xf0]  ;;  %v17742_v7 = vpop.f32.mrf.mxu1 }
 0x668   :  { %10149 = vmatpush.bf16.msrb.mxu3 %v15316_v22  ;;  %10125 = vmatpush.bf16.msrb.mxu1 %v15172_v35  ;;  %v15292_v22 = vor.u32 %v17060_v30, %v15291_v50  ;;  %v15396_v35 = vor.u32 %v17086_v17, %v15395_v15  ;;  %v15588_v50 = vor.u32 %v17134_v39, %v15587_v29  ;;  %v15515_v30 = vld [vmem:[#allocation9 + $0x550] sm:$0xf] }
 0x669   :  { %v15444_v15 = vor.u32 %v17098_v36, %v15443_v25  ;;  %v15516_v17 = vor.u32 %v17116_v51, %v15515_v30  ;;  %v15564_v39 = vor.u32 %v17128_v55, %v15563_v20  ;;  %v15555_v25 = vld [vmem:[#allocation9 + $0x5a0] sm:$0xf]  ;;  %v17126_v36 = vld [vmem:[#allocation9 + $0x5a4] sm:$0xf0] }
 0x66a   :  { %10137 = vmatpush.bf16.msrb.mxu2 %v15244_v1  ;;  %10113 = vmatpush.bf16.msrb.mxu0 %v15100_v47  ;;  %v17728_v1 = vpack.c.bf16 %v8486_v57, %v8486_v57  ;;  %v15532_v47 = vor.u32 %v17120_v8, %v15531_v63  ;;  %v15571_v8 = vld [vmem:[#allocation9 + $0x5c0] sm:$0xf]  ;;  %v17074_v51 = vld [vmem:[#allocation9 + $0x404] sm:$0xf0]  ;;  %v15556_v28 = vor.u32 %v17126_v36, %v15555_v25  ;;  %v15643_v25 = vld [vmem:[#allocation9 + $0x650] sm:$0xf] }
 0x66b   :  { %v15475_v55 = vld [vmem:[#allocation9 + $0x500] sm:$0xf]  ;;  %v17148_v36 = vld [vmem:[#allocation9 + $0x654] sm:$0xf0] }
 0x66c   :  { %10150 = vmatpush.bf16.msrb.mxu3 %v15308_v0  ;;  %10126 = vmatpush.bf16.msrb.mxu1 %v15164_v54  ;;  %v17084_v0 = vld [vmem:[#allocation9 + $0x454] sm:$0xf0]  ;;  %v8323_v54 = vpop.f32.mrf.mxu3 }
 0x66d   :  { %v15355_v54 = vld [vmem:[#allocation9 + $0x410] sm:$0xf] }
 0x66e   :  { %10138 = vmatpush.bf16.msrb.mxu2 %v15236_v19  ;;  %10114 = vmatpush.bf16.msrb.mxu0 %v15092_v37  ;;  %v15388_v19 = vor.u32 %v17084_v0, %v15387_v13  ;;  %v17736_v37 = vpack.c.bf16 %v8488_v56, %v8488_v56  ;;  %v15427_v13 = vld [vmem:[#allocation9 + $0x4a0] sm:$0xf]  ;;  %v17094_v0 = vld [vmem:[#allocation9 + $0x4a4] sm:$0xf0] }
 0x66f   :  { %v15428_v56 = vor.u32 %v17094_v0, %v15427_v13  ;;  %v15651_v13 = vld [vmem:[#allocation9 + $0x660] sm:$0xf] }
 0x670   :  { %10151 = vmatpush.bf16.msrb.mxu3 %v15300_v41  ;;  %10127 = vmatpush.bf16.msrb.mxu1 %v15156_v58  ;;  %v17082_v41 = vld [vmem:[#allocation9 + $0x444] sm:$0xf0]  ;;  %v15579_v58 = vld [vmem:[#allocation9 + $0x5d0] sm:$0xf] }
 0x671   :  { %10115 = vmatmul.bf16.vlgmr.msrb.gmra.mxu0 %v17726_v21  ;;  %v15380_v57 = vor.u32 %v17082_v41, %v15379_v24  ;;  %v17110_v24 = vld [vmem:[#allocation9 + $0x524] sm:$0xf0]  ;;  %v8349_v41 = vpop.f32.mrf.mxu1 }
 0x672   :  { %10159 = vmatpush.bf16.msra.mxu0 %v15404_v31  ;;  %10139 = vmatpush.bf16.msrb.mxu2 %v15228_v53  ;;  %v17132_v31 = vld [vmem:[#allocation9 + $0x5d4] sm:$0xf0] }
 0x673   :  { %10128 = vmatmul.bf16.vlgmr.msrb.gmra.mxu1 %v17728_v1  ;;  %v17080_v53 = vld [vmem:[#allocation9 + $0x434] sm:$0xf0]  ;;  %v15580_v59 = vor.u32 %v17132_v31, %v15579_v58  ;;  %v17090_v58 = vld [vmem:[#allocation9 + $0x484] sm:$0xf0] }
 0x674   :  { %10172 = vmatpush.bf16.msra.mxu1 %v15468_v42  ;;  %10152 = vmatpush.bf16.msrb.mxu3 %v15292_v22  ;;  %v15371_v42 = vld [vmem:[#allocation9 + $0x430] sm:$0xf]  ;;  %v17740_v22 = vpop.f32.mrf.mxu0 }
 0x675   :  { %v15372_v63 = vor.u32 %v17080_v53, %v15371_v42  ;;  %v17152_v42 = vld [vmem:[#allocation9 + $0x674] sm:$0xf0]  ;;  %v15723_v53 = vld [vmem:[#allocation9 + $0x6f0] sm:$0xf] }
 0x676   :  { %10160 = vmatpush.bf16.msra.mxu0 %v15396_v35  ;;  %10140 = vmatpush.bf16.msrb.mxu2 %v15220_v6  ;;  %v17130_v35 = vld [vmem:[#allocation9 + $0x5c4] sm:$0xf0]  ;;  %v15508_v6 = vor.u32 %v17114_v4, %v15507_v62  ;;  %v17108_v62 = vld [vmem:[#allocation9 + $0x514] sm:$0xf0]  ;;  %v17746_v4 = vpop.f32.mrf.mxu3  ;;  %v15724_v0 = vor.u32 %v17168_v60, %v15723_v53 }
 0x677   :  { %v15572_v38 = vor.u32 %v17130_v35, %v15571_v8  ;;  %v15547_v8 = vld [vmem:[#allocation9 + $0x590] sm:$0xf]  ;;  %v17124_v35 = vld [vmem:[#allocation9 + $0x594] sm:$0xf0]  ;;  %v17182_v60 = vld [vmem:[#allocation9 + $0x764] sm:$0xf0] }
 0x678   :  { %10173 = vmatpush.bf16.msra.mxu1 %v15460_v18  ;;  %10153 = vmatpush.bf16.msrb.mxu3 %v15284_v43  ;;  %v17078_v18 = vld [vmem:[#allocation9 + $0x424] sm:$0xf0]  ;;  %v17112_v43 = vld [vmem:[#allocation9 + $0x534] sm:$0xf0]  ;;  %v15548_v20 = vor.u32 %v17124_v35, %v15547_v8  ;;  %v15635_v35 = vld [vmem:[#allocation9 + $0x640] sm:$0xf] }
 0x679   :  { %10141 = vmatmul.bf16.vlgmr.msrb.gmra.mxu2 %v17734_v34  ;;  %v15500_v23 = vor.u32 %v17112_v43, %v15499_v9  ;;  %v17150_v9 = vld [vmem:[#allocation9 + $0x664] sm:$0xf0]  ;;  %v15715_v43 = vld [vmem:[#allocation9 + $0x6e0] sm:$0xf] }
 0x67a   :  { %10185 = vmatpush.bf16.msra.mxu2 %v15532_v47  ;;  %10161 = vmatpush.bf16.msra.mxu0 %v15388_v19  ;;  %v15364_v47 = vor.u32 %v17078_v18, %v15363_v61  ;;  %v17092_v19 = vld [vmem:[#allocation9 + $0x494] sm:$0xf0]  ;;  %v8490_v61 = vmax.f32 %v17638_v2, 0.0 }
 0x67b   :  { %10154 = vmatmul.bf16.vlgmr.msrb.gmra.mxu3 %v17736_v37  ;;  %v15420_v30 = vor.u32 %v17092_v19, %v15419_v27  ;;  %v15652_v27 = vor.u32 %v17150_v9, %v15651_v13  ;;  %v15851_v19 = vld [vmem:[#allocation9 + $0x7f0] sm:$0xf]  ;;  %v17180_v9 = vld [vmem:[#allocation9 + $0x754] sm:$0xf0] }
 0x67c   :  { %10198 = vmatpush.bf16.msra.mxu3 %v15596_v14  ;;  %10174 = vmatpush.bf16.msra.mxu1 %v15452_v10  ;;  %v17076_v14 = vld [vmem:[#allocation9 + $0x414] sm:$0xf0]  ;;  %v8336_v29 = vpop.f32.mrf.mxu0  ;;  %v15491_v10 = vld [vmem:[#allocation9 + $0x520] sm:$0xf] }
 0x67d   :  { %v15492_v31 = vor.u32 %v17110_v24, %v15491_v10  ;;  %v17200_v29 = vld [vmem:[#allocation9 + $0x7f4] sm:$0xf0] }
 0x67e   :  { %10186 = vmatpush.bf16.msra.mxu2 %v15524_v5  ;;  %10162 = vmatpush.bf16.msra.mxu0 %v15380_v57  ;;  %v15356_v5 = vor.u32 %v17076_v14, %v15355_v54  ;;  %v15411_v57 = vld [vmem:[#allocation9 + $0x480] sm:$0xf]  ;;  %v17122_v14 = vld [vmem:[#allocation9 + $0x584] sm:$0xf0]  ;;  %v17754_v10 = vld [vmem:[#allocation7 + $0x8] sm:$0xff]  ;;  %v15852_v53 = vor.u32 %v17200_v29, %v15851_v19 }
 0x67f   :  { %v15412_v18 = vor.u32 %v17090_v58, %v15411_v57  ;;  %v15539_v54 = vld [vmem:[#allocation9 + $0x580] sm:$0xf]  ;;  %v1679_v24 = vperm.slane %v17754_v10, 6  ;;  %v15707_v58 = vld [vmem:[#allocation9 + $0x6d0] sm:$0xf] }
 0x680   :  { %10199 = vmatpush.bf16.msra.mxu3 %v15588_v50  ;;  %10175 = vmatpush.bf16.msra.mxu1 %v15444_v15  ;;  %v15347_v50 = vld [vmem:[#allocation9 + $0x400] sm:$0xf]  ;;  %v15659_v15 = vld [vmem:[#allocation9 + $0x670] sm:$0xf] }
 0x682   :  { %10187 = vmatpush.bf16.msra.mxu2 %v15516_v17  ;;  %10163 = vmatpush.bf16.msra.mxu0 %v15372_v63  ;;  %v17744_v17 = vpop.f32.mrf.mxu2  ;;  %v15348_v63 = vor.u32 %v17074_v51, %v15347_v50  ;;  %v8491_v50 = vmax.f32 %v17654_v3, 0.0  ;;  %v15540_v51 = vor.u32 %v17122_v14, %v15539_v54  ;;  %v17198_v3 = vld [vmem:[#allocation9 + $0x7e4] sm:$0xf0]  ;;  %v17144_v54 = vld [vmem:[#allocation9 + $0x634] sm:$0xf0] }
 0x684   :  { %10200 = vmatpush.bf16.msra.mxu3 %v15580_v59  ;;  %10176 = vmatpush.bf16.msra.mxu1 %v15436_v16  ;;  %v15483_v59 = vld [vmem:[#allocation9 + $0x510] sm:$0xf]  ;;  %v8489_v16 = vmax.f32 %v17624_v46, 0.0  ;;  %v17770_v19 = vpop.f32.mrf.mxu0 }
 0x685   :  { %v15787_v46 = vld [vmem:[#allocation9 + $0x770] sm:$0xf] }
 0x686   :  { %10188 = vmatpush.bf16.msra.mxu2 %v15508_v6  ;;  %10164 = vmatpush.bf16.msra.mxu0 %v15364_v47  ;;  %v15660_v6 = vor.u32 %v17152_v42, %v15659_v15  ;;  %v17166_v47 = vld [vmem:[#allocation9 + $0x6e4] sm:$0xf0]  ;;  %v17750_v2 = vpack.c.bf16 %v8489_v16, %v8489_v16  ;;  %v8492_v15 = vmax.f32 %v17668_v48, 0.0  ;;  %v8375_v42 = vpop.f32.mrf.mxu3 }
 0x687   :  { %v15716_v41 = vor.u32 %v17166_v47, %v15715_v43  ;;  %v17146_v16 = vld [vmem:[#allocation9 + $0x644] sm:$0xf0]  ;;  %v15835_v43 = vld [vmem:[#allocation9 + $0x7d0] sm:$0xf]  ;;  %v17196_v47 = vld [vmem:[#allocation9 + $0x7d4] sm:$0xf0] }
 0x688   :  { %10201 = vmatpush.bf16.msra.mxu3 %v15572_v38  ;;  %10177 = vmatpush.bf16.msra.mxu1 %v15428_v56  ;;  %v15484_v38 = vor.u32 %v17108_v62, %v15483_v59  ;;  %v17106_v56 = vld [vmem:[#allocation9 + $0x504] sm:$0xf0]  ;;  %v15644_v59 = vor.u32 %v17148_v36, %v15643_v25  ;;  %v15843_v62 = vld [vmem:[#allocation9 + $0x7e0] sm:$0xf]  ;;  %v17764_v13 = vpack.c.bf16 %v8492_v15, %v8492_v15  ;;  %v15755_v42 = vld [vmem:[#allocation9 + $0x730] sm:$0xf] }
 0x689   :  { %v15836_v29 = vor.u32 %v17196_v47, %v15835_v43  ;;  %v15827_v25 = vld [vmem:[#allocation9 + $0x7c0] sm:$0xf]  ;;  %v17194_v36 = vld [vmem:[#allocation9 + $0x7c4] sm:$0xf0] }
 0x68a   :  { %10189 = vmatpush.bf16.msra.mxu2 %v15500_v23  ;;  %10165 = vmatpush.bf16.msra.mxu0 %v15356_v5  ;;  %v17184_v23 = vld [vmem:[#allocation9 + $0x774] sm:$0xf0]  ;;  %v15476_v5 = vor.u32 %v17106_v56, %v15475_v55  ;;  %v15627_v56 = vld [vmem:[#allocation9 + $0x630] sm:$0xf]  ;;  %v15828_v15 = vor.u32 %v17194_v36, %v15827_v25  ;;  %v17190_v43 = vld [vmem:[#allocation9 + $0x7a4] sm:$0xf0] }
 0x68b   :  { %v15788_v57 = vor.u32 %v17184_v23, %v15787_v46  ;;  %v15691_v46 = vld [vmem:[#allocation9 + $0x6b0] sm:$0xf]  ;;  %v17160_v23 = vld [vmem:[#allocation9 + $0x6b4] sm:$0xf0]  ;;  %v15603_v47 = vld [vmem:[#allocation9 + $0x600] sm:$0xf] }
 0x68c   :  { %10202 = vmatpush.bf16.msra.mxu3 %v15564_v39  ;;  %10178 = vmatpush.bf16.msra.mxu1 %v15420_v30  ;;  %v17752_v39 = vpack.c.bf16 %v8490_v61, %v8490_v61  ;;  %v8362_v30 = vpop.f32.mrf.mxu2  ;;  %v17762_v61 = vpack.c.bf16 %v8491_v50, %v8491_v50  ;;  %v15692_v50 = vor.u32 %v17160_v23, %v15691_v46  ;;  %v16959_v46 = vld [vmem:[#allocation9 + $0x74] sm:$0xf]  ;;  %v14893_v23 = vld [vmem:[#allocation9 + $0x78] sm:$0xf0]  ;;  %v15739_v25 = vld [vmem:[#allocation9 + $0x710] sm:$0xf] }
 0x68d   :  { %v15619_v30 = vld [vmem:[#allocation9 + $0x620] sm:$0xf]  ;;  %v17172_v36 = vld [vmem:[#allocation9 + $0x714] sm:$0xf0] }
 0x68e   :  { %10190 = vmatpush.bf16.msra.mxu2 %v15492_v31  ;;  %10166 = vmatpush.bf16.msra.mxu0 %v15348_v63  ;;  %v17164_v31 = vld [vmem:[#allocation9 + $0x6d4] sm:$0xf0]  ;;  %v8283_v63 = vadd.f32 %v17716_v40, %v1679_v24  ;;  %v15636_v40 = vor.u32 %v17146_v16, %v15635_v35  ;;  %v15763_v24 = vld [vmem:[#allocation9 + $0x740] sm:$0xf]  ;;  %v15675_v16 = vld [vmem:[#allocation9 + $0x690] sm:$0xf] }
 0x68f   :  { %v15708_v8 = vor.u32 %v17164_v31, %v15707_v58  ;;  %v15683_v58 = vld [vmem:[#allocation9 + $0x6a0] sm:$0xf] }
 0x690   :  { %10203 = vmatpush.bf16.msra.mxu3 %v15556_v28  ;;  %10179 = vmatpush.bf16.msra.mxu1 %v15412_v18  ;;  %v15779_v28 = vld [vmem:[#allocation9 + $0x760] sm:$0xf] }
 0x691   :  { %10167 = vmatmul.bf16.vlgmr.msra.gmra.mxu0 %v17750_v2  ;;  %v15780_v48 = vor.u32 %v17182_v60, %v15779_v28  ;;  %v15699_v18 = vld [vmem:[#allocation9 + $0x6c0] sm:$0xf]  ;;  %v15819_v60 = vld [vmem:[#allocation9 + $0x7b0] sm:$0xf] }
 0x692   :  { %10211 = vmatpush.bf16.msrb.mxu0 %v15660_v6  ;;  %10191 = vmatpush.bf16.msra.mxu2 %v15484_v38  ;;  %v17162_v6 = vld [vmem:[#allocation9 + $0x6c4] sm:$0xf0]  ;;  %v15771_v38 = vld [vmem:[#allocation9 + $0x750] sm:$0xf] }
 0x693   :  { %10180 = vmatmul.bf16.vlgmr.msra.gmra.mxu1 %v17752_v39  ;;  %v15700_v55 = vor.u32 %v17162_v6, %v15699_v18  ;;  %v15772_v14 = vor.u32 %v17180_v9, %v15771_v38  ;;  %v15747_v6 = vld [vmem:[#allocation9 + $0x720] sm:$0xf] }
 0x694   :  { %10224 = vmatpush.bf16.msrb.mxu1 %v15724_v0  ;;  %10204 = vmatpush.bf16.msra.mxu3 %v15548_v20  ;;  %v15844_v0 = vor.u32 %v17198_v3, %v15843_v62  ;;  %v8296_v20 = vadd.f32 %v17718_v11, %v8283_v63  ;;  %v15628_v11 = vor.u32 %v17144_v54, %v15627_v56  ;;  %v15611_v63 = vld [vmem:[#allocation9 + $0x610] sm:$0xf]  ;;  %v15667_v56 = vld [vmem:[#allocation9 + $0x680] sm:$0xf]  ;;  %v17154_v54 = vld [vmem:[#allocation9 + $0x684] sm:$0xf0] }
 0x696   :  { %10212 = vmatpush.bf16.msrb.mxu0 %v15652_v27  ;;  %10192 = vmatpush.bf16.msra.mxu2 %v15476_v5  ;;  %v8309_v27 = vadd.f32 %v17720_v32, %v8296_v20  ;;  %v17772_v5 = vpop.f32.mrf.mxu1  ;;  %v17158_v32 = vld [vmem:[#allocation9 + $0x6a4] sm:$0xf0] }
 0x697   :  { %v15684_v3 = vor.u32 %v17158_v32, %v15683_v58  ;;  %v8494_v58 = vmax.f32 %v17700_v33, 0.0  ;;  %v15668_v32 = vor.u32 %v17154_v54, %v15667_v56  ;;  %v16991_v33 = vld [vmem:[#allocation9 + $0x174] sm:$0xf]  ;;  %v14941_v56 = vld [vmem:[#allocation9 + $0xd8] sm:$0xf0] }
 0x698   :  { %10225 = vmatpush.bf16.msrb.mxu1 %v15716_v41  ;;  %10205 = vmatpush.bf16.msra.mxu3 %v15540_v51  ;;  %v17178_v41 = vld [vmem:[#allocation9 + $0x744] sm:$0xf0]  ;;  %v8322_v31 = vadd.f32 %v17722_v44, %v8309_v27  ;;  %v8388_v44 = vpop.f32.mrf.mxu0  ;;  %v16975_v27 = vld [vmem:[#allocation9 + $0xf4] sm:$0xf] }
 0x699   :  { %10193 = vmatmul.bf16.vlgmr.msra.gmra.mxu2 %v17762_v61  ;;  %v17142_v51 = vld [vmem:[#allocation9 + $0x624] sm:$0xf0]  ;;  %v17007_v44 = vld [vmem:[#allocation9 + $0x1f4] sm:$0xf] }
 0x69a   :  { %10237 = vmatpush.bf16.msrb.mxu2 %v15788_v57  ;;  %10213 = vmatpush.bf16.msrb.mxu0 %v15644_v59  ;;  %v15764_v57 = vor.u32 %v17178_v41, %v15763_v24  ;;  %v15620_v28 = vor.u32 %v17142_v51, %v15619_v30  ;;  %v17192_v59 = vld [vmem:[#allocation9 + $0x7b4] sm:$0xf0]  ;;  %v8335_v62 = vadd.f32 %v17740_v22, %v8322_v31  ;;  %v17778_v24 = vpop.f32.mrf.mxu2  ;;  %v15803_v30 = vld [vmem:[#allocation9 + $0x790] sm:$0xf]  ;;  %v16957_v31 = vld [vmem:[#allocation9 + $0x64] sm:$0xf] }
 0x69b   :  { %10206 = vmatmul.bf16.vlgmr.msra.gmra.mxu3 %v17764_v13  ;;  %v15820_v18 = vor.u32 %v17192_v59, %v15819_v60  ;;  %v17188_v51 = vld [vmem:[#allocation9 + $0x794] sm:$0xf0]  ;;  %v14949_v60 = vld [vmem:[#allocation9 + $0xe8] sm:$0xf0] }
 0x69c   :  { %10250 = vmatpush.bf16.msrb.mxu3 %v15852_v53  ;;  %10226 = vmatpush.bf16.msrb.mxu1 %v15708_v8  ;;  %v17176_v53 = vld [vmem:[#allocation9 + $0x734] sm:$0xf0]  ;;  %v8348_v22 = vadd.f32 %v17742_v7, %v8335_v62  ;;  %v17780_v7 = vpop.f32.mrf.mxu3  ;;  %v15804_v62 = vor.u32 %v17188_v51, %v15803_v30  ;;  %v16969_v51 = vld [vmem:[#allocation9 + $0xc4] sm:$0xf] }
 0x69d   :  { %v17140_v8 = vld [vmem:[#allocation9 + $0x614] sm:$0xf0]  ;;  %v15756_v35 = vor.u32 %v17176_v53, %v15755_v42  ;;  %v15740_v42 = vor.u32 %v17172_v36, %v15739_v25  ;;  %v14885_v53 = vld [vmem:[#allocation9 + $0x68] sm:$0xf0] }
 0x69e   :  { %10238 = vmatpush.bf16.msrb.mxu2 %v15780_v48  ;;  %10214 = vmatpush.bf16.msrb.mxu0 %v15636_v40  ;;  %v17156_v48 = vld [vmem:[#allocation9 + $0x694] sm:$0xf0]  ;;  %v8401_v38 = vpop.f32.mrf.mxu1  ;;  %v15612_v9 = vor.u32 %v17140_v8, %v15611_v63  ;;  %v15811_v40 = vld [vmem:[#allocation9 + $0x7a0] sm:$0xf]  ;;  %v17170_v63 = vld [vmem:[#allocation9 + $0x704] sm:$0xf0] }
 0x69f   :  { %v15676_v20 = vor.u32 %v17156_v48, %v15675_v16  ;;  %v15812_v41 = vor.u32 %v17190_v43, %v15811_v40  ;;  %v15795_v8 = vld [vmem:[#allocation9 + $0x780] sm:$0xf]  ;;  %v14888_v48 = vor.u32 %v16957_v31, %v14885_v53  ;;  %v16955_v38 = vld [vmem:[#allocation9 + $0x54] sm:$0xf]  ;;  %v1680_v43 = vperm.slane %v17754_v10, 7 }
 0x6a0   :  { %10251 = vmatpush.bf16.msrb.mxu3 %v15844_v0  ;;  %10227 = vmatpush.bf16.msrb.mxu1 %v15700_v55  ;;  %v17174_v0 = vld [vmem:[#allocation9 + $0x724] sm:$0xf0]  ;;  %v14869_v25 = vld [vmem:[#allocation9 + $0x48] sm:$0xf0] }
 0x6a1   :  { %v17138_v55 = vld [vmem:[#allocation9 + $0x604] sm:$0xf0] }
 0x6a2   :  { %10239 = vmatpush.bf16.msrb.mxu2 %v15772_v14  ;;  %10215 = vmatpush.bf16.msrb.mxu0 %v15628_v11  ;;  %v15748_v14 = vor.u32 %v17174_v0, %v15747_v6  ;;  %v14957_v11 = vld [vmem:[#allocation9 + $0xf8] sm:$0xf0]  ;;  %v17787_v6 = vpack.c.bf16 %v8494_v58, %v8494_v58 }
 0x6a4   :  { %10252 = vmatpush.bf16.msrb.mxu3 %v15836_v29  ;;  %10228 = vmatpush.bf16.msrb.mxu1 %v15692_v50  ;;  %v8361_v29 = vadd.f32 %v17744_v17, %v8348_v22  ;;  %v15604_v50 = vor.u32 %v17138_v55, %v15603_v47  ;;  %v14896_v17 = vor.u32 %v16959_v46, %v14893_v23  ;;  %v8414_v47 = vpop.f32.mrf.mxu2  ;;  %v16971_v55 = vld [vmem:[#allocation9 + $0xd4] sm:$0xf]  ;;  %v8427_v54 = vpop.f32.mrf.mxu3  ;;  %v16989_v46 = vld [vmem:[#allocation9 + $0x164] sm:$0xf]  ;;  %v15013_v23 = vld [vmem:[#allocation9 + $0x168] sm:$0xf0] }
 0x6a5   :  { %v14944_v10 = vor.u32 %v16971_v55, %v14941_v56  ;;  %v15016_v30 = vor.u32 %v16989_v46, %v15013_v23  ;;  %v16999_v56 = vld [vmem:[#allocation9 + $0x1b4] sm:$0xf]  ;;  %v15053_v54 = vld [vmem:[#allocation9 + $0x1b8] sm:$0xf0] }
 0x6a6   :  { %10240 = vmatpush.bf16.msrb.mxu2 %v15764_v57  ;;  %10216 = vmatpush.bf16.msrb.mxu0 %v15620_v28  ;;  %v8493_v57 = vmax.f32 %v17684_v12, 0.0  ;;  %v16973_v28 = vld [vmem:[#allocation9 + $0xe4] sm:$0xf]  ;;  %v8374_v59 = vadd.f32 %v17746_v4, %v8361_v29  ;;  %v17186_v12 = vld [vmem:[#allocation9 + $0x784] sm:$0xf0] }
 0x6a7   :  { %v14952_v4 = vor.u32 %v16973_v28, %v14949_v60  ;;  %v15796_v22 = vor.u32 %v17186_v12, %v15795_v8  ;;  %v17005_v29 = vld [vmem:[#allocation9 + $0x1e4] sm:$0xf]  ;;  %v16951_v28 = vld [vmem:[#allocation9 + $0x34] sm:$0xf]  ;;  %v14861_v60 = vld [vmem:[#allocation9 + $0x38] sm:$0xf0] }
 0x6a8   :  { %10253 = vmatpush.bf16.msrb.mxu3 %v15828_v15  ;;  %10229 = vmatpush.bf16.msrb.mxu1 %v15684_v3  ;;  %v14960_v15 = vor.u32 %v16975_v27, %v14957_v11  ;;  %v15731_v3 = vld [vmem:[#allocation9 + $0x700] sm:$0xf]  ;;  %v17785_v16 = vpack.c.bf16 %v8493_v57, %v8493_v57  ;;  %v8495_v40 = vmax.f32 %v8374_v59, 0.0  ;;  %v16953_v11 = vld [vmem:[#allocation9 + $0x44] sm:$0xf] }
 0x6a9   :  { %v15732_v0 = vor.u32 %v17170_v63, %v15731_v3  ;;  %v14933_v57 = vld [vmem:[#allocation9 + $0xc8] sm:$0xf0]  ;;  %v14872_v31 = vor.u32 %v16953_v11, %v14869_v25  ;;  %v14925_v3 = vld [vmem:[#allocation9 + $0xb8] sm:$0xf0]  ;;  %v16985_v12 = vld [vmem:[#allocation9 + $0x144] sm:$0xf]  ;;  %v15056_v25 = vor.u32 %v16999_v56, %v15053_v54 }
 0x6aa   :  { %10241 = vmatpush.bf16.msrb.mxu2 %v15756_v35  ;;  %10217 = vmatpush.bf16.msrb.mxu0 %v15612_v9  ;;  %v15021_v35 = vld [vmem:[#allocation9 + $0x178] sm:$0xf0]  ;;  %v17792_v36 = vpack.c.bf16 %v8495_v40, %v8495_v40  ;;  %v14936_v53 = vor.u32 %v16969_v51, %v14933_v57  ;;  %v16965_v40 = vld [vmem:[#allocation9 + $0xa4] sm:$0xf]  ;;  %v16947_v46 = vld [vmem:[#allocation9 + $0x14] sm:$0xf] }
 0x6ab   :  { %v14877_v9 = vld [vmem:[#allocation9 + $0x58] sm:$0xf0]  ;;  %v16997_v57 = vld [vmem:[#allocation9 + $0x1a4] sm:$0xf]  ;;  %v15029_v54 = vld [vmem:[#allocation9 + $0x188] sm:$0xf0] }
 0x6ac   :  { %10254 = vmatpush.bf16.msrb.mxu3 %v15820_v18  ;;  %10230 = vmatpush.bf16.msrb.mxu1 %v15676_v20  ;;  %v15085_v18 = vld [vmem:[#allocation9 + $0x1f8] sm:$0xf0]  ;;  %v15024_v20 = vor.u32 %v16991_v33, %v15021_v35  ;;  %v14880_v27 = vor.u32 %v16955_v38, %v14877_v9  ;;  %v14997_v33 = vld [vmem:[#allocation9 + $0x148] sm:$0xf0]  ;;  %v16949_v38 = vld [vmem:[#allocation9 + $0x24] sm:$0xf] }
 0x6ad   :  { %v15000_v9 = vor.u32 %v16985_v12, %v14997_v33  ;;  %v14845_v23 = vld [vmem:[#allocation9 + $0x18] sm:$0xf0]  ;;  %v16993_v56 = vld [vmem:[#allocation9 + $0x184] sm:$0xf] }
 0x6ae   :  { %10242 = vmatpush.bf16.msrb.mxu2 %v15748_v14  ;;  %10218 = vmatpush.bf16.msrb.mxu0 %v15604_v50  ;;  %v15088_v14 = vor.u32 %v17007_v44, %v15085_v18  ;;  %v8387_v50 = vadd.f32 %v17770_v19, %v1680_v43  ;;  %v8438_v63 = vpop.f32.mrf.mxu0  ;;  %v14864_v44 = vor.u32 %v16951_v28, %v14861_v60  ;;  %v17001_v18 = vld [vmem:[#allocation9 + $0x1c4] sm:$0xf]  ;;  %v14917_v43 = vld [vmem:[#allocation9 + $0xa8] sm:$0xf0]  ;;  %v17023_v60 = vld [vmem:[#allocation9 + $0x274] sm:$0xf] }
 0x6af   :  { %v14973_v12 = vld [vmem:[#allocation9 + $0x118] sm:$0xf0] }
 0x6b0   :  { %10255 = vmatpush.bf16.msrb.mxu3 %v15812_v41  ;;  %10231 = vmatpush.bf16.msrb.mxu1 %v15668_v32  ;;  %v15077_v41 = vld [vmem:[#allocation9 + $0x1e8] sm:$0xf0]  ;;  %v16987_v32 = vld [vmem:[#allocation9 + $0x154] sm:$0xf]  ;;  %v8400_v19 = vadd.f32 %v17772_v5, %v8387_v50  ;;  %v16981_v50 = vld [vmem:[#allocation9 + $0x124] sm:$0xf] }
 0x6b1   :  { %10219 = vmatmul.bf16.vlgmr.msrb.gmra.mxu0 %v17785_v16  ;;  %v15080_v58 = vor.u32 %v17005_v29, %v15077_v41  ;;  %v14853_v5 = vld [vmem:[#allocation9 + $0x28] sm:$0xf0]  ;;  %v16963_v41 = vld [vmem:[#allocation9 + $0x94] sm:$0xf] }
 0x6b2   :  { %10263 = vmatpush.bf16.msra.mxu0 %v14896_v17  ;;  %10243 = vmatpush.bf16.msrb.mxu2 %v15740_v42  ;;  %v15005_v17 = vld [vmem:[#allocation9 + $0x158] sm:$0xf0]  ;;  %v8413_v35 = vadd.f32 %v17778_v24, %v8400_v19  ;;  %v14856_v24 = vor.u32 %v16949_v38, %v14853_v5  ;;  %v17021_v38 = vld [vmem:[#allocation9 + $0x264] sm:$0xf]  ;;  %v15141_v5 = vld [vmem:[#allocation9 + $0x268] sm:$0xf0] }
 0x6b3   :  { %10232 = vmatmul.bf16.vlgmr.msrb.gmra.mxu1 %v17787_v6  ;;  %v15069_v42 = vld [vmem:[#allocation9 + $0x1d8] sm:$0xf0]  ;;  %v15008_v59 = vor.u32 %v16987_v32, %v15005_v17  ;;  %v16945_v32 = vld [vmem:[#allocation9 + $0x4] sm:$0xf] }
 0x6b4   :  { %10276 = vmatpush.bf16.msra.mxu1 %v14960_v15  ;;  %10256 = vmatpush.bf16.msrb.mxu3 %v15804_v62  ;;  %v17003_v15 = vld [vmem:[#allocation9 + $0x1d4] sm:$0xf]  ;;  %v8426_v55 = vadd.f32 %v17780_v7, %v8413_v35  ;;  %v14848_v7 = vor.u32 %v16947_v46, %v14845_v23  ;;  %v15149_v19 = vld [vmem:[#allocation9 + $0x278] sm:$0xf0] }
 0x6b5   :  { %v16967_v62 = vld [vmem:[#allocation9 + $0xb4] sm:$0xf]  ;;  %v15072_v8 = vor.u32 %v17003_v15, %v15069_v42  ;;  %v16961_v15 = vld [vmem:[#allocation9 + $0x84] sm:$0xf]  ;;  %v14901_v42 = vld [vmem:[#allocation9 + $0x88] sm:$0xf0] }
 0x6b6   :  { %10264 = vmatpush.bf16.msra.mxu0 %v14888_v48  ;;  %10244 = vmatpush.bf16.msrb.mxu2 %v15732_v0  ;;  %v8451_v48 = vpop.f32.mrf.mxu1  ;;  %v14928_v0 = vor.u32 %v16967_v62, %v14925_v3  ;;  %v8440_v11 = vpop.f32.mrf.mxu0  ;;  %v17055_v46 = vld [vmem:[#allocation9 + $0x374] sm:$0xf]  ;;  %v15277_v23 = vld [vmem:[#allocation9 + $0x378] sm:$0xf0] }
 0x6b8   :  { %10277 = vmatpush.bf16.msra.mxu1 %v14952_v4  ;;  %10257 = vmatpush.bf16.msrb.mxu3 %v15796_v22  ;;  %v15061_v4 = vld [vmem:[#allocation9 + $0x1c8] sm:$0xf0]  ;;  %v16983_v22 = vld [vmem:[#allocation9 + $0x134] sm:$0xf] }
 0x6b9   :  { %10245 = vmatmul.bf16.vlgmr.msrb.gmra.mxu2 %v17792_v36  ;;  %v15064_v47 = vor.u32 %v17001_v18, %v15061_v4  ;;  %v16995_v18 = vld [vmem:[#allocation9 + $0x194] sm:$0xf]  ;;  %v15037_v4 = vld [vmem:[#allocation9 + $0x198] sm:$0xf0] }
 0x6ba   :  { %10289 = vmatpush.bf16.msra.mxu2 %v15024_v20  ;;  %10265 = vmatpush.bf16.msra.mxu0 %v14880_v27  ;;  %v14989_v20 = vld [vmem:[#allocation9 + $0x138] sm:$0xf0]  ;;  %v8439_v27 = vadd.f32 %v8438_v63, %v8426_v55  ;;  %v15040_v55 = vor.u32 %v16995_v18, %v15037_v4  ;;  %v17067_v18 = vld [vmem:[#allocation9 + $0x3d4] sm:$0xf] }
 0x6bb   :  { %v14992_v29 = vor.u32 %v16983_v22, %v14989_v20  ;;  %v15213_v63 = vld [vmem:[#allocation9 + $0x2f8] sm:$0xf0]  ;;  %v15205_v22 = vld [vmem:[#allocation9 + $0x2e8] sm:$0xf0]  ;;  %v16977_v20 = vld [vmem:[#allocation9 + $0x104] sm:$0xf] }
 0x6bc   :  { %10302 = vmatpush.bf16.msra.mxu3 %v15088_v14  ;;  %10278 = vmatpush.bf16.msra.mxu1 %v14944_v10  ;;  %v14920_v14 = vor.u32 %v16965_v40, %v14917_v43  ;;  %v14909_v10 = vld [vmem:[#allocation9 + $0x98] sm:$0xf0]  ;;  %v8464_v62 = vpop.f32.mrf.mxu2 }
 0x6bd   :  { %v14912_v17 = vor.u32 %v16963_v41, %v14909_v10  ;;  %v15341_v41 = vld [vmem:[#allocation9 + $0x3f8] sm:$0xf0] }
 0x6be   :  { %10290 = vmatpush.bf16.msra.mxu2 %v15016_v30  ;;  %10266 = vmatpush.bf16.msra.mxu0 %v14872_v31  ;;  %v14981_v30 = vld [vmem:[#allocation9 + $0x128] sm:$0xf0]  ;;  %v8453_v51 = vpop.f32.mrf.mxu1  ;;  %v8477_v35 = vpop.f32.mrf.mxu3  ;;  %v15325_v4 = vld [vmem:[#allocation9 + $0x3d8] sm:$0xf0] }
 0x6bf   :  { %v14837_v31 = vld [vmem:[#allocation9 + $0x8] sm:$0xf0]  ;;  %v14984_v28 = vor.u32 %v16981_v50, %v14981_v30  ;;  %v17019_v50 = vld [vmem:[#allocation9 + $0x254] sm:$0xf]  ;;  %v15133_v30 = vld [vmem:[#allocation9 + $0x258] sm:$0xf0] }
 0x6c0   :  { %10303 = vmatpush.bf16.msra.mxu3 %v15080_v58  ;;  %10279 = vmatpush.bf16.msra.mxu1 %v14936_v53  ;;  %v15045_v58 = vld [vmem:[#allocation9 + $0x1a8] sm:$0xf0]  ;;  %v8452_v53 = vadd.f32 %v8451_v48, %v8439_v27  ;;  %v15152_v48 = vor.u32 %v17023_v60, %v15149_v19  ;;  %v15144_v27 = vor.u32 %v17021_v38, %v15141_v5  ;;  %v15117_v38 = vld [vmem:[#allocation9 + $0x238] sm:$0xf0] }
 0x6c1   :  { %v15048_v3 = vor.u32 %v16997_v57, %v15045_v58  ;;  %v15280_v57 = vor.u32 %v17055_v46, %v15277_v23  ;;  %v17035_v58 = vld [vmem:[#allocation9 + $0x2d4] sm:$0xf]  ;;  %v15333_v60 = vld [vmem:[#allocation9 + $0x3e8] sm:$0xf0]  ;;  %v17013_v46 = vld [vmem:[#allocation9 + $0x224] sm:$0xf] }
 0x6c2   :  { %10291 = vmatpush.bf16.msra.mxu2 %v15008_v59  ;;  %10267 = vmatpush.bf16.msra.mxu0 %v14864_v44  ;;  %v17039_v59 = vld [vmem:[#allocation9 + $0x2f4] sm:$0xf]  ;;  %v8465_v33 = vadd.f32 %v8464_v62, %v8452_v53  ;;  %v14840_v44 = vor.u32 %v16945_v32, %v14837_v31  ;;  %v15197_v32 = vld [vmem:[#allocation9 + $0x2d8] sm:$0xf0]  ;;  %v15136_v53 = vor.u32 %v17019_v50, %v15133_v30  ;;  %v15125_v62 = vld [vmem:[#allocation9 + $0x248] sm:$0xf0] }
 0x6c3   :  { %v15216_v40 = vor.u32 %v17039_v59, %v15213_v63  ;;  %v15200_v19 = vor.u32 %v17035_v58, %v15197_v32  ;;  %v17017_v59 = vld [vmem:[#allocation9 + $0x244] sm:$0xf]  ;;  %v15189_v63 = vld [vmem:[#allocation9 + $0x2c8] sm:$0xf0]  ;;  %v17047_v50 = vld [vmem:[#allocation9 + $0x334] sm:$0xf] }
 0x6c4   :  { %10304 = vmatpush.bf16.msra.mxu3 %v15072_v8  ;;  %10280 = vmatpush.bf16.msra.mxu1 %v14928_v0  ;;  %v16979_v8 = vld [vmem:[#allocation9 + $0x114] sm:$0xf]  ;;  %v14904_v0 = vor.u32 %v16961_v15, %v14901_v42  ;;  %v8466_v51 = vpop.f32.mrf.mxu2  ;;  %v17053_v15 = vld [vmem:[#allocation9 + $0x364] sm:$0xf]  ;;  %v15269_v42 = vld [vmem:[#allocation9 + $0x368] sm:$0xf0] }
 0x6c5   :  { %v14976_v43 = vor.u32 %v16979_v8, %v14973_v12  ;;  %v17051_v12 = vld [vmem:[#allocation9 + $0x354] sm:$0xf]  ;;  %v15109_v23 = vld [vmem:[#allocation9 + $0x228] sm:$0xf0]  ;;  %v15245_v30 = vld [vmem:[#allocation9 + $0x338] sm:$0xf0] }
 0x6c6   :  { %10292 = vmatpush.bf16.msra.mxu2 %v15000_v9  ;;  %10268 = vmatpush.bf16.msra.mxu0 %v14856_v24  ;;  %v8478_v9 = vadd.f32 %v8477_v35, %v8465_v33  ;;  %v14965_v24 = vld [vmem:[#allocation9 + $0x108] sm:$0xf0]  ;;  %v15261_v33 = vld [vmem:[#allocation9 + $0x358] sm:$0xf0]  ;;  %v15112_v51 = vor.u32 %v17013_v46, %v15109_v23  ;;  %v17011_v32 = vld [vmem:[#allocation9 + $0x214] sm:$0xf] }
 0x6c7   :  { %v15264_v5 = vor.u32 %v17051_v12, %v15261_v33  ;;  %v15093_v12 = vld [vmem:[#allocation9 + $0x208] sm:$0xf0]  ;;  %v17025_v33 = vld [vmem:[#allocation9 + $0x284] sm:$0xf] }
 0x6c8   :  { %10305 = vmatpush.bf16.msra.mxu3 %v15064_v47  ;;  %10281 = vmatpush.bf16.msra.mxu1 %v14920_v14  ;;  %v17037_v47 = vld [vmem:[#allocation9 + $0x2e4] sm:$0xf]  ;;  %v8496_v14 = vmax.f32 %v8478_v9, 0.0  ;;  %v17031_v9 = vld [vmem:[#allocation9 + $0x2b4] sm:$0xf] }
 0x6c9   :  { %v15208_v11 = vor.u32 %v17037_v47, %v15205_v22  ;;  %v15328_v47 = vor.u32 %v17067_v18, %v15325_v4  ;;  %v17049_v22 = vld [vmem:[#allocation9 + $0x344] sm:$0xf]  ;;  %v17087_v18 = vld [vmem:[#allocation9 + $0x474] sm:$0xf]  ;;  %v15405_v4 = vld [vmem:[#allocation9 + $0x478] sm:$0xf0] }
 0x6ca   :  { %10293 = vmatpush.bf16.msra.mxu2 %v14992_v29  ;;  %10269 = vmatpush.bf16.msra.mxu0 %v14848_v7  ;;  %v17071_v29 = vld [vmem:[#allocation9 + $0x3f4] sm:$0xf]  ;;  %v17799_v10 = vpack.c.bf16 %v8496_v14, %v8496_v14  ;;  %v15032_v7 = vor.u32 %v16993_v56, %v15029_v54  ;;  %v17065_v56 = vld [vmem:[#allocation9 + $0x3c4] sm:$0xf]  ;;  %v15317_v54 = vld [vmem:[#allocation9 + $0x3c8] sm:$0xf0] }
 0x6cb   :  { %v15344_v31 = vor.u32 %v17071_v29, %v15341_v41  ;;  %v17029_v41 = vld [vmem:[#allocation9 + $0x2a4] sm:$0xf]  ;;  %v15397_v46 = vld [vmem:[#allocation9 + $0x468] sm:$0xf0] }
 0x6cc   :  { %10306 = vmatpush.bf16.msra.mxu3 %v15056_v25  ;;  %10282 = vmatpush.bf16.msra.mxu1 %v14912_v17  ;;  %v14968_v25 = vor.u32 %v16977_v20, %v14965_v24  ;;  %v8479_v17 = vpop.f32.mrf.mxu3  ;;  %v15253_v20 = vld [vmem:[#allocation9 + $0x348] sm:$0xf0]  ;;  %v17101_v23 = vld [vmem:[#allocation9 + $0x4e4] sm:$0xf] }
 0x6cd   :  { %10258 = vmatmul.bf16.vlgmr.msrb.gmra.mxu3 %v17799_v10  ;;  %v15256_v29 = vor.u32 %v17049_v22, %v15253_v20  ;;  %v15101_v17 = vld [vmem:[#allocation9 + $0x218] sm:$0xf0]  ;;  %v17059_v22 = vld [vmem:[#allocation9 + $0x394] sm:$0xf] }
 0x6ce   :  { %10294 = vmatpush.bf16.msra.mxu2 %v14984_v28  ;;  %10270 = vmatpush.bf16.msra.mxu0 %v14840_v44  ;;  %v17069_v28 = vld [vmem:[#allocation9 + $0x3e4] sm:$0xf]  ;;  %v15128_v44 = vor.u32 %v17017_v59, %v15125_v62  ;;  %v15104_v62 = vor.u32 %v17011_v32, %v15101_v17  ;;  %v15293_v20 = vld [vmem:[#allocation9 + $0x398] sm:$0xf0] }
 0x6cf   :  { %v15336_v8 = vor.u32 %v17069_v28, %v15333_v60  ;;  %v17045_v60 = vld [vmem:[#allocation9 + $0x324] sm:$0xf] }
 0x6d0   :  { %10307 = vmatpush.bf16.msra.mxu3 %v15048_v3  ;;  %10283 = vmatpush.bf16.msra.mxu1 %v14904_v0  ;;  %v15272_v3 = vor.u32 %v17053_v15, %v15269_v42  ;;  %v17027_v15 = vld [vmem:[#allocation9 + $0x294] sm:$0xf]  ;;  %v15165_v42 = vld [vmem:[#allocation9 + $0x298] sm:$0xf0] }
 0x6d1   :  { %10271 = vmatmul.bf16.vlgmr.msra.gmra.mxu0 %v17702_v52  ;;  %v17804_v52 = vld [vmem:[#allocation10] sm:$0x3] }
 0x6d2   :  { %10315 = vmatpush.bf16.msrb.mxu0 %v15152_v48  ;;  %10295 = vmatpush.bf16.msra.mxu2 %v14976_v43  ;;  %v8771_v35 = vperm.slane %v17804_v52, 0  ;;  %v17015_v48 = vld [vmem:[#allocation9 + $0x234] sm:$0xf]  ;;  %v10064_v43 = vpop.f32.mrf.mxu0 }
 0x6d3   :  { %10284 = vmatmul.bf16.vlgmr.msra.gmra.mxu1 %v17704_v45  ;;  %v17033_v45 = vld [vmem:[#allocation9 + $0x2c4] sm:$0xf]  ;;  %v15120_v24 = vor.u32 %v17015_v48, %v15117_v38 }
 0x6d4   :  { %10328 = vmatpush.bf16.msrb.mxu1 %v15216_v40  ;;  %10308 = vmatpush.bf16.msra.mxu3 %v15040_v55  ;;  %v15192_v0 = vor.u32 %v17033_v45, %v15189_v63  ;;  %v15181_v40 = vld [vmem:[#allocation9 + $0x2b8] sm:$0xf0]  ;;  %v10077_v55 = vpop.f32.mrf.mxu1  ;;  %v15301_v45 = vld [vmem:[#allocation9 + $0x3a8] sm:$0xf0]  ;;  %v17009_v63 = vld [vmem:[#allocation9 + $0x204] sm:$0xf] }
 0x6d5   :  { %v15184_v14 = vor.u32 %v17031_v9, %v15181_v40  ;;  %v15229_v9 = vld [vmem:[#allocation9 + $0x318] sm:$0xf0] }
 0x6d6   :  { %10316 = vmatpush.bf16.msrb.mxu0 %v15144_v27  ;;  %10296 = vmatpush.bf16.msra.mxu2 %v14968_v25  ;;  %v15320_v25 = vor.u32 %v17065_v56, %v15317_v54 }
 0x6d8   :  { %10329 = vmatpush.bf16.msrb.mxu1 %v15208_v11  ;;  %10309 = vmatpush.bf16.msra.mxu3 %v15032_v7  ;;  %v15173_v11 = vld [vmem:[#allocation9 + $0x2a8] sm:$0xf0]  ;;  %v17063_v7 = vld [vmem:[#allocation9 + $0x3b4] sm:$0xf] }
 0x6d9   :  { %10297 = vmatmul.bf16.vlgmr.msra.gmra.mxu2 %v17710_v26  ;;  %v10065_v26 = vadd.f32 %v10064_v43, %v8771_v35  ;;  %v15176_v58 = vor.u32 %v17029_v41, %v15173_v11  ;;  %v15157_v35 = vld [vmem:[#allocation9 + $0x288] sm:$0xf0]  ;;  %v15296_v41 = vor.u32 %v17059_v22, %v15293_v20  ;;  %v17095_v22 = vld [vmem:[#allocation9 + $0x4b4] sm:$0xf]  ;;  %v15437_v20 = vld [vmem:[#allocation9 + $0x4b8] sm:$0xf0] }
 0x6da   :  { %10341 = vmatpush.bf16.msrb.mxu2 %v15280_v57  ;;  %10317 = vmatpush.bf16.msrb.mxu0 %v15136_v53  ;;  %v15309_v57 = vld [vmem:[#allocation9 + $0x3b8] sm:$0xf0]  ;;  %v10066_v53 = vpop.f32.mrf.mxu0  ;;  %v15221_v11 = vld [vmem:[#allocation9 + $0x308] sm:$0xf0] }
 0x6db   :  { %v10078_v27 = vadd.f32 %v10077_v55, %v10065_v26  ;;  %v15312_v28 = vor.u32 %v17063_v7, %v15309_v57  ;;  %v15160_v26 = vor.u32 %v17025_v33, %v15157_v35  ;;  %v15408_v55 = vor.u32 %v17087_v18, %v15405_v4  ;;  %v17135_v57 = vld [vmem:[#allocation9 + $0x5f4] sm:$0xf]  ;;  %v17081_v35 = vld [vmem:[#allocation9 + $0x444] sm:$0xf]  ;;  %v15445_v4 = vld [vmem:[#allocation9 + $0x4c8] sm:$0xf0] }
 0x6dc   :  { %10354 = vmatpush.bf16.msrb.mxu3 %v15344_v31  ;;  %10330 = vmatpush.bf16.msrb.mxu1 %v15200_v19  ;;  %v15248_v31 = vor.u32 %v17047_v50, %v15245_v30  ;;  %v15237_v19 = vld [vmem:[#allocation9 + $0x328] sm:$0xf0]  ;;  %v10079_v59 = vpop.f32.mrf.mxu1  ;;  %v10090_v48 = vpop.f32.mrf.mxu2  ;;  %v17119_v30 = vld [vmem:[#allocation9 + $0x574] sm:$0xf]  ;;  %v17097_v18 = vld [vmem:[#allocation9 + $0x4c4] sm:$0xf] }
 0x6dd   :  { %10310 = vmatmul.bf16.vlgmr.msra.gmra.mxu3 %v17712_v49  ;;  %v17043_v49 = vld [vmem:[#allocation9 + $0x314] sm:$0xf]  ;;  %v10091_v40 = vadd.f32 %v10090_v48, %v10078_v27  ;;  %v17041_v27 = vld [vmem:[#allocation9 + $0x304] sm:$0xf]  ;;  %v15285_v50 = vld [vmem:[#allocation9 + $0x388] sm:$0xf0] }
 0x6de   :  { %10342 = vmatpush.bf16.msrb.mxu2 %v15272_v3  ;;  %10318 = vmatpush.bf16.msrb.mxu0 %v15128_v44  ;;  %v17061_v3 = vld [vmem:[#allocation9 + $0x3a4] sm:$0xf]  ;;  %v15240_v44 = vor.u32 %v17045_v60, %v15237_v19  ;;  %v10103_v43 = vpop.f32.mrf.mxu3  ;;  %v15224_v17 = vor.u32 %v17041_v27, %v15221_v11  ;;  %v17099_v60 = vld [vmem:[#allocation9 + $0x4d4] sm:$0xf]  ;;  %v15453_v19 = vld [vmem:[#allocation9 + $0x4d8] sm:$0xf0] }
 0x6df   :  { %v15304_v38 = vor.u32 %v17061_v3, %v15301_v45  ;;  %v17809_v56 = vadd.f32 %v10103_v43, %v10091_v40  ;;  %v17117_v3 = vld [vmem:[#allocation9 + $0x564] sm:$0xf]  ;;  %v15525_v45 = vld [vmem:[#allocation9 + $0x568] sm:$0xf0]  ;;  %v15456_v33 = vor.u32 %v17099_v60, %v15453_v19  ;;  %v15517_v48 = vld [vmem:[#allocation9 + $0x558] sm:$0xf0] }
 0x6e0   :  { %10355 = vmatpush.bf16.msrb.mxu3 %v15336_v8  ;;  %10331 = vmatpush.bf16.msrb.mxu1 %v15192_v0  ;;  %v15168_v8 = vor.u32 %v17027_v15, %v15165_v42  ;;  %v17103_v0 = vld [vmem:[#allocation9 + $0x4f4] sm:$0xf]  ;;  %v15389_v15 = vld [vmem:[#allocation9 + $0x458] sm:$0xf0]  ;;  %v15365_v27 = vld [vmem:[#allocation9 + $0x428] sm:$0xf0] }
 0x6e1   :  { %v17079_v40 = vld [vmem:[#allocation9 + $0x434] sm:$0xf]  ;;  %v15373_v43 = vld [vmem:[#allocation9 + $0x438] sm:$0xf0] }
 0x6e2   :  { %10343 = vmatpush.bf16.msrb.mxu2 %v15264_v5  ;;  %10319 = vmatpush.bf16.msrb.mxu0 %v15120_v24  ;;  %v15469_v5 = vld [vmem:[#allocation9 + $0x4f8] sm:$0xf0]  ;;  %v17085_v24 = vld [vmem:[#allocation9 + $0x464] sm:$0xf] }
 0x6e3   :  { %v15472_v54 = vor.u32 %v17103_v0, %v15469_v5  ;;  %v15400_v7 = vor.u32 %v17085_v24, %v15397_v46  ;;  %v17131_v5 = vld [vmem:[#allocation9 + $0x5d4] sm:$0xf]  ;;  %v17113_v24 = vld [vmem:[#allocation9 + $0x544] sm:$0xf]  ;;  %v15376_v46 = vor.u32 %v17079_v40, %v15373_v43 }
 0x6e4   :  { %10356 = vmatpush.bf16.msrb.mxu3 %v15328_v47  ;;  %10332 = vmatpush.bf16.msrb.mxu1 %v15184_v14  ;;  %v15096_v47 = vor.u32 %v17009_v63, %v15093_v12  ;;  %v15232_v14 = vor.u32 %v17043_v49, %v15229_v9  ;;  %v10092_v42 = vpop.f32.mrf.mxu2  ;;  %v15589_v12 = vld [vmem:[#allocation9 + $0x5e8] sm:$0xf0]  ;;  %v15581_v49 = vld [vmem:[#allocation9 + $0x5d8] sm:$0xf0]  ;;  %v15448_v9 = vor.u32 %v17097_v18, %v15445_v4  ;;  %v17151_v4 = vld [vmem:[#allocation9 + $0x674] sm:$0xf] }
 0x6e6   :  { %10344 = vmatpush.bf16.msrb.mxu2 %v15256_v29  ;;  %10320 = vmatpush.bf16.msrb.mxu0 %v15112_v51  ;;  %v15461_v29 = vld [vmem:[#allocation9 + $0x4e8] sm:$0xf0]  ;;  %v15533_v51 = vld [vmem:[#allocation9 + $0x578] sm:$0xf0]  ;;  %v10105_v59 = vpop.f32.mrf.mxu3 }
 0x6e7   :  { %v15464_v32 = vor.u32 %v17101_v23, %v15461_v29  ;;  %v17129_v23 = vld [vmem:[#allocation9 + $0x5c4] sm:$0xf]  ;;  %v15440_v29 = vor.u32 %v17095_v22, %v15437_v20  ;;  %v17123_v22 = vld [vmem:[#allocation9 + $0x594] sm:$0xf]  ;;  %v15549_v20 = vld [vmem:[#allocation9 + $0x598] sm:$0xf0] }
 0x6e8   :  { %10357 = vmatpush.bf16.msrb.mxu3 %v15320_v25  ;;  %10333 = vmatpush.bf16.msrb.mxu1 %v15176_v58  ;;  %v17057_v25 = vld [vmem:[#allocation9 + $0x384] sm:$0xf]  ;;  %v15597_v58 = vld [vmem:[#allocation9 + $0x5f8] sm:$0xf0] }
 0x6e9   :  { %v15288_v53 = vor.u32 %v17057_v25, %v15285_v50  ;;  %v17093_v50 = vld [vmem:[#allocation9 + $0x4a4] sm:$0xf] }
 0x6ea   :  { %10345 = vmatpush.bf16.msrb.mxu2 %v15248_v31  ;;  %10321 = vmatpush.bf16.msrb.mxu0 %v15104_v62  ;;  %v17083_v31 = vld [vmem:[#allocation9 + $0x454] sm:$0xf]  ;;  %v15600_v62 = vor.u32 %v17135_v57, %v15597_v58  ;;  %v15501_v57 = vld [vmem:[#allocation9 + $0x538] sm:$0xf0]  ;;  %v17109_v59 = vld [vmem:[#allocation9 + $0x524] sm:$0xf] }
 0x6eb   :  { %v15392_v63 = vor.u32 %v17083_v31, %v15389_v15  ;;  %v17127_v58 = vld [vmem:[#allocation9 + $0x5b4] sm:$0xf]  ;;  %v15357_v15 = vld [vmem:[#allocation9 + $0x418] sm:$0xf0] }
 0x6ec   :  { %10358 = vmatpush.bf16.msrb.mxu3 %v15312_v28  ;;  %10334 = vmatpush.bf16.msrb.mxu1 %v15168_v8  ;;  %v15536_v28 = vor.u32 %v17119_v30, %v15533_v51  ;;  %v17133_v8 = vld [vmem:[#allocation9 + $0x5e4] sm:$0xf]  ;;  %v15429_v30 = vld [vmem:[#allocation9 + $0x4a8] sm:$0xf0]  ;;  %v17075_v31 = vld [vmem:[#allocation9 + $0x414] sm:$0xf] }
 0x6ed   :  { %v15592_v0 = vor.u32 %v17133_v8, %v15589_v12  ;;  %v15557_v8 = vld [vmem:[#allocation9 + $0x5a8] sm:$0xf0]  ;;  %v17073_v12 = vld [vmem:[#allocation9 + $0x404] sm:$0xf] }
 0x6ee   :  { %10346 = vmatpush.bf16.msrb.mxu2 %v15240_v44  ;;  %10322 = vmatpush.bf16.msrb.mxu0 %v15096_v47  ;;  %v15381_v44 = vld [vmem:[#allocation9 + $0x448] sm:$0xf0] }
 0x6f0   :  { %10359 = vmatpush.bf16.msrb.mxu3 %v15304_v38  ;;  %10335 = vmatpush.bf16.msrb.mxu1 %v15160_v26  ;;  %v15384_v38 = vor.u32 %v17081_v35, %v15381_v44  ;;  %v10116_v26 = vpop.f32.mrf.mxu0  ;;  %v15349_v35 = vld [vmem:[#allocation9 + $0x408] sm:$0xf0]  ;;  %v17089_v44 = vld [vmem:[#allocation9 + $0x484] sm:$0xf] }
 0x6f1   :  { %10323 = vmatmul.bf16.vlgmr.msrb.gmra.mxu0 %v17726_v21  ;;  %v15528_v21 = vor.u32 %v17117_v3, %v15525_v45  ;;  %v15360_v45 = vor.u32 %v17075_v31, %v15357_v15 }
 0x6f2   :  { %10367 = vmatpush.bf16.msra.mxu0 %v15408_v55  ;;  %10347 = vmatpush.bf16.msrb.mxu2 %v15232_v14  ;;  %v15584_v55 = vor.u32 %v17131_v5, %v15581_v49  ;;  %v10129_v14 = vpop.f32.mrf.mxu1  ;;  %v15725_v5 = vld [vmem:[#allocation9 + $0x6f8] sm:$0xf0]  ;;  %v17107_v49 = vld [vmem:[#allocation9 + $0x514] sm:$0xf] }
 0x6f3   :  { %10336 = vmatmul.bf16.vlgmr.msrb.gmra.mxu1 %v17728_v1  ;;  %v17115_v1 = vld [vmem:[#allocation9 + $0x554] sm:$0xf] }
 0x6f4   :  { %10380 = vmatpush.bf16.msra.mxu1 %v15472_v54  ;;  %10360 = vmatpush.bf16.msrb.mxu3 %v15296_v41  ;;  %v15520_v47 = vor.u32 %v17115_v1, %v15517_v48  ;;  %v15509_v54 = vld [vmem:[#allocation9 + $0x548] sm:$0xf0]  ;;  %v17077_v41 = vld [vmem:[#allocation9 + $0x424] sm:$0xf]  ;;  %v17167_v1 = vld [vmem:[#allocation9 + $0x6f4] sm:$0xf] }
 0x6f5   :  { %v15512_v25 = vor.u32 %v17113_v24, %v15509_v54  ;;  %v17149_v24 = vld [vmem:[#allocation9 + $0x664] sm:$0xf] }
 0x6f6   :  { %10368 = vmatpush.bf16.msra.mxu0 %v15400_v7  ;;  %10348 = vmatpush.bf16.msrb.mxu2 %v15224_v17  ;;  %v17111_v7 = vld [vmem:[#allocation9 + $0x534] sm:$0xf]  ;;  %v15432_v17 = vor.u32 %v17093_v50, %v15429_v30  ;;  %v15789_v30 = vld [vmem:[#allocation9 + $0x778] sm:$0xf0] }
 0x6f7   :  { %v15504_v42 = vor.u32 %v17111_v7, %v15501_v57  ;;  %v17183_v50 = vld [vmem:[#allocation9 + $0x774] sm:$0xf]  ;;  %v15853_v57 = vld [vmem:[#allocation9 + $0x7f8] sm:$0xf0] }
 0x6f8   :  { %10381 = vmatpush.bf16.msra.mxu1 %v15464_v32  ;;  %10361 = vmatpush.bf16.msrb.mxu3 %v15288_v53  ;;  %v15565_v32 = vld [vmem:[#allocation9 + $0x5b8] sm:$0xf0]  ;;  %v17091_v53 = vld [vmem:[#allocation9 + $0x494] sm:$0xf]  ;;  %v10118_v60 = vpop.f32.mrf.mxu0 }
 0x6f9   :  { %10349 = vmatmul.bf16.vlgmr.msrb.gmra.mxu2 %v17734_v34  ;;  %v10117_v34 = vadd.f32 %v10116_v26, %v17809_v56  ;;  %v15368_v56 = vor.u32 %v17077_v41, %v15365_v27  ;;  %v15568_v19 = vor.u32 %v17127_v58, %v15565_v32  ;;  %v17105_v41 = vld [vmem:[#allocation9 + $0x504] sm:$0xf]  ;;  %v15477_v27 = vld [vmem:[#allocation9 + $0x508] sm:$0xf0]  ;;  %v17199_v7 = vld [vmem:[#allocation9 + $0x7f4] sm:$0xf] }
 0x6fa   :  { %10393 = vmatpush.bf16.msra.mxu2 %v15536_v28  ;;  %10369 = vmatpush.bf16.msra.mxu0 %v15392_v63  ;;  %v15421_v28 = vld [vmem:[#allocation9 + $0x498] sm:$0xf0]  ;;  %v10131_v3 = vpop.f32.mrf.mxu1  ;;  %v17125_v63 = vld [vmem:[#allocation9 + $0x5a4] sm:$0xf]  ;;  %v15480_v58 = vor.u32 %v17105_v41, %v15477_v27  ;;  %v17147_v32 = vld [vmem:[#allocation9 + $0x654] sm:$0xf] }
 0x6fb   :  { %10362 = vmatmul.bf16.vlgmr.msrb.gmra.mxu3 %v17736_v37  ;;  %v15573_v37 = vld [vmem:[#allocation9 + $0x5c8] sm:$0xf0]  ;;  %v10130_v11 = vadd.f32 %v10129_v14, %v10117_v34  ;;  %v15728_v34 = vor.u32 %v17167_v1, %v15725_v5  ;;  %v15837_v1 = vld [vmem:[#allocation9 + $0x7d8] sm:$0xf0]  ;;  %v17175_v41 = vld [vmem:[#allocation9 + $0x734] sm:$0xf] }
 0x6fc   :  { %10406 = vmatpush.bf16.msra.mxu3 %v15600_v62  ;;  %10382 = vmatpush.bf16.msra.mxu1 %v15456_v33  ;;  %v15576_v51 = vor.u32 %v17129_v23, %v15573_v37  ;;  %v15493_v62 = vld [vmem:[#allocation9 + $0x528] sm:$0xf0]  ;;  %v15424_v33 = vor.u32 %v17091_v53, %v15421_v28  ;;  %v10142_v48 = vpop.f32.mrf.mxu2  ;;  %v17165_v23 = vld [vmem:[#allocation9 + $0x6e4] sm:$0xf]  ;;  %v17163_v53 = vld [vmem:[#allocation9 + $0x6d4] sm:$0xf] }
 0x6fd   :  { %v15496_v18 = vor.u32 %v17109_v59, %v15493_v62  ;;  %v10143_v40 = vadd.f32 %v10142_v48, %v10130_v11  ;;  %v15717_v37 = vld [vmem:[#allocation9 + $0x6e8] sm:$0xf0]  ;;  %v17121_v11 = vld [vmem:[#allocation9 + $0x584] sm:$0xf]  ;;  %v15709_v28 = vld [vmem:[#allocation9 + $0x6d8] sm:$0xf0] }
 0x6fe   :  { %10394 = vmatpush.bf16.msra.mxu2 %v15528_v21  ;;  %10370 = vmatpush.bf16.msra.mxu0 %v15384_v38  ;;  %v15413_v21 = vld [vmem:[#allocation9 + $0x488] sm:$0xf0]  ;;  %v15560_v38 = vor.u32 %v17125_v63, %v15557_v8  ;;  %v10155_v43 = vpop.f32.mrf.mxu3  ;;  %v17181_v59 = vld [vmem:[#allocation9 + $0x764] sm:$0xf]  ;;  %v15712_v8 = vor.u32 %v17163_v53, %v15709_v28  ;;  %v15629_v5 = vld [vmem:[#allocation9 + $0x638] sm:$0xf0] }
 0x6ff   :  { %v15416_v26 = vor.u32 %v17089_v44, %v15413_v21  ;;  %v17816_v54 = vadd.f32 %v10155_v43, %v10143_v40  ;;  %v15781_v62 = vld [vmem:[#allocation9 + $0x768] sm:$0xf0]  ;;  %v15693_v40 = vld [vmem:[#allocation9 + $0x6b8] sm:$0xf0]  ;;  %v17189_v28 = vld [vmem:[#allocation9 + $0x7a4] sm:$0xf] }
 0x700   :  { %10407 = vmatpush.bf16.msra.mxu3 %v15592_v0  ;;  %10383 = vmatpush.bf16.msra.mxu1 %v15448_v9  ;;  %v15661_v0 = vld [vmem:[#allocation9 + $0x678] sm:$0xf0]  ;;  %v15845_v63 = vld [vmem:[#allocation9 + $0x7e8] sm:$0xf0] }
 0x701   :  { %v15485_v9 = vld [vmem:[#allocation9 + $0x518] sm:$0xf0]  ;;  %v15701_v44 = vld [vmem:[#allocation9 + $0x6c8] sm:$0xf0] }
 0x702   :  { %10395 = vmatpush.bf16.msra.mxu2 %v15520_v47  ;;  %10371 = vmatpush.bf16.msra.mxu0 %v15376_v46  ;;  %v15352_v47 = vor.u32 %v17073_v12, %v15349_v35  ;;  %v15488_v14 = vor.u32 %v17107_v49, %v15485_v9  ;;  %v15653_v46 = vld [vmem:[#allocation9 + $0x668] sm:$0xf0]  ;;  %v17145_v12 = vld [vmem:[#allocation9 + $0x644] sm:$0xf]  ;;  %v17159_v9 = vld [vmem:[#allocation9 + $0x6b4] sm:$0xf] }
 0x703   :  { %v17161_v35 = vld [vmem:[#allocation9 + $0x6c4] sm:$0xf]  ;;  %v15757_v27 = vld [vmem:[#allocation9 + $0x738] sm:$0xf0] }
 0x704   :  { %10408 = vmatpush.bf16.msra.mxu3 %v15584_v55  ;;  %10384 = vmatpush.bf16.msra.mxu1 %v15440_v29  ;;  %v15664_v55 = vor.u32 %v17151_v4, %v15661_v0  ;;  %v15552_v29 = vor.u32 %v17123_v22, %v15549_v20  ;;  %v10144_v31 = vpop.f32.mrf.mxu2  ;;  %v17195_v0 = vld [vmem:[#allocation9 + $0x7d4] sm:$0xf]  ;;  %v15704_v48 = vor.u32 %v17161_v35, %v15701_v44  ;;  %v17177_v22 = vld [vmem:[#allocation9 + $0x744] sm:$0xf] }
 0x705   :  { %v17173_v31 = vld [vmem:[#allocation9 + $0x724] sm:$0xf] }
 0x706   :  { %10396 = vmatpush.bf16.msra.mxu2 %v15512_v25  ;;  %10372 = vmatpush.bf16.msra.mxu0 %v15368_v56  ;;  %v15541_v25 = vld [vmem:[#allocation9 + $0x588] sm:$0xf0]  ;;  %v15720_v56 = vor.u32 %v17165_v23, %v15717_v37  ;;  %v10157_v60 = vpop.f32.mrf.mxu3  ;;  %v17157_v23 = vld [vmem:[#allocation9 + $0x6a4] sm:$0xf] }
 0x707   :  { %v15544_v15 = vor.u32 %v17121_v11, %v15541_v25  ;;  %v15685_v37 = vld [vmem:[#allocation9 + $0x6a8] sm:$0xf0]  ;;  %v17191_v25 = vld [vmem:[#allocation9 + $0x7b4] sm:$0xf] }
 0x708   :  { %10409 = vmatpush.bf16.msra.mxu3 %v15576_v51  ;;  %10385 = vmatpush.bf16.msra.mxu1 %v15432_v17  ;;  %v15656_v51 = vor.u32 %v17149_v24, %v15653_v46  ;;  %v15645_v17 = vld [vmem:[#allocation9 + $0x658] sm:$0xf0]  ;;  %v15696_v24 = vor.u32 %v17159_v9, %v15693_v40  ;;  %v15813_v60 = vld [vmem:[#allocation9 + $0x7a8] sm:$0xf0] }
 0x709   :  { %v15648_v3 = vor.u32 %v17147_v32, %v15645_v17 }
 0x70a   :  { %10397 = vmatpush.bf16.msra.mxu2 %v15504_v42  ;;  %10373 = vmatpush.bf16.msra.mxu0 %v15360_v45  ;;  %v15792_v42 = vor.u32 %v17183_v50, %v15789_v30  ;;  %v17197_v45 = vld [vmem:[#allocation9 + $0x7e4] sm:$0xf]  ;;  %v15821_v50 = vld [vmem:[#allocation9 + $0x7b8] sm:$0xf0]  ;;  %v15688_v30 = vor.u32 %v17157_v23, %v15685_v37 }
 0x70b   :  { %v15848_v21 = vor.u32 %v17197_v45, %v15845_v63  ;;  %v15824_v17 = vor.u32 %v17191_v25, %v15821_v50  ;;  %v17153_v45 = vld [vmem:[#allocation9 + $0x684] sm:$0xf]  ;;  %v15669_v63 = vld [vmem:[#allocation9 + $0x688] sm:$0xf0] }
 0x70c   :  { %10410 = vmatpush.bf16.msra.mxu3 %v15568_v19  ;;  %10386 = vmatpush.bf16.msra.mxu1 %v15424_v33  ;;  %v15856_v19 = vor.u32 %v17199_v7, %v15853_v57  ;;  %v15637_v33 = vld [vmem:[#allocation9 + $0x648] sm:$0xf0]  ;;  %v15613_v7 = vld [vmem:[#allocation9 + $0x618] sm:$0xf0]  ;;  %v15760_v57 = vor.u32 %v17175_v41, %v15757_v27 }
 0x70d   :  { %v15640_v4 = vor.u32 %v17145_v12, %v15637_v33  ;;  %v15816_v12 = vor.u32 %v17189_v28, %v15813_v60  ;;  %v17171_v33 = vld [vmem:[#allocation9 + $0x714] sm:$0xf] }
 0x70e   :  { %10398 = vmatpush.bf16.msra.mxu2 %v15496_v18  ;;  %10374 = vmatpush.bf16.msra.mxu0 %v15352_v47  ;;  %v15773_v18 = vld [vmem:[#allocation9 + $0x758] sm:$0xf0]  ;;  %v17822_v43 = vpop.f32.mrf.mxu0  ;;  %v15840_v47 = vor.u32 %v17195_v0, %v15837_v1  ;;  %v17169_v1 = vld [vmem:[#allocation9 + $0x704] sm:$0xf] }
 0x710   :  { %10411 = vmatpush.bf16.msra.mxu3 %v15560_v38  ;;  %10387 = vmatpush.bf16.msra.mxu1 %v15416_v26  ;;  %v17143_v38 = vld [vmem:[#allocation9 + $0x634] sm:$0xf]  ;;  %v17824_v20 = vpop.f32.mrf.mxu1 }
 0x711   :  { %10375 = vmatmul.bf16.vlgmr.msra.gmra.mxu0 %v17750_v2  ;;  %v15784_v2 = vor.u32 %v17181_v59, %v15781_v62  ;;  %v15632_v26 = vor.u32 %v17143_v38, %v15629_v5  ;;  %v17137_v59 = vld [vmem:[#allocation9 + $0x604] sm:$0xf]  ;;  %v15605_v62 = vld [vmem:[#allocation9 + $0x608] sm:$0xf0] }
 0x712   :  { %10419 = vmatpush.bf16.msrb.mxu0 %v15664_v55  ;;  %10399 = vmatpush.bf16.msra.mxu2 %v15488_v14  ;;  %v17193_v55 = vld [vmem:[#allocation9 + $0x7c4] sm:$0xf]  ;;  %v15621_v14 = vld [vmem:[#allocation9 + $0x628] sm:$0xf0]  ;;  %v15608_v44 = vor.u32 %v17137_v59, %v15605_v62 }
 0x713   :  { %10388 = vmatmul.bf16.vlgmr.msra.gmra.mxu1 %v17752_v39  ;;  %v17179_v39 = vld [vmem:[#allocation9 + $0x754] sm:$0xf]  ;;  %v17185_v38 = vld [vmem:[#allocation9 + $0x784] sm:$0xf]  ;;  %v15797_v5 = vld [vmem:[#allocation9 + $0x788] sm:$0xf0] }
 0x714   :  { %10432 = vmatpush.bf16.msrb.mxu1 %v15728_v34  ;;  %10412 = vmatpush.bf16.msra.mxu3 %v15552_v29  ;;  %v15776_v49 = vor.u32 %v17179_v39, %v15773_v18  ;;  %v17141_v34 = vld [vmem:[#allocation9 + $0x624] sm:$0xf]  ;;  %v15805_v39 = vld [vmem:[#allocation9 + $0x798] sm:$0xf0]  ;;  %v15672_v18 = vor.u32 %v17153_v45, %v15669_v63  ;;  %v15800_v40 = vor.u32 %v17185_v38, %v15797_v5 }
 0x715   :  { %v15624_v11 = vor.u32 %v17141_v34, %v15621_v14 }
 0x716   :  { %10420 = vmatpush.bf16.msrb.mxu0 %v15656_v51  ;;  %10400 = vmatpush.bf16.msra.mxu2 %v15480_v58  ;;  %v17139_v51 = vld [vmem:[#allocation9 + $0x614] sm:$0xf]  ;;  %v15677_v58 = vld [vmem:[#allocation9 + $0x698] sm:$0xf0]  ;;  %v10170_v32 = vpop.f32.mrf.mxu0 }
 0x717   :  { %v15616_v53 = vor.u32 %v17139_v51, %v15613_v7 }
 0x718   :  { %10433 = vmatpush.bf16.msrb.mxu1 %v15720_v56  ;;  %10413 = vmatpush.bf16.msra.mxu3 %v15544_v15  ;;  %v17155_v56 = vld [vmem:[#allocation9 + $0x694] sm:$0xf]  ;;  %v15749_v15 = vld [vmem:[#allocation9 + $0x728] sm:$0xf0] }
 0x719   :  { %10401 = vmatmul.bf16.vlgmr.msra.gmra.mxu2 %v17762_v61  ;;  %v15765_v61 = vld [vmem:[#allocation9 + $0x748] sm:$0xf0] }
 0x71a   :  { %10445 = vmatpush.bf16.msrb.mxu2 %v15792_v42  ;;  %10421 = vmatpush.bf16.msrb.mxu0 %v15648_v3  ;;  %v15768_v46 = vor.u32 %v17177_v22, %v15765_v61  ;;  %v10183_v42 = vpop.f32.mrf.mxu1  ;;  %v15752_v3 = vor.u32 %v17173_v31, %v15749_v15 }
 0x71b   :  { %10414 = vmatmul.bf16.vlgmr.msra.gmra.mxu3 %v17764_v13  ;;  %v15829_v13 = vld [vmem:[#allocation9 + $0x7c8] sm:$0xf0] }
 0x71c   :  { %10458 = vmatpush.bf16.msrb.mxu3 %v15856_v19  ;;  %10434 = vmatpush.bf16.msrb.mxu1 %v15712_v8  ;;  %v15832_v29 = vor.u32 %v17193_v55, %v15829_v13  ;;  %v15680_v19 = vor.u32 %v17155_v56, %v15677_v58  ;;  %v10194_v8 = vpop.f32.mrf.mxu2 }
 0x71e   :  { %10446 = vmatpush.bf16.msrb.mxu2 %v15784_v2  ;;  %10422 = vmatpush.bf16.msrb.mxu0 %v15640_v4  ;;  %v15741_v2 = vld [vmem:[#allocation9 + $0x718] sm:$0xf0]  ;;  %v10207_v35 = vpop.f32.mrf.mxu3 }
 0x71f   :  { %v15744_v4 = vor.u32 %v17171_v33, %v15741_v2 }
 0x720   :  { %10459 = vmatpush.bf16.msrb.mxu3 %v15848_v21  ;;  %10435 = vmatpush.bf16.msrb.mxu1 %v15704_v48  ;;  %v17187_v21 = vld [vmem:[#allocation9 + $0x794] sm:$0xf]  ;;  %v15733_v48 = vld [vmem:[#allocation9 + $0x708] sm:$0xf0] }
 0x721   :  { %v15808_v0 = vor.u32 %v17187_v21, %v15805_v39 }
 0x722   :  { %10447 = vmatpush.bf16.msrb.mxu2 %v15776_v49  ;;  %10423 = vmatpush.bf16.msrb.mxu0 %v15632_v26  ;;  %v15736_v49 = vor.u32 %v17169_v1, %v15733_v48 }
 0x724   :  { %10460 = vmatpush.bf16.msrb.mxu3 %v15840_v47  ;;  %10436 = vmatpush.bf16.msrb.mxu1 %v15696_v24  ;;  %v10196_v9 = vpop.f32.mrf.mxu2  ;;  %v10169_v24 = vadd.f32 %v17822_v43, %v17816_v54 }
 0x726   :  { %10448 = vmatpush.bf16.msrb.mxu2 %v15768_v46  ;;  %10424 = vmatpush.bf16.msrb.mxu0 %v15624_v11  ;;  %v10209_v47 = vpop.f32.mrf.mxu3 }
 0x728   :  { %10461 = vmatpush.bf16.msrb.mxu3 %v15832_v29  ;;  %10437 = vmatpush.bf16.msrb.mxu1 %v15688_v30 }
 0x72a   :  { %10449 = vmatpush.bf16.msrb.mxu2 %v15760_v57  ;;  %10425 = vmatpush.bf16.msrb.mxu0 %v15616_v53 }
 0x72c   :  { %10462 = vmatpush.bf16.msrb.mxu3 %v15824_v17  ;;  %10438 = vmatpush.bf16.msrb.mxu1 %v15680_v19 }
 0x72e   :  { %10450 = vmatpush.bf16.msrb.mxu2 %v15752_v3  ;;  %10426 = vmatpush.bf16.msrb.mxu0 %v15608_v44  ;;  %v10220_v22 = vpop.f32.mrf.mxu0 }
 0x730   :  { %10463 = vmatpush.bf16.msrb.mxu3 %v15816_v12  ;;  %10439 = vmatpush.bf16.msrb.mxu1 %v15672_v18  ;;  %v10233_v61 = vpop.f32.mrf.mxu1 }
 0x731   :  { %10427 = vmatmul.bf16.vlgmr.msrb.gmra.mxu0 %v17785_v16  ;;  %v10182_v16 = vadd.f32 %v17824_v20, %v10169_v24 }
 0x732   :  { %10451 = vmatpush.bf16.msrb.mxu2 %v15744_v4 }
 0x733   :  { %10440 = vmatmul.bf16.vlgmr.msrb.gmra.mxu1 %v17787_v6  ;;  %v10195_v14 = vadd.f32 %v10194_v8, %v10182_v16  ;;  %v8772_v6 = vperm.slane %v17804_v52, 1 }
 0x734   :  { %10464 = vmatpush.bf16.msrb.mxu3 %v15808_v0 }
 0x735   :  { %v10208_v46 = vadd.f32 %v10207_v35, %v10195_v14 }
 0x736   :  { %10452 = vmatpush.bf16.msrb.mxu2 %v15736_v49  ;;  %v10222_v26 = vpop.f32.mrf.mxu0 }
 0x737   :  { %v10221_v23 = vadd.f32 %v10220_v22, %v10208_v46 }
 0x738   :  { %10465 = vmatpush.bf16.msrb.mxu3 %v15800_v40  ;;  %v10235_v55 = vpop.f32.mrf.mxu1 }
 0x739   :  { %10453 = vmatmul.bf16.vlgmr.msrb.gmra.mxu2 %v17792_v36  ;;  %v10234_v41 = vadd.f32 %v10233_v61, %v10221_v23 }
 0x73b   :  { %10466 = vmatmul.bf16.vlgmr.msrb.gmra.mxu3 %v17799_v10 }
 0x73c   :  { %v10246_v13 = vpop.f32.mrf.mxu2 }
 0x73d   :  { %v10247_v27 = vadd.f32 %v10246_v13, %v10234_v41 }
 0x744   :  { %v10248_v34 = vpop.f32.mrf.mxu2 }
 0x74e   :  { %v10272_v37 = vpop.f32.mrf.mxu0 }
 0x74f   :  { %v10273_v36 = vadd.f32 %v10272_v37, %v8772_v6 }
 0x750   :  { %v10285_v29 = vpop.f32.mrf.mxu1  ;;  %v10259_v11 = vpop.f32.mrf.mxu3 }
 0x751   :  { %v10286_v10 = vadd.f32 %v10285_v29, %v10273_v36  ;;  %v10260_v25 = vadd.f32 %v10259_v11, %v10247_v27 }
 0x753   :  { %10471 = vst [vmem:[%s17847_s7] sm:$0xff] %v10260_v25 }
 0x756   :  { %v10274_v50 = vpop.f32.mrf.mxu0 }
 0x758   :  { %v10287_v30 = vpop.f32.mrf.mxu1  ;;  %v10261_v43 = vpop.f32.mrf.mxu3 }
 0x75c   :  { %v10298_v54 = vpop.f32.mrf.mxu2 }
 0x75d   :  { %v10299_v28 = vadd.f32 %v10298_v54, %v10286_v10 }
 0x760   :  { %v10311_v52 = vpop.f32.mrf.mxu3 }
 0x761   :  { %v10312_v59 = vadd.f32 %v10311_v52, %v10299_v28 }
 0x764   :  { %v10300_v20 = vpop.f32.mrf.mxu2 }
 0x768   :  { %v10313_v57 = vpop.f32.mrf.mxu3 }
 0x76e   :  { %v10324_v51 = vpop.f32.mrf.mxu0 }
 0x76f   :  { %v10325_v62 = vadd.f32 %v10324_v51, %v10312_v59 }
 0x770   :  { %v10337_v7 = vpop.f32.mrf.mxu1 }
 0x771   :  { %v10338_v63 = vadd.f32 %v10337_v7, %v10325_v62 }
 0x776   :  { %v10326_v56 = vpop.f32.mrf.mxu0 }
 0x778   :  { %v10339_v58 = vpop.f32.mrf.mxu1 }
 0x77c   :  { %v10350_v32 = vpop.f32.mrf.mxu2 }
 0x77d   :  { %v10351_v8 = vadd.f32 %v10350_v32, %v10338_v63 }
 0x77e   :  { %v10363_v17 = vpop.f32.mrf.mxu3 }
 0x77f   :  { %v10364_v2 = vadd.f32 %v10363_v17, %v10351_v8 }
 0x784   :  { %v10352_v31 = vpop.f32.mrf.mxu2 }
 0x786   :  { %v10365_v15 = vpop.f32.mrf.mxu3 }
 0x78e   :  { %v10376_v42 = vpop.f32.mrf.mxu0 }
 0x78f   :  { %v10377_v35 = vadd.f32 %v10376_v42, %v10364_v2 }
 0x790   :  { %v10389_v53 = vpop.f32.mrf.mxu1 }
 0x791   :  { %v10390_v44 = vadd.f32 %v10389_v53, %v10377_v35 }
 0x796   :  { %v10378_v60 = vpop.f32.mrf.mxu0 }
 0x798   :  { %v10391_v19 = vpop.f32.mrf.mxu1 }
 0x79c   :  { %v10402_v3 = vpop.f32.mrf.mxu2 }
 0x79d   :  { %v10403_v39 = vadd.f32 %v10402_v3, %v10390_v44 }
 0x79e   :  { %v10415_v45 = vpop.f32.mrf.mxu3 }
 0x79f   :  { %v10416_v4 = vadd.f32 %v10415_v45, %v10403_v39 }
 0x7a4   :  { %v10404_v12 = vpop.f32.mrf.mxu2 }
 0x7a6   :  { %v10417_v33 = vpop.f32.mrf.mxu3 }
 0x7ae   :  { %v10428_v21 = vpop.f32.mrf.mxu0 }
 0x7af   :  { %v10429_v0 = vadd.f32 %v10428_v21, %v10416_v4 }
 0x7b0   :  { %v10441_v18 = vpop.f32.mrf.mxu1 }
 0x7b1   :  { %v10442_v38 = vadd.f32 %v10441_v18, %v10429_v0 }
 0x7b6   :  { %v10430_v1 = vpop.f32.mrf.mxu0 }
 0x7b8   :  { %v10443_v48 = vpop.f32.mrf.mxu1 }
 0x7bc   :  { %v10454_v5 = vpop.f32.mrf.mxu2 }
 0x7bd   :  { %v10455_v49 = vadd.f32 %v10454_v5, %v10442_v38 }
 0x7be   :  { %v10467_v9 = vpop.f32.mrf.mxu3 }
 0x7bf   :  { %v10468_v40 = vadd.f32 %v10467_v9, %v10455_v49 }
 0x7c1   :  { %10472 = vst [vmem:[%s17847_s7 + $0x8] sm:$0xff] %v10468_v40 }
 0x7c4   :  { %v10456_v47 = vpop.f32.mrf.mxu2 }
 0x7c6   :  { %v10469_v22 = vpop.f32.mrf.mxu3 }
 0x7c7   :  { %10477 = vsyncpa [#allocation3], 1 }
 0x7c8   :  { %10478 = vsyncpa [#allocation5], 1 }
 0x7c9   :  { %10479 = vsyncpa [#allocation8], 1 }
 0x7ca   :  { %10480 = vsyncpa [#allocation11], 1 }

</bundles_post_ra>
